<compile_context>
chip_gen: v7x
topology: tpu7x:2x2x1
jax: 0.10.0
libtpu: 0.0.40
codegen_flags: <defaults>
</compile_context>

<pallas_src>
import functools

import jax
import jax.numpy as jnp
from jax import lax
from jax.experimental import pallas as pl
from jax.experimental.pallas import tpu as pltpu

D = 128        # hidden_dim
E = 32         # embedding_dim
LAYERS = 4     # num_layers
VOCAB = 64     # vocab_size (small, synthetic)
VP = 128       # vocab padded to a full lane tile (lane-dense logits store)
T = 8          # sequence length
B = 4          # batch size

_VMEM = pl.BlockSpec(memory_space=pltpu.MemorySpace.VMEM)


def _sig(x):
    # sigmoid(x) = 0.5 * tanh(0.5 x) + 0.5  -> single EUP op, no divide.
    return 0.5 * jnp.tanh(0.5 * x) + 0.5


# ---------------------------------------------------------------------------
# Single fused kernel: (folded) embedding -> 4 LSTM layers -> Linear
# ---------------------------------------------------------------------------
def _fused_kernel(ids_ref, table0_ref, b0_ref,
                  wih1, wih2, wih3,
                  whh0, whh1, whh2, whh3,
                  b1, b2, b3,
                  wout_ref, bout_ref,
                  logits_ref, hn_ref, cn_ref,
                  gates_buf, x_buf,
                  *, seq_len, bp):
    n = seq_len * bp

    # ---- Layer-0 gates via one-hot matmul on the folded (emb @ w_ih0) table ----
    ids = ids_ref[...]                                          # (n, 1) int32
    iota = lax.broadcasted_iota(jnp.int32, (n, VOCAB), 1)
    onehot = (iota == ids).astype(jnp.bfloat16)                 # (n, VOCAB)
    gates_buf[...] = (jnp.dot(onehot, table0_ref[...],
                              preferred_element_type=jnp.float32)
                      + b0_ref[...])                            # (n, 4D) f32

    wih = (None, wih1, wih2, wih3)
    whh = (whh0, whh1, whh2, whh3)
    bias = (b0_ref, b1, b2, b3)

    def recurrence(layer, w_hh_bf16):
        # Serial time loop; h/c carried as values (4 vregs), per-step gates
        # slice loaded from VMEM scratch, per-step output written to x_buf.
        h = jnp.zeros((bp, D), jnp.float32)
        c = jnp.zeros((bp, D), jnp.float32)
        for t in range(seq_len):
            g = (gates_buf[t * bp:(t + 1) * bp, :]
                 + jnp.dot(h.astype(jnp.bfloat16), w_hh_bf16,
                           preferred_element_type=jnp.float32))       # (bp, 4D)
            i_g = _sig(g[:, 0 * D:1 * D])
            f_g = _sig(g[:, 1 * D:2 * D])
            g_g = jnp.tanh(g[:, 2 * D:3 * D])
            o_g = _sig(g[:, 3 * D:4 * D])
            c = f_g * c + i_g * g_g
            h = o_g * jnp.tanh(c)
            x_buf[t * bp:(t + 1) * bp, :] = h
        hn_ref[layer] = h
        cn_ref[layer] = c

    # Layer 0 (input projection already in gates_buf).
    recurrence(0, whh[0][...])

    # Layers 1..3: hoisted input projection on the full slab, then recurrence.
    for l in range(1, LAYERS):
        x = x_buf[...].astype(jnp.bfloat16)                     # (n, D)
        gates_buf[...] = (jnp.dot(x, wih[l][...],
                                  preferred_element_type=jnp.float32)
                          + bias[l][...])
        recurrence(l, whh[l][...])

    # ---- Output projection (lane-dense: VP = 128) ----
    x_final = x_buf[...].astype(jnp.bfloat16)                   # (n, D)
    logits_ref[...] = (jnp.dot(x_final, wout_ref[...],
                               preferred_element_type=jnp.float32)
                       + bout_ref[...])


# ---------------------------------------------------------------------------
# Parameters (deterministic, PyTorch-like init), kernel packing, forward pass
# ---------------------------------------------------------------------------
def init_params(key, vocab_size):
    """Float32 master parameters (used by the pure-JAX reference)."""
    k_emb, k_lstm, k_out = jax.random.split(key, 3)
    bound = D ** -0.5
    params = {"embedding": jax.random.normal(k_emb, (vocab_size, E), jnp.float32)}
    w_ih, w_hh, bias = [], [], []
    lk = jax.random.split(k_lstm, LAYERS * 4)
    for l in range(LAYERS):
        in_dim = E if l == 0 else D
        k0, k1, k2, k3 = lk[4 * l: 4 * l + 4]
        w_ih.append(jax.random.uniform(k0, (in_dim, 4 * D), jnp.float32, -bound, bound))
        w_hh.append(jax.random.uniform(k1, (D, 4 * D), jnp.float32, -bound, bound))
        b_ih = jax.random.uniform(k2, (4 * D,), jnp.float32, -bound, bound)
        b_hh = jax.random.uniform(k3, (4 * D,), jnp.float32, -bound, bound)
        bias.append((b_ih + b_hh).reshape(1, 4 * D))
    params["w_ih"], params["w_hh"], params["b"] = w_ih, w_hh, bias
    ko1, ko2 = jax.random.split(k_out)
    params["w_out"] = jax.random.uniform(ko1, (D, vocab_size), jnp.float32, -bound, bound)
    params["b_out"] = jax.random.uniform(ko2, (1, vocab_size), jnp.float32, -bound, bound)
    return params


def pack_kernel_params(p):
    """Host-side weight folding / bf16 casting / padding for the kernel."""
    vocab_size = p["w_out"].shape[1]
    kp = {}
    # Fold embedding into the layer-0 input projection.
    kp["table0"] = jnp.dot(p["embedding"], p["w_ih"][0]).astype(jnp.bfloat16)  # (V, 4D)
    kp["w_ih"] = [w.astype(jnp.bfloat16) for w in p["w_ih"][1:]]               # layers 1..3
    kp["w_hh"] = [w.astype(jnp.bfloat16) for w in p["w_hh"]]
    kp["b"] = list(p["b"])                                                     # f32 biases
    kp["w_out"] = jnp.pad(p["w_out"],
                          ((0, 0), (0, VP - vocab_size))).astype(jnp.bfloat16)
    kp["b_out"] = jnp.pad(p["b_out"], ((0, 0), (0, VP - vocab_size)))
    return kp


@jax.jit
def model_forward(kparams, x_tokens):
    """x_tokens: (T, B) int32. Returns (logits (T,B,VOCAB), (h_n, c_n)).

    Initial hidden state is zero (PyTorch hidden=None default)."""
    seq_len, batch = x_tokens.shape
    bp = ((batch + 15) // 16) * 16                # pad batch to a bf16-friendly tile
    ids = jnp.pad(x_tokens.astype(jnp.int32), ((0, 0), (0, bp - batch)))
    n = seq_len * bp
    ids = ids.reshape(n, 1)                       # row = t*bp + b

    kernel = functools.partial(_fused_kernel, seq_len=seq_len, bp=bp)
    out_shapes = (
        jax.ShapeDtypeStruct((n, VP), jnp.float32),              # padded logits
        jax.ShapeDtypeStruct((LAYERS, bp, D), jnp.float32),      # h_n (padded B)
        jax.ShapeDtypeStruct((LAYERS, bp, D), jnp.float32),      # c_n (padded B)
    )
    logits_p, h_n_p, c_n_p = pl.pallas_call(
        kernel,
        out_shape=out_shapes,
        in_specs=[_VMEM] * 15,
        out_specs=(_VMEM, _VMEM, _VMEM),
        scratch_shapes=[pltpu.VMEM((n, 4 * D), jnp.float32),     # gates_x slab
                        pltpu.VMEM((n, D), jnp.float32)],        # layer outputs
    )(ids,
      kparams["table0"], kparams["b"][0],
      kparams["w_ih"][0], kparams["w_ih"][1], kparams["w_ih"][2],
      kparams["w_hh"][0], kparams["w_hh"][1], kparams["w_hh"][2], kparams["w_hh"][3],
      kparams["b"][1], kparams["b"][2], kparams["b"][3],
      kparams["w_out"], kparams["b_out"])

    logits = logits_p.reshape(seq_len, bp, VP)[:, :batch, :VOCAB]
    return logits, (h_n_p[:, :batch, :], c_n_p[:, :batch, :])


def reference_forward(params, x_tokens):
    """Pure-JAX f32 reference matching the PyTorch module semantics."""
    x = params["embedding"][x_tokens]            # (T, B, E)
    seq_len = x_tokens.shape[0]
    h_n, c_n = [], []
    for l in range(LAYERS):
        w_ih, w_hh, b = params["w_ih"][l], params["w_hh"][l], params["b"][l]
        h = jnp.zeros((x.shape[1], D), jnp.float32)
        c = jnp.zeros((x.shape[1], D), jnp.float32)
        outs = []
        for t in range(seq_len):
            gates = x[t] @ w_ih + h @ w_hh + b
            i = jax.nn.sigmoid(gates[:, 0 * D:1 * D])
            f = jax.nn.sigmoid(gates[:, 1 * D:2 * D])
            g = jnp.tanh(gates[:, 2 * D:3 * D])
            o = jax.nn.sigmoid(gates[:, 3 * D:4 * D])
            c = f * c + i * g
            h = o * jnp.tanh(c)
            outs.append(h)
        x = jnp.stack(outs, axis=0)
        h_n.append(h)
        c_n.append(c)
    logits = x @ params["w_out"] + params["b_out"]
    return logits, (jnp.stack(h_n), jnp.stack(c_n))


if __name__ == "__main__":
    key = jax.random.PRNGKey(0)
    k_params, k_x = jax.random.split(key)
    params = init_params(k_params, VOCAB)
    kparams = pack_kernel_params(params)
    x = jax.random.randint(k_x, (T, B), 0, VOCAB, dtype=jnp.int32)

    logits, (h_n, c_n) = model_forward(kparams, x)
    jax.block_until_ready((logits, h_n, c_n))

    assert logits.shape == (T, B, VOCAB), logits.shape
    assert h_n.shape == (LAYERS, B, D), h_n.shape
    assert c_n.shape == (LAYERS, B, D), c_n.shape
    assert bool(jnp.all(jnp.isfinite(logits)))

    # Validate against the f32 reference (bf16 matmul weights => ~1e-2 tolerance).
    ref_logits, (ref_h, ref_c) = reference_forward(params, x)
    err_logits = float(jnp.max(jnp.abs(logits - ref_logits)))
    err_h = float(jnp.max(jnp.abs(h_n - ref_h)))
    assert err_logits < 0.1 and err_h < 0.1, (err_logits, err_h)

    print("KERNEL_OK")
</pallas_src>

<mosaic_0001>
module attributes {stable_mosaic.version = 11 : i64} {
  func.func @_fused_kernel(%arg0: memref<128x1xi32, #tpu.memory_space<vmem>>, %arg1: memref<64x512xbf16, #tpu.memory_space<vmem>>, %arg2: memref<1x512xf32, #tpu.memory_space<vmem>>, %arg3: memref<128x512xbf16, #tpu.memory_space<vmem>>, %arg4: memref<128x512xbf16, #tpu.memory_space<vmem>>, %arg5: memref<128x512xbf16, #tpu.memory_space<vmem>>, %arg6: memref<128x512xbf16, #tpu.memory_space<vmem>>, %arg7: memref<128x512xbf16, #tpu.memory_space<vmem>>, %arg8: memref<128x512xbf16, #tpu.memory_space<vmem>>, %arg9: memref<128x512xbf16, #tpu.memory_space<vmem>>, %arg10: memref<1x512xf32, #tpu.memory_space<vmem>>, %arg11: memref<1x512xf32, #tpu.memory_space<vmem>>, %arg12: memref<1x512xf32, #tpu.memory_space<vmem>>, %arg13: memref<128x128xbf16, #tpu.memory_space<vmem>>, %arg14: memref<1x128xf32, #tpu.memory_space<vmem>>, %arg15: memref<128x128xf32, #tpu.memory_space<vmem>>, %arg16: memref<4x16x128xf32, #tpu.memory_space<vmem>>, %arg17: memref<4x16x128xf32, #tpu.memory_space<vmem>>, %arg18: memref<128x512xf32, #tpu.memory_space<vmem>>, %arg19: memref<128x128xf32, #tpu.memory_space<vmem>>) attributes {dimension_semantics = [], scalar_prefetch = 0 : i64, scratch_operands = 2 : i64, tpu.core_type = #tpu.core_type<tc>} {
    %c0 = arith.constant 0 : index
    %c0_0 = arith.constant 0 : index
    %0 = vector.load %arg0[%c0, %c0_0] : memref<128x1xi32, #tpu.memory_space<vmem>>, vector<128x1xi32>
    %1 = tpu.iota {dimensions = array<i32: 1>} : vector<128x64xi32>
    %2 = vector.broadcast %0 : vector<128x1xi32> to vector<128x64xi32>
    %3 = arith.cmpi eq, %1, %2 : vector<128x64xi32>
    %4 = arith.extui %3 : vector<128x64xi1> to vector<128x64xi32>
    %5 = arith.sitofp %4 : vector<128x64xi32> to vector<128x64xf32>
    %6 = arith.truncf %5 : vector<128x64xf32> to vector<128x64xbf16>
    %c0_1 = arith.constant 0 : index
    %c0_2 = arith.constant 0 : index
    %7 = vector.load %arg1[%c0_1, %c0_2] : memref<64x512xbf16, #tpu.memory_space<vmem>>, vector<64x512xbf16>
    %cst = arith.constant dense<0.000000e+00> : vector<128x512xf32>
    %8 = tpu.matmul %6, %7, %cst {dimension_numbers = #tpu.dot_dimension_numbers<[1], [0], [0], [1], [0, 0, 1, 1], [], []>} : vector<128x64xbf16>, vector<64x512xbf16>, vector<128x512xf32> -> vector<128x512xf32>
    %c0_3 = arith.constant 0 : index
    %c0_4 = arith.constant 0 : index
    %9 = vector.load %arg2[%c0_3, %c0_4] : memref<1x512xf32, #tpu.memory_space<vmem>>, vector<1x512xf32>
    %10 = vector.broadcast %9 : vector<1x512xf32> to vector<128x512xf32>
    %11 = arith.addf %8, %10 : vector<128x512xf32>
    %c0_5 = arith.constant 0 : index
    %c0_6 = arith.constant 0 : index
    %12 = vector.load %arg18[%c0_5, %c0_6] : memref<128x512xf32, #tpu.memory_space<vmem>>, vector<128x512xf32>
    tpu.vector_store %arg18[%c0_5, %c0_6], %11 {strides = array<i32>} : memref<128x512xf32, #tpu.memory_space<vmem>>, vector<128x512xf32>,
    %c0_7 = arith.constant 0 : index
    %c0_8 = arith.constant 0 : index
    %13 = vector.load %arg6[%c0_7, %c0_8] : memref<128x512xbf16, #tpu.memory_space<vmem>>, vector<128x512xbf16>
    %cst_9 = arith.constant 0.000000e+00 : f32
    %14 = vector.broadcast %cst_9 : f32 to vector<16x128xf32>
    %cst_10 = arith.constant 0.000000e+00 : f32
    %15 = vector.broadcast %cst_10 : f32 to vector<16x128xf32>
    %c0_11 = arith.constant 0 : index
    %c0_12 = arith.constant 0 : index
    %16 = vector.load %arg18[%c0_11, %c0_12] : memref<128x512xf32, #tpu.memory_space<vmem>>, vector<16x512xf32>
    %17 = arith.truncf %14 : vector<16x128xf32> to vector<16x128xbf16>
    %cst_13 = arith.constant dense<0.000000e+00> : vector<16x512xf32>
    %18 = tpu.matmul %17, %13, %cst_13 {dimension_numbers = #tpu.dot_dimension_numbers<[1], [0], [0], [1], [0, 0, 1, 1], [], []>} : vector<16x128xbf16>, vector<128x512xbf16>, vector<16x512xf32> -> vector<16x512xf32>
    %19 = arith.addf %16, %18 : vector<16x512xf32>
    %20 = vector.extract_strided_slice %19 {offsets = [0, 0], sizes = [16, 128], strides = [1, 1]} : vector<16x512xf32> to vector<16x128xf32>
    %cst_14 = arith.constant 5.000000e-01 : f32
    %21 = vector.broadcast %cst_14 : f32 to vector<16x128xf32>
    %22 = arith.mulf %21, %20 : vector<16x128xf32>
    %23 = math.tanh %22 : vector<16x128xf32>
    %cst_15 = arith.constant 5.000000e-01 : f32
    %24 = vector.broadcast %cst_15 : f32 to vector<16x128xf32>
    %25 = arith.mulf %24, %23 : vector<16x128xf32>
    %cst_16 = arith.constant 5.000000e-01 : f32
    %26 = vector.broadcast %cst_16 : f32 to vector<16x128xf32>
    %27 = arith.addf %25, %26 : vector<16x128xf32>
    %28 = vector.extract_strided_slice %19 {offsets = [0, 128], sizes = [16, 128], strides = [1, 1]} : vector<16x512xf32> to vector<16x128xf32>
    %cst_17 = arith.constant 5.000000e-01 : f32
    %29 = vector.broadcast %cst_17 : f32 to vector<16x128xf32>
    %30 = arith.mulf %29, %28 : vector<16x128xf32>
    %31 = math.tanh %30 : vector<16x128xf32>
    %cst_18 = arith.constant 5.000000e-01 : f32
    %32 = vector.broadcast %cst_18 : f32 to vector<16x128xf32>
    %33 = arith.mulf %32, %31 : vector<16x128xf32>
    %cst_19 = arith.constant 5.000000e-01 : f32
    %34 = vector.broadcast %cst_19 : f32 to vector<16x128xf32>
    %35 = arith.addf %33, %34 : vector<16x128xf32>
    %36 = vector.extract_strided_slice %19 {offsets = [0, 256], sizes = [16, 128], strides = [1, 1]} : vector<16x512xf32> to vector<16x128xf32>
    %37 = math.tanh %36 : vector<16x128xf32>
    %38 = vector.extract_strided_slice %19 {offsets = [0, 384], sizes = [16, 128], strides = [1, 1]} : vector<16x512xf32> to vector<16x128xf32>
    %cst_20 = arith.constant 5.000000e-01 : f32
    %39 = vector.broadcast %cst_20 : f32 to vector<16x128xf32>
    %40 = arith.mulf %39, %38 : vector<16x128xf32>
    %41 = math.tanh %40 : vector<16x128xf32>
    %cst_21 = arith.constant 5.000000e-01 : f32
    %42 = vector.broadcast %cst_21 : f32 to vector<16x128xf32>
    %43 = arith.mulf %42, %41 : vector<16x128xf32>
    %cst_22 = arith.constant 5.000000e-01 : f32
    %44 = vector.broadcast %cst_22 : f32 to vector<16x128xf32>
    %45 = arith.addf %43, %44 : vector<16x128xf32>
    %46 = arith.mulf %35, %15 : vector<16x128xf32>
    %47 = arith.mulf %27, %37 : vector<16x128xf32>
    %48 = arith.addf %46, %47 : vector<16x128xf32>
    %49 = math.tanh %48 : vector<16x128xf32>
    %50 = arith.mulf %45, %49 : vector<16x128xf32>
    %c0_23 = arith.constant 0 : index
    %c0_24 = arith.constant 0 : index
    %51 = vector.load %arg19[%c0_23, %c0_24] : memref<128x128xf32, #tpu.memory_space<vmem>>, vector<16x128xf32>
    tpu.vector_store %arg19[%c0_23, %c0_24], %50 {strides = array<i32>} : memref<128x128xf32, #tpu.memory_space<vmem>>, vector<16x128xf32>,
    %c16 = arith.constant 16 : index
    %c0_25 = arith.constant 0 : index
    %52 = vector.load %arg18[%c16, %c0_25] : memref<128x512xf32, #tpu.memory_space<vmem>>, vector<16x512xf32>
    %53 = arith.truncf %50 : vector<16x128xf32> to vector<16x128xbf16>
    %cst_26 = arith.constant dense<0.000000e+00> : vector<16x512xf32>
    %54 = tpu.matmul %53, %13, %cst_26 {dimension_numbers = #tpu.dot_dimension_numbers<[1], [0], [0], [1], [0, 0, 1, 1], [], []>} : vector<16x128xbf16>, vector<128x512xbf16>, vector<16x512xf32> -> vector<16x512xf32>
    %55 = arith.addf %52, %54 : vector<16x512xf32>
    %56 = vector.extract_strided_slice %55 {offsets = [0, 0], sizes = [16, 128], strides = [1, 1]} : vector<16x512xf32> to vector<16x128xf32>
    %cst_27 = arith.constant 5.000000e-01 : f32
    %57 = vector.broadcast %cst_27 : f32 to vector<16x128xf32>
    %58 = arith.mulf %57, %56 : vector<16x128xf32>
    %59 = math.tanh %58 : vector<16x128xf32>
    %cst_28 = arith.constant 5.000000e-01 : f32
    %60 = vector.broadcast %cst_28 : f32 to vector<16x128xf32>
    %61 = arith.mulf %60, %59 : vector<16x128xf32>
    %cst_29 = arith.constant 5.000000e-01 : f32
    %62 = vector.broadcast %cst_29 : f32 to vector<16x128xf32>
    %63 = arith.addf %61, %62 : vector<16x128xf32>
    %64 = vector.extract_strided_slice %55 {offsets = [0, 128], sizes = [16, 128], strides = [1, 1]} : vector<16x512xf32> to vector<16x128xf32>
    %cst_30 = arith.constant 5.000000e-01 : f32
    %65 = vector.broadcast %cst_30 : f32 to vector<16x128xf32>
    %66 = arith.mulf %65, %64 : vector<16x128xf32>
    %67 = math.tanh %66 : vector<16x128xf32>
    %cst_31 = arith.constant 5.000000e-01 : f32
    %68 = vector.broadcast %cst_31 : f32 to vector<16x128xf32>
    %69 = arith.mulf %68, %67 : vector<16x128xf32>
    %cst_32 = arith.constant 5.000000e-01 : f32
    %70 = vector.broadcast %cst_32 : f32 to vector<16x128xf32>
    %71 = arith.addf %69, %70 : vector<16x128xf32>
    %72 = vector.extract_strided_slice %55 {offsets = [0, 256], sizes = [16, 128], strides = [1, 1]} : vector<16x512xf32> to vector<16x128xf32>
    %73 = math.tanh %72 : vector<16x128xf32>
    %74 = vector.extract_strided_slice %55 {offsets = [0, 384], sizes = [16, 128], strides = [1, 1]} : vector<16x512xf32> to vector<16x128xf32>
    %cst_33 = arith.constant 5.000000e-01 : f32
    %75 = vector.broadcast %cst_33 : f32 to vector<16x128xf32>
    %76 = arith.mulf %75, %74 : vector<16x128xf32>
    %77 = math.tanh %76 : vector<16x128xf32>
    %cst_34 = arith.constant 5.000000e-01 : f32
    %78 = vector.broadcast %cst_34 : f32 to vector<16x128xf32>
    %79 = arith.mulf %78, %77 : vector<16x128xf32>
    %cst_35 = arith.constant 5.000000e-01 : f32
    %80 = vector.broadcast %cst_35 : f32 to vector<16x128xf32>
    %81 = arith.addf %79, %80 : vector<16x128xf32>
    %82 = arith.mulf %71, %48 : vector<16x128xf32>
    %83 = arith.mulf %63, %73 : vector<16x128xf32>
    %84 = arith.addf %82, %83 : vector<16x128xf32>
    %85 = math.tanh %84 : vector<16x128xf32>
    %86 = arith.mulf %81, %85 : vector<16x128xf32>
    %c16_36 = arith.constant 16 : index
    %c0_37 = arith.constant 0 : index
    %87 = vector.load %arg19[%c16_36, %c0_37] : memref<128x128xf32, #tpu.memory_space<vmem>>, vector<16x128xf32>
    tpu.vector_store %arg19[%c16_36, %c0_37], %86 {strides = array<i32>} : memref<128x128xf32, #tpu.memory_space<vmem>>, vector<16x128xf32>,
    %c32 = arith.constant 32 : index
    %c0_38 = arith.constant 0 : index
    %88 = vector.load %arg18[%c32, %c0_38] : memref<128x512xf32, #tpu.memory_space<vmem>>, vector<16x512xf32>
    %89 = arith.truncf %86 : vector<16x128xf32> to vector<16x128xbf16>
    %cst_39 = arith.constant dense<0.000000e+00> : vector<16x512xf32>
    %90 = tpu.matmul %89, %13, %cst_39 {dimension_numbers = #tpu.dot_dimension_numbers<[1], [0], [0], [1], [0, 0, 1, 1], [], []>} : vector<16x128xbf16>, vector<128x512xbf16>, vector<16x512xf32> -> vector<16x512xf32>
    %91 = arith.addf %88, %90 : vector<16x512xf32>
    %92 = vector.extract_strided_slice %91 {offsets = [0, 0], sizes = [16, 128], strides = [1, 1]} : vector<16x512xf32> to vector<16x128xf32>
    %cst_40 = arith.constant 5.000000e-01 : f32
    %93 = vector.broadcast %cst_40 : f32 to vector<16x128xf32>
    %94 = arith.mulf %93, %92 : vector<16x128xf32>
    %95 = math.tanh %94 : vector<16x128xf32>
    %cst_41 = arith.constant 5.000000e-01 : f32
    %96 = vector.broadcast %cst_41 : f32 to vector<16x128xf32>
    %97 = arith.mulf %96, %95 : vector<16x128xf32>
    %cst_42 = arith.constant 5.000000e-01 : f32
    %98 = vector.broadcast %cst_42 : f32 to vector<16x128xf32>
    %99 = arith.addf %97, %98 : vector<16x128xf32>
    %100 = vector.extract_strided_slice %91 {offsets = [0, 128], sizes = [16, 128], strides = [1, 1]} : vector<16x512xf32> to vector<16x128xf32>
    %cst_43 = arith.constant 5.000000e-01 : f32
    %101 = vector.broadcast %cst_43 : f32 to vector<16x128xf32>
    %102 = arith.mulf %101, %100 : vector<16x128xf32>
    %103 = math.tanh %102 : vector<16x128xf32>
    %cst_44 = arith.constant 5.000000e-01 : f32
    %104 = vector.broadcast %cst_44 : f32 to vector<16x128xf32>
    %105 = arith.mulf %104, %103 : vector<16x128xf32>
    %cst_45 = arith.constant 5.000000e-01 : f32
    %106 = vector.broadcast %cst_45 : f32 to vector<16x128xf32>
    %107 = arith.addf %105, %106 : vector<16x128xf32>
    %108 = vector.extract_strided_slice %91 {offsets = [0, 256], sizes = [16, 128], strides = [1, 1]} : vector<16x512xf32> to vector<16x128xf32>
    %109 = math.tanh %108 : vector<16x128xf32>
    %110 = vector.extract_strided_slice %91 {offsets = [0, 384], sizes = [16, 128], strides = [1, 1]} : vector<16x512xf32> to vector<16x128xf32>
    %cst_46 = arith.constant 5.000000e-01 : f32
    %111 = vector.broadcast %cst_46 : f32 to vector<16x128xf32>
    %112 = arith.mulf %111, %110 : vector<16x128xf32>
    %113 = math.tanh %112 : vector<16x128xf32>
    %cst_47 = arith.constant 5.000000e-01 : f32
    %114 = vector.broadcast %cst_47 : f32 to vector<16x128xf32>
    %115 = arith.mulf %114, %113 : vector<16x128xf32>
    %cst_48 = arith.constant 5.000000e-01 : f32
    %116 = vector.broadcast %cst_48 : f32 to vector<16x128xf32>
    %117 = arith.addf %115, %116 : vector<16x128xf32>
    %118 = arith.mulf %107, %84 : vector<16x128xf32>
    %119 = arith.mulf %99, %109 : vector<16x128xf32>
    %120 = arith.addf %118, %119 : vector<16x128xf32>
    %121 = math.tanh %120 : vector<16x128xf32>
    %122 = arith.mulf %117, %121 : vector<16x128xf32>
    %c32_49 = arith.constant 32 : index
    %c0_50 = arith.constant 0 : index
    %123 = vector.load %arg19[%c32_49, %c0_50] : memref<128x128xf32, #tpu.memory_space<vmem>>, vector<16x128xf32>
    tpu.vector_store %arg19[%c32_49, %c0_50], %122 {strides = array<i32>} : memref<128x128xf32, #tpu.memory_space<vmem>>, vector<16x128xf32>,
    %c48 = arith.constant 48 : index
    %c0_51 = arith.constant 0 : index
    %124 = vector.load %arg18[%c48, %c0_51] : memref<128x512xf32, #tpu.memory_space<vmem>>, vector<16x512xf32>
    %125 = arith.truncf %122 : vector<16x128xf32> to vector<16x128xbf16>
    %cst_52 = arith.constant dense<0.000000e+00> : vector<16x512xf32>
    %126 = tpu.matmul %125, %13, %cst_52 {dimension_numbers = #tpu.dot_dimension_numbers<[1], [0], [0], [1], [0, 0, 1, 1], [], []>} : vector<16x128xbf16>, vector<128x512xbf16>, vector<16x512xf32> -> vector<16x512xf32>
    %127 = arith.addf %124, %126 : vector<16x512xf32>
    %128 = vector.extract_strided_slice %127 {offsets = [0, 0], sizes = [16, 128], strides = [1, 1]} : vector<16x512xf32> to vector<16x128xf32>
    %cst_53 = arith.constant 5.000000e-01 : f32
    %129 = vector.broadcast %cst_53 : f32 to vector<16x128xf32>
    %130 = arith.mulf %129, %128 : vector<16x128xf32>
    %131 = math.tanh %130 : vector<16x128xf32>
    %cst_54 = arith.constant 5.000000e-01 : f32
    %132 = vector.broadcast %cst_54 : f32 to vector<16x128xf32>
    %133 = arith.mulf %132, %131 : vector<16x128xf32>
    %cst_55 = arith.constant 5.000000e-01 : f32
    %134 = vector.broadcast %cst_55 : f32 to vector<16x128xf32>
    %135 = arith.addf %133, %134 : vector<16x128xf32>
    %136 = vector.extract_strided_slice %127 {offsets = [0, 128], sizes = [16, 128], strides = [1, 1]} : vector<16x512xf32> to vector<16x128xf32>
    %cst_56 = arith.constant 5.000000e-01 : f32
    %137 = vector.broadcast %cst_56 : f32 to vector<16x128xf32>
    %138 = arith.mulf %137, %136 : vector<16x128xf32>
    %139 = math.tanh %138 : vector<16x128xf32>
    %cst_57 = arith.constant 5.000000e-01 : f32
    %140 = vector.broadcast %cst_57 : f32 to vector<16x128xf32>
    %141 = arith.mulf %140, %139 : vector<16x128xf32>
    %cst_58 = arith.constant 5.000000e-01 : f32
    %142 = vector.broadcast %cst_58 : f32 to vector<16x128xf32>
    %143 = arith.addf %141, %142 : vector<16x128xf32>
    %144 = vector.extract_strided_slice %127 {offsets = [0, 256], sizes = [16, 128], strides = [1, 1]} : vector<16x512xf32> to vector<16x128xf32>
    %145 = math.tanh %144 : vector<16x128xf32>
    %146 = vector.extract_strided_slice %127 {offsets = [0, 384], sizes = [16, 128], strides = [1, 1]} : vector<16x512xf32> to vector<16x128xf32>
    %cst_59 = arith.constant 5.000000e-01 : f32
    %147 = vector.broadcast %cst_59 : f32 to vector<16x128xf32>
    %148 = arith.mulf %147, %146 : vector<16x128xf32>
    %149 = math.tanh %148 : vector<16x128xf32>
    %cst_60 = arith.constant 5.000000e-01 : f32
    %150 = vector.broadcast %cst_60 : f32 to vector<16x128xf32>
    %151 = arith.mulf %150, %149 : vector<16x128xf32>
    %cst_61 = arith.constant 5.000000e-01 : f32
    %152 = vector.broadcast %cst_61 : f32 to vector<16x128xf32>
    %153 = arith.addf %151, %152 : vector<16x128xf32>
    %154 = arith.mulf %143, %120 : vector<16x128xf32>
    %155 = arith.mulf %135, %145 : vector<16x128xf32>
    %156 = arith.addf %154, %155 : vector<16x128xf32>
    %157 = math.tanh %156 : vector<16x128xf32>
    %158 = arith.mulf %153, %157 : vector<16x128xf32>
    %c48_62 = arith.constant 48 : index
    %c0_63 = arith.constant 0 : index
    %159 = vector.load %arg19[%c48_62, %c0_63] : memref<128x128xf32, #tpu.memory_space<vmem>>, vector<16x128xf32>
    tpu.vector_store %arg19[%c48_62, %c0_63], %158 {strides = array<i32>} : memref<128x128xf32, #tpu.memory_space<vmem>>, vector<16x128xf32>,
    %c64 = arith.constant 64 : index
    %c0_64 = arith.constant 0 : index
    %160 = vector.load %arg18[%c64, %c0_64] : memref<128x512xf32, #tpu.memory_space<vmem>>, vector<16x512xf32>
    %161 = arith.truncf %158 : vector<16x128xf32> to vector<16x128xbf16>
    %cst_65 = arith.constant dense<0.000000e+00> : vector<16x512xf32>
    %162 = tpu.matmul %161, %13, %cst_65 {dimension_numbers = #tpu.dot_dimension_numbers<[1], [0], [0], [1], [0, 0, 1, 1], [], []>} : vector<16x128xbf16>, vector<128x512xbf16>, vector<16x512xf32> -> vector<16x512xf32>
    %163 = arith.addf %160, %162 : vector<16x512xf32>
    %164 = vector.extract_strided_slice %163 {offsets = [0, 0], sizes = [16, 128], strides = [1, 1]} : vector<16x512xf32> to vector<16x128xf32>
    %cst_66 = arith.constant 5.000000e-01 : f32
    %165 = vector.broadcast %cst_66 : f32 to vector<16x128xf32>
    %166 = arith.mulf %165, %164 : vector<16x128xf32>
    %167 = math.tanh %166 : vector<16x128xf32>
    %cst_67 = arith.constant 5.000000e-01 : f32
    %168 = vector.broadcast %cst_67 : f32 to vector<16x128xf32>
    %169 = arith.mulf %168, %167 : vector<16x128xf32>
    %cst_68 = arith.constant 5.000000e-01 : f32
    %170 = vector.broadcast %cst_68 : f32 to vector<16x128xf32>
    %171 = arith.addf %169, %170 : vector<16x128xf32>
    %172 = vector.extract_strided_slice %163 {offsets = [0, 128], sizes = [16, 128], strides = [1, 1]} : vector<16x512xf32> to vector<16x128xf32>
    %cst_69 = arith.constant 5.000000e-01 : f32
    %173 = vector.broadcast %cst_69 : f32 to vector<16x128xf32>
    %174 = arith.mulf %173, %172 : vector<16x128xf32>
    %175 = math.tanh %174 : vector<16x128xf32>
    %cst_70 = arith.constant 5.000000e-01 : f32
    %176 = vector.broadcast %cst_70 : f32 to vector<16x128xf32>
    %177 = arith.mulf %176, %175 : vector<16x128xf32>
    %cst_71 = arith.constant 5.000000e-01 : f32
    %178 = vector.broadcast %cst_71 : f32 to vector<16x128xf32>
    %179 = arith.addf %177, %178 : vector<16x128xf32>
    %180 = vector.extract_strided_slice %163 {offsets = [0, 256], sizes = [16, 128], strides = [1, 1]} : vector<16x512xf32> to vector<16x128xf32>
    %181 = math.tanh %180 : vector<16x128xf32>
    %182 = vector.extract_strided_slice %163 {offsets = [0, 384], sizes = [16, 128], strides = [1, 1]} : vector<16x512xf32> to vector<16x128xf32>
    %cst_72 = arith.constant 5.000000e-01 : f32
    %183 = vector.broadcast %cst_72 : f32 to vector<16x128xf32>
    %184 = arith.mulf %183, %182 : vector<16x128xf32>
    %185 = math.tanh %184 : vector<16x128xf32>
    %cst_73 = arith.constant 5.000000e-01 : f32
    %186 = vector.broadcast %cst_73 : f32 to vector<16x128xf32>
    %187 = arith.mulf %186, %185 : vector<16x128xf32>
    %cst_74 = arith.constant 5.000000e-01 : f32
    %188 = vector.broadcast %cst_74 : f32 to vector<16x128xf32>
    %189 = arith.addf %187, %188 : vector<16x128xf32>
    %190 = arith.mulf %179, %156 : vector<16x128xf32>
    %191 = arith.mulf %171, %181 : vector<16x128xf32>
    %192 = arith.addf %190, %191 : vector<16x128xf32>
    %193 = math.tanh %192 : vector<16x128xf32>
    %194 = arith.mulf %189, %193 : vector<16x128xf32>
    %c64_75 = arith.constant 64 : index
    %c0_76 = arith.constant 0 : index
    %195 = vector.load %arg19[%c64_75, %c0_76] : memref<128x128xf32, #tpu.memory_space<vmem>>, vector<16x128xf32>
    tpu.vector_store %arg19[%c64_75, %c0_76], %194 {strides = array<i32>} : memref<128x128xf32, #tpu.memory_space<vmem>>, vector<16x128xf32>,
    %c80 = arith.constant 80 : index
    %c0_77 = arith.constant 0 : index
    %196 = vector.load %arg18[%c80, %c0_77] : memref<128x512xf32, #tpu.memory_space<vmem>>, vector<16x512xf32>
    %197 = arith.truncf %194 : vector<16x128xf32> to vector<16x128xbf16>
    %cst_78 = arith.constant dense<0.000000e+00> : vector<16x512xf32>
    %198 = tpu.matmul %197, %13, %cst_78 {dimension_numbers = #tpu.dot_dimension_numbers<[1], [0], [0], [1], [0, 0, 1, 1], [], []>} : vector<16x128xbf16>, vector<128x512xbf16>, vector<16x512xf32> -> vector<16x512xf32>
    %199 = arith.addf %196, %198 : vector<16x512xf32>
    %200 = vector.extract_strided_slice %199 {offsets = [0, 0], sizes = [16, 128], strides = [1, 1]} : vector<16x512xf32> to vector<16x128xf32>
    %cst_79 = arith.constant 5.000000e-01 : f32
    %201 = vector.broadcast %cst_79 : f32 to vector<16x128xf32>
    %202 = arith.mulf %201, %200 : vector<16x128xf32>
    %203 = math.tanh %202 : vector<16x128xf32>
    %cst_80 = arith.constant 5.000000e-01 : f32
    %204 = vector.broadcast %cst_80 : f32 to vector<16x128xf32>
    %205 = arith.mulf %204, %203 : vector<16x128xf32>
    %cst_81 = arith.constant 5.000000e-01 : f32
    %206 = vector.broadcast %cst_81 : f32 to vector<16x128xf32>
    %207 = arith.addf %205, %206 : vector<16x128xf32>
    %208 = vector.extract_strided_slice %199 {offsets = [0, 128], sizes = [16, 128], strides = [1, 1]} : vector<16x512xf32> to vector<16x128xf32>
    %cst_82 = arith.constant 5.000000e-01 : f32
    %209 = vector.broadcast %cst_82 : f32 to vector<16x128xf32>
    %210 = arith.mulf %209, %208 : vector<16x128xf32>
    %211 = math.tanh %210 : vector<16x128xf32>
    %cst_83 = arith.constant 5.000000e-01 : f32
    %212 = vector.broadcast %cst_83 : f32 to vector<16x128xf32>
    %213 = arith.mulf %212, %211 : vector<16x128xf32>
    %cst_84 = arith.constant 5.000000e-01 : f32
    %214 = vector.broadcast %cst_84 : f32 to vector<16x128xf32>
    %215 = arith.addf %213, %214 : vector<16x128xf32>
    %216 = vector.extract_strided_slice %199 {offsets = [0, 256], sizes = [16, 128], strides = [1, 1]} : vector<16x512xf32> to vector<16x128xf32>
    %217 = math.tanh %216 : vector<16x128xf32>
    %218 = vector.extract_strided_slice %199 {offsets = [0, 384], sizes = [16, 128], strides = [1, 1]} : vector<16x512xf32> to vector<16x128xf32>
    %cst_85 = arith.constant 5.000000e-01 : f32
    %219 = vector.broadcast %cst_85 : f32 to vector<16x128xf32>
    %220 = arith.mulf %219, %218 : vector<16x128xf32>
    %221 = math.tanh %220 : vector<16x128xf32>
    %cst_86 = arith.constant 5.000000e-01 : f32
    %222 = vector.broadcast %cst_86 : f32 to vector<16x128xf32>
    %223 = arith.mulf %222, %221 : vector<16x128xf32>
    %cst_87 = arith.constant 5.000000e-01 : f32
    %224 = vector.broadcast %cst_87 : f32 to vector<16x128xf32>
    %225 = arith.addf %223, %224 : vector<16x128xf32>
    %226 = arith.mulf %215, %192 : vector<16x128xf32>
    %227 = arith.mulf %207, %217 : vector<16x128xf32>
    %228 = arith.addf %226, %227 : vector<16x128xf32>
    %229 = math.tanh %228 : vector<16x128xf32>
    %230 = arith.mulf %225, %229 : vector<16x128xf32>
    %c80_88 = arith.constant 80 : index
    %c0_89 = arith.constant 0 : index
    %231 = vector.load %arg19[%c80_88, %c0_89] : memref<128x128xf32, #tpu.memory_space<vmem>>, vector<16x128xf32>
    tpu.vector_store %arg19[%c80_88, %c0_89], %230 {strides = array<i32>} : memref<128x128xf32, #tpu.memory_space<vmem>>, vector<16x128xf32>,
    %c96 = arith.constant 96 : index
    %c0_90 = arith.constant 0 : index
    %232 = vector.load %arg18[%c96, %c0_90] : memref<128x512xf32, #tpu.memory_space<vmem>>, vector<16x512xf32>
    %233 = arith.truncf %230 : vector<16x128xf32> to vector<16x128xbf16>
    %cst_91 = arith.constant dense<0.000000e+00> : vector<16x512xf32>
    %234 = tpu.matmul %233, %13, %cst_91 {dimension_numbers = #tpu.dot_dimension_numbers<[1], [0], [0], [1], [0, 0, 1, 1], [], []>} : vector<16x128xbf16>, vector<128x512xbf16>, vector<16x512xf32> -> vector<16x512xf32>
    %235 = arith.addf %232, %234 : vector<16x512xf32>
    %236 = vector.extract_strided_slice %235 {offsets = [0, 0], sizes = [16, 128], strides = [1, 1]} : vector<16x512xf32> to vector<16x128xf32>
    %cst_92 = arith.constant 5.000000e-01 : f32
    %237 = vector.broadcast %cst_92 : f32 to vector<16x128xf32>
    %238 = arith.mulf %237, %236 : vector<16x128xf32>
    %239 = math.tanh %238 : vector<16x128xf32>
    %cst_93 = arith.constant 5.000000e-01 : f32
    %240 = vector.broadcast %cst_93 : f32 to vector<16x128xf32>
    %241 = arith.mulf %240, %239 : vector<16x128xf32>
    %cst_94 = arith.constant 5.000000e-01 : f32
    %242 = vector.broadcast %cst_94 : f32 to vector<16x128xf32>
    %243 = arith.addf %241, %242 : vector<16x128xf32>
    %244 = vector.extract_strided_slice %235 {offsets = [0, 128], sizes = [16, 128], strides = [1, 1]} : vector<16x512xf32> to vector<16x128xf32>
    %cst_95 = arith.constant 5.000000e-01 : f32
    %245 = vector.broadcast %cst_95 : f32 to vector<16x128xf32>
    %246 = arith.mulf %245, %244 : vector<16x128xf32>
    %247 = math.tanh %246 : vector<16x128xf32>
    %cst_96 = arith.constant 5.000000e-01 : f32
    %248 = vector.broadcast %cst_96 : f32 to vector<16x128xf32>
    %249 = arith.mulf %248, %247 : vector<16x128xf32>
    %cst_97 = arith.constant 5.000000e-01 : f32
    %250 = vector.broadcast %cst_97 : f32 to vector<16x128xf32>
    %251 = arith.addf %249, %250 : vector<16x128xf32>
    %252 = vector.extract_strided_slice %235 {offsets = [0, 256], sizes = [16, 128], strides = [1, 1]} : vector<16x512xf32> to vector<16x128xf32>
    %253 = math.tanh %252 : vector<16x128xf32>
    %254 = vector.extract_strided_slice %235 {offsets = [0, 384], sizes = [16, 128], strides = [1, 1]} : vector<16x512xf32> to vector<16x128xf32>
    %cst_98 = arith.constant 5.000000e-01 : f32
    %255 = vector.broadcast %cst_98 : f32 to vector<16x128xf32>
    %256 = arith.mulf %255, %254 : vector<16x128xf32>
    %257 = math.tanh %256 : vector<16x128xf32>
    %cst_99 = arith.constant 5.000000e-01 : f32
    %258 = vector.broadcast %cst_99 : f32 to vector<16x128xf32>
    %259 = arith.mulf %258, %257 : vector<16x128xf32>
    %cst_100 = arith.constant 5.000000e-01 : f32
    %260 = vector.broadcast %cst_100 : f32 to vector<16x128xf32>
    %261 = arith.addf %259, %260 : vector<16x128xf32>
    %262 = arith.mulf %251, %228 : vector<16x128xf32>
    %263 = arith.mulf %243, %253 : vector<16x128xf32>
    %264 = arith.addf %262, %263 : vector<16x128xf32>
    %265 = math.tanh %264 : vector<16x128xf32>
    %266 = arith.mulf %261, %265 : vector<16x128xf32>
    %c96_101 = arith.constant 96 : index
    %c0_102 = arith.constant 0 : index
    %267 = vector.load %arg19[%c96_101, %c0_102] : memref<128x128xf32, #tpu.memory_space<vmem>>, vector<16x128xf32>
    tpu.vector_store %arg19[%c96_101, %c0_102], %266 {strides = array<i32>} : memref<128x128xf32, #tpu.memory_space<vmem>>, vector<16x128xf32>,
    %c112 = arith.constant 112 : index
    %c0_103 = arith.constant 0 : index
    %268 = vector.load %arg18[%c112, %c0_103] : memref<128x512xf32, #tpu.memory_space<vmem>>, vector<16x512xf32>
    %269 = arith.truncf %266 : vector<16x128xf32> to vector<16x128xbf16>
    %cst_104 = arith.constant dense<0.000000e+00> : vector<16x512xf32>
    %270 = tpu.matmul %269, %13, %cst_104 {dimension_numbers = #tpu.dot_dimension_numbers<[1], [0], [0], [1], [0, 0, 1, 1], [], []>} : vector<16x128xbf16>, vector<128x512xbf16>, vector<16x512xf32> -> vector<16x512xf32>
    %271 = arith.addf %268, %270 : vector<16x512xf32>
    %272 = vector.extract_strided_slice %271 {offsets = [0, 0], sizes = [16, 128], strides = [1, 1]} : vector<16x512xf32> to vector<16x128xf32>
    %cst_105 = arith.constant 5.000000e-01 : f32
    %273 = vector.broadcast %cst_105 : f32 to vector<16x128xf32>
    %274 = arith.mulf %273, %272 : vector<16x128xf32>
    %275 = math.tanh %274 : vector<16x128xf32>
    %cst_106 = arith.constant 5.000000e-01 : f32
    %276 = vector.broadcast %cst_106 : f32 to vector<16x128xf32>
    %277 = arith.mulf %276, %275 : vector<16x128xf32>
    %cst_107 = arith.constant 5.000000e-01 : f32
    %278 = vector.broadcast %cst_107 : f32 to vector<16x128xf32>
    %279 = arith.addf %277, %278 : vector<16x128xf32>
    %280 = vector.extract_strided_slice %271 {offsets = [0, 128], sizes = [16, 128], strides = [1, 1]} : vector<16x512xf32> to vector<16x128xf32>
    %cst_108 = arith.constant 5.000000e-01 : f32
    %281 = vector.broadcast %cst_108 : f32 to vector<16x128xf32>
    %282 = arith.mulf %281, %280 : vector<16x128xf32>
    %283 = math.tanh %282 : vector<16x128xf32>
    %cst_109 = arith.constant 5.000000e-01 : f32
    %284 = vector.broadcast %cst_109 : f32 to vector<16x128xf32>
    %285 = arith.mulf %284, %283 : vector<16x128xf32>
    %cst_110 = arith.constant 5.000000e-01 : f32
    %286 = vector.broadcast %cst_110 : f32 to vector<16x128xf32>
    %287 = arith.addf %285, %286 : vector<16x128xf32>
    %288 = vector.extract_strided_slice %271 {offsets = [0, 256], sizes = [16, 128], strides = [1, 1]} : vector<16x512xf32> to vector<16x128xf32>
    %289 = math.tanh %288 : vector<16x128xf32>
    %290 = vector.extract_strided_slice %271 {offsets = [0, 384], sizes = [16, 128], strides = [1, 1]} : vector<16x512xf32> to vector<16x128xf32>
    %cst_111 = arith.constant 5.000000e-01 : f32
    %291 = vector.broadcast %cst_111 : f32 to vector<16x128xf32>
    %292 = arith.mulf %291, %290 : vector<16x128xf32>
    %293 = math.tanh %292 : vector<16x128xf32>
    %cst_112 = arith.constant 5.000000e-01 : f32
    %294 = vector.broadcast %cst_112 : f32 to vector<16x128xf32>
    %295 = arith.mulf %294, %293 : vector<16x128xf32>
    %cst_113 = arith.constant 5.000000e-01 : f32
    %296 = vector.broadcast %cst_113 : f32 to vector<16x128xf32>
    %297 = arith.addf %295, %296 : vector<16x128xf32>
    %298 = arith.mulf %287, %264 : vector<16x128xf32>
    %299 = arith.mulf %279, %289 : vector<16x128xf32>
    %300 = arith.addf %298, %299 : vector<16x128xf32>
    %301 = math.tanh %300 : vector<16x128xf32>
    %302 = arith.mulf %297, %301 : vector<16x128xf32>
    %c112_114 = arith.constant 112 : index
    %c0_115 = arith.constant 0 : index
    %303 = vector.load %arg19[%c112_114, %c0_115] : memref<128x128xf32, #tpu.memory_space<vmem>>, vector<16x128xf32>
    tpu.vector_store %arg19[%c112_114, %c0_115], %302 {strides = array<i32>} : memref<128x128xf32, #tpu.memory_space<vmem>>, vector<16x128xf32>,
    %c0_116 = arith.constant 0 : index
    %c0_117 = arith.constant 0 : index
    %c0_118 = arith.constant 0 : index
    %304 = vector.load %arg16[%c0_116, %c0_117, %c0_118] : memref<4x16x128xf32, #tpu.memory_space<vmem>>, vector<1x16x128xf32>
    %305 = vector.shape_cast %304 : vector<1x16x128xf32> to vector<16x128xf32>
    %306 = vector.shape_cast %302 : vector<16x128xf32> to vector<1x16x128xf32>
    tpu.vector_store %arg16[%c0_116, %c0_117, %c0_118], %306 {strides = array<i32>} : memref<4x16x128xf32, #tpu.memory_space<vmem>>, vector<1x16x128xf32>,
    %c0_119 = arith.constant 0 : index
    %c0_120 = arith.constant 0 : index
    %c0_121 = arith.constant 0 : index
    %307 = vector.load %arg17[%c0_119, %c0_120, %c0_121] : memref<4x16x128xf32, #tpu.memory_space<vmem>>, vector<1x16x128xf32>
    %308 = vector.shape_cast %307 : vector<1x16x128xf32> to vector<16x128xf32>
    %309 = vector.shape_cast %300 : vector<16x128xf32> to vector<1x16x128xf32>
    tpu.vector_store %arg17[%c0_119, %c0_120, %c0_121], %309 {strides = array<i32>} : memref<4x16x128xf32, #tpu.memory_space<vmem>>, vector<1x16x128xf32>,
    %c0_122 = arith.constant 0 : index
    %c0_123 = arith.constant 0 : index
    %310 = vector.load %arg19[%c0_122, %c0_123] : memref<128x128xf32, #tpu.memory_space<vmem>>, vector<128x128xf32>
    %311 = arith.truncf %310 : vector<128x128xf32> to vector<128x128xbf16>
    %c0_124 = arith.constant 0 : index
    %c0_125 = arith.constant 0 : index
    %312 = vector.load %arg3[%c0_124, %c0_125] : memref<128x512xbf16, #tpu.memory_space<vmem>>, vector<128x512xbf16>
    %cst_126 = arith.constant dense<0.000000e+00> : vector<128x512xf32>
    %313 = tpu.matmul %311, %312, %cst_126 {dimension_numbers = #tpu.dot_dimension_numbers<[1], [0], [0], [1], [0, 0, 1, 1], [], []>} : vector<128x128xbf16>, vector<128x512xbf16>, vector<128x512xf32> -> vector<128x512xf32>
    %c0_127 = arith.constant 0 : index
    %c0_128 = arith.constant 0 : index
    %314 = vector.load %arg10[%c0_127, %c0_128] : memref<1x512xf32, #tpu.memory_space<vmem>>, vector<1x512xf32>
    %315 = vector.broadcast %314 : vector<1x512xf32> to vector<128x512xf32>
    %316 = arith.addf %313, %315 : vector<128x512xf32>
    %c0_129 = arith.constant 0 : index
    %c0_130 = arith.constant 0 : index
    %317 = vector.load %arg18[%c0_129, %c0_130] : memref<128x512xf32, #tpu.memory_space<vmem>>, vector<128x512xf32>
    tpu.vector_store %arg18[%c0_129, %c0_130], %316 {strides = array<i32>} : memref<128x512xf32, #tpu.memory_space<vmem>>, vector<128x512xf32>,
    %c0_131 = arith.constant 0 : index
    %c0_132 = arith.constant 0 : index
    %318 = vector.load %arg7[%c0_131, %c0_132] : memref<128x512xbf16, #tpu.memory_space<vmem>>, vector<128x512xbf16>
    %cst_133 = arith.constant 0.000000e+00 : f32
    %319 = vector.broadcast %cst_133 : f32 to vector<16x128xf32>
    %cst_134 = arith.constant 0.000000e+00 : f32
    %320 = vector.broadcast %cst_134 : f32 to vector<16x128xf32>
    %c0_135 = arith.constant 0 : index
    %c0_136 = arith.constant 0 : index
    %321 = vector.load %arg18[%c0_135, %c0_136] : memref<128x512xf32, #tpu.memory_space<vmem>>, vector<16x512xf32>
    %322 = arith.truncf %319 : vector<16x128xf32> to vector<16x128xbf16>
    %cst_137 = arith.constant dense<0.000000e+00> : vector<16x512xf32>
    %323 = tpu.matmul %322, %318, %cst_137 {dimension_numbers = #tpu.dot_dimension_numbers<[1], [0], [0], [1], [0, 0, 1, 1], [], []>} : vector<16x128xbf16>, vector<128x512xbf16>, vector<16x512xf32> -> vector<16x512xf32>
    %324 = arith.addf %321, %323 : vector<16x512xf32>
    %325 = vector.extract_strided_slice %324 {offsets = [0, 0], sizes = [16, 128], strides = [1, 1]} : vector<16x512xf32> to vector<16x128xf32>
    %cst_138 = arith.constant 5.000000e-01 : f32
    %326 = vector.broadcast %cst_138 : f32 to vector<16x128xf32>
    %327 = arith.mulf %326, %325 : vector<16x128xf32>
    %328 = math.tanh %327 : vector<16x128xf32>
    %cst_139 = arith.constant 5.000000e-01 : f32
    %329 = vector.broadcast %cst_139 : f32 to vector<16x128xf32>
    %330 = arith.mulf %329, %328 : vector<16x128xf32>
    %cst_140 = arith.constant 5.000000e-01 : f32
    %331 = vector.broadcast %cst_140 : f32 to vector<16x128xf32>
    %332 = arith.addf %330, %331 : vector<16x128xf32>
    %333 = vector.extract_strided_slice %324 {offsets = [0, 128], sizes = [16, 128], strides = [1, 1]} : vector<16x512xf32> to vector<16x128xf32>
    %cst_141 = arith.constant 5.000000e-01 : f32
    %334 = vector.broadcast %cst_141 : f32 to vector<16x128xf32>
    %335 = arith.mulf %334, %333 : vector<16x128xf32>
    %336 = math.tanh %335 : vector<16x128xf32>
    %cst_142 = arith.constant 5.000000e-01 : f32
    %337 = vector.broadcast %cst_142 : f32 to vector<16x128xf32>
    %338 = arith.mulf %337, %336 : vector<16x128xf32>
    %cst_143 = arith.constant 5.000000e-01 : f32
    %339 = vector.broadcast %cst_143 : f32 to vector<16x128xf32>
    %340 = arith.addf %338, %339 : vector<16x128xf32>
    %341 = vector.extract_strided_slice %324 {offsets = [0, 256], sizes = [16, 128], strides = [1, 1]} : vector<16x512xf32> to vector<16x128xf32>
    %342 = math.tanh %341 : vector<16x128xf32>
    %343 = vector.extract_strided_slice %324 {offsets = [0, 384], sizes = [16, 128], strides = [1, 1]} : vector<16x512xf32> to vector<16x128xf32>
    %cst_144 = arith.constant 5.000000e-01 : f32
    %344 = vector.broadcast %cst_144 : f32 to vector<16x128xf32>
    %345 = arith.mulf %344, %343 : vector<16x128xf32>
    %346 = math.tanh %345 : vector<16x128xf32>
    %cst_145 = arith.constant 5.000000e-01 : f32
    %347 = vector.broadcast %cst_145 : f32 to vector<16x128xf32>
    %348 = arith.mulf %347, %346 : vector<16x128xf32>
    %cst_146 = arith.constant 5.000000e-01 : f32
    %349 = vector.broadcast %cst_146 : f32 to vector<16x128xf32>
    %350 = arith.addf %348, %349 : vector<16x128xf32>
    %351 = arith.mulf %340, %320 : vector<16x128xf32>
    %352 = arith.mulf %332, %342 : vector<16x128xf32>
    %353 = arith.addf %351, %352 : vector<16x128xf32>
    %354 = math.tanh %353 : vector<16x128xf32>
    %355 = arith.mulf %350, %354 : vector<16x128xf32>
    %c0_147 = arith.constant 0 : index
    %c0_148 = arith.constant 0 : index
    %356 = vector.load %arg19[%c0_147, %c0_148] : memref<128x128xf32, #tpu.memory_space<vmem>>, vector<16x128xf32>
    tpu.vector_store %arg19[%c0_147, %c0_148], %355 {strides = array<i32>} : memref<128x128xf32, #tpu.memory_space<vmem>>, vector<16x128xf32>,
    %c16_149 = arith.constant 16 : index
    %c0_150 = arith.constant 0 : index
    %357 = vector.load %arg18[%c16_149, %c0_150] : memref<128x512xf32, #tpu.memory_space<vmem>>, vector<16x512xf32>
    %358 = arith.truncf %355 : vector<16x128xf32> to vector<16x128xbf16>
    %cst_151 = arith.constant dense<0.000000e+00> : vector<16x512xf32>
    %359 = tpu.matmul %358, %318, %cst_151 {dimension_numbers = #tpu.dot_dimension_numbers<[1], [0], [0], [1], [0, 0, 1, 1], [], []>} : vector<16x128xbf16>, vector<128x512xbf16>, vector<16x512xf32> -> vector<16x512xf32>
    %360 = arith.addf %357, %359 : vector<16x512xf32>
    %361 = vector.extract_strided_slice %360 {offsets = [0, 0], sizes = [16, 128], strides = [1, 1]} : vector<16x512xf32> to vector<16x128xf32>
    %cst_152 = arith.constant 5.000000e-01 : f32
    %362 = vector.broadcast %cst_152 : f32 to vector<16x128xf32>
    %363 = arith.mulf %362, %361 : vector<16x128xf32>
    %364 = math.tanh %363 : vector<16x128xf32>
    %cst_153 = arith.constant 5.000000e-01 : f32
    %365 = vector.broadcast %cst_153 : f32 to vector<16x128xf32>
    %366 = arith.mulf %365, %364 : vector<16x128xf32>
    %cst_154 = arith.constant 5.000000e-01 : f32
    %367 = vector.broadcast %cst_154 : f32 to vector<16x128xf32>
    %368 = arith.addf %366, %367 : vector<16x128xf32>
    %369 = vector.extract_strided_slice %360 {offsets = [0, 128], sizes = [16, 128], strides = [1, 1]} : vector<16x512xf32> to vector<16x128xf32>
    %cst_155 = arith.constant 5.000000e-01 : f32
    %370 = vector.broadcast %cst_155 : f32 to vector<16x128xf32>
    %371 = arith.mulf %370, %369 : vector<16x128xf32>
    %372 = math.tanh %371 : vector<16x128xf32>
    %cst_156 = arith.constant 5.000000e-01 : f32
    %373 = vector.broadcast %cst_156 : f32 to vector<16x128xf32>
    %374 = arith.mulf %373, %372 : vector<16x128xf32>
    %cst_157 = arith.constant 5.000000e-01 : f32
    %375 = vector.broadcast %cst_157 : f32 to vector<16x128xf32>
    %376 = arith.addf %374, %375 : vector<16x128xf32>
    %377 = vector.extract_strided_slice %360 {offsets = [0, 256], sizes = [16, 128], strides = [1, 1]} : vector<16x512xf32> to vector<16x128xf32>
    %378 = math.tanh %377 : vector<16x128xf32>
    %379 = vector.extract_strided_slice %360 {offsets = [0, 384], sizes = [16, 128], strides = [1, 1]} : vector<16x512xf32> to vector<16x128xf32>
    %cst_158 = arith.constant 5.000000e-01 : f32
    %380 = vector.broadcast %cst_158 : f32 to vector<16x128xf32>
    %381 = arith.mulf %380, %379 : vector<16x128xf32>
    %382 = math.tanh %381 : vector<16x128xf32>
    %cst_159 = arith.constant 5.000000e-01 : f32
    %383 = vector.broadcast %cst_159 : f32 to vector<16x128xf32>
    %384 = arith.mulf %383, %382 : vector<16x128xf32>
    %cst_160 = arith.constant 5.000000e-01 : f32
    %385 = vector.broadcast %cst_160 : f32 to vector<16x128xf32>
    %386 = arith.addf %384, %385 : vector<16x128xf32>
    %387 = arith.mulf %376, %353 : vector<16x128xf32>
    %388 = arith.mulf %368, %378 : vector<16x128xf32>
    %389 = arith.addf %387, %388 : vector<16x128xf32>
    %390 = math.tanh %389 : vector<16x128xf32>
    %391 = arith.mulf %386, %390 : vector<16x128xf32>
    %c16_161 = arith.constant 16 : index
    %c0_162 = arith.constant 0 : index
    %392 = vector.load %arg19[%c16_161, %c0_162] : memref<128x128xf32, #tpu.memory_space<vmem>>, vector<16x128xf32>
    tpu.vector_store %arg19[%c16_161, %c0_162], %391 {strides = array<i32>} : memref<128x128xf32, #tpu.memory_space<vmem>>, vector<16x128xf32>,
    %c32_163 = arith.constant 32 : index
    %c0_164 = arith.constant 0 : index
    %393 = vector.load %arg18[%c32_163, %c0_164] : memref<128x512xf32, #tpu.memory_space<vmem>>, vector<16x512xf32>
    %394 = arith.truncf %391 : vector<16x128xf32> to vector<16x128xbf16>
    %cst_165 = arith.constant dense<0.000000e+00> : vector<16x512xf32>
    %395 = tpu.matmul %394, %318, %cst_165 {dimension_numbers = #tpu.dot_dimension_numbers<[1], [0], [0], [1], [0, 0, 1, 1], [], []>} : vector<16x128xbf16>, vector<128x512xbf16>, vector<16x512xf32> -> vector<16x512xf32>
    %396 = arith.addf %393, %395 : vector<16x512xf32>
    %397 = vector.extract_strided_slice %396 {offsets = [0, 0], sizes = [16, 128], strides = [1, 1]} : vector<16x512xf32> to vector<16x128xf32>
    %cst_166 = arith.constant 5.000000e-01 : f32
    %398 = vector.broadcast %cst_166 : f32 to vector<16x128xf32>
    %399 = arith.mulf %398, %397 : vector<16x128xf32>
    %400 = math.tanh %399 : vector<16x128xf32>
    %cst_167 = arith.constant 5.000000e-01 : f32
    %401 = vector.broadcast %cst_167 : f32 to vector<16x128xf32>
    %402 = arith.mulf %401, %400 : vector<16x128xf32>
    %cst_168 = arith.constant 5.000000e-01 : f32
    %403 = vector.broadcast %cst_168 : f32 to vector<16x128xf32>
    %404 = arith.addf %402, %403 : vector<16x128xf32>
    %405 = vector.extract_strided_slice %396 {offsets = [0, 128], sizes = [16, 128], strides = [1, 1]} : vector<16x512xf32> to vector<16x128xf32>
    %cst_169 = arith.constant 5.000000e-01 : f32
    %406 = vector.broadcast %cst_169 : f32 to vector<16x128xf32>
    %407 = arith.mulf %406, %405 : vector<16x128xf32>
    %408 = math.tanh %407 : vector<16x128xf32>
    %cst_170 = arith.constant 5.000000e-01 : f32
    %409 = vector.broadcast %cst_170 : f32 to vector<16x128xf32>
    %410 = arith.mulf %409, %408 : vector<16x128xf32>
    %cst_171 = arith.constant 5.000000e-01 : f32
    %411 = vector.broadcast %cst_171 : f32 to vector<16x128xf32>
    %412 = arith.addf %410, %411 : vector<16x128xf32>
    %413 = vector.extract_strided_slice %396 {offsets = [0, 256], sizes = [16, 128], strides = [1, 1]} : vector<16x512xf32> to vector<16x128xf32>
    %414 = math.tanh %413 : vector<16x128xf32>
    %415 = vector.extract_strided_slice %396 {offsets = [0, 384], sizes = [16, 128], strides = [1, 1]} : vector<16x512xf32> to vector<16x128xf32>
    %cst_172 = arith.constant 5.000000e-01 : f32
    %416 = vector.broadcast %cst_172 : f32 to vector<16x128xf32>
    %417 = arith.mulf %416, %415 : vector<16x128xf32>
    %418 = math.tanh %417 : vector<16x128xf32>
    %cst_173 = arith.constant 5.000000e-01 : f32
    %419 = vector.broadcast %cst_173 : f32 to vector<16x128xf32>
    %420 = arith.mulf %419, %418 : vector<16x128xf32>
    %cst_174 = arith.constant 5.000000e-01 : f32
    %421 = vector.broadcast %cst_174 : f32 to vector<16x128xf32>
    %422 = arith.addf %420, %421 : vector<16x128xf32>
    %423 = arith.mulf %412, %389 : vector<16x128xf32>
    %424 = arith.mulf %404, %414 : vector<16x128xf32>
    %425 = arith.addf %423, %424 : vector<16x128xf32>
    %426 = math.tanh %425 : vector<16x128xf32>
    %427 = arith.mulf %422, %426 : vector<16x128xf32>
    %c32_175 = arith.constant 32 : index
    %c0_176 = arith.constant 0 : index
    %428 = vector.load %arg19[%c32_175, %c0_176] : memref<128x128xf32, #tpu.memory_space<vmem>>, vector<16x128xf32>
    tpu.vector_store %arg19[%c32_175, %c0_176], %427 {strides = array<i32>} : memref<128x128xf32, #tpu.memory_space<vmem>>, vector<16x128xf32>,
    %c48_177 = arith.constant 48 : index
    %c0_178 = arith.constant 0 : index
    %429 = vector.load %arg18[%c48_177, %c0_178] : memref<128x512xf32, #tpu.memory_space<vmem>>, vector<16x512xf32>
    %430 = arith.truncf %427 : vector<16x128xf32> to vector<16x128xbf16>
    %cst_179 = arith.constant dense<0.000000e+00> : vector<16x512xf32>
    %431 = tpu.matmul %430, %318, %cst_179 {dimension_numbers = #tpu.dot_dimension_numbers<[1], [0], [0], [1], [0, 0, 1, 1], [], []>} : vector<16x128xbf16>, vector<128x512xbf16>, vector<16x512xf32> -> vector<16x512xf32>
    %432 = arith.addf %429, %431 : vector<16x512xf32>
    %433 = vector.extract_strided_slice %432 {offsets = [0, 0], sizes = [16, 128], strides = [1, 1]} : vector<16x512xf32> to vector<16x128xf32>
    %cst_180 = arith.constant 5.000000e-01 : f32
    %434 = vector.broadcast %cst_180 : f32 to vector<16x128xf32>
    %435 = arith.mulf %434, %433 : vector<16x128xf32>
    %436 = math.tanh %435 : vector<16x128xf32>
    %cst_181 = arith.constant 5.000000e-01 : f32
    %437 = vector.broadcast %cst_181 : f32 to vector<16x128xf32>
    %438 = arith.mulf %437, %436 : vector<16x128xf32>
    %cst_182 = arith.constant 5.000000e-01 : f32
    %439 = vector.broadcast %cst_182 : f32 to vector<16x128xf32>
    %440 = arith.addf %438, %439 : vector<16x128xf32>
    %441 = vector.extract_strided_slice %432 {offsets = [0, 128], sizes = [16, 128], strides = [1, 1]} : vector<16x512xf32> to vector<16x128xf32>
    %cst_183 = arith.constant 5.000000e-01 : f32
    %442 = vector.broadcast %cst_183 : f32 to vector<16x128xf32>
    %443 = arith.mulf %442, %441 : vector<16x128xf32>
    %444 = math.tanh %443 : vector<16x128xf32>
    %cst_184 = arith.constant 5.000000e-01 : f32
    %445 = vector.broadcast %cst_184 : f32 to vector<16x128xf32>
    %446 = arith.mulf %445, %444 : vector<16x128xf32>
    %cst_185 = arith.constant 5.000000e-01 : f32
    %447 = vector.broadcast %cst_185 : f32 to vector<16x128xf32>
    %448 = arith.addf %446, %447 : vector<16x128xf32>
    %449 = vector.extract_strided_slice %432 {offsets = [0, 256], sizes = [16, 128], strides = [1, 1]} : vector<16x512xf32> to vector<16x128xf32>
    %450 = math.tanh %449 : vector<16x128xf32>
    %451 = vector.extract_strided_slice %432 {offsets = [0, 384], sizes = [16, 128], strides = [1, 1]} : vector<16x512xf32> to vector<16x128xf32>
    %cst_186 = arith.constant 5.000000e-01 : f32
    %452 = vector.broadcast %cst_186 : f32 to vector<16x128xf32>
    %453 = arith.mulf %452, %451 : vector<16x128xf32>
    %454 = math.tanh %453 : vector<16x128xf32>
    %cst_187 = arith.constant 5.000000e-01 : f32
    %455 = vector.broadcast %cst_187 : f32 to vector<16x128xf32>
    %456 = arith.mulf %455, %454 : vector<16x128xf32>
    %cst_188 = arith.constant 5.000000e-01 : f32
    %457 = vector.broadcast %cst_188 : f32 to vector<16x128xf32>
    %458 = arith.addf %456, %457 : vector<16x128xf32>
    %459 = arith.mulf %448, %425 : vector<16x128xf32>
    %460 = arith.mulf %440, %450 : vector<16x128xf32>
    %461 = arith.addf %459, %460 : vector<16x128xf32>
    %462 = math.tanh %461 : vector<16x128xf32>
    %463 = arith.mulf %458, %462 : vector<16x128xf32>
    %c48_189 = arith.constant 48 : index
    %c0_190 = arith.constant 0 : index
    %464 = vector.load %arg19[%c48_189, %c0_190] : memref<128x128xf32, #tpu.memory_space<vmem>>, vector<16x128xf32>
    tpu.vector_store %arg19[%c48_189, %c0_190], %463 {strides = array<i32>} : memref<128x128xf32, #tpu.memory_space<vmem>>, vector<16x128xf32>,
    %c64_191 = arith.constant 64 : index
    %c0_192 = arith.constant 0 : index
    %465 = vector.load %arg18[%c64_191, %c0_192] : memref<128x512xf32, #tpu.memory_space<vmem>>, vector<16x512xf32>
    %466 = arith.truncf %463 : vector<16x128xf32> to vector<16x128xbf16>
    %cst_193 = arith.constant dense<0.000000e+00> : vector<16x512xf32>
    %467 = tpu.matmul %466, %318, %cst_193 {dimension_numbers = #tpu.dot_dimension_numbers<[1], [0], [0], [1], [0, 0, 1, 1], [], []>} : vector<16x128xbf16>, vector<128x512xbf16>, vector<16x512xf32> -> vector<16x512xf32>
    %468 = arith.addf %465, %467 : vector<16x512xf32>
    %469 = vector.extract_strided_slice %468 {offsets = [0, 0], sizes = [16, 128], strides = [1, 1]} : vector<16x512xf32> to vector<16x128xf32>
    %cst_194 = arith.constant 5.000000e-01 : f32
    %470 = vector.broadcast %cst_194 : f32 to vector<16x128xf32>
    %471 = arith.mulf %470, %469 : vector<16x128xf32>
    %472 = math.tanh %471 : vector<16x128xf32>
    %cst_195 = arith.constant 5.000000e-01 : f32
    %473 = vector.broadcast %cst_195 : f32 to vector<16x128xf32>
    %474 = arith.mulf %473, %472 : vector<16x128xf32>
    %cst_196 = arith.constant 5.000000e-01 : f32
    %475 = vector.broadcast %cst_196 : f32 to vector<16x128xf32>
    %476 = arith.addf %474, %475 : vector<16x128xf32>
    %477 = vector.extract_strided_slice %468 {offsets = [0, 128], sizes = [16, 128], strides = [1, 1]} : vector<16x512xf32> to vector<16x128xf32>
    %cst_197 = arith.constant 5.000000e-01 : f32
    %478 = vector.broadcast %cst_197 : f32 to vector<16x128xf32>
    %479 = arith.mulf %478, %477 : vector<16x128xf32>
    %480 = math.tanh %479 : vector<16x128xf32>
    %cst_198 = arith.constant 5.000000e-01 : f32
    %481 = vector.broadcast %cst_198 : f32 to vector<16x128xf32>
    %482 = arith.mulf %481, %480 : vector<16x128xf32>
    %cst_199 = arith.constant 5.000000e-01 : f32
    %483 = vector.broadcast %cst_199 : f32 to vector<16x128xf32>
    %484 = arith.addf %482, %483 : vector<16x128xf32>
    %485 = vector.extract_strided_slice %468 {offsets = [0, 256], sizes = [16, 128], strides = [1, 1]} : vector<16x512xf32> to vector<16x128xf32>
    %486 = math.tanh %485 : vector<16x128xf32>
    %487 = vector.extract_strided_slice %468 {offsets = [0, 384], sizes = [16, 128], strides = [1, 1]} : vector<16x512xf32> to vector<16x128xf32>
    %cst_200 = arith.constant 5.000000e-01 : f32
    %488 = vector.broadcast %cst_200 : f32 to vector<16x128xf32>
    %489 = arith.mulf %488, %487 : vector<16x128xf32>
    %490 = math.tanh %489 : vector<16x128xf32>
    %cst_201 = arith.constant 5.000000e-01 : f32
    %491 = vector.broadcast %cst_201 : f32 to vector<16x128xf32>
    %492 = arith.mulf %491, %490 : vector<16x128xf32>
    %cst_202 = arith.constant 5.000000e-01 : f32
    %493 = vector.broadcast %cst_202 : f32 to vector<16x128xf32>
    %494 = arith.addf %492, %493 : vector<16x128xf32>
    %495 = arith.mulf %484, %461 : vector<16x128xf32>
    %496 = arith.mulf %476, %486 : vector<16x128xf32>
    %497 = arith.addf %495, %496 : vector<16x128xf32>
    %498 = math.tanh %497 : vector<16x128xf32>
    %499 = arith.mulf %494, %498 : vector<16x128xf32>
    %c64_203 = arith.constant 64 : index
    %c0_204 = arith.constant 0 : index
    %500 = vector.load %arg19[%c64_203, %c0_204] : memref<128x128xf32, #tpu.memory_space<vmem>>, vector<16x128xf32>
    tpu.vector_store %arg19[%c64_203, %c0_204], %499 {strides = array<i32>} : memref<128x128xf32, #tpu.memory_space<vmem>>, vector<16x128xf32>,
    %c80_205 = arith.constant 80 : index
    %c0_206 = arith.constant 0 : index
    %501 = vector.load %arg18[%c80_205, %c0_206] : memref<128x512xf32, #tpu.memory_space<vmem>>, vector<16x512xf32>
    %502 = arith.truncf %499 : vector<16x128xf32> to vector<16x128xbf16>
    %cst_207 = arith.constant dense<0.000000e+00> : vector<16x512xf32>
    %503 = tpu.matmul %502, %318, %cst_207 {dimension_numbers = #tpu.dot_dimension_numbers<[1], [0], [0], [1], [0, 0, 1, 1], [], []>} : vector<16x128xbf16>, vector<128x512xbf16>, vector<16x512xf32> -> vector<16x512xf32>
    %504 = arith.addf %501, %503 : vector<16x512xf32>
    %505 = vector.extract_strided_slice %504 {offsets = [0, 0], sizes = [16, 128], strides = [1, 1]} : vector<16x512xf32> to vector<16x128xf32>
    %cst_208 = arith.constant 5.000000e-01 : f32
    %506 = vector.broadcast %cst_208 : f32 to vector<16x128xf32>
    %507 = arith.mulf %506, %505 : vector<16x128xf32>
    %508 = math.tanh %507 : vector<16x128xf32>
    %cst_209 = arith.constant 5.000000e-01 : f32
    %509 = vector.broadcast %cst_209 : f32 to vector<16x128xf32>
    %510 = arith.mulf %509, %508 : vector<16x128xf32>
    %cst_210 = arith.constant 5.000000e-01 : f32
    %511 = vector.broadcast %cst_210 : f32 to vector<16x128xf32>
    %512 = arith.addf %510, %511 : vector<16x128xf32>
    %513 = vector.extract_strided_slice %504 {offsets = [0, 128], sizes = [16, 128], strides = [1, 1]} : vector<16x512xf32> to vector<16x128xf32>
    %cst_211 = arith.constant 5.000000e-01 : f32
    %514 = vector.broadcast %cst_211 : f32 to vector<16x128xf32>
    %515 = arith.mulf %514, %513 : vector<16x128xf32>
    %516 = math.tanh %515 : vector<16x128xf32>
    %cst_212 = arith.constant 5.000000e-01 : f32
    %517 = vector.broadcast %cst_212 : f32 to vector<16x128xf32>
    %518 = arith.mulf %517, %516 : vector<16x128xf32>
    %cst_213 = arith.constant 5.000000e-01 : f32
    %519 = vector.broadcast %cst_213 : f32 to vector<16x128xf32>
    %520 = arith.addf %518, %519 : vector<16x128xf32>
    %521 = vector.extract_strided_slice %504 {offsets = [0, 256], sizes = [16, 128], strides = [1, 1]} : vector<16x512xf32> to vector<16x128xf32>
    %522 = math.tanh %521 : vector<16x128xf32>
    %523 = vector.extract_strided_slice %504 {offsets = [0, 384], sizes = [16, 128], strides = [1, 1]} : vector<16x512xf32> to vector<16x128xf32>
    %cst_214 = arith.constant 5.000000e-01 : f32
    %524 = vector.broadcast %cst_214 : f32 to vector<16x128xf32>
    %525 = arith.mulf %524, %523 : vector<16x128xf32>
    %526 = math.tanh %525 : vector<16x128xf32>
    %cst_215 = arith.constant 5.000000e-01 : f32
    %527 = vector.broadcast %cst_215 : f32 to vector<16x128xf32>
    %528 = arith.mulf %527, %526 : vector<16x128xf32>
    %cst_216 = arith.constant 5.000000e-01 : f32
    %529 = vector.broadcast %cst_216 : f32 to vector<16x128xf32>
    %530 = arith.addf %528, %529 : vector<16x128xf32>
    %531 = arith.mulf %520, %497 : vector<16x128xf32>
    %532 = arith.mulf %512, %522 : vector<16x128xf32>
    %533 = arith.addf %531, %532 : vector<16x128xf32>
    %534 = math.tanh %533 : vector<16x128xf32>
    %535 = arith.mulf %530, %534 : vector<16x128xf32>
    %c80_217 = arith.constant 80 : index
    %c0_218 = arith.constant 0 : index
    %536 = vector.load %arg19[%c80_217, %c0_218] : memref<128x128xf32, #tpu.memory_space<vmem>>, vector<16x128xf32>
    tpu.vector_store %arg19[%c80_217, %c0_218], %535 {strides = array<i32>} : memref<128x128xf32, #tpu.memory_space<vmem>>, vector<16x128xf32>,
    %c96_219 = arith.constant 96 : index
    %c0_220 = arith.constant 0 : index
    %537 = vector.load %arg18[%c96_219, %c0_220] : memref<128x512xf32, #tpu.memory_space<vmem>>, vector<16x512xf32>
    %538 = arith.truncf %535 : vector<16x128xf32> to vector<16x128xbf16>
    %cst_221 = arith.constant dense<0.000000e+00> : vector<16x512xf32>
    %539 = tpu.matmul %538, %318, %cst_221 {dimension_numbers = #tpu.dot_dimension_numbers<[1], [0], [0], [1], [0, 0, 1, 1], [], []>} : vector<16x128xbf16>, vector<128x512xbf16>, vector<16x512xf32> -> vector<16x512xf32>
    %540 = arith.addf %537, %539 : vector<16x512xf32>
    %541 = vector.extract_strided_slice %540 {offsets = [0, 0], sizes = [16, 128], strides = [1, 1]} : vector<16x512xf32> to vector<16x128xf32>
    %cst_222 = arith.constant 5.000000e-01 : f32
    %542 = vector.broadcast %cst_222 : f32 to vector<16x128xf32>
    %543 = arith.mulf %542, %541 : vector<16x128xf32>
    %544 = math.tanh %543 : vector<16x128xf32>
    %cst_223 = arith.constant 5.000000e-01 : f32
    %545 = vector.broadcast %cst_223 : f32 to vector<16x128xf32>
    %546 = arith.mulf %545, %544 : vector<16x128xf32>
    %cst_224 = arith.constant 5.000000e-01 : f32
    %547 = vector.broadcast %cst_224 : f32 to vector<16x128xf32>
    %548 = arith.addf %546, %547 : vector<16x128xf32>
    %549 = vector.extract_strided_slice %540 {offsets = [0, 128], sizes = [16, 128], strides = [1, 1]} : vector<16x512xf32> to vector<16x128xf32>
    %cst_225 = arith.constant 5.000000e-01 : f32
    %550 = vector.broadcast %cst_225 : f32 to vector<16x128xf32>
    %551 = arith.mulf %550, %549 : vector<16x128xf32>
    %552 = math.tanh %551 : vector<16x128xf32>
    %cst_226 = arith.constant 5.000000e-01 : f32
    %553 = vector.broadcast %cst_226 : f32 to vector<16x128xf32>
    %554 = arith.mulf %553, %552 : vector<16x128xf32>
    %cst_227 = arith.constant 5.000000e-01 : f32
    %555 = vector.broadcast %cst_227 : f32 to vector<16x128xf32>
    %556 = arith.addf %554, %555 : vector<16x128xf32>
    %557 = vector.extract_strided_slice %540 {offsets = [0, 256], sizes = [16, 128], strides = [1, 1]} : vector<16x512xf32> to vector<16x128xf32>
    %558 = math.tanh %557 : vector<16x128xf32>
    %559 = vector.extract_strided_slice %540 {offsets = [0, 384], sizes = [16, 128], strides = [1, 1]} : vector<16x512xf32> to vector<16x128xf32>
    %cst_228 = arith.constant 5.000000e-01 : f32
    %560 = vector.broadcast %cst_228 : f32 to vector<16x128xf32>
    %561 = arith.mulf %560, %559 : vector<16x128xf32>
    %562 = math.tanh %561 : vector<16x128xf32>
    %cst_229 = arith.constant 5.000000e-01 : f32
    %563 = vector.broadcast %cst_229 : f32 to vector<16x128xf32>
    %564 = arith.mulf %563, %562 : vector<16x128xf32>
    %cst_230 = arith.constant 5.000000e-01 : f32
    %565 = vector.broadcast %cst_230 : f32 to vector<16x128xf32>
    %566 = arith.addf %564, %565 : vector<16x128xf32>
    %567 = arith.mulf %556, %533 : vector<16x128xf32>
    %568 = arith.mulf %548, %558 : vector<16x128xf32>
    %569 = arith.addf %567, %568 : vector<16x128xf32>
    %570 = math.tanh %569 : vector<16x128xf32>
    %571 = arith.mulf %566, %570 : vector<16x128xf32>
    %c96_231 = arith.constant 96 : index
    %c0_232 = arith.constant 0 : index
    %572 = vector.load %arg19[%c96_231, %c0_232] : memref<128x128xf32, #tpu.memory_space<vmem>>, vector<16x128xf32>
    tpu.vector_store %arg19[%c96_231, %c0_232], %571 {strides = array<i32>} : memref<128x128xf32, #tpu.memory_space<vmem>>, vector<16x128xf32>,
    %c112_233 = arith.constant 112 : index
    %c0_234 = arith.constant 0 : index
    %573 = vector.load %arg18[%c112_233, %c0_234] : memref<128x512xf32, #tpu.memory_space<vmem>>, vector<16x512xf32>
    %574 = arith.truncf %571 : vector<16x128xf32> to vector<16x128xbf16>
    %cst_235 = arith.constant dense<0.000000e+00> : vector<16x512xf32>
    %575 = tpu.matmul %574, %318, %cst_235 {dimension_numbers = #tpu.dot_dimension_numbers<[1], [0], [0], [1], [0, 0, 1, 1], [], []>} : vector<16x128xbf16>, vector<128x512xbf16>, vector<16x512xf32> -> vector<16x512xf32>
    %576 = arith.addf %573, %575 : vector<16x512xf32>
    %577 = vector.extract_strided_slice %576 {offsets = [0, 0], sizes = [16, 128], strides = [1, 1]} : vector<16x512xf32> to vector<16x128xf32>
    %cst_236 = arith.constant 5.000000e-01 : f32
    %578 = vector.broadcast %cst_236 : f32 to vector<16x128xf32>
    %579 = arith.mulf %578, %577 : vector<16x128xf32>
    %580 = math.tanh %579 : vector<16x128xf32>
    %cst_237 = arith.constant 5.000000e-01 : f32
    %581 = vector.broadcast %cst_237 : f32 to vector<16x128xf32>
    %582 = arith.mulf %581, %580 : vector<16x128xf32>
    %cst_238 = arith.constant 5.000000e-01 : f32
    %583 = vector.broadcast %cst_238 : f32 to vector<16x128xf32>
    %584 = arith.addf %582, %583 : vector<16x128xf32>
    %585 = vector.extract_strided_slice %576 {offsets = [0, 128], sizes = [16, 128], strides = [1, 1]} : vector<16x512xf32> to vector<16x128xf32>
    %cst_239 = arith.constant 5.000000e-01 : f32
    %586 = vector.broadcast %cst_239 : f32 to vector<16x128xf32>
    %587 = arith.mulf %586, %585 : vector<16x128xf32>
    %588 = math.tanh %587 : vector<16x128xf32>
    %cst_240 = arith.constant 5.000000e-01 : f32
    %589 = vector.broadcast %cst_240 : f32 to vector<16x128xf32>
    %590 = arith.mulf %589, %588 : vector<16x128xf32>
    %cst_241 = arith.constant 5.000000e-01 : f32
    %591 = vector.broadcast %cst_241 : f32 to vector<16x128xf32>
    %592 = arith.addf %590, %591 : vector<16x128xf32>
    %593 = vector.extract_strided_slice %576 {offsets = [0, 256], sizes = [16, 128], strides = [1, 1]} : vector<16x512xf32> to vector<16x128xf32>
    %594 = math.tanh %593 : vector<16x128xf32>
    %595 = vector.extract_strided_slice %576 {offsets = [0, 384], sizes = [16, 128], strides = [1, 1]} : vector<16x512xf32> to vector<16x128xf32>
    %cst_242 = arith.constant 5.000000e-01 : f32
    %596 = vector.broadcast %cst_242 : f32 to vector<16x128xf32>
    %597 = arith.mulf %596, %595 : vector<16x128xf32>
    %598 = math.tanh %597 : vector<16x128xf32>
    %cst_243 = arith.constant 5.000000e-01 : f32
    %599 = vector.broadcast %cst_243 : f32 to vector<16x128xf32>
    %600 = arith.mulf %599, %598 : vector<16x128xf32>
    %cst_244 = arith.constant 5.000000e-01 : f32
    %601 = vector.broadcast %cst_244 : f32 to vector<16x128xf32>
    %602 = arith.addf %600, %601 : vector<16x128xf32>
    %603 = arith.mulf %592, %569 : vector<16x128xf32>
    %604 = arith.mulf %584, %594 : vector<16x128xf32>
    %605 = arith.addf %603, %604 : vector<16x128xf32>
    %606 = math.tanh %605 : vector<16x128xf32>
    %607 = arith.mulf %602, %606 : vector<16x128xf32>
    %c112_245 = arith.constant 112 : index
    %c0_246 = arith.constant 0 : index
    %608 = vector.load %arg19[%c112_245, %c0_246] : memref<128x128xf32, #tpu.memory_space<vmem>>, vector<16x128xf32>
    tpu.vector_store %arg19[%c112_245, %c0_246], %607 {strides = array<i32>} : memref<128x128xf32, #tpu.memory_space<vmem>>, vector<16x128xf32>,
    %c1 = arith.constant 1 : index
    %c0_247 = arith.constant 0 : index
    %c0_248 = arith.constant 0 : index
    %609 = vector.load %arg16[%c1, %c0_247, %c0_248] : memref<4x16x128xf32, #tpu.memory_space<vmem>>, vector<1x16x128xf32>
    %610 = vector.shape_cast %609 : vector<1x16x128xf32> to vector<16x128xf32>
    %611 = vector.shape_cast %607 : vector<16x128xf32> to vector<1x16x128xf32>
    tpu.vector_store %arg16[%c1, %c0_247, %c0_248], %611 {strides = array<i32>} : memref<4x16x128xf32, #tpu.memory_space<vmem>>, vector<1x16x128xf32>,
    %c1_249 = arith.constant 1 : index
    %c0_250 = arith.constant 0 : index
    %c0_251 = arith.constant 0 : index
    %612 = vector.load %arg17[%c1_249, %c0_250, %c0_251] : memref<4x16x128xf32, #tpu.memory_space<vmem>>, vector<1x16x128xf32>
    %613 = vector.shape_cast %612 : vector<1x16x128xf32> to vector<16x128xf32>
    %614 = vector.shape_cast %605 : vector<16x128xf32> to vector<1x16x128xf32>
    tpu.vector_store %arg17[%c1_249, %c0_250, %c0_251], %614 {strides = array<i32>} : memref<4x16x128xf32, #tpu.memory_space<vmem>>, vector<1x16x128xf32>,
    %c0_252 = arith.constant 0 : index
    %c0_253 = arith.constant 0 : index
    %615 = vector.load %arg19[%c0_252, %c0_253] : memref<128x128xf32, #tpu.memory_space<vmem>>, vector<128x128xf32>
    %616 = arith.truncf %615 : vector<128x128xf32> to vector<128x128xbf16>
    %c0_254 = arith.constant 0 : index
    %c0_255 = arith.constant 0 : index
    %617 = vector.load %arg4[%c0_254, %c0_255] : memref<128x512xbf16, #tpu.memory_space<vmem>>, vector<128x512xbf16>
    %cst_256 = arith.constant dense<0.000000e+00> : vector<128x512xf32>
    %618 = tpu.matmul %616, %617, %cst_256 {dimension_numbers = #tpu.dot_dimension_numbers<[1], [0], [0], [1], [0, 0, 1, 1], [], []>} : vector<128x128xbf16>, vector<128x512xbf16>, vector<128x512xf32> -> vector<128x512xf32>
    %c0_257 = arith.constant 0 : index
    %c0_258 = arith.constant 0 : index
    %619 = vector.load %arg11[%c0_257, %c0_258] : memref<1x512xf32, #tpu.memory_space<vmem>>, vector<1x512xf32>
    %620 = vector.broadcast %619 : vector<1x512xf32> to vector<128x512xf32>
    %621 = arith.addf %618, %620 : vector<128x512xf32>
    %c0_259 = arith.constant 0 : index
    %c0_260 = arith.constant 0 : index
    %622 = vector.load %arg18[%c0_259, %c0_260] : memref<128x512xf32, #tpu.memory_space<vmem>>, vector<128x512xf32>
    tpu.vector_store %arg18[%c0_259, %c0_260], %621 {strides = array<i32>} : memref<128x512xf32, #tpu.memory_space<vmem>>, vector<128x512xf32>,
    %c0_261 = arith.constant 0 : index
    %c0_262 = arith.constant 0 : index
    %623 = vector.load %arg8[%c0_261, %c0_262] : memref<128x512xbf16, #tpu.memory_space<vmem>>, vector<128x512xbf16>
    %cst_263 = arith.constant 0.000000e+00 : f32
    %624 = vector.broadcast %cst_263 : f32 to vector<16x128xf32>
    %cst_264 = arith.constant 0.000000e+00 : f32
    %625 = vector.broadcast %cst_264 : f32 to vector<16x128xf32>
    %c0_265 = arith.constant 0 : index
    %c0_266 = arith.constant 0 : index
    %626 = vector.load %arg18[%c0_265, %c0_266] : memref<128x512xf32, #tpu.memory_space<vmem>>, vector<16x512xf32>
    %627 = arith.truncf %624 : vector<16x128xf32> to vector<16x128xbf16>
    %cst_267 = arith.constant dense<0.000000e+00> : vector<16x512xf32>
    %628 = tpu.matmul %627, %623, %cst_267 {dimension_numbers = #tpu.dot_dimension_numbers<[1], [0], [0], [1], [0, 0, 1, 1], [], []>} : vector<16x128xbf16>, vector<128x512xbf16>, vector<16x512xf32> -> vector<16x512xf32>
    %629 = arith.addf %626, %628 : vector<16x512xf32>
    %630 = vector.extract_strided_slice %629 {offsets = [0, 0], sizes = [16, 128], strides = [1, 1]} : vector<16x512xf32> to vector<16x128xf32>
    %cst_268 = arith.constant 5.000000e-01 : f32
    %631 = vector.broadcast %cst_268 : f32 to vector<16x128xf32>
    %632 = arith.mulf %631, %630 : vector<16x128xf32>
    %633 = math.tanh %632 : vector<16x128xf32>
    %cst_269 = arith.constant 5.000000e-01 : f32
    %634 = vector.broadcast %cst_269 : f32 to vector<16x128xf32>
    %635 = arith.mulf %634, %633 : vector<16x128xf32>
    %cst_270 = arith.constant 5.000000e-01 : f32
    %636 = vector.broadcast %cst_270 : f32 to vector<16x128xf32>
    %637 = arith.addf %635, %636 : vector<16x128xf32>
    %638 = vector.extract_strided_slice %629 {offsets = [0, 128], sizes = [16, 128], strides = [1, 1]} : vector<16x512xf32> to vector<16x128xf32>
    %cst_271 = arith.constant 5.000000e-01 : f32
    %639 = vector.broadcast %cst_271 : f32 to vector<16x128xf32>
    %640 = arith.mulf %639, %638 : vector<16x128xf32>
    %641 = math.tanh %640 : vector<16x128xf32>
    %cst_272 = arith.constant 5.000000e-01 : f32
    %642 = vector.broadcast %cst_272 : f32 to vector<16x128xf32>
    %643 = arith.mulf %642, %641 : vector<16x128xf32>
    %cst_273 = arith.constant 5.000000e-01 : f32
    %644 = vector.broadcast %cst_273 : f32 to vector<16x128xf32>
    %645 = arith.addf %643, %644 : vector<16x128xf32>
    %646 = vector.extract_strided_slice %629 {offsets = [0, 256], sizes = [16, 128], strides = [1, 1]} : vector<16x512xf32> to vector<16x128xf32>
    %647 = math.tanh %646 : vector<16x128xf32>
    %648 = vector.extract_strided_slice %629 {offsets = [0, 384], sizes = [16, 128], strides = [1, 1]} : vector<16x512xf32> to vector<16x128xf32>
    %cst_274 = arith.constant 5.000000e-01 : f32
    %649 = vector.broadcast %cst_274 : f32 to vector<16x128xf32>
    %650 = arith.mulf %649, %648 : vector<16x128xf32>
    %651 = math.tanh %650 : vector<16x128xf32>
    %cst_275 = arith.constant 5.000000e-01 : f32
    %652 = vector.broadcast %cst_275 : f32 to vector<16x128xf32>
    %653 = arith.mulf %652, %651 : vector<16x128xf32>
    %cst_276 = arith.constant 5.000000e-01 : f32
    %654 = vector.broadcast %cst_276 : f32 to vector<16x128xf32>
    %655 = arith.addf %653, %654 : vector<16x128xf32>
    %656 = arith.mulf %645, %625 : vector<16x128xf32>
    %657 = arith.mulf %637, %647 : vector<16x128xf32>
    %658 = arith.addf %656, %657 : vector<16x128xf32>
    %659 = math.tanh %658 : vector<16x128xf32>
    %660 = arith.mulf %655, %659 : vector<16x128xf32>
    %c0_277 = arith.constant 0 : index
    %c0_278 = arith.constant 0 : index
    %661 = vector.load %arg19[%c0_277, %c0_278] : memref<128x128xf32, #tpu.memory_space<vmem>>, vector<16x128xf32>
    tpu.vector_store %arg19[%c0_277, %c0_278], %660 {strides = array<i32>} : memref<128x128xf32, #tpu.memory_space<vmem>>, vector<16x128xf32>,
    %c16_279 = arith.constant 16 : index
    %c0_280 = arith.constant 0 : index
    %662 = vector.load %arg18[%c16_279, %c0_280] : memref<128x512xf32, #tpu.memory_space<vmem>>, vector<16x512xf32>
    %663 = arith.truncf %660 : vector<16x128xf32> to vector<16x128xbf16>
    %cst_281 = arith.constant dense<0.000000e+00> : vector<16x512xf32>
    %664 = tpu.matmul %663, %623, %cst_281 {dimension_numbers = #tpu.dot_dimension_numbers<[1], [0], [0], [1], [0, 0, 1, 1], [], []>} : vector<16x128xbf16>, vector<128x512xbf16>, vector<16x512xf32> -> vector<16x512xf32>
    %665 = arith.addf %662, %664 : vector<16x512xf32>
    %666 = vector.extract_strided_slice %665 {offsets = [0, 0], sizes = [16, 128], strides = [1, 1]} : vector<16x512xf32> to vector<16x128xf32>
    %cst_282 = arith.constant 5.000000e-01 : f32
    %667 = vector.broadcast %cst_282 : f32 to vector<16x128xf32>
    %668 = arith.mulf %667, %666 : vector<16x128xf32>
    %669 = math.tanh %668 : vector<16x128xf32>
    %cst_283 = arith.constant 5.000000e-01 : f32
    %670 = vector.broadcast %cst_283 : f32 to vector<16x128xf32>
    %671 = arith.mulf %670, %669 : vector<16x128xf32>
    %cst_284 = arith.constant 5.000000e-01 : f32
    %672 = vector.broadcast %cst_284 : f32 to vector<16x128xf32>
    %673 = arith.addf %671, %672 : vector<16x128xf32>
    %674 = vector.extract_strided_slice %665 {offsets = [0, 128], sizes = [16, 128], strides = [1, 1]} : vector<16x512xf32> to vector<16x128xf32>
    %cst_285 = arith.constant 5.000000e-01 : f32
    %675 = vector.broadcast %cst_285 : f32 to vector<16x128xf32>
    %676 = arith.mulf %675, %674 : vector<16x128xf32>
    %677 = math.tanh %676 : vector<16x128xf32>
    %cst_286 = arith.constant 5.000000e-01 : f32
    %678 = vector.broadcast %cst_286 : f32 to vector<16x128xf32>
    %679 = arith.mulf %678, %677 : vector<16x128xf32>
    %cst_287 = arith.constant 5.000000e-01 : f32
    %680 = vector.broadcast %cst_287 : f32 to vector<16x128xf32>
    %681 = arith.addf %679, %680 : vector<16x128xf32>
    %682 = vector.extract_strided_slice %665 {offsets = [0, 256], sizes = [16, 128], strides = [1, 1]} : vector<16x512xf32> to vector<16x128xf32>
    %683 = math.tanh %682 : vector<16x128xf32>
    %684 = vector.extract_strided_slice %665 {offsets = [0, 384], sizes = [16, 128], strides = [1, 1]} : vector<16x512xf32> to vector<16x128xf32>
    %cst_288 = arith.constant 5.000000e-01 : f32
    %685 = vector.broadcast %cst_288 : f32 to vector<16x128xf32>
    %686 = arith.mulf %685, %684 : vector<16x128xf32>
    %687 = math.tanh %686 : vector<16x128xf32>
    %cst_289 = arith.constant 5.000000e-01 : f32
    %688 = vector.broadcast %cst_289 : f32 to vector<16x128xf32>
    %689 = arith.mulf %688, %687 : vector<16x128xf32>
    %cst_290 = arith.constant 5.000000e-01 : f32
    %690 = vector.broadcast %cst_290 : f32 to vector<16x128xf32>
    %691 = arith.addf %689, %690 : vector<16x128xf32>
    %692 = arith.mulf %681, %658 : vector<16x128xf32>
    %693 = arith.mulf %673, %683 : vector<16x128xf32>
    %694 = arith.addf %692, %693 : vector<16x128xf32>
    %695 = math.tanh %694 : vector<16x128xf32>
    %696 = arith.mulf %691, %695 : vector<16x128xf32>
    %c16_291 = arith.constant 16 : index
    %c0_292 = arith.constant 0 : index
    %697 = vector.load %arg19[%c16_291, %c0_292] : memref<128x128xf32, #tpu.memory_space<vmem>>, vector<16x128xf32>
    tpu.vector_store %arg19[%c16_291, %c0_292], %696 {strides = array<i32>} : memref<128x128xf32, #tpu.memory_space<vmem>>, vector<16x128xf32>,
    %c32_293 = arith.constant 32 : index
    %c0_294 = arith.constant 0 : index
    %698 = vector.load %arg18[%c32_293, %c0_294] : memref<128x512xf32, #tpu.memory_space<vmem>>, vector<16x512xf32>
    %699 = arith.truncf %696 : vector<16x128xf32> to vector<16x128xbf16>
    %cst_295 = arith.constant dense<0.000000e+00> : vector<16x512xf32>
    %700 = tpu.matmul %699, %623, %cst_295 {dimension_numbers = #tpu.dot_dimension_numbers<[1], [0], [0], [1], [0, 0, 1, 1], [], []>} : vector<16x128xbf16>, vector<128x512xbf16>, vector<16x512xf32> -> vector<16x512xf32>
    %701 = arith.addf %698, %700 : vector<16x512xf32>
    %702 = vector.extract_strided_slice %701 {offsets = [0, 0], sizes = [16, 128], strides = [1, 1]} : vector<16x512xf32> to vector<16x128xf32>
    %cst_296 = arith.constant 5.000000e-01 : f32
    %703 = vector.broadcast %cst_296 : f32 to vector<16x128xf32>
    %704 = arith.mulf %703, %702 : vector<16x128xf32>
    %705 = math.tanh %704 : vector<16x128xf32>
    %cst_297 = arith.constant 5.000000e-01 : f32
    %706 = vector.broadcast %cst_297 : f32 to vector<16x128xf32>
    %707 = arith.mulf %706, %705 : vector<16x128xf32>
    %cst_298 = arith.constant 5.000000e-01 : f32
    %708 = vector.broadcast %cst_298 : f32 to vector<16x128xf32>
    %709 = arith.addf %707, %708 : vector<16x128xf32>
    %710 = vector.extract_strided_slice %701 {offsets = [0, 128], sizes = [16, 128], strides = [1, 1]} : vector<16x512xf32> to vector<16x128xf32>
    %cst_299 = arith.constant 5.000000e-01 : f32
    %711 = vector.broadcast %cst_299 : f32 to vector<16x128xf32>
    %712 = arith.mulf %711, %710 : vector<16x128xf32>
    %713 = math.tanh %712 : vector<16x128xf32>
    %cst_300 = arith.constant 5.000000e-01 : f32
    %714 = vector.broadcast %cst_300 : f32 to vector<16x128xf32>
    %715 = arith.mulf %714, %713 : vector<16x128xf32>
    %cst_301 = arith.constant 5.000000e-01 : f32
    %716 = vector.broadcast %cst_301 : f32 to vector<16x128xf32>
    %717 = arith.addf %715, %716 : vector<16x128xf32>
    %718 = vector.extract_strided_slice %701 {offsets = [0, 256], sizes = [16, 128], strides = [1, 1]} : vector<16x512xf32> to vector<16x128xf32>
    %719 = math.tanh %718 : vector<16x128xf32>
    %720 = vector.extract_strided_slice %701 {offsets = [0, 384], sizes = [16, 128], strides = [1, 1]} : vector<16x512xf32> to vector<16x128xf32>
    %cst_302 = arith.constant 5.000000e-01 : f32
    %721 = vector.broadcast %cst_302 : f32 to vector<16x128xf32>
    %722 = arith.mulf %721, %720 : vector<16x128xf32>
    %723 = math.tanh %722 : vector<16x128xf32>
    %cst_303 = arith.constant 5.000000e-01 : f32
    %724 = vector.broadcast %cst_303 : f32 to vector<16x128xf32>
    %725 = arith.mulf %724, %723 : vector<16x128xf32>
    %cst_304 = arith.constant 5.000000e-01 : f32
    %726 = vector.broadcast %cst_304 : f32 to vector<16x128xf32>
    %727 = arith.addf %725, %726 : vector<16x128xf32>
    %728 = arith.mulf %717, %694 : vector<16x128xf32>
    %729 = arith.mulf %709, %719 : vector<16x128xf32>
    %730 = arith.addf %728, %729 : vector<16x128xf32>
    %731 = math.tanh %730 : vector<16x128xf32>
    %732 = arith.mulf %727, %731 : vector<16x128xf32>
    %c32_305 = arith.constant 32 : index
    %c0_306 = arith.constant 0 : index
    %733 = vector.load %arg19[%c32_305, %c0_306] : memref<128x128xf32, #tpu.memory_space<vmem>>, vector<16x128xf32>
    tpu.vector_store %arg19[%c32_305, %c0_306], %732 {strides = array<i32>} : memref<128x128xf32, #tpu.memory_space<vmem>>, vector<16x128xf32>,
    %c48_307 = arith.constant 48 : index
    %c0_308 = arith.constant 0 : index
    %734 = vector.load %arg18[%c48_307, %c0_308] : memref<128x512xf32, #tpu.memory_space<vmem>>, vector<16x512xf32>
    %735 = arith.truncf %732 : vector<16x128xf32> to vector<16x128xbf16>
    %cst_309 = arith.constant dense<0.000000e+00> : vector<16x512xf32>
    %736 = tpu.matmul %735, %623, %cst_309 {dimension_numbers = #tpu.dot_dimension_numbers<[1], [0], [0], [1], [0, 0, 1, 1], [], []>} : vector<16x128xbf16>, vector<128x512xbf16>, vector<16x512xf32> -> vector<16x512xf32>
    %737 = arith.addf %734, %736 : vector<16x512xf32>
    %738 = vector.extract_strided_slice %737 {offsets = [0, 0], sizes = [16, 128], strides = [1, 1]} : vector<16x512xf32> to vector<16x128xf32>
    %cst_310 = arith.constant 5.000000e-01 : f32
    %739 = vector.broadcast %cst_310 : f32 to vector<16x128xf32>
    %740 = arith.mulf %739, %738 : vector<16x128xf32>
    %741 = math.tanh %740 : vector<16x128xf32>
    %cst_311 = arith.constant 5.000000e-01 : f32
    %742 = vector.broadcast %cst_311 : f32 to vector<16x128xf32>
    %743 = arith.mulf %742, %741 : vector<16x128xf32>
    %cst_312 = arith.constant 5.000000e-01 : f32
    %744 = vector.broadcast %cst_312 : f32 to vector<16x128xf32>
    %745 = arith.addf %743, %744 : vector<16x128xf32>
    %746 = vector.extract_strided_slice %737 {offsets = [0, 128], sizes = [16, 128], strides = [1, 1]} : vector<16x512xf32> to vector<16x128xf32>
    %cst_313 = arith.constant 5.000000e-01 : f32
    %747 = vector.broadcast %cst_313 : f32 to vector<16x128xf32>
    %748 = arith.mulf %747, %746 : vector<16x128xf32>
    %749 = math.tanh %748 : vector<16x128xf32>
    %cst_314 = arith.constant 5.000000e-01 : f32
    %750 = vector.broadcast %cst_314 : f32 to vector<16x128xf32>
    %751 = arith.mulf %750, %749 : vector<16x128xf32>
    %cst_315 = arith.constant 5.000000e-01 : f32
    %752 = vector.broadcast %cst_315 : f32 to vector<16x128xf32>
    %753 = arith.addf %751, %752 : vector<16x128xf32>
    %754 = vector.extract_strided_slice %737 {offsets = [0, 256], sizes = [16, 128], strides = [1, 1]} : vector<16x512xf32> to vector<16x128xf32>
    %755 = math.tanh %754 : vector<16x128xf32>
    %756 = vector.extract_strided_slice %737 {offsets = [0, 384], sizes = [16, 128], strides = [1, 1]} : vector<16x512xf32> to vector<16x128xf32>
    %cst_316 = arith.constant 5.000000e-01 : f32
    %757 = vector.broadcast %cst_316 : f32 to vector<16x128xf32>
    %758 = arith.mulf %757, %756 : vector<16x128xf32>
    %759 = math.tanh %758 : vector<16x128xf32>
    %cst_317 = arith.constant 5.000000e-01 : f32
    %760 = vector.broadcast %cst_317 : f32 to vector<16x128xf32>
    %761 = arith.mulf %760, %759 : vector<16x128xf32>
    %cst_318 = arith.constant 5.000000e-01 : f32
    %762 = vector.broadcast %cst_318 : f32 to vector<16x128xf32>
    %763 = arith.addf %761, %762 : vector<16x128xf32>
    %764 = arith.mulf %753, %730 : vector<16x128xf32>
    %765 = arith.mulf %745, %755 : vector<16x128xf32>
    %766 = arith.addf %764, %765 : vector<16x128xf32>
    %767 = math.tanh %766 : vector<16x128xf32>
    %768 = arith.mulf %763, %767 : vector<16x128xf32>
    %c48_319 = arith.constant 48 : index
    %c0_320 = arith.constant 0 : index
    %769 = vector.load %arg19[%c48_319, %c0_320] : memref<128x128xf32, #tpu.memory_space<vmem>>, vector<16x128xf32>
    tpu.vector_store %arg19[%c48_319, %c0_320], %768 {strides = array<i32>} : memref<128x128xf32, #tpu.memory_space<vmem>>, vector<16x128xf32>,
    %c64_321 = arith.constant 64 : index
    %c0_322 = arith.constant 0 : index
    %770 = vector.load %arg18[%c64_321, %c0_322] : memref<128x512xf32, #tpu.memory_space<vmem>>, vector<16x512xf32>
    %771 = arith.truncf %768 : vector<16x128xf32> to vector<16x128xbf16>
    %cst_323 = arith.constant dense<0.000000e+00> : vector<16x512xf32>
    %772 = tpu.matmul %771, %623, %cst_323 {dimension_numbers = #tpu.dot_dimension_numbers<[1], [0], [0], [1], [0, 0, 1, 1], [], []>} : vector<16x128xbf16>, vector<128x512xbf16>, vector<16x512xf32> -> vector<16x512xf32>
    %773 = arith.addf %770, %772 : vector<16x512xf32>
    %774 = vector.extract_strided_slice %773 {offsets = [0, 0], sizes = [16, 128], strides = [1, 1]} : vector<16x512xf32> to vector<16x128xf32>
    %cst_324 = arith.constant 5.000000e-01 : f32
    %775 = vector.broadcast %cst_324 : f32 to vector<16x128xf32>
    %776 = arith.mulf %775, %774 : vector<16x128xf32>
    %777 = math.tanh %776 : vector<16x128xf32>
    %cst_325 = arith.constant 5.000000e-01 : f32
    %778 = vector.broadcast %cst_325 : f32 to vector<16x128xf32>
    %779 = arith.mulf %778, %777 : vector<16x128xf32>
    %cst_326 = arith.constant 5.000000e-01 : f32
    %780 = vector.broadcast %cst_326 : f32 to vector<16x128xf32>
    %781 = arith.addf %779, %780 : vector<16x128xf32>
    %782 = vector.extract_strided_slice %773 {offsets = [0, 128], sizes = [16, 128], strides = [1, 1]} : vector<16x512xf32> to vector<16x128xf32>
    %cst_327 = arith.constant 5.000000e-01 : f32
    %783 = vector.broadcast %cst_327 : f32 to vector<16x128xf32>
    %784 = arith.mulf %783, %782 : vector<16x128xf32>
    %785 = math.tanh %784 : vector<16x128xf32>
    %cst_328 = arith.constant 5.000000e-01 : f32
    %786 = vector.broadcast %cst_328 : f32 to vector<16x128xf32>
    %787 = arith.mulf %786, %785 : vector<16x128xf32>
    %cst_329 = arith.constant 5.000000e-01 : f32
    %788 = vector.broadcast %cst_329 : f32 to vector<16x128xf32>
    %789 = arith.addf %787, %788 : vector<16x128xf32>
    %790 = vector.extract_strided_slice %773 {offsets = [0, 256], sizes = [16, 128], strides = [1, 1]} : vector<16x512xf32> to vector<16x128xf32>
    %791 = math.tanh %790 : vector<16x128xf32>
    %792 = vector.extract_strided_slice %773 {offsets = [0, 384], sizes = [16, 128], strides = [1, 1]} : vector<16x512xf32> to vector<16x128xf32>
    %cst_330 = arith.constant 5.000000e-01 : f32
    %793 = vector.broadcast %cst_330 : f32 to vector<16x128xf32>
    %794 = arith.mulf %793, %792 : vector<16x128xf32>
    %795 = math.tanh %794 : vector<16x128xf32>
    %cst_331 = arith.constant 5.000000e-01 : f32
    %796 = vector.broadcast %cst_331 : f32 to vector<16x128xf32>
    %797 = arith.mulf %796, %795 : vector<16x128xf32>
    %cst_332 = arith.constant 5.000000e-01 : f32
    %798 = vector.broadcast %cst_332 : f32 to vector<16x128xf32>
    %799 = arith.addf %797, %798 : vector<16x128xf32>
    %800 = arith.mulf %789, %766 : vector<16x128xf32>
    %801 = arith.mulf %781, %791 : vector<16x128xf32>
    %802 = arith.addf %800, %801 : vector<16x128xf32>
    %803 = math.tanh %802 : vector<16x128xf32>
    %804 = arith.mulf %799, %803 : vector<16x128xf32>
    %c64_333 = arith.constant 64 : index
    %c0_334 = arith.constant 0 : index
    %805 = vector.load %arg19[%c64_333, %c0_334] : memref<128x128xf32, #tpu.memory_space<vmem>>, vector<16x128xf32>
    tpu.vector_store %arg19[%c64_333, %c0_334], %804 {strides = array<i32>} : memref<128x128xf32, #tpu.memory_space<vmem>>, vector<16x128xf32>,
    %c80_335 = arith.constant 80 : index
    %c0_336 = arith.constant 0 : index
    %806 = vector.load %arg18[%c80_335, %c0_336] : memref<128x512xf32, #tpu.memory_space<vmem>>, vector<16x512xf32>
    %807 = arith.truncf %804 : vector<16x128xf32> to vector<16x128xbf16>
    %cst_337 = arith.constant dense<0.000000e+00> : vector<16x512xf32>
    %808 = tpu.matmul %807, %623, %cst_337 {dimension_numbers = #tpu.dot_dimension_numbers<[1], [0], [0], [1], [0, 0, 1, 1], [], []>} : vector<16x128xbf16>, vector<128x512xbf16>, vector<16x512xf32> -> vector<16x512xf32>
    %809 = arith.addf %806, %808 : vector<16x512xf32>
    %810 = vector.extract_strided_slice %809 {offsets = [0, 0], sizes = [16, 128], strides = [1, 1]} : vector<16x512xf32> to vector<16x128xf32>
    %cst_338 = arith.constant 5.000000e-01 : f32
    %811 = vector.broadcast %cst_338 : f32 to vector<16x128xf32>
    %812 = arith.mulf %811, %810 : vector<16x128xf32>
    %813 = math.tanh %812 : vector<16x128xf32>
    %cst_339 = arith.constant 5.000000e-01 : f32
    %814 = vector.broadcast %cst_339 : f32 to vector<16x128xf32>
    %815 = arith.mulf %814, %813 : vector<16x128xf32>
    %cst_340 = arith.constant 5.000000e-01 : f32
    %816 = vector.broadcast %cst_340 : f32 to vector<16x128xf32>
    %817 = arith.addf %815, %816 : vector<16x128xf32>
    %818 = vector.extract_strided_slice %809 {offsets = [0, 128], sizes = [16, 128], strides = [1, 1]} : vector<16x512xf32> to vector<16x128xf32>
    %cst_341 = arith.constant 5.000000e-01 : f32
    %819 = vector.broadcast %cst_341 : f32 to vector<16x128xf32>
    %820 = arith.mulf %819, %818 : vector<16x128xf32>
    %821 = math.tanh %820 : vector<16x128xf32>
    %cst_342 = arith.constant 5.000000e-01 : f32
    %822 = vector.broadcast %cst_342 : f32 to vector<16x128xf32>
    %823 = arith.mulf %822, %821 : vector<16x128xf32>
    %cst_343 = arith.constant 5.000000e-01 : f32
    %824 = vector.broadcast %cst_343 : f32 to vector<16x128xf32>
    %825 = arith.addf %823, %824 : vector<16x128xf32>
    %826 = vector.extract_strided_slice %809 {offsets = [0, 256], sizes = [16, 128], strides = [1, 1]} : vector<16x512xf32> to vector<16x128xf32>
    %827 = math.tanh %826 : vector<16x128xf32>
    %828 = vector.extract_strided_slice %809 {offsets = [0, 384], sizes = [16, 128], strides = [1, 1]} : vector<16x512xf32> to vector<16x128xf32>
    %cst_344 = arith.constant 5.000000e-01 : f32
    %829 = vector.broadcast %cst_344 : f32 to vector<16x128xf32>
    %830 = arith.mulf %829, %828 : vector<16x128xf32>
    %831 = math.tanh %830 : vector<16x128xf32>
    %cst_345 = arith.constant 5.000000e-01 : f32
    %832 = vector.broadcast %cst_345 : f32 to vector<16x128xf32>
    %833 = arith.mulf %832, %831 : vector<16x128xf32>
    %cst_346 = arith.constant 5.000000e-01 : f32
    %834 = vector.broadcast %cst_346 : f32 to vector<16x128xf32>
    %835 = arith.addf %833, %834 : vector<16x128xf32>
    %836 = arith.mulf %825, %802 : vector<16x128xf32>
    %837 = arith.mulf %817, %827 : vector<16x128xf32>
    %838 = arith.addf %836, %837 : vector<16x128xf32>
    %839 = math.tanh %838 : vector<16x128xf32>
    %840 = arith.mulf %835, %839 : vector<16x128xf32>
    %c80_347 = arith.constant 80 : index
    %c0_348 = arith.constant 0 : index
    %841 = vector.load %arg19[%c80_347, %c0_348] : memref<128x128xf32, #tpu.memory_space<vmem>>, vector<16x128xf32>
    tpu.vector_store %arg19[%c80_347, %c0_348], %840 {strides = array<i32>} : memref<128x128xf32, #tpu.memory_space<vmem>>, vector<16x128xf32>,
    %c96_349 = arith.constant 96 : index
    %c0_350 = arith.constant 0 : index
    %842 = vector.load %arg18[%c96_349, %c0_350] : memref<128x512xf32, #tpu.memory_space<vmem>>, vector<16x512xf32>
    %843 = arith.truncf %840 : vector<16x128xf32> to vector<16x128xbf16>
    %cst_351 = arith.constant dense<0.000000e+00> : vector<16x512xf32>
    %844 = tpu.matmul %843, %623, %cst_351 {dimension_numbers = #tpu.dot_dimension_numbers<[1], [0], [0], [1], [0, 0, 1, 1], [], []>} : vector<16x128xbf16>, vector<128x512xbf16>, vector<16x512xf32> -> vector<16x512xf32>
    %845 = arith.addf %842, %844 : vector<16x512xf32>
    %846 = vector.extract_strided_slice %845 {offsets = [0, 0], sizes = [16, 128], strides = [1, 1]} : vector<16x512xf32> to vector<16x128xf32>
    %cst_352 = arith.constant 5.000000e-01 : f32
    %847 = vector.broadcast %cst_352 : f32 to vector<16x128xf32>
    %848 = arith.mulf %847, %846 : vector<16x128xf32>
    %849 = math.tanh %848 : vector<16x128xf32>
    %cst_353 = arith.constant 5.000000e-01 : f32
    %850 = vector.broadcast %cst_353 : f32 to vector<16x128xf32>
    %851 = arith.mulf %850, %849 : vector<16x128xf32>
    %cst_354 = arith.constant 5.000000e-01 : f32
    %852 = vector.broadcast %cst_354 : f32 to vector<16x128xf32>
    %853 = arith.addf %851, %852 : vector<16x128xf32>
    %854 = vector.extract_strided_slice %845 {offsets = [0, 128], sizes = [16, 128], strides = [1, 1]} : vector<16x512xf32> to vector<16x128xf32>
    %cst_355 = arith.constant 5.000000e-01 : f32
    %855 = vector.broadcast %cst_355 : f32 to vector<16x128xf32>
    %856 = arith.mulf %855, %854 : vector<16x128xf32>
    %857 = math.tanh %856 : vector<16x128xf32>
    %cst_356 = arith.constant 5.000000e-01 : f32
    %858 = vector.broadcast %cst_356 : f32 to vector<16x128xf32>
    %859 = arith.mulf %858, %857 : vector<16x128xf32>
    %cst_357 = arith.constant 5.000000e-01 : f32
    %860 = vector.broadcast %cst_357 : f32 to vector<16x128xf32>
    %861 = arith.addf %859, %860 : vector<16x128xf32>
    %862 = vector.extract_strided_slice %845 {offsets = [0, 256], sizes = [16, 128], strides = [1, 1]} : vector<16x512xf32> to vector<16x128xf32>
    %863 = math.tanh %862 : vector<16x128xf32>
    %864 = vector.extract_strided_slice %845 {offsets = [0, 384], sizes = [16, 128], strides = [1, 1]} : vector<16x512xf32> to vector<16x128xf32>
    %cst_358 = arith.constant 5.000000e-01 : f32
    %865 = vector.broadcast %cst_358 : f32 to vector<16x128xf32>
    %866 = arith.mulf %865, %864 : vector<16x128xf32>
    %867 = math.tanh %866 : vector<16x128xf32>
    %cst_359 = arith.constant 5.000000e-01 : f32
    %868 = vector.broadcast %cst_359 : f32 to vector<16x128xf32>
    %869 = arith.mulf %868, %867 : vector<16x128xf32>
    %cst_360 = arith.constant 5.000000e-01 : f32
    %870 = vector.broadcast %cst_360 : f32 to vector<16x128xf32>
    %871 = arith.addf %869, %870 : vector<16x128xf32>
    %872 = arith.mulf %861, %838 : vector<16x128xf32>
    %873 = arith.mulf %853, %863 : vector<16x128xf32>
    %874 = arith.addf %872, %873 : vector<16x128xf32>
    %875 = math.tanh %874 : vector<16x128xf32>
    %876 = arith.mulf %871, %875 : vector<16x128xf32>
    %c96_361 = arith.constant 96 : index
    %c0_362 = arith.constant 0 : index
    %877 = vector.load %arg19[%c96_361, %c0_362] : memref<128x128xf32, #tpu.memory_space<vmem>>, vector<16x128xf32>
    tpu.vector_store %arg19[%c96_361, %c0_362], %876 {strides = array<i32>} : memref<128x128xf32, #tpu.memory_space<vmem>>, vector<16x128xf32>,
    %c112_363 = arith.constant 112 : index
    %c0_364 = arith.constant 0 : index
    %878 = vector.load %arg18[%c112_363, %c0_364] : memref<128x512xf32, #tpu.memory_space<vmem>>, vector<16x512xf32>
    %879 = arith.truncf %876 : vector<16x128xf32> to vector<16x128xbf16>
    %cst_365 = arith.constant dense<0.000000e+00> : vector<16x512xf32>
    %880 = tpu.matmul %879, %623, %cst_365 {dimension_numbers = #tpu.dot_dimension_numbers<[1], [0], [0], [1], [0, 0, 1, 1], [], []>} : vector<16x128xbf16>, vector<128x512xbf16>, vector<16x512xf32> -> vector<16x512xf32>
    %881 = arith.addf %878, %880 : vector<16x512xf32>
    %882 = vector.extract_strided_slice %881 {offsets = [0, 0], sizes = [16, 128], strides = [1, 1]} : vector<16x512xf32> to vector<16x128xf32>
    %cst_366 = arith.constant 5.000000e-01 : f32
    %883 = vector.broadcast %cst_366 : f32 to vector<16x128xf32>
    %884 = arith.mulf %883, %882 : vector<16x128xf32>
    %885 = math.tanh %884 : vector<16x128xf32>
    %cst_367 = arith.constant 5.000000e-01 : f32
    %886 = vector.broadcast %cst_367 : f32 to vector<16x128xf32>
    %887 = arith.mulf %886, %885 : vector<16x128xf32>
    %cst_368 = arith.constant 5.000000e-01 : f32
    %888 = vector.broadcast %cst_368 : f32 to vector<16x128xf32>
    %889 = arith.addf %887, %888 : vector<16x128xf32>
    %890 = vector.extract_strided_slice %881 {offsets = [0, 128], sizes = [16, 128], strides = [1, 1]} : vector<16x512xf32> to vector<16x128xf32>
    %cst_369 = arith.constant 5.000000e-01 : f32
    %891 = vector.broadcast %cst_369 : f32 to vector<16x128xf32>
    %892 = arith.mulf %891, %890 : vector<16x128xf32>
    %893 = math.tanh %892 : vector<16x128xf32>
    %cst_370 = arith.constant 5.000000e-01 : f32
    %894 = vector.broadcast %cst_370 : f32 to vector<16x128xf32>
    %895 = arith.mulf %894, %893 : vector<16x128xf32>
    %cst_371 = arith.constant 5.000000e-01 : f32
    %896 = vector.broadcast %cst_371 : f32 to vector<16x128xf32>
    %897 = arith.addf %895, %896 : vector<16x128xf32>
    %898 = vector.extract_strided_slice %881 {offsets = [0, 256], sizes = [16, 128], strides = [1, 1]} : vector<16x512xf32> to vector<16x128xf32>
    %899 = math.tanh %898 : vector<16x128xf32>
    %900 = vector.extract_strided_slice %881 {offsets = [0, 384], sizes = [16, 128], strides = [1, 1]} : vector<16x512xf32> to vector<16x128xf32>
    %cst_372 = arith.constant 5.000000e-01 : f32
    %901 = vector.broadcast %cst_372 : f32 to vector<16x128xf32>
    %902 = arith.mulf %901, %900 : vector<16x128xf32>
    %903 = math.tanh %902 : vector<16x128xf32>
    %cst_373 = arith.constant 5.000000e-01 : f32
    %904 = vector.broadcast %cst_373 : f32 to vector<16x128xf32>
    %905 = arith.mulf %904, %903 : vector<16x128xf32>
    %cst_374 = arith.constant 5.000000e-01 : f32
    %906 = vector.broadcast %cst_374 : f32 to vector<16x128xf32>
    %907 = arith.addf %905, %906 : vector<16x128xf32>
    %908 = arith.mulf %897, %874 : vector<16x128xf32>
    %909 = arith.mulf %889, %899 : vector<16x128xf32>
    %910 = arith.addf %908, %909 : vector<16x128xf32>
    %911 = math.tanh %910 : vector<16x128xf32>
    %912 = arith.mulf %907, %911 : vector<16x128xf32>
    %c112_375 = arith.constant 112 : index
    %c0_376 = arith.constant 0 : index
    %913 = vector.load %arg19[%c112_375, %c0_376] : memref<128x128xf32, #tpu.memory_space<vmem>>, vector<16x128xf32>
    tpu.vector_store %arg19[%c112_375, %c0_376], %912 {strides = array<i32>} : memref<128x128xf32, #tpu.memory_space<vmem>>, vector<16x128xf32>,
    %c2 = arith.constant 2 : index
    %c0_377 = arith.constant 0 : index
    %c0_378 = arith.constant 0 : index
    %914 = vector.load %arg16[%c2, %c0_377, %c0_378] : memref<4x16x128xf32, #tpu.memory_space<vmem>>, vector<1x16x128xf32>
    %915 = vector.shape_cast %914 : vector<1x16x128xf32> to vector<16x128xf32>
    %916 = vector.shape_cast %912 : vector<16x128xf32> to vector<1x16x128xf32>
    tpu.vector_store %arg16[%c2, %c0_377, %c0_378], %916 {strides = array<i32>} : memref<4x16x128xf32, #tpu.memory_space<vmem>>, vector<1x16x128xf32>,
    %c2_379 = arith.constant 2 : index
    %c0_380 = arith.constant 0 : index
    %c0_381 = arith.constant 0 : index
    %917 = vector.load %arg17[%c2_379, %c0_380, %c0_381] : memref<4x16x128xf32, #tpu.memory_space<vmem>>, vector<1x16x128xf32>
    %918 = vector.shape_cast %917 : vector<1x16x128xf32> to vector<16x128xf32>
    %919 = vector.shape_cast %910 : vector<16x128xf32> to vector<1x16x128xf32>
    tpu.vector_store %arg17[%c2_379, %c0_380, %c0_381], %919 {strides = array<i32>} : memref<4x16x128xf32, #tpu.memory_space<vmem>>, vector<1x16x128xf32>,
    %c0_382 = arith.constant 0 : index
    %c0_383 = arith.constant 0 : index
    %920 = vector.load %arg19[%c0_382, %c0_383] : memref<128x128xf32, #tpu.memory_space<vmem>>, vector<128x128xf32>
    %921 = arith.truncf %920 : vector<128x128xf32> to vector<128x128xbf16>
    %c0_384 = arith.constant 0 : index
    %c0_385 = arith.constant 0 : index
    %922 = vector.load %arg5[%c0_384, %c0_385] : memref<128x512xbf16, #tpu.memory_space<vmem>>, vector<128x512xbf16>
    %cst_386 = arith.constant dense<0.000000e+00> : vector<128x512xf32>
    %923 = tpu.matmul %921, %922, %cst_386 {dimension_numbers = #tpu.dot_dimension_numbers<[1], [0], [0], [1], [0, 0, 1, 1], [], []>} : vector<128x128xbf16>, vector<128x512xbf16>, vector<128x512xf32> -> vector<128x512xf32>
    %c0_387 = arith.constant 0 : index
    %c0_388 = arith.constant 0 : index
    %924 = vector.load %arg12[%c0_387, %c0_388] : memref<1x512xf32, #tpu.memory_space<vmem>>, vector<1x512xf32>
    %925 = vector.broadcast %924 : vector<1x512xf32> to vector<128x512xf32>
    %926 = arith.addf %923, %925 : vector<128x512xf32>
    %c0_389 = arith.constant 0 : index
    %c0_390 = arith.constant 0 : index
    %927 = vector.load %arg18[%c0_389, %c0_390] : memref<128x512xf32, #tpu.memory_space<vmem>>, vector<128x512xf32>
    tpu.vector_store %arg18[%c0_389, %c0_390], %926 {strides = array<i32>} : memref<128x512xf32, #tpu.memory_space<vmem>>, vector<128x512xf32>,
    %c0_391 = arith.constant 0 : index
    %c0_392 = arith.constant 0 : index
    %928 = vector.load %arg9[%c0_391, %c0_392] : memref<128x512xbf16, #tpu.memory_space<vmem>>, vector<128x512xbf16>
    %cst_393 = arith.constant 0.000000e+00 : f32
    %929 = vector.broadcast %cst_393 : f32 to vector<16x128xf32>
    %cst_394 = arith.constant 0.000000e+00 : f32
    %930 = vector.broadcast %cst_394 : f32 to vector<16x128xf32>
    %c0_395 = arith.constant 0 : index
    %c0_396 = arith.constant 0 : index
    %931 = vector.load %arg18[%c0_395, %c0_396] : memref<128x512xf32, #tpu.memory_space<vmem>>, vector<16x512xf32>
    %932 = arith.truncf %929 : vector<16x128xf32> to vector<16x128xbf16>
    %cst_397 = arith.constant dense<0.000000e+00> : vector<16x512xf32>
    %933 = tpu.matmul %932, %928, %cst_397 {dimension_numbers = #tpu.dot_dimension_numbers<[1], [0], [0], [1], [0, 0, 1, 1], [], []>} : vector<16x128xbf16>, vector<128x512xbf16>, vector<16x512xf32> -> vector<16x512xf32>
    %934 = arith.addf %931, %933 : vector<16x512xf32>
    %935 = vector.extract_strided_slice %934 {offsets = [0, 0], sizes = [16, 128], strides = [1, 1]} : vector<16x512xf32> to vector<16x128xf32>
    %cst_398 = arith.constant 5.000000e-01 : f32
    %936 = vector.broadcast %cst_398 : f32 to vector<16x128xf32>
    %937 = arith.mulf %936, %935 : vector<16x128xf32>
    %938 = math.tanh %937 : vector<16x128xf32>
    %cst_399 = arith.constant 5.000000e-01 : f32
    %939 = vector.broadcast %cst_399 : f32 to vector<16x128xf32>
    %940 = arith.mulf %939, %938 : vector<16x128xf32>
    %cst_400 = arith.constant 5.000000e-01 : f32
    %941 = vector.broadcast %cst_400 : f32 to vector<16x128xf32>
    %942 = arith.addf %940, %941 : vector<16x128xf32>
    %943 = vector.extract_strided_slice %934 {offsets = [0, 128], sizes = [16, 128], strides = [1, 1]} : vector<16x512xf32> to vector<16x128xf32>
    %cst_401 = arith.constant 5.000000e-01 : f32
    %944 = vector.broadcast %cst_401 : f32 to vector<16x128xf32>
    %945 = arith.mulf %944, %943 : vector<16x128xf32>
    %946 = math.tanh %945 : vector<16x128xf32>
    %cst_402 = arith.constant 5.000000e-01 : f32
    %947 = vector.broadcast %cst_402 : f32 to vector<16x128xf32>
    %948 = arith.mulf %947, %946 : vector<16x128xf32>
    %cst_403 = arith.constant 5.000000e-01 : f32
    %949 = vector.broadcast %cst_403 : f32 to vector<16x128xf32>
    %950 = arith.addf %948, %949 : vector<16x128xf32>
    %951 = vector.extract_strided_slice %934 {offsets = [0, 256], sizes = [16, 128], strides = [1, 1]} : vector<16x512xf32> to vector<16x128xf32>
    %952 = math.tanh %951 : vector<16x128xf32>
    %953 = vector.extract_strided_slice %934 {offsets = [0, 384], sizes = [16, 128], strides = [1, 1]} : vector<16x512xf32> to vector<16x128xf32>
    %cst_404 = arith.constant 5.000000e-01 : f32
    %954 = vector.broadcast %cst_404 : f32 to vector<16x128xf32>
    %955 = arith.mulf %954, %953 : vector<16x128xf32>
    %956 = math.tanh %955 : vector<16x128xf32>
    %cst_405 = arith.constant 5.000000e-01 : f32
    %957 = vector.broadcast %cst_405 : f32 to vector<16x128xf32>
    %958 = arith.mulf %957, %956 : vector<16x128xf32>
    %cst_406 = arith.constant 5.000000e-01 : f32
    %959 = vector.broadcast %cst_406 : f32 to vector<16x128xf32>
    %960 = arith.addf %958, %959 : vector<16x128xf32>
    %961 = arith.mulf %950, %930 : vector<16x128xf32>
    %962 = arith.mulf %942, %952 : vector<16x128xf32>
    %963 = arith.addf %961, %962 : vector<16x128xf32>
    %964 = math.tanh %963 : vector<16x128xf32>
    %965 = arith.mulf %960, %964 : vector<16x128xf32>
    %c0_407 = arith.constant 0 : index
    %c0_408 = arith.constant 0 : index
    %966 = vector.load %arg19[%c0_407, %c0_408] : memref<128x128xf32, #tpu.memory_space<vmem>>, vector<16x128xf32>
    tpu.vector_store %arg19[%c0_407, %c0_408], %965 {strides = array<i32>} : memref<128x128xf32, #tpu.memory_space<vmem>>, vector<16x128xf32>,
    %c16_409 = arith.constant 16 : index
    %c0_410 = arith.constant 0 : index
    %967 = vector.load %arg18[%c16_409, %c0_410] : memref<128x512xf32, #tpu.memory_space<vmem>>, vector<16x512xf32>
    %968 = arith.truncf %965 : vector<16x128xf32> to vector<16x128xbf16>
    %cst_411 = arith.constant dense<0.000000e+00> : vector<16x512xf32>
    %969 = tpu.matmul %968, %928, %cst_411 {dimension_numbers = #tpu.dot_dimension_numbers<[1], [0], [0], [1], [0, 0, 1, 1], [], []>} : vector<16x128xbf16>, vector<128x512xbf16>, vector<16x512xf32> -> vector<16x512xf32>
    %970 = arith.addf %967, %969 : vector<16x512xf32>
    %971 = vector.extract_strided_slice %970 {offsets = [0, 0], sizes = [16, 128], strides = [1, 1]} : vector<16x512xf32> to vector<16x128xf32>
    %cst_412 = arith.constant 5.000000e-01 : f32
    %972 = vector.broadcast %cst_412 : f32 to vector<16x128xf32>
    %973 = arith.mulf %972, %971 : vector<16x128xf32>
    %974 = math.tanh %973 : vector<16x128xf32>
    %cst_413 = arith.constant 5.000000e-01 : f32
    %975 = vector.broadcast %cst_413 : f32 to vector<16x128xf32>
    %976 = arith.mulf %975, %974 : vector<16x128xf32>
    %cst_414 = arith.constant 5.000000e-01 : f32
    %977 = vector.broadcast %cst_414 : f32 to vector<16x128xf32>
    %978 = arith.addf %976, %977 : vector<16x128xf32>
    %979 = vector.extract_strided_slice %970 {offsets = [0, 128], sizes = [16, 128], strides = [1, 1]} : vector<16x512xf32> to vector<16x128xf32>
    %cst_415 = arith.constant 5.000000e-01 : f32
    %980 = vector.broadcast %cst_415 : f32 to vector<16x128xf32>
    %981 = arith.mulf %980, %979 : vector<16x128xf32>
    %982 = math.tanh %981 : vector<16x128xf32>
    %cst_416 = arith.constant 5.000000e-01 : f32
    %983 = vector.broadcast %cst_416 : f32 to vector<16x128xf32>
    %984 = arith.mulf %983, %982 : vector<16x128xf32>
    %cst_417 = arith.constant 5.000000e-01 : f32
    %985 = vector.broadcast %cst_417 : f32 to vector<16x128xf32>
    %986 = arith.addf %984, %985 : vector<16x128xf32>
    %987 = vector.extract_strided_slice %970 {offsets = [0, 256], sizes = [16, 128], strides = [1, 1]} : vector<16x512xf32> to vector<16x128xf32>
    %988 = math.tanh %987 : vector<16x128xf32>
    %989 = vector.extract_strided_slice %970 {offsets = [0, 384], sizes = [16, 128], strides = [1, 1]} : vector<16x512xf32> to vector<16x128xf32>
    %cst_418 = arith.constant 5.000000e-01 : f32
    %990 = vector.broadcast %cst_418 : f32 to vector<16x128xf32>
    %991 = arith.mulf %990, %989 : vector<16x128xf32>
    %992 = math.tanh %991 : vector<16x128xf32>
    %cst_419 = arith.constant 5.000000e-01 : f32
    %993 = vector.broadcast %cst_419 : f32 to vector<16x128xf32>
    %994 = arith.mulf %993, %992 : vector<16x128xf32>
    %cst_420 = arith.constant 5.000000e-01 : f32
    %995 = vector.broadcast %cst_420 : f32 to vector<16x128xf32>
    %996 = arith.addf %994, %995 : vector<16x128xf32>
    %997 = arith.mulf %986, %963 : vector<16x128xf32>
    %998 = arith.mulf %978, %988 : vector<16x128xf32>
    %999 = arith.addf %997, %998 : vector<16x128xf32>
    %1000 = math.tanh %999 : vector<16x128xf32>
    %1001 = arith.mulf %996, %1000 : vector<16x128xf32>
    %c16_421 = arith.constant 16 : index
    %c0_422 = arith.constant 0 : index
    %1002 = vector.load %arg19[%c16_421, %c0_422] : memref<128x128xf32, #tpu.memory_space<vmem>>, vector<16x128xf32>
    tpu.vector_store %arg19[%c16_421, %c0_422], %1001 {strides = array<i32>} : memref<128x128xf32, #tpu.memory_space<vmem>>, vector<16x128xf32>,
    %c32_423 = arith.constant 32 : index
    %c0_424 = arith.constant 0 : index
    %1003 = vector.load %arg18[%c32_423, %c0_424] : memref<128x512xf32, #tpu.memory_space<vmem>>, vector<16x512xf32>
    %1004 = arith.truncf %1001 : vector<16x128xf32> to vector<16x128xbf16>
    %cst_425 = arith.constant dense<0.000000e+00> : vector<16x512xf32>
    %1005 = tpu.matmul %1004, %928, %cst_425 {dimension_numbers = #tpu.dot_dimension_numbers<[1], [0], [0], [1], [0, 0, 1, 1], [], []>} : vector<16x128xbf16>, vector<128x512xbf16>, vector<16x512xf32> -> vector<16x512xf32>
    %1006 = arith.addf %1003, %1005 : vector<16x512xf32>
    %1007 = vector.extract_strided_slice %1006 {offsets = [0, 0], sizes = [16, 128], strides = [1, 1]} : vector<16x512xf32> to vector<16x128xf32>
    %cst_426 = arith.constant 5.000000e-01 : f32
    %1008 = vector.broadcast %cst_426 : f32 to vector<16x128xf32>
    %1009 = arith.mulf %1008, %1007 : vector<16x128xf32>
    %1010 = math.tanh %1009 : vector<16x128xf32>
    %cst_427 = arith.constant 5.000000e-01 : f32
    %1011 = vector.broadcast %cst_427 : f32 to vector<16x128xf32>
    %1012 = arith.mulf %1011, %1010 : vector<16x128xf32>
    %cst_428 = arith.constant 5.000000e-01 : f32
    %1013 = vector.broadcast %cst_428 : f32 to vector<16x128xf32>
    %1014 = arith.addf %1012, %1013 : vector<16x128xf32>
    %1015 = vector.extract_strided_slice %1006 {offsets = [0, 128], sizes = [16, 128], strides = [1, 1]} : vector<16x512xf32> to vector<16x128xf32>
    %cst_429 = arith.constant 5.000000e-01 : f32
    %1016 = vector.broadcast %cst_429 : f32 to vector<16x128xf32>
    %1017 = arith.mulf %1016, %1015 : vector<16x128xf32>
    %1018 = math.tanh %1017 : vector<16x128xf32>
    %cst_430 = arith.constant 5.000000e-01 : f32
    %1019 = vector.broadcast %cst_430 : f32 to vector<16x128xf32>
    %1020 = arith.mulf %1019, %1018 : vector<16x128xf32>
    %cst_431 = arith.constant 5.000000e-01 : f32
    %1021 = vector.broadcast %cst_431 : f32 to vector<16x128xf32>
    %1022 = arith.addf %1020, %1021 : vector<16x128xf32>
    %1023 = vector.extract_strided_slice %1006 {offsets = [0, 256], sizes = [16, 128], strides = [1, 1]} : vector<16x512xf32> to vector<16x128xf32>
    %1024 = math.tanh %1023 : vector<16x128xf32>
    %1025 = vector.extract_strided_slice %1006 {offsets = [0, 384], sizes = [16, 128], strides = [1, 1]} : vector<16x512xf32> to vector<16x128xf32>
    %cst_432 = arith.constant 5.000000e-01 : f32
    %1026 = vector.broadcast %cst_432 : f32 to vector<16x128xf32>
    %1027 = arith.mulf %1026, %1025 : vector<16x128xf32>
    %1028 = math.tanh %1027 : vector<16x128xf32>
    %cst_433 = arith.constant 5.000000e-01 : f32
    %1029 = vector.broadcast %cst_433 : f32 to vector<16x128xf32>
    %1030 = arith.mulf %1029, %1028 : vector<16x128xf32>
    %cst_434 = arith.constant 5.000000e-01 : f32
    %1031 = vector.broadcast %cst_434 : f32 to vector<16x128xf32>
    %1032 = arith.addf %1030, %1031 : vector<16x128xf32>
    %1033 = arith.mulf %1022, %999 : vector<16x128xf32>
    %1034 = arith.mulf %1014, %1024 : vector<16x128xf32>
    %1035 = arith.addf %1033, %1034 : vector<16x128xf32>
    %1036 = math.tanh %1035 : vector<16x128xf32>
    %1037 = arith.mulf %1032, %1036 : vector<16x128xf32>
    %c32_435 = arith.constant 32 : index
    %c0_436 = arith.constant 0 : index
    %1038 = vector.load %arg19[%c32_435, %c0_436] : memref<128x128xf32, #tpu.memory_space<vmem>>, vector<16x128xf32>
    tpu.vector_store %arg19[%c32_435, %c0_436], %1037 {strides = array<i32>} : memref<128x128xf32, #tpu.memory_space<vmem>>, vector<16x128xf32>,
    %c48_437 = arith.constant 48 : index
    %c0_438 = arith.constant 0 : index
    %1039 = vector.load %arg18[%c48_437, %c0_438] : memref<128x512xf32, #tpu.memory_space<vmem>>, vector<16x512xf32>
    %1040 = arith.truncf %1037 : vector<16x128xf32> to vector<16x128xbf16>
    %cst_439 = arith.constant dense<0.000000e+00> : vector<16x512xf32>
    %1041 = tpu.matmul %1040, %928, %cst_439 {dimension_numbers = #tpu.dot_dimension_numbers<[1], [0], [0], [1], [0, 0, 1, 1], [], []>} : vector<16x128xbf16>, vector<128x512xbf16>, vector<16x512xf32> -> vector<16x512xf32>
    %1042 = arith.addf %1039, %1041 : vector<16x512xf32>
    %1043 = vector.extract_strided_slice %1042 {offsets = [0, 0], sizes = [16, 128], strides = [1, 1]} : vector<16x512xf32> to vector<16x128xf32>
    %cst_440 = arith.constant 5.000000e-01 : f32
    %1044 = vector.broadcast %cst_440 : f32 to vector<16x128xf32>
    %1045 = arith.mulf %1044, %1043 : vector<16x128xf32>
    %1046 = math.tanh %1045 : vector<16x128xf32>
    %cst_441 = arith.constant 5.000000e-01 : f32
    %1047 = vector.broadcast %cst_441 : f32 to vector<16x128xf32>
    %1048 = arith.mulf %1047, %1046 : vector<16x128xf32>
    %cst_442 = arith.constant 5.000000e-01 : f32
    %1049 = vector.broadcast %cst_442 : f32 to vector<16x128xf32>
    %1050 = arith.addf %1048, %1049 : vector<16x128xf32>
    %1051 = vector.extract_strided_slice %1042 {offsets = [0, 128], sizes = [16, 128], strides = [1, 1]} : vector<16x512xf32> to vector<16x128xf32>
    %cst_443 = arith.constant 5.000000e-01 : f32
    %1052 = vector.broadcast %cst_443 : f32 to vector<16x128xf32>
    %1053 = arith.mulf %1052, %1051 : vector<16x128xf32>
    %1054 = math.tanh %1053 : vector<16x128xf32>
    %cst_444 = arith.constant 5.000000e-01 : f32
    %1055 = vector.broadcast %cst_444 : f32 to vector<16x128xf32>
    %1056 = arith.mulf %1055, %1054 : vector<16x128xf32>
    %cst_445 = arith.constant 5.000000e-01 : f32
    %1057 = vector.broadcast %cst_445 : f32 to vector<16x128xf32>
    %1058 = arith.addf %1056, %1057 : vector<16x128xf32>
    %1059 = vector.extract_strided_slice %1042 {offsets = [0, 256], sizes = [16, 128], strides = [1, 1]} : vector<16x512xf32> to vector<16x128xf32>
    %1060 = math.tanh %1059 : vector<16x128xf32>
    %1061 = vector.extract_strided_slice %1042 {offsets = [0, 384], sizes = [16, 128], strides = [1, 1]} : vector<16x512xf32> to vector<16x128xf32>
    %cst_446 = arith.constant 5.000000e-01 : f32
    %1062 = vector.broadcast %cst_446 : f32 to vector<16x128xf32>
    %1063 = arith.mulf %1062, %1061 : vector<16x128xf32>
    %1064 = math.tanh %1063 : vector<16x128xf32>
    %cst_447 = arith.constant 5.000000e-01 : f32
    %1065 = vector.broadcast %cst_447 : f32 to vector<16x128xf32>
    %1066 = arith.mulf %1065, %1064 : vector<16x128xf32>
    %cst_448 = arith.constant 5.000000e-01 : f32
    %1067 = vector.broadcast %cst_448 : f32 to vector<16x128xf32>
    %1068 = arith.addf %1066, %1067 : vector<16x128xf32>
    %1069 = arith.mulf %1058, %1035 : vector<16x128xf32>
    %1070 = arith.mulf %1050, %1060 : vector<16x128xf32>
    %1071 = arith.addf %1069, %1070 : vector<16x128xf32>
    %1072 = math.tanh %1071 : vector<16x128xf32>
    %1073 = arith.mulf %1068, %1072 : vector<16x128xf32>
    %c48_449 = arith.constant 48 : index
    %c0_450 = arith.constant 0 : index
    %1074 = vector.load %arg19[%c48_449, %c0_450] : memref<128x128xf32, #tpu.memory_space<vmem>>, vector<16x128xf32>
    tpu.vector_store %arg19[%c48_449, %c0_450], %1073 {strides = array<i32>} : memref<128x128xf32, #tpu.memory_space<vmem>>, vector<16x128xf32>,
    %c64_451 = arith.constant 64 : index
    %c0_452 = arith.constant 0 : index
    %1075 = vector.load %arg18[%c64_451, %c0_452] : memref<128x512xf32, #tpu.memory_space<vmem>>, vector<16x512xf32>
    %1076 = arith.truncf %1073 : vector<16x128xf32> to vector<16x128xbf16>
    %cst_453 = arith.constant dense<0.000000e+00> : vector<16x512xf32>
    %1077 = tpu.matmul %1076, %928, %cst_453 {dimension_numbers = #tpu.dot_dimension_numbers<[1], [0], [0], [1], [0, 0, 1, 1], [], []>} : vector<16x128xbf16>, vector<128x512xbf16>, vector<16x512xf32> -> vector<16x512xf32>
    %1078 = arith.addf %1075, %1077 : vector<16x512xf32>
    %1079 = vector.extract_strided_slice %1078 {offsets = [0, 0], sizes = [16, 128], strides = [1, 1]} : vector<16x512xf32> to vector<16x128xf32>
    %cst_454 = arith.constant 5.000000e-01 : f32
    %1080 = vector.broadcast %cst_454 : f32 to vector<16x128xf32>
    %1081 = arith.mulf %1080, %1079 : vector<16x128xf32>
    %1082 = math.tanh %1081 : vector<16x128xf32>
    %cst_455 = arith.constant 5.000000e-01 : f32
    %1083 = vector.broadcast %cst_455 : f32 to vector<16x128xf32>
    %1084 = arith.mulf %1083, %1082 : vector<16x128xf32>
    %cst_456 = arith.constant 5.000000e-01 : f32
    %1085 = vector.broadcast %cst_456 : f32 to vector<16x128xf32>
    %1086 = arith.addf %1084, %1085 : vector<16x128xf32>
    %1087 = vector.extract_strided_slice %1078 {offsets = [0, 128], sizes = [16, 128], strides = [1, 1]} : vector<16x512xf32> to vector<16x128xf32>
    %cst_457 = arith.constant 5.000000e-01 : f32
    %1088 = vector.broadcast %cst_457 : f32 to vector<16x128xf32>
    %1089 = arith.mulf %1088, %1087 : vector<16x128xf32>
    %1090 = math.tanh %1089 : vector<16x128xf32>
    %cst_458 = arith.constant 5.000000e-01 : f32
    %1091 = vector.broadcast %cst_458 : f32 to vector<16x128xf32>
    %1092 = arith.mulf %1091, %1090 : vector<16x128xf32>
    %cst_459 = arith.constant 5.000000e-01 : f32
    %1093 = vector.broadcast %cst_459 : f32 to vector<16x128xf32>
    %1094 = arith.addf %1092, %1093 : vector<16x128xf32>
    %1095 = vector.extract_strided_slice %1078 {offsets = [0, 256], sizes = [16, 128], strides = [1, 1]} : vector<16x512xf32> to vector<16x128xf32>
    %1096 = math.tanh %1095 : vector<16x128xf32>
    %1097 = vector.extract_strided_slice %1078 {offsets = [0, 384], sizes = [16, 128], strides = [1, 1]} : vector<16x512xf32> to vector<16x128xf32>
    %cst_460 = arith.constant 5.000000e-01 : f32
    %1098 = vector.broadcast %cst_460 : f32 to vector<16x128xf32>
    %1099 = arith.mulf %1098, %1097 : vector<16x128xf32>
    %1100 = math.tanh %1099 : vector<16x128xf32>
    %cst_461 = arith.constant 5.000000e-01 : f32
    %1101 = vector.broadcast %cst_461 : f32 to vector<16x128xf32>
    %1102 = arith.mulf %1101, %1100 : vector<16x128xf32>
    %cst_462 = arith.constant 5.000000e-01 : f32
    %1103 = vector.broadcast %cst_462 : f32 to vector<16x128xf32>
    %1104 = arith.addf %1102, %1103 : vector<16x128xf32>
    %1105 = arith.mulf %1094, %1071 : vector<16x128xf32>
    %1106 = arith.mulf %1086, %1096 : vector<16x128xf32>
    %1107 = arith.addf %1105, %1106 : vector<16x128xf32>
    %1108 = math.tanh %1107 : vector<16x128xf32>
    %1109 = arith.mulf %1104, %1108 : vector<16x128xf32>
    %c64_463 = arith.constant 64 : index
    %c0_464 = arith.constant 0 : index
    %1110 = vector.load %arg19[%c64_463, %c0_464] : memref<128x128xf32, #tpu.memory_space<vmem>>, vector<16x128xf32>
    tpu.vector_store %arg19[%c64_463, %c0_464], %1109 {strides = array<i32>} : memref<128x128xf32, #tpu.memory_space<vmem>>, vector<16x128xf32>,
    %c80_465 = arith.constant 80 : index
    %c0_466 = arith.constant 0 : index
    %1111 = vector.load %arg18[%c80_465, %c0_466] : memref<128x512xf32, #tpu.memory_space<vmem>>, vector<16x512xf32>
    %1112 = arith.truncf %1109 : vector<16x128xf32> to vector<16x128xbf16>
    %cst_467 = arith.constant dense<0.000000e+00> : vector<16x512xf32>
    %1113 = tpu.matmul %1112, %928, %cst_467 {dimension_numbers = #tpu.dot_dimension_numbers<[1], [0], [0], [1], [0, 0, 1, 1], [], []>} : vector<16x128xbf16>, vector<128x512xbf16>, vector<16x512xf32> -> vector<16x512xf32>
    %1114 = arith.addf %1111, %1113 : vector<16x512xf32>
    %1115 = vector.extract_strided_slice %1114 {offsets = [0, 0], sizes = [16, 128], strides = [1, 1]} : vector<16x512xf32> to vector<16x128xf32>
    %cst_468 = arith.constant 5.000000e-01 : f32
    %1116 = vector.broadcast %cst_468 : f32 to vector<16x128xf32>
    %1117 = arith.mulf %1116, %1115 : vector<16x128xf32>
    %1118 = math.tanh %1117 : vector<16x128xf32>
    %cst_469 = arith.constant 5.000000e-01 : f32
    %1119 = vector.broadcast %cst_469 : f32 to vector<16x128xf32>
    %1120 = arith.mulf %1119, %1118 : vector<16x128xf32>
    %cst_470 = arith.constant 5.000000e-01 : f32
    %1121 = vector.broadcast %cst_470 : f32 to vector<16x128xf32>
    %1122 = arith.addf %1120, %1121 : vector<16x128xf32>
    %1123 = vector.extract_strided_slice %1114 {offsets = [0, 128], sizes = [16, 128], strides = [1, 1]} : vector<16x512xf32> to vector<16x128xf32>
    %cst_471 = arith.constant 5.000000e-01 : f32
    %1124 = vector.broadcast %cst_471 : f32 to vector<16x128xf32>
    %1125 = arith.mulf %1124, %1123 : vector<16x128xf32>
    %1126 = math.tanh %1125 : vector<16x128xf32>
    %cst_472 = arith.constant 5.000000e-01 : f32
    %1127 = vector.broadcast %cst_472 : f32 to vector<16x128xf32>
    %1128 = arith.mulf %1127, %1126 : vector<16x128xf32>
    %cst_473 = arith.constant 5.000000e-01 : f32
    %1129 = vector.broadcast %cst_473 : f32 to vector<16x128xf32>
    %1130 = arith.addf %1128, %1129 : vector<16x128xf32>
    %1131 = vector.extract_strided_slice %1114 {offsets = [0, 256], sizes = [16, 128], strides = [1, 1]} : vector<16x512xf32> to vector<16x128xf32>
    %1132 = math.tanh %1131 : vector<16x128xf32>
    %1133 = vector.extract_strided_slice %1114 {offsets = [0, 384], sizes = [16, 128], strides = [1, 1]} : vector<16x512xf32> to vector<16x128xf32>
    %cst_474 = arith.constant 5.000000e-01 : f32
    %1134 = vector.broadcast %cst_474 : f32 to vector<16x128xf32>
    %1135 = arith.mulf %1134, %1133 : vector<16x128xf32>
    %1136 = math.tanh %1135 : vector<16x128xf32>
    %cst_475 = arith.constant 5.000000e-01 : f32
    %1137 = vector.broadcast %cst_475 : f32 to vector<16x128xf32>
    %1138 = arith.mulf %1137, %1136 : vector<16x128xf32>
    %cst_476 = arith.constant 5.000000e-01 : f32
    %1139 = vector.broadcast %cst_476 : f32 to vector<16x128xf32>
    %1140 = arith.addf %1138, %1139 : vector<16x128xf32>
    %1141 = arith.mulf %1130, %1107 : vector<16x128xf32>
    %1142 = arith.mulf %1122, %1132 : vector<16x128xf32>
    %1143 = arith.addf %1141, %1142 : vector<16x128xf32>
    %1144 = math.tanh %1143 : vector<16x128xf32>
    %1145 = arith.mulf %1140, %1144 : vector<16x128xf32>
    %c80_477 = arith.constant 80 : index
    %c0_478 = arith.constant 0 : index
    %1146 = vector.load %arg19[%c80_477, %c0_478] : memref<128x128xf32, #tpu.memory_space<vmem>>, vector<16x128xf32>
    tpu.vector_store %arg19[%c80_477, %c0_478], %1145 {strides = array<i32>} : memref<128x128xf32, #tpu.memory_space<vmem>>, vector<16x128xf32>,
    %c96_479 = arith.constant 96 : index
    %c0_480 = arith.constant 0 : index
    %1147 = vector.load %arg18[%c96_479, %c0_480] : memref<128x512xf32, #tpu.memory_space<vmem>>, vector<16x512xf32>
    %1148 = arith.truncf %1145 : vector<16x128xf32> to vector<16x128xbf16>
    %cst_481 = arith.constant dense<0.000000e+00> : vector<16x512xf32>
    %1149 = tpu.matmul %1148, %928, %cst_481 {dimension_numbers = #tpu.dot_dimension_numbers<[1], [0], [0], [1], [0, 0, 1, 1], [], []>} : vector<16x128xbf16>, vector<128x512xbf16>, vector<16x512xf32> -> vector<16x512xf32>
    %1150 = arith.addf %1147, %1149 : vector<16x512xf32>
    %1151 = vector.extract_strided_slice %1150 {offsets = [0, 0], sizes = [16, 128], strides = [1, 1]} : vector<16x512xf32> to vector<16x128xf32>
    %cst_482 = arith.constant 5.000000e-01 : f32
    %1152 = vector.broadcast %cst_482 : f32 to vector<16x128xf32>
    %1153 = arith.mulf %1152, %1151 : vector<16x128xf32>
    %1154 = math.tanh %1153 : vector<16x128xf32>
    %cst_483 = arith.constant 5.000000e-01 : f32
    %1155 = vector.broadcast %cst_483 : f32 to vector<16x128xf32>
    %1156 = arith.mulf %1155, %1154 : vector<16x128xf32>
    %cst_484 = arith.constant 5.000000e-01 : f32
    %1157 = vector.broadcast %cst_484 : f32 to vector<16x128xf32>
    %1158 = arith.addf %1156, %1157 : vector<16x128xf32>
    %1159 = vector.extract_strided_slice %1150 {offsets = [0, 128], sizes = [16, 128], strides = [1, 1]} : vector<16x512xf32> to vector<16x128xf32>
    %cst_485 = arith.constant 5.000000e-01 : f32
    %1160 = vector.broadcast %cst_485 : f32 to vector<16x128xf32>
    %1161 = arith.mulf %1160, %1159 : vector<16x128xf32>
    %1162 = math.tanh %1161 : vector<16x128xf32>
    %cst_486 = arith.constant 5.000000e-01 : f32
    %1163 = vector.broadcast %cst_486 : f32 to vector<16x128xf32>
    %1164 = arith.mulf %1163, %1162 : vector<16x128xf32>
    %cst_487 = arith.constant 5.000000e-01 : f32
    %1165 = vector.broadcast %cst_487 : f32 to vector<16x128xf32>
    %1166 = arith.addf %1164, %1165 : vector<16x128xf32>
    %1167 = vector.extract_strided_slice %1150 {offsets = [0, 256], sizes = [16, 128], strides = [1, 1]} : vector<16x512xf32> to vector<16x128xf32>
    %1168 = math.tanh %1167 : vector<16x128xf32>
    %1169 = vector.extract_strided_slice %1150 {offsets = [0, 384], sizes = [16, 128], strides = [1, 1]} : vector<16x512xf32> to vector<16x128xf32>
    %cst_488 = arith.constant 5.000000e-01 : f32
    %1170 = vector.broadcast %cst_488 : f32 to vector<16x128xf32>
    %1171 = arith.mulf %1170, %1169 : vector<16x128xf32>
    %1172 = math.tanh %1171 : vector<16x128xf32>
    %cst_489 = arith.constant 5.000000e-01 : f32
    %1173 = vector.broadcast %cst_489 : f32 to vector<16x128xf32>
    %1174 = arith.mulf %1173, %1172 : vector<16x128xf32>
    %cst_490 = arith.constant 5.000000e-01 : f32
    %1175 = vector.broadcast %cst_490 : f32 to vector<16x128xf32>
    %1176 = arith.addf %1174, %1175 : vector<16x128xf32>
    %1177 = arith.mulf %1166, %1143 : vector<16x128xf32>
    %1178 = arith.mulf %1158, %1168 : vector<16x128xf32>
    %1179 = arith.addf %1177, %1178 : vector<16x128xf32>
    %1180 = math.tanh %1179 : vector<16x128xf32>
    %1181 = arith.mulf %1176, %1180 : vector<16x128xf32>
    %c96_491 = arith.constant 96 : index
    %c0_492 = arith.constant 0 : index
    %1182 = vector.load %arg19[%c96_491, %c0_492] : memref<128x128xf32, #tpu.memory_space<vmem>>, vector<16x128xf32>
    tpu.vector_store %arg19[%c96_491, %c0_492], %1181 {strides = array<i32>} : memref<128x128xf32, #tpu.memory_space<vmem>>, vector<16x128xf32>,
    %c112_493 = arith.constant 112 : index
    %c0_494 = arith.constant 0 : index
    %1183 = vector.load %arg18[%c112_493, %c0_494] : memref<128x512xf32, #tpu.memory_space<vmem>>, vector<16x512xf32>
    %1184 = arith.truncf %1181 : vector<16x128xf32> to vector<16x128xbf16>
    %cst_495 = arith.constant dense<0.000000e+00> : vector<16x512xf32>
    %1185 = tpu.matmul %1184, %928, %cst_495 {dimension_numbers = #tpu.dot_dimension_numbers<[1], [0], [0], [1], [0, 0, 1, 1], [], []>} : vector<16x128xbf16>, vector<128x512xbf16>, vector<16x512xf32> -> vector<16x512xf32>
    %1186 = arith.addf %1183, %1185 : vector<16x512xf32>
    %1187 = vector.extract_strided_slice %1186 {offsets = [0, 0], sizes = [16, 128], strides = [1, 1]} : vector<16x512xf32> to vector<16x128xf32>
    %cst_496 = arith.constant 5.000000e-01 : f32
    %1188 = vector.broadcast %cst_496 : f32 to vector<16x128xf32>
    %1189 = arith.mulf %1188, %1187 : vector<16x128xf32>
    %1190 = math.tanh %1189 : vector<16x128xf32>
    %cst_497 = arith.constant 5.000000e-01 : f32
    %1191 = vector.broadcast %cst_497 : f32 to vector<16x128xf32>
    %1192 = arith.mulf %1191, %1190 : vector<16x128xf32>
    %cst_498 = arith.constant 5.000000e-01 : f32
    %1193 = vector.broadcast %cst_498 : f32 to vector<16x128xf32>
    %1194 = arith.addf %1192, %1193 : vector<16x128xf32>
    %1195 = vector.extract_strided_slice %1186 {offsets = [0, 128], sizes = [16, 128], strides = [1, 1]} : vector<16x512xf32> to vector<16x128xf32>
    %cst_499 = arith.constant 5.000000e-01 : f32
    %1196 = vector.broadcast %cst_499 : f32 to vector<16x128xf32>
    %1197 = arith.mulf %1196, %1195 : vector<16x128xf32>
    %1198 = math.tanh %1197 : vector<16x128xf32>
    %cst_500 = arith.constant 5.000000e-01 : f32
    %1199 = vector.broadcast %cst_500 : f32 to vector<16x128xf32>
    %1200 = arith.mulf %1199, %1198 : vector<16x128xf32>
    %cst_501 = arith.constant 5.000000e-01 : f32
    %1201 = vector.broadcast %cst_501 : f32 to vector<16x128xf32>
    %1202 = arith.addf %1200, %1201 : vector<16x128xf32>
    %1203 = vector.extract_strided_slice %1186 {offsets = [0, 256], sizes = [16, 128], strides = [1, 1]} : vector<16x512xf32> to vector<16x128xf32>
    %1204 = math.tanh %1203 : vector<16x128xf32>
    %1205 = vector.extract_strided_slice %1186 {offsets = [0, 384], sizes = [16, 128], strides = [1, 1]} : vector<16x512xf32> to vector<16x128xf32>
    %cst_502 = arith.constant 5.000000e-01 : f32
    %1206 = vector.broadcast %cst_502 : f32 to vector<16x128xf32>
    %1207 = arith.mulf %1206, %1205 : vector<16x128xf32>
    %1208 = math.tanh %1207 : vector<16x128xf32>
    %cst_503 = arith.constant 5.000000e-01 : f32
    %1209 = vector.broadcast %cst_503 : f32 to vector<16x128xf32>
    %1210 = arith.mulf %1209, %1208 : vector<16x128xf32>
    %cst_504 = arith.constant 5.000000e-01 : f32
    %1211 = vector.broadcast %cst_504 : f32 to vector<16x128xf32>
    %1212 = arith.addf %1210, %1211 : vector<16x128xf32>
    %1213 = arith.mulf %1202, %1179 : vector<16x128xf32>
    %1214 = arith.mulf %1194, %1204 : vector<16x128xf32>
    %1215 = arith.addf %1213, %1214 : vector<16x128xf32>
    %1216 = math.tanh %1215 : vector<16x128xf32>
    %1217 = arith.mulf %1212, %1216 : vector<16x128xf32>
    %c112_505 = arith.constant 112 : index
    %c0_506 = arith.constant 0 : index
    %1218 = vector.load %arg19[%c112_505, %c0_506] : memref<128x128xf32, #tpu.memory_space<vmem>>, vector<16x128xf32>
    tpu.vector_store %arg19[%c112_505, %c0_506], %1217 {strides = array<i32>} : memref<128x128xf32, #tpu.memory_space<vmem>>, vector<16x128xf32>,
    %c3 = arith.constant 3 : index
    %c0_507 = arith.constant 0 : index
    %c0_508 = arith.constant 0 : index
    %1219 = vector.load %arg16[%c3, %c0_507, %c0_508] : memref<4x16x128xf32, #tpu.memory_space<vmem>>, vector<1x16x128xf32>
    %1220 = vector.shape_cast %1219 : vector<1x16x128xf32> to vector<16x128xf32>
    %1221 = vector.shape_cast %1217 : vector<16x128xf32> to vector<1x16x128xf32>
    tpu.vector_store %arg16[%c3, %c0_507, %c0_508], %1221 {strides = array<i32>} : memref<4x16x128xf32, #tpu.memory_space<vmem>>, vector<1x16x128xf32>,
    %c3_509 = arith.constant 3 : index
    %c0_510 = arith.constant 0 : index
    %c0_511 = arith.constant 0 : index
    %1222 = vector.load %arg17[%c3_509, %c0_510, %c0_511] : memref<4x16x128xf32, #tpu.memory_space<vmem>>, vector<1x16x128xf32>
    %1223 = vector.shape_cast %1222 : vector<1x16x128xf32> to vector<16x128xf32>
    %1224 = vector.shape_cast %1215 : vector<16x128xf32> to vector<1x16x128xf32>
    tpu.vector_store %arg17[%c3_509, %c0_510, %c0_511], %1224 {strides = array<i32>} : memref<4x16x128xf32, #tpu.memory_space<vmem>>, vector<1x16x128xf32>,
    %c0_512 = arith.constant 0 : index
    %c0_513 = arith.constant 0 : index
    %1225 = vector.load %arg19[%c0_512, %c0_513] : memref<128x128xf32, #tpu.memory_space<vmem>>, vector<128x128xf32>
    %1226 = arith.truncf %1225 : vector<128x128xf32> to vector<128x128xbf16>
    %c0_514 = arith.constant 0 : index
    %c0_515 = arith.constant 0 : index
    %1227 = vector.load %arg13[%c0_514, %c0_515] : memref<128x128xbf16, #tpu.memory_space<vmem>>, vector<128x128xbf16>
    %cst_516 = arith.constant dense<0.000000e+00> : vector<128x128xf32>
    %1228 = tpu.matmul %1226, %1227, %cst_516 {dimension_numbers = #tpu.dot_dimension_numbers<[1], [0], [0], [1], [0, 0, 1, 1], [], []>} : vector<128x128xbf16>, vector<128x128xbf16>, vector<128x128xf32> -> vector<128x128xf32>
    %c0_517 = arith.constant 0 : index
    %c0_518 = arith.constant 0 : index
    %1229 = vector.load %arg14[%c0_517, %c0_518] : memref<1x128xf32, #tpu.memory_space<vmem>>, vector<1x128xf32>
    %1230 = vector.broadcast %1229 : vector<1x128xf32> to vector<128x128xf32>
    %1231 = arith.addf %1228, %1230 : vector<128x128xf32>
    %c0_519 = arith.constant 0 : index
    %c0_520 = arith.constant 0 : index
    %1232 = vector.load %arg15[%c0_519, %c0_520] : memref<128x128xf32, #tpu.memory_space<vmem>>, vector<128x128xf32>
    tpu.vector_store %arg15[%c0_519, %c0_520], %1231 {strides = array<i32>} : memref<128x128xf32, #tpu.memory_space<vmem>>, vector<128x128xf32>,
    return
  }
}

</mosaic_0001>

<bundles_post_ra>
// kernel: model_forward.1
= control target key start
LH: loop header
LB: loop body
LE: loop exit
PB: predicated region body
PF: predicated region fallthrough
CT: control target
= control target key end

     0   :  { %s13093_s0 = inlined_call_operand.vmem [shape: s32[128,1], index: 0, kind: input, shape index: {}]   ;;  %s13094_s1 = inlined_call_operand.vmem [shape: bf16[64,512], index: 1, kind: input, shape index: {}]   ;;  %s13095_s2 = inlined_call_operand.hbm [shape: f32[1,512], index: 2, kind: input, shape index: {}]   ;;  %s13096_s3 = inlined_call_operand.hbm [shape: bf16[128,512], index: 3, kind: input, shape index: {}]   ;;  %s13097_s4 = inlined_call_operand.hbm [shape: bf16[128,512], index: 4, kind: input, shape index: {}]   ;;  %s13098_s5 = inlined_call_operand.hbm [shape: bf16[128,512], index: 5, kind: input, shape index: {}]   ;;  %s13099_s6 = inlined_call_operand.hbm [shape: bf16[128,512], index: 6, kind: input, shape index: {}]   ;;  %s13100_s7 = inlined_call_operand.hbm [shape: bf16[128,512], index: 7, kind: input, shape index: {}]   ;;  %s13101_s8 = inlined_call_operand.hbm [shape: bf16[128,512], index: 8, kind: input, shape index: {}]   ;;  %s13102_s9 = inlined_call_operand.hbm [shape: bf16[128,512], index: 9, kind: input, shape index: {}]   ;;  %s13103_s10 = inlined_call_operand.hbm [shape: f32[1,512], index: 10, kind: input, shape index: {}]   ;;  %s13104_s11 = inlined_call_operand.hbm [shape: f32[1,512], index: 11, kind: input, shape index: {}]   ;;  %s13105_s12 = inlined_call_operand.hbm [shape: f32[1,512], index: 12, kind: input, shape index: {}]   ;;  %s13106_s13 = inlined_call_operand.vmem [shape: bf16[128,128], index: 13, kind: input, shape index: {}]   ;;  %s13107_s14 = inlined_call_operand.vmem [shape: f32[1,128], index: 14, kind: input, shape index: {}]   ;;  %s13108_s15 = inlined_call_operand.vmem [shape: f32[128,128], index: 15, kind: output, shape index: {0}]   ;;  %s13109_s16 = inlined_call_operand.vmem [shape: f32[4,16,128], index: 16, kind: output, shape index: {1}]   ;;  %s13110_s17 = inlined_call_operand.vmem [shape: f32[4,16,128], index: 17, kind: output, shape index: {2}]  }
   0x1   :  { %13128 = sst [smem:[#allocation44_spill]] %s13093_s0 }
   0x2   :  { %13129 = sst [smem:[#allocation45_spill]] %s13094_s1 }
   0x3   :  { %13130 = sst [smem:[#allocation46_spill]] %s13108_s15 }
   0x4   :  { %23 = vsyncpa [#allocation5], 0 }
   0x5   :  { %24 = vsyncpa [#allocation7], 0 }
   0x6   :  { %25 = vsyncpa [#allocation10], 0 }
   0x7   :  { %26 = vsyncpa [#allocation13], 0 }
   0x8   :  { %27 = vsyncpa [#allocation16], 0 }
   0x9   :  { %28 = vsyncpa [#allocation19], 0  ;;  %s10126_s24 = smov [#allocation6]   ;;  %s9872_s28 = scalar_lea.hbm %s13096_s3, 4096 }
   0xa   :  { %s48_s25 = sshll.u32 %s10126_s24, 4  ;;  %p9873_p0 = scmp.ne.s32.totalorder %s13096_s3, %s9872_s28  ;;  %s49_s25 = int_to_ptr.vmem [resolvable:$true] %s48_s25 }
   0xb   :  { %p9876_p1 = scmp.lt.u32.totalorder %s9872_s28, %s13096_s3 }
   0xd   :  { %p9878_p2 = pnand %p9876_p1, %p9873_p0 }
   0xf   :  { %9881 = shalt.err (!%p9878_p2)
}
  0x10   :  { %s9882_s19 = scalar_lea.vmem %s49_s25, 4096  ;;  %p9887_p4 = scmp.lt.s32.totalorder %s49_s25, %s49_s25 }
  0x11   :  { %p9883_p3 = scmp.ne.s32.totalorder %s49_s25, %s9882_s19  ;;  %p9888_p5 = scmp.lt.s32.totalorder %s9882_s19, %s9882_s19 }
  0x13   :  { %p9889_p6 = por %p9888_p5, %p9887_p4 }
  0x15   :  { %p9890_p7 = pnand %p9889_p6, %p9883_p3 }
  0x17   :  { %9893 = shalt.err (!%p9890_p7)
}
  0x18   :  { %s10127_s1 = smov 256   ;;  %s10128_s20 = smov 16  }
  0x19   :  { %54 = dma.hbm_to_vmem [thread:$0]  %s13096_s3, 4096, %s49_s25, [#allocation7], %s10127_s1, %s10127_s1, %s10128_s20  }
  0x1a   :  { %s10129_s23 = smov [#allocation9]   ;;  %s10130_s26 = smov [#allocation12]  }
  0x1b   :  { %s72_s24 = sshll.u32 %s10129_s23, 4  ;;  %s96_s27 = sshll.u32 %s10130_s26, 4  ;;  %s73_s24 = int_to_ptr.vmem [resolvable:$true] %s72_s24  ;;  %s97_s27 = int_to_ptr.vmem [resolvable:$true] %s96_s27 }
  0x1c   :  { %s9894_s0 = scalar_lea.hbm %s13098_s5, 4096 }
  0x1d   :  { %p9895_p8 = scmp.ne.s32.totalorder %s13098_s5, %s9894_s0  ;;  %p9898_p9 = scmp.lt.u32.totalorder %s9894_s0, %s13098_s5 }
  0x1f   :  { %p9900_p10 = pnand %p9898_p9, %p9895_p8 }
  0x21   :  { %9903 = shalt.err (!%p9900_p10)
}
  0x22   :  { %s9904_s3 = scalar_lea.vmem %s73_s24, 4096  ;;  %p9909_p12 = scmp.lt.s32.totalorder %s73_s24, %s73_s24 }
  0x23   :  { %p9905_p11 = scmp.ne.s32.totalorder %s73_s24, %s9904_s3  ;;  %p9910_p13 = scmp.lt.s32.totalorder %s9904_s3, %s9904_s3 }
  0x25   :  { %p9911_p0 = por %p9910_p13, %p9909_p12 }
  0x27   :  { %p9912_p1 = pnand %p9911_p0, %p9905_p11 }
  0x29   :  { %9915 = shalt.err (!%p9912_p1)
}
  0x2a   :  { %78 = dma.hbm_to_vmem [thread:$0]  %s13098_s5, 4096, %s73_s24, [#allocation10], %s10127_s1, %s10127_s1, %s10128_s20  }
  0x2b   :  { %s9916_s23 = scalar_lea.hbm %s13100_s7, 4096 }
  0x2c   :  { %p9917_p2 = scmp.ne.s32.totalorder %s13100_s7, %s9916_s23  ;;  %p9920_p3 = scmp.lt.u32.totalorder %s9916_s23, %s13100_s7 }
  0x2e   :  { %p9922_p4 = pnand %p9920_p3, %p9917_p2 }
  0x30   :  { %9925 = shalt.err (!%p9922_p4)
}
  0x31   :  { %s9926_s30 = scalar_lea.vmem %s97_s27, 4096  ;;  %p9931_p6 = scmp.lt.s32.totalorder %s97_s27, %s97_s27 }
  0x32   :  { %p9927_p5 = scmp.ne.s32.totalorder %s97_s27, %s9926_s30  ;;  %p9932_p7 = scmp.lt.s32.totalorder %s9926_s30, %s9926_s30 }
  0x34   :  { %p9933_p8 = por %p9932_p7, %p9931_p6 }
  0x36   :  { %p9934_p9 = pnand %p9933_p8, %p9927_p5 }
  0x38   :  { %9937 = shalt.err (!%p9934_p9)
}
  0x39   :  { %102 = dma.hbm_to_vmem [thread:$0]  %s13100_s7, 4096, %s97_s27, [#allocation13], %s10127_s1, %s10127_s1, %s10128_s20  }
  0x3a   :  { %s10131_s18 = smov [#allocation15]   ;;  %s10132_s3 = smov [#allocation18]  }
  0x3b   :  { %s120_s19 = sshll.u32 %s10131_s18, 4  ;;  %s143_s25 = sshll.u32 %s10132_s3, 4  ;;  %s121_s19 = int_to_ptr.vmem [resolvable:$true] %s120_s19  ;;  %s144_s25 = int_to_ptr.vmem [resolvable:$true] %s143_s25 }
  0x3c   :  { %s9938_s15 = scalar_lea.hbm %s13102_s9, 4096 }
  0x3d   :  { %p9939_p10 = scmp.ne.s32.totalorder %s13102_s9, %s9938_s15  ;;  %p9942_p11 = scmp.lt.u32.totalorder %s9938_s15, %s13102_s9 }
  0x3f   :  { %p9944_p12 = pnand %p9942_p11, %p9939_p10 }
  0x41   :  { %9947 = shalt.err (!%p9944_p12)
}
  0x42   :  { %s9948_s7 = scalar_lea.vmem %s121_s19, 4096  ;;  %p9953_p0 = scmp.lt.s32.totalorder %s121_s19, %s121_s19 }
  0x43   :  { %p9949_p13 = scmp.ne.s32.totalorder %s121_s19, %s9948_s7  ;;  %p9954_p1 = scmp.lt.s32.totalorder %s9948_s7, %s9948_s7 }
  0x45   :  { %p9955_p2 = por %p9954_p1, %p9953_p0 }
  0x47   :  { %p9956_p3 = pnand %p9955_p2, %p9949_p13 }
  0x49   :  { %9959 = shalt.err (!%p9956_p3)
}
  0x4a   :  { %126 = dma.hbm_to_vmem [thread:$0]  %s13102_s9, 4096, %s121_s19, [#allocation16], %s10127_s1, %s10127_s1, %s10128_s20  }
  0x4b   :  { %s9960_s24 = scalar_lea.hbm %s13104_s11, 64 }
  0x4c   :  { %p9961_p4 = scmp.ne.s32.totalorder %s13104_s11, %s9960_s24  ;;  %p9964_p5 = scmp.lt.u32.totalorder %s9960_s24, %s13104_s11 }
  0x4e   :  { %p9966_p6 = pnand %p9964_p5, %p9961_p4 }
  0x50   :  { %9969 = shalt.err (!%p9966_p6)
}
  0x51   :  { %s9970_s15 = scalar_lea.vmem %s144_s25, 64  ;;  %p9975_p8 = scmp.lt.s32.totalorder %s144_s25, %s144_s25 }
  0x52   :  { %p9971_p7 = scmp.ne.s32.totalorder %s144_s25, %s9970_s15  ;;  %p9976_p9 = scmp.lt.s32.totalorder %s9970_s15, %s9970_s15 }
  0x54   :  { %p9977_p10 = por %p9976_p9, %p9975_p8 }
  0x56   :  { %p9978_p11 = pnand %p9977_p10, %p9971_p7 }
  0x58   :  { %9981 = shalt.err (!%p9978_p11)
}
  0x59   :  { %146 = dma.hbm_to_vmem [thread:$0]  %s13104_s11, 64, %s144_s25, [#allocation19]  }
  0x5a   :  { %s10133_s23 = smov [#allocation4]   ;;  %s10134_s28 = smov [#allocation8]  }
  0x5b   :  { %s39_s26 = sshll.u32 %s10133_s23, 4  ;;  %s60_s29 = sshll.u32 %s10134_s28, 4  ;;  %s40_s26 = int_to_ptr.vmem [resolvable:$true] %s39_s26  ;;  %s61_s29 = int_to_ptr.vmem [resolvable:$true] %s60_s29 }
  0x5c   :  { %s9982_s0 = scalar_lea.hbm %s13095_s2, 64 }
  0x5d   :  { %p9983_p12 = scmp.ne.s32.totalorder %s13095_s2, %s9982_s0  ;;  %p9986_p13 = scmp.lt.u32.totalorder %s9982_s0, %s13095_s2 }
  0x5f   :  { %p9988_p0 = pnand %p9986_p13, %p9983_p12 }
  0x61   :  { %9991 = shalt.err (!%p9988_p0)
}
  0x62   :  { %s9992_s11 = scalar_lea.vmem %s40_s26, 64  ;;  %p9997_p2 = scmp.lt.s32.totalorder %s40_s26, %s40_s26 }
  0x63   :  { %p9993_p1 = scmp.ne.s32.totalorder %s40_s26, %s9992_s11  ;;  %p9998_p3 = scmp.lt.s32.totalorder %s9992_s11, %s9992_s11 }
  0x65   :  { %p9999_p4 = por %p9998_p3, %p9997_p2 }
  0x67   :  { %p10000_p5 = pnand %p9999_p4, %p9993_p1 }
  0x69   :  { %10003 = shalt.err (!%p10000_p5)
}
  0x6a   :  { %42 = dma.hbm_to_vmem [thread:$0]  %s13095_s2, 64, %s40_s26, [#allocation5]  }
  0x6b   :  { %s10004_s15 = scalar_lea.hbm %s13097_s4, 4096 }
  0x6c   :  { %p10005_p6 = scmp.ne.s32.totalorder %s13097_s4, %s10004_s15  ;;  %p10008_p7 = scmp.lt.u32.totalorder %s10004_s15, %s13097_s4 }
  0x6e   :  { %p10010_p8 = pnand %p10008_p7, %p10005_p6 }
  0x70   :  { %10013 = shalt.err (!%p10010_p8)
}
  0x71   :  { %s10014_s7 = scalar_lea.vmem %s61_s29, 4096  ;;  %p10019_p10 = scmp.lt.s32.totalorder %s61_s29, %s61_s29 }
  0x72   :  { %p10015_p9 = scmp.ne.s32.totalorder %s61_s29, %s10014_s7  ;;  %p10020_p11 = scmp.lt.s32.totalorder %s10014_s7, %s10014_s7 }
  0x74   :  { %p10021_p12 = por %p10020_p11, %p10019_p10 }
  0x76   :  { %p10022_p13 = pnand %p10021_p12, %p10015_p9 }
  0x78   :  { %10025 = shalt.err (!%p10022_p13)
}
  0x79   :  { %66 = dma.hbm_to_vmem [thread:$0]  %s13097_s4, 4096, %s61_s29, [#allocation7], %s10127_s1, %s10127_s1, %s10128_s20  }
  0x7a   :  { %s10135_s27 = smov [#allocation11]   ;;  %s10136_s30 = smov [#allocation14]  }
  0x7b   :  { %s84_s0 = sshll.u32 %s10135_s27, 4  ;;  %s108_s5 = sshll.u32 %s10136_s30, 4  ;;  %s85_s0 = int_to_ptr.vmem [resolvable:$true] %s84_s0  ;;  %s109_s5 = int_to_ptr.vmem [resolvable:$true] %s108_s5 }
  0x7c   :  { %s10026_s11 = scalar_lea.hbm %s13099_s6, 4096 }
  0x7d   :  { %p10027_p0 = scmp.ne.s32.totalorder %s13099_s6, %s10026_s11  ;;  %p10030_p1 = scmp.lt.u32.totalorder %s10026_s11, %s13099_s6 }
  0x7f   :  { %p10032_p2 = pnand %p10030_p1, %p10027_p0 }
  0x81   :  { %10035 = shalt.err (!%p10032_p2)
}
  0x82   :  { %s10036_s4 = scalar_lea.vmem %s85_s0, 4096  ;;  %p10041_p4 = scmp.lt.s32.totalorder %s85_s0, %s85_s0 }
  0x83   :  { %p10037_p3 = scmp.ne.s32.totalorder %s85_s0, %s10036_s4  ;;  %p10042_p5 = scmp.lt.s32.totalorder %s10036_s4, %s10036_s4 }
  0x85   :  { %p10043_p6 = por %p10042_p5, %p10041_p4 }
  0x87   :  { %p10044_p7 = pnand %p10043_p6, %p10037_p3 }
  0x89   :  { %10047 = shalt.err (!%p10044_p7)
}
  0x8a   :  { %90 = dma.hbm_to_vmem [thread:$0]  %s13099_s6, 4096, %s85_s0, [#allocation10], %s10127_s1, %s10127_s1, %s10128_s20  }
  0x8b   :  { %s10048_s23 = scalar_lea.hbm %s13101_s8, 4096 }
  0x8c   :  { %p10049_p8 = scmp.ne.s32.totalorder %s13101_s8, %s10048_s23  ;;  %p10052_p9 = scmp.lt.u32.totalorder %s10048_s23, %s13101_s8 }
  0x8e   :  { %p10054_p10 = pnand %p10052_p9, %p10049_p8 }
  0x90   :  { %10057 = shalt.err (!%p10054_p10)
}
  0x91   :  { %s10058_s27 = scalar_lea.vmem %s109_s5, 4096  ;;  %p10063_p12 = scmp.lt.s32.totalorder %s109_s5, %s109_s5 }
  0x92   :  { %p10059_p11 = scmp.ne.s32.totalorder %s109_s5, %s10058_s27  ;;  %p10064_p13 = scmp.lt.s32.totalorder %s10058_s27, %s10058_s27 }
  0x94   :  { %p10065_p0 = por %p10064_p13, %p10063_p12 }
  0x96   :  { %p10066_p1 = pnand %p10065_p0, %p10059_p11 }
  0x98   :  { %10069 = shalt.err (!%p10066_p1)
}
  0x99   :  { %114 = dma.hbm_to_vmem [thread:$0]  %s13101_s8, 4096, %s109_s5, [#allocation13], %s10127_s1, %s10127_s1, %s10128_s20  }
  0x9a   :  { %s10137_s30 = smov [#allocation17]   ;;  %s10138_s18 = smov [#allocation20]  }
  0x9b   :  { %s133_s24 = sshll.u32 %s10137_s30, 4  ;;  %s153_s11 = sshll.u32 %s10138_s18, 4  ;;  %s134_s24 = int_to_ptr.vmem [resolvable:$true] %s133_s24  ;;  %s154_s11 = int_to_ptr.vmem [resolvable:$true] %s153_s11 }
  0x9c   :  { %s10070_s21 = scalar_lea.hbm %s13103_s10, 64 }
  0x9d   :  { %p10071_p2 = scmp.ne.s32.totalorder %s13103_s10, %s10070_s21  ;;  %p10074_p3 = scmp.lt.u32.totalorder %s10070_s21, %s13103_s10 }
  0x9f   :  { %p10076_p4 = pnand %p10074_p3, %p10071_p2 }
  0xa1   :  { %10079 = shalt.err (!%p10076_p4)
}
  0xa2   :  { %s10080_s8 = scalar_lea.vmem %s134_s24, 64  ;;  %p10085_p6 = scmp.lt.s32.totalorder %s134_s24, %s134_s24 }
  0xa3   :  { %p10081_p5 = scmp.ne.s32.totalorder %s134_s24, %s10080_s8  ;;  %p10086_p7 = scmp.lt.s32.totalorder %s10080_s8, %s10080_s8 }
  0xa5   :  { %p10087_p8 = por %p10086_p7, %p10085_p6 }
  0xa7   :  { %p10088_p9 = pnand %p10087_p8, %p10081_p5 }
  0xa9   :  { %10091 = shalt.err (!%p10088_p9)
}
  0xaa   :  { %136 = dma.hbm_to_vmem [thread:$0]  %s13103_s10, 64, %s134_s24, [#allocation16]  }
  0xab   :  { %s10092_s19 = scalar_lea.hbm %s13105_s12, 64 }
  0xac   :  { %p10093_p10 = scmp.ne.s32.totalorder %s13105_s12, %s10092_s19  ;;  %p10096_p11 = scmp.lt.u32.totalorder %s10092_s19, %s13105_s12 }
  0xae   :  { %p10098_p12 = pnand %p10096_p11, %p10093_p10 }
  0xb0   :  { %10101 = shalt.err (!%p10098_p12)
}
  0xb1   :  { %s10102_s26 = scalar_lea.vmem %s154_s11, 64  ;;  %p10107_p0 = scmp.lt.s32.totalorder %s154_s11, %s154_s11 }
  0xb2   :  { %p10103_p13 = scmp.ne.s32.totalorder %s154_s11, %s10102_s26  ;;  %p10108_p1 = scmp.lt.s32.totalorder %s10102_s26, %s10102_s26 }
  0xb4   :  { %p10109_p2 = por %p10108_p1, %p10107_p0 }
  0xb6   :  { %p10110_p3 = pnand %p10109_p2, %p10103_p13 }
  0xb8   :  { %10113 = shalt.err (!%p10110_p3)
}
  0xb9   :  { %156 = dma.hbm_to_vmem [thread:$0]  %s13105_s12, 64, %s154_s11, [#allocation19]  }
  0xba   :  { %10114 = dma.done.wait [#allocation5], 64  }
  0xbb   :  { %10115 = vsyncadd [#allocation5], 4294967232 }
  0xbc   :  { %10116 = dma.done.wait [#allocation7], 8192  }
  0xbd   :  { %10117 = vsyncadd [#allocation7], 4294959104 }
  0xbe   :  { %10118 = dma.done.wait [#allocation10], 8192  }
  0xbf   :  { %10119 = vsyncadd [#allocation10], 4294959104 }
  0xc0   :  { %10120 = dma.done.wait [#allocation13], 8192  }
  0xc1   :  { %10121 = vsyncadd [#allocation13], 4294959104 }
  0xc2   :  { %10122 = dma.done.wait [#allocation16], 4160  }
  0xc3   :  { %10123 = vsyncadd [#allocation16], 4294963136 }
  0xc4   :  { %10124 = dma.done.wait [#allocation19], 128  }
  0xc5   :  { %10125 = vsyncadd [#allocation19], 4294967168  ;;  %v13114_v0 = vmov 0   ;;  %s13131_s0 = sld [smem:[#allocation44_spill]]  ;;  %s13132_s1 = sld [smem:[#allocation45_spill]]  ;;  %v211_v27 = vlaneseq  ;;  %v10140_v33 = vmov 0.0  }
  0xc6   :  { %8735 = vset.pattern.permute.xlu1 %v13114_v0  ;;  %8734 = vset.pattern.permute.xlu0 %v13114_v0  ;;  %v10451_v22 = vld [vmem:[#allocation11 + $0x4] ss:$16 sps:$4 sm:$0xff]   ;;  %vm435_vm2 = vcmask 523264   ;;  %v10510_v54 = vld [vmem:[#allocation11] ss:$16 sps:$4 sm:$0xff]   ;;  %s13173_s25 = sld [smem:[#allocation46_spill]] }
  0xc7   :  { %532 = vmatprep.mubr.bf16.mxu1 %v13114_v0  ;;  %492 = vmatprep.mubr.bf16.mxu0 %v13114_v0  ;;  %v10467_v28 = vand.u32 127, %v211_v27  ;;  %v10515_v56 = vld [vmem:[#allocation11 + $0x24] ss:$16 sps:$4 sm:$0xff]   ;;  %v10522_v62 = vld [vmem:[#allocation11 + $0xc] ss:$16 sps:$4 sm:$0xff]  }
  0xc8   :  { %v10529_v63 = vld [vmem:[#allocation11 + $0x20] ss:$16 sps:$4 sm:$0xff]  }
  0xcb   :  { %v205_v1 = vld [vmem:[%s13131_s0 + $0x50] sm:$0xff]  ;;  %v203_v2 = vld [vmem:[%s13131_s0 + $0x40] sm:$0xff]  ;;  %v206_v3 = vld [vmem:[%s13131_s0 + $0x58] sm:$0xff] }
  0xcc   :  { %244 = vperm.xlu1 %8735, %v205_v1   ;;  %238 = vperm.xlu0 %8734, %v203_v2   ;;  %v204_v4 = vld [vmem:[%s13131_s0 + $0x48] sm:$0xff]  ;;  %v207_v6 = vld [vmem:[%s13131_s0 + $0x60] sm:$0xff]  ;;  %v210_v10 = vld [vmem:[%s13131_s0 + $0x78] sm:$0xff] }
  0xcd   :  { %v208_v5 = vld [vmem:[%s13131_s0 + $0x68] sm:$0xff]  ;;  %v8736_v7 = vld [vmem:[%s13132_s1 + $0x4] ss:$16 sps:$4 sm:$0xff]   ;;  %v8738_v8 = vld [vmem:[%s13132_s1] ss:$16 sps:$4 sm:$0xff]  }
  0xce   :  { %v8739_v9 = vld [vmem:[%s13132_s1 + $0x24] ss:$16 sps:$4 sm:$0xff]   ;;  %8199 = vmatprep.subr.bf16.mxu1 %v8736_v7  ;;  %460 = vmatprep.subr.bf16.mxu0 %v8736_v7  ;;  %v8741_v12 = vld [vmem:[%s13132_s1 + $0x20] ss:$16 sps:$4 sm:$0xff]   ;;  %v196_v14 = vld [vmem:[%s13131_s0 + $0x8] sm:$0xff] }
  0xcf   :  { %v209_v11 = vld [vmem:[%s13131_s0 + $0x70] sm:$0xff]  ;;  %8203 = vmatpush1.bf16.msra.mxu1 %v8738_v8  ;;  %461 = vmatpush1.bf16.msra.mxu0 %v8738_v8  ;;  %v195_v15 = vld [vmem:[%s13131_s0] sm:$0xff]  ;;  %v198_v18 = vld [vmem:[%s13131_s0 + $0x18] sm:$0xff] }
  0xd0   :  { %247 = vperm.xlu1 %8735, %v206_v3   ;;  %241 = vperm.xlu0 %8734, %v204_v4   ;;  %v8742_v13 = vld [vmem:[%s13132_s1 + $0x44] ss:$16 sps:$4 sm:$0xff]   ;;  %v8744_v16 = vld [vmem:[%s13132_s1 + $0x40] ss:$16 sps:$4 sm:$0xff]   ;;  %v8750_v21 = vld [vmem:[%s13132_s1 + $0xc] ss:$16 sps:$4 sm:$0xff]  }
  0xd1   :  { %8200 = vmatprep.subr.bf16.mxu1 %v8739_v9  ;;  %462 = vmatprep.subr.bf16.mxu0 %v8739_v9  ;;  %v8745_v17 = vld [vmem:[%s13132_s1 + $0x64] ss:$16 sps:$4 sm:$0xff]   ;;  %v8747_v20 = vld [vmem:[%s13132_s1 + $0x60] ss:$16 sps:$4 sm:$0xff]   ;;  %v200_v23 = vld [vmem:[%s13131_s0 + $0x28] sm:$0xff] }
  0xd2   :  { %v197_v19 = vld [vmem:[%s13131_s0 + $0x10] sm:$0xff]  ;;  %v199_v24 = vld [vmem:[%s13131_s0 + $0x20] sm:$0xff]  ;;  %v202_v25 = vld [vmem:[%s13131_s0 + $0x38] sm:$0xff] }
  0xd3   :  { %8204 = vmatpush1.bf16.msra.mxu1 %v8741_v12  ;;  %463 = vmatpush1.bf16.msra.mxu0 %v8741_v12  ;;  %v201_v26 = vld [vmem:[%s13131_s0 + $0x30] sm:$0xff]  ;;  %v8748_v36 = vld [vmem:[%s13132_s1 + $0x8] ss:$16 sps:$4 sm:$0xff]   ;;  %v8753_v38 = vld [vmem:[%s13132_s1 + $0x2c] ss:$16 sps:$4 sm:$0xff]  }
  0xd4   :  { %253 = vperm.xlu1 %8735, %v208_v5   ;;  %250 = vperm.xlu0 %8734, %v207_v6   ;;  %v8751_v41 = vld [vmem:[%s13132_s1 + $0x28] ss:$16 sps:$4 sm:$0xff]   ;;  %v8759_v42 = vld [vmem:[%s13132_s1 + $0x4c] ss:$16 sps:$4 sm:$0xff]   ;;  %v10545_v7 = vld [vmem:[#allocation11 + $0x40] ss:$16 sps:$4 sm:$0xff]  }
  0xd5   :  { %8201 = vmatprep.subr.bf16.mxu1 %v8742_v13  ;;  %464 = vmatprep.subr.bf16.mxu0 %v8742_v13  ;;  %v8757_v47 = vld [vmem:[%s13132_s1 + $0x48] ss:$16 sps:$4 sm:$0xff]   ;;  %v8768_v49 = vld [vmem:[%s13132_s1 + $0x6c] ss:$16 sps:$4 sm:$0xff]   ;;  %v10557_v12 = vld [vmem:[#allocation11 + $0x60] ss:$16 sps:$4 sm:$0xff]  }
  0xd6   :  { %v8766_v57 = vld [vmem:[%s13132_s1 + $0x68] ss:$16 sps:$4 sm:$0xff]  }
  0xd7   :  { %8205 = vmatpush1.bf16.msra.mxu1 %v8744_v16  ;;  %465 = vmatpush1.bf16.msra.mxu0 %v8744_v16  ;;  %v10535_v2 = vld [vmem:[#allocation11 + $0x44] ss:$16 sps:$4 sm:$0xff]  }
  0xd8   :  { %259 = vperm.xlu1 %8735, %v210_v10   ;;  %256 = vperm.xlu0 %8734, %v209_v11   ;;  %v10549_v9 = vld [vmem:[#allocation11 + $0x64] ss:$16 sps:$4 sm:$0xff]  }
  0xd9   :  { %8202 = vmatprep.subr.bf16.mxu1 %v8745_v17  ;;  %466 = vmatprep.subr.bf16.mxu0 %v8745_v17 }
  0xdb   :  { %8206 = vmatpush1.bf16.msra.mxu1 %v8747_v20  ;;  %467 = vmatpush1.bf16.msra.mxu0 %v8747_v20 }
  0xdc   :  { %217 = vperm.xlu1 %8735, %v196_v14   ;;  %214 = vperm.xlu0 %8734, %v195_v15   ;;  %v10563_v14 = vld [vmem:[#allocation11 + $0x84] ss:$16 sps:$4 sm:$0xff]  }
  0xdd   :  { %573 = vmatprep.subr.bf16.mxu1 %v8750_v21  ;;  %950 = vmatprep.subr.bf16.mxu0 %v10451_v22  ;;  %v10574_v21 = vld [vmem:[#allocation11 + $0xa4] ss:$16 sps:$4 sm:$0xff]  }
  0xe0   :  { %223 = vperm.xlu1 %8735, %v198_v18   ;;  %220 = vperm.xlu0 %8734, %v197_v19   ;;  %v10570_v19 = vld [vmem:[#allocation11 + $0x80] ss:$16 sps:$4 sm:$0xff]  }
  0xe4   :  { %229 = vperm.xlu1 %8735, %v200_v23   ;;  %226 = vperm.xlu0 %8734, %v199_v24   ;;  %v10580_v23 = vld [vmem:[#allocation11 + $0x8] ss:$16 sps:$4 sm:$0xff]   ;;  %v10582_v24 = vld [vmem:[#allocation11 + $0xa0] ss:$16 sps:$4 sm:$0xff]  }
  0xe8   :  { %235 = vperm.xlu1 %8735, %v202_v25   ;;  %232 = vperm.xlu0 %8734, %v201_v26   ;;  %v10586_v25 = vld [vmem:[#allocation11 + $0xc4] ss:$16 sps:$4 sm:$0xff]  }
 0x14b   :  { %v245_v29 = vpop.permute.xlu1 %244  ;;  %v239_v30 = vpop.permute.xlu0 %238 }
 0x14c   :  { %vm269_vm0 = vcmp.eq.s32.totalorder %v10467_v28, %v239_v30  ;;  %vm271_vm3 = vcmp.eq.s32.totalorder %v10467_v28, %v245_v29  ;;  %v10590_v30 = vld [vmem:[#allocation11 + $0x2c] ss:$16 sps:$4 sm:$0xff]  }
 0x14d   :  { %v7866_v34 = vsel %vm269_vm0, 1.0, %v10140_v33  ;;  %v7868_v43 = vsel %vm271_vm3, 1.0, %v10140_v33 }
 0x14f   :  { %v248_v31 = vpop.permute.xlu1 %247  ;;  %v242_v32 = vpop.permute.xlu0 %241 }
 0x150   :  { %vm270_vm1 = vcmp.eq.s32.totalorder %v10467_v28, %v242_v32  ;;  %vm272_vm4 = vcmp.eq.s32.totalorder %v10467_v28, %v248_v31  ;;  %v10598_v31 = vld [vmem:[#allocation11 + $0x28] ss:$16 sps:$4 sm:$0xff]  }
 0x151   :  { %v7867_v35 = vsel %vm270_vm1, 1.0, %v10140_v33  ;;  %v7869_v44 = vsel %vm272_vm4, 1.0, %v10140_v33 }
 0x152   :  { %v10476_v37 = vpack.c.bf16 %v7867_v35, %v7866_v34  ;;  %v10497_v48 = vpack.c.bf16 %v7869_v44, %v7868_v43  ;;  %v10602_v34 = vld [vmem:[#allocation11 + $0xe4] ss:$16 sps:$4 sm:$0xff]   ;;  %v10610_v35 = vld [vmem:[#allocation11 + $0xe0] ss:$16 sps:$4 sm:$0xff]   ;;  %v10643_v43 = vld [vmem:[#allocation11 + $0xa8] ss:$16 sps:$4 sm:$0xff]  }
 0x153   :  { %v254_v39 = vpop.permute.xlu1 %253  ;;  %v251_v40 = vpop.permute.xlu0 %250  ;;  %v10647_v44 = vld [vmem:[#allocation11 + $0xcc] ss:$16 sps:$4 sm:$0xff]  }
 0x154   :  { %7894 = vmatmul.mubr.msk.bf16.vlgmr.msra.gmra.mrb[0].mxu1 %vm435_vm2, %v10476_v37  ;;  %vm274_vm5 = vcmp.eq.s32.totalorder %v10467_v28, %v254_v39  ;;  %vm273_vm6 = vcmp.eq.s32.totalorder %v10467_v28, %v251_v40  ;;  %v10623_v39 = vld [vmem:[#allocation11 + $0x68] ss:$16 sps:$4 sm:$0xff]   ;;  %v10627_v40 = vld [vmem:[#allocation11 + $0x8c] ss:$16 sps:$4 sm:$0xff]  }
 0x155   :  { %574 = vmatpush1.bf16.msra.mxu1 %v8748_v36  ;;  %542 = vmatprep.mubr.bf16.mxu1 %v13114_v0  ;;  %v7871_v58 = vsel %vm274_vm5, 1.0, %v10140_v33  ;;  %v7870_v59 = vsel %vm273_vm6, 1.0, %v10140_v33  ;;  %v10614_v36 = vld [vmem:[#allocation11 + $0x48] ss:$16 sps:$4 sm:$0xff]  }
 0x156   :  { %575 = vmatprep.subr.bf16.mxu1 %v8753_v38  ;;  %v10532_v1 = vpack.c.bf16 %v7871_v58, %v7870_v59  ;;  %v10617_v38 = vld [vmem:[#allocation11 + $0x6c] ss:$16 sps:$4 sm:$0xff]  }
 0x157   :  { %v260_v45 = vpop.permute.xlu1 %259  ;;  %v257_v46 = vpop.permute.xlu0 %256 }
 0x158   :  { %vm276_vm11 = vcmp.eq.s32.totalorder %v10467_v28, %v260_v45  ;;  %vm275_vm12 = vcmp.eq.s32.totalorder %v10467_v28, %v257_v46  ;;  %v10651_v45 = vld [vmem:[#allocation11 + $0xc8] ss:$16 sps:$4 sm:$0xff]   ;;  %v10655_v46 = vld [vmem:[#allocation11 + $0xec] ss:$16 sps:$4 sm:$0xff]  }
 0x159   :  { %576 = vmatpush1.bf16.msra.mxu1 %v8751_v41  ;;  %v7873_v10 = vsel %vm276_vm11, 1.0, %v10140_v33  ;;  %v7872_v11 = vsel %vm275_vm12, 1.0, %v10140_v33  ;;  %v10633_v41 = vld [vmem:[#allocation11 + $0x88] ss:$16 sps:$4 sm:$0xff]  }
 0x15a   :  { %577 = vmatprep.subr.bf16.mxu1 %v8759_v42  ;;  %v10560_v13 = vpack.c.bf16 %v7873_v10, %v7872_v11  ;;  %v10637_v42 = vld [vmem:[#allocation11 + $0xac] ss:$16 sps:$4 sm:$0xff]   ;;  %v336_v10 = vshrl.u32 %v211_v27, 7 }
 0x15b   :  { %v218_v50 = vpop.permute.xlu1 %217  ;;  %v215_v51 = vpop.permute.xlu0 %214 }
 0x15c   :  { %vm262_vm7 = vcmp.eq.s32.totalorder %v10467_v28, %v218_v50  ;;  %vm261_vm8 = vcmp.eq.s32.totalorder %v10467_v28, %v215_v51  ;;  %7895 = vmatmul.mubr.msk.bf16.gmra.mrb[4].mxu1 %vm435_vm2, %v10497_v48  ;;  %v10738_v11 = vsub.s32 1, %v336_v10 }
 0x15d   :  { %v7859_v52 = vsel %vm262_vm7, 1.0, %v10140_v33  ;;  %v7858_v53 = vsel %vm261_vm8, 1.0, %v10140_v33  ;;  %552 = vmatprep.mubr.bf16.mxu1 %v13114_v0  ;;  %578 = vmatpush1.bf16.msra.mxu1 %v8757_v47  ;;  %v10661_v47 = vld [vmem:[#allocation11 + $0xe8] ss:$16 sps:$4 sm:$0xff]  }
 0x15e   :  { %v10513_v55 = vpack.c.bf16 %v7859_v52, %v7858_v53  ;;  %579 = vmatprep.subr.bf16.mxu1 %v8768_v49  ;;  %13144 = vst [vmem:[#allocation38_spill] sm:$0xff] %v10738_v11 }
 0x15f   :  { %v224_v60 = vpop.permute.xlu1 %223  ;;  %v221_v61 = vpop.permute.xlu0 %220 }
 0x160   :  { %vm264_vm9 = vcmp.eq.s32.totalorder %v10467_v28, %v224_v60  ;;  %vm263_vm10 = vcmp.eq.s32.totalorder %v10467_v28, %v221_v61  ;;  %7890 = vmatmul.mubr.msk.bf16.vlgmr.msra.gmra.mrb[0].mxu0 %vm435_vm2, %v10513_v55 }
 0x161   :  { %951 = vmatpush1.bf16.msra.mxu0 %v10510_v54  ;;  %502 = vmatprep.mubr.bf16.mxu0 %v13114_v0  ;;  %v7861_v3 = vsel %vm264_vm9, 1.0, %v10140_v33  ;;  %v7860_v4 = vsel %vm263_vm10, 1.0, %v10140_v33 }
 0x162   :  { %952 = vmatprep.subr.bf16.mxu0 %v10515_v56  ;;  %580 = vmatpush1.bf16.msra.mxu1 %v8766_v57  ;;  %v310_v8 = vpack.c.bf16 %v7861_v3, %v7860_v4 }
 0x163   :  { %993 = vmatprep.subr.bf16.mxu1 %v10522_v62  ;;  %v230_v5 = vpop.permute.xlu1 %229  ;;  %v227_v6 = vpop.permute.xlu0 %226 }
 0x164   :  { %7896 = vmatmul.mubr.msk.bf16.gmra.mrb[8].mxu1 %vm435_vm2, %v10532_v1  ;;  %vm266_vm13 = vcmp.eq.s32.totalorder %v10467_v28, %v230_v5  ;;  %vm265_vm14 = vcmp.eq.s32.totalorder %v10467_v28, %v227_v6 }
 0x165   :  { %953 = vmatpush1.bf16.msra.mxu0 %v10529_v63  ;;  %562 = vmatprep.mubr.bf16.mxu1 %v13114_v0  ;;  %v7863_v15 = vsel %vm266_vm13, 1.0, %v10140_v33  ;;  %v7862_v16 = vsel %vm265_vm14, 1.0, %v10140_v33 }
 0x166   :  { %954 = vmatprep.subr.bf16.mxu0 %v10535_v2  ;;  %v311_v20 = vpack.c.bf16 %v7863_v15, %v7862_v16  ;;  %v10740_v15 = vsub.s32 0, %v336_v10 }
 0x167   :  { %v236_v17 = vpop.permute.xlu1 %235  ;;  %v233_v18 = vpop.permute.xlu0 %232 }
 0x168   :  { %7891 = vmatmul.mubr.msk.bf16.gmra.mrb[4].mxu0 %vm435_vm2, %v310_v8  ;;  %vm268_vm15 = vcmp.eq.s32.totalorder %v10467_v28, %v236_v17  ;;  %vm267_vm0 = vcmp.eq.s32.totalorder %v10467_v28, %v233_v18  ;;  %v10596_v28 = vld [vmem:[#allocation11 + $0xc0] ss:$16 sps:$4 sm:$0xff]   ;;  %13145 = vst [vmem:[#allocation39_spill] sm:$0xff] %v10740_v15 }
 0x169   :  { %955 = vmatpush1.bf16.msra.mxu0 %v10545_v7  ;;  %512 = vmatprep.mubr.bf16.mxu0 %v13114_v0  ;;  %v7865_v26 = vsel %vm268_vm15, 1.0, %v10140_v33  ;;  %v7864_v29 = vsel %vm267_vm0, 1.0, %v10140_v33  ;;  %v10605_v33 = vld [vmem:[#allocation11 + $0x4c] ss:$16 sps:$4 sm:$0xff]  }
 0x16a   :  { %956 = vmatprep.subr.bf16.mxu0 %v10549_v9  ;;  %v312_v32 = vpack.c.bf16 %v7865_v26, %v7864_v29 }
 0x16c   :  { %7897 = vmatmul.mubr.msk.bf16.gmra.mrb[12].mxu1 %vm435_vm2, %v10560_v13 }
 0x16d   :  { %957 = vmatpush1.bf16.msra.mxu0 %v10557_v12  ;;  %605 = vmatprep.mubr.bf16.mxu1 %v13114_v0 }
 0x16e   :  { %958 = vmatprep.subr.bf16.mxu0 %v10563_v14 }
 0x170   :  { %7892 = vmatmul.mubr.msk.bf16.gmra.mrb[8].mxu0 %vm435_vm2, %v311_v20 }
 0x171   :  { %959 = vmatpush1.bf16.msra.mxu0 %v10570_v19  ;;  %522 = vmatprep.mubr.bf16.mxu0 %v13114_v0 }
 0x172   :  { %960 = vmatprep.subr.bf16.mxu0 %v10574_v21 }
 0x174   :  { %7898 = vmatmul.mubr.msk.bf16.vlgmr.msra.gmra.mrb[16].mxu1 %vm435_vm2, %v10513_v55 }
 0x175   :  { %994 = vmatpush1.bf16.msra.mxu1 %v10580_v23  ;;  %961 = vmatpush1.bf16.msra.mxu0 %v10582_v24 }
 0x176   :  { %962 = vmatprep.subr.bf16.mxu0 %v10586_v25  ;;  %615 = vmatprep.mubr.bf16.mxu1 %v13114_v0 }
 0x177   :  { %995 = vmatprep.subr.bf16.mxu1 %v10590_v30 }
 0x178   :  { %7893 = vmatmul.mubr.msk.bf16.gmra.mrb[12].mxu0 %vm435_vm2, %v312_v32 }
 0x179   :  { %963 = vmatpush1.bf16.msra.mxu0 %v10596_v28  ;;  %996 = vmatpush1.bf16.msra.mxu1 %v10598_v31 }
 0x17a   :  { %964 = vmatprep.subr.bf16.mxu0 %v10602_v34  ;;  %982 = vmatprep.mubr.bf16.mxu0 %v13114_v0 }
 0x17b   :  { %997 = vmatprep.subr.bf16.mxu1 %v10605_v33 }
 0x17c   :  { %7899 = vmatmul.mubr.msk.bf16.gmra.mrb[20].mxu1 %vm435_vm2, %v310_v8 }
 0x17d   :  { %965 = vmatpush1.bf16.msra.mxu0 %v10610_v35  ;;  %625 = vmatprep.mubr.bf16.mxu1 %v13114_v0 }
 0x17e   :  { %998 = vmatpush1.bf16.msra.mxu1 %v10614_v36  ;;  %1091 = vmatprep.subr.bf16.mxu0 %v10451_v22 }
 0x17f   :  { %999 = vmatprep.subr.bf16.mxu1 %v10617_v38 }
 0x180   :  { %983 = vmatmul.mubr.bf16.vlgmr.msra.gmra.mrb[0].mxu0 %v13114_v0 }
 0x181   :  { %1092 = vmatpush1.bf16.msra.mxu0 %v10510_v54  ;;  %1123 = vmatprep.mubr.bf16.mxu0 %v13114_v0 }
 0x182   :  { %1000 = vmatpush1.bf16.msra.mxu1 %v10623_v39  ;;  %1093 = vmatprep.subr.bf16.mxu0 %v10515_v56 }
 0x183   :  { %1001 = vmatprep.subr.bf16.mxu1 %v10627_v40 }
 0x184   :  { %7900 = vmatmul.mubr.msk.bf16.gmra.mrb[24].mxu1 %vm435_vm2, %v311_v20 }
 0x185   :  { %635 = vmatprep.mubr.bf16.mxu1 %v13114_v0  ;;  %1094 = vmatpush1.bf16.msra.mxu0 %v10529_v63 }
 0x186   :  { %1002 = vmatpush1.bf16.msra.mxu1 %v10633_v41  ;;  %1095 = vmatprep.subr.bf16.mxu0 %v10535_v2 }
 0x187   :  { %1003 = vmatprep.subr.bf16.mxu1 %v10637_v42 }
 0x189   :  { %1096 = vmatpush1.bf16.msra.mxu0 %v10545_v7 }
 0x18a   :  { %1004 = vmatpush1.bf16.msra.mxu1 %v10643_v43  ;;  %1097 = vmatprep.subr.bf16.mxu0 %v10549_v9 }
 0x18b   :  { %1005 = vmatprep.subr.bf16.mxu1 %v10647_v44 }
 0x18c   :  { %7901 = vmatmul.mubr.msk.bf16.gmra.mrb[28].mxu1 %vm435_vm2, %v312_v32 }
 0x18d   :  { %645 = vmatprep.mubr.bf16.mxu1 %v13114_v0  ;;  %1098 = vmatpush1.bf16.msra.mxu0 %v10557_v12 }
 0x18e   :  { %1006 = vmatpush1.bf16.msra.mxu1 %v10651_v45  ;;  %1099 = vmatprep.subr.bf16.mxu0 %v10563_v14 }
 0x18f   :  { %1007 = vmatprep.subr.bf16.mxu1 %v10655_v46 }
 0x191   :  { %1100 = vmatpush1.bf16.msra.mxu0 %v10570_v19 }
 0x192   :  { %1008 = vmatpush1.bf16.msra.mxu1 %v10661_v47  ;;  %1101 = vmatprep.subr.bf16.mxu0 %v10574_v21 }
 0x193   :  { %1134 = vmatprep.subr.bf16.mxu1 %v10522_v62 }
 0x194   :  { %7902 = vmatmul.mubr.msk.bf16.gmra.mrb[32].mxu1 %vm435_vm2, %v10476_v37 }
 0x195   :  { %655 = vmatprep.mubr.bf16.mxu1 %v13114_v0  ;;  %1102 = vmatpush1.bf16.msra.mxu0 %v10582_v24 }
 0x196   :  { %1103 = vmatprep.subr.bf16.mxu0 %v10586_v25 }
 0x199   :  { %1104 = vmatpush1.bf16.msra.mxu0 %v10596_v28 }
 0x19a   :  { %1105 = vmatprep.subr.bf16.mxu0 %v10602_v34 }
 0x19c   :  { %7903 = vmatmul.mubr.msk.bf16.gmra.mrb[36].mxu1 %vm435_vm2, %v10497_v48 }
 0x19d   :  { %665 = vmatprep.mubr.bf16.mxu1 %v13114_v0  ;;  %1106 = vmatpush1.bf16.msra.mxu0 %v10610_v35 }
 0x19e   :  { %1232 = vmatprep.subr.bf16.mxu0 %v10451_v22 }
 0x1a4   :  { %7904 = vmatmul.mubr.msk.bf16.gmra.mrb[40].mxu1 %vm435_vm2, %v10532_v1 }
 0x1a5   :  { %675 = vmatprep.mubr.bf16.mxu1 %v13114_v0 }
 0x1ac   :  { %7905 = vmatmul.mubr.msk.bf16.gmra.mrb[44].mxu1 %vm435_vm2, %v10560_v13  ;;  %v333_v13 = vld [vmem:[#allocation4] sm:$0xf] }
 0x1ad   :  { %1025 = vmatprep.mubr.bf16.mxu1 %v13114_v0  ;;  %v10743_v16 = vrot.slane %v333_v13, %v10738_v11  ;;  %v10746_v17 = vrot.slane %v333_v13, %v10740_v15  ;;  %v10754_v11 = vsub.s32 3, %v336_v10 }
 0x1af   :  { %13147 = vst [vmem:[#allocation41_spill] sm:$0xff] %v10754_v11 }
 0x1b4   :  { %1026 = vmatmul.mubr.bf16.vlgmr.msra.gmra.mrb[16].mxu1 %v13114_v0 }
 0x1b5   :  { %1135 = vmatpush1.bf16.msra.mxu1 %v10580_v23  ;;  %1166 = vmatprep.mubr.bf16.mxu1 %v13114_v0 }
 0x1b6   :  { %1136 = vmatprep.subr.bf16.mxu1 %v10590_v30 }
 0x1b9   :  { %1137 = vmatpush1.bf16.msra.mxu1 %v10598_v31 }
 0x1ba   :  { %1138 = vmatprep.subr.bf16.mxu1 %v10605_v33 }
 0x1bd   :  { %1139 = vmatpush1.bf16.msra.mxu1 %v10614_v36 }
 0x1be   :  { %1140 = vmatprep.subr.bf16.mxu1 %v10617_v38 }
 0x1c1   :  { %1141 = vmatpush1.bf16.msra.mxu1 %v10623_v39 }
 0x1c2   :  { %1142 = vmatprep.subr.bf16.mxu1 %v10627_v40 }
 0x1c5   :  { %1143 = vmatpush1.bf16.msra.mxu1 %v10633_v41 }
 0x1c6   :  { %1144 = vmatprep.subr.bf16.mxu1 %v10637_v42 }
 0x1c9   :  { %1145 = vmatpush1.bf16.msra.mxu1 %v10643_v43 }
 0x1ca   :  { %1146 = vmatprep.subr.bf16.mxu1 %v10647_v44 }
 0x1cd   :  { %1147 = vmatpush1.bf16.msra.mxu1 %v10651_v45 }
 0x1ce   :  { %1148 = vmatprep.subr.bf16.mxu1 %v10655_v46 }
 0x1d1   :  { %1149 = vmatpush1.bf16.msra.mxu1 %v10661_v47 }
 0x1d2   :  { %1275 = vmatprep.subr.bf16.mxu1 %v10522_v62 }
 0x227   :  { %v10705_v22 = vpop.f32.mrb[0].mxu1 }
 0x228   :  { %v10707_v37 = vpop.f32.mrb[1].mxu1 }
 0x229   :  { %v10709_v48 = vpop.f32.mrb[2].mxu1 }
 0x22a   :  { %v10711_v49 = vpop.f32.mrb[3].mxu1 }
 0x22f   :  { %v10713_v50 = vpop.f32.mrb[4].mxu1 }
 0x230   :  { %v10715_v51 = vpop.f32.mrb[5].mxu1 }
 0x231   :  { %13133 = vst [vmem:[#allocation27_spill] sm:$0xff] %v10715_v51  ;;  %v10717_v52 = vpop.f32.mrb[6].mxu1 }
 0x232   :  { %13134 = vst [vmem:[#allocation28_spill] sm:$0xff] %v10717_v52  ;;  %v10719_v53 = vpop.f32.mrb[7].mxu1 }
 0x233   :  { %13135 = vst [vmem:[#allocation29_spill] sm:$0xff] %v10719_v53 }
 0x237   :  { %v10721_v55 = vpop.f32.mrb[8].mxu1 }
 0x238   :  { %13136 = vst [vmem:[#allocation30_spill] sm:$0xff] %v10721_v55  ;;  %v10723_v57 = vpop.f32.mrb[9].mxu1 }
 0x239   :  { %13137 = vst [vmem:[#allocation31_spill] sm:$0xff] %v10723_v57  ;;  %v10725_v58 = vpop.f32.mrb[10].mxu1 }
 0x23a   :  { %13138 = vst [vmem:[#allocation32_spill] sm:$0xff] %v10725_v58  ;;  %v10727_v59 = vpop.f32.mrb[11].mxu1 }
 0x23b   :  { %13139 = vst [vmem:[#allocation33_spill] sm:$0xff] %v10727_v59 }
 0x23f   :  { %v10729_v60 = vpop.f32.mrb[12].mxu1 }
 0x240   :  { %13140 = vst [vmem:[#allocation34_spill] sm:$0xff] %v10729_v60  ;;  %v10731_v61 = vpop.f32.mrb[13].mxu1 }
 0x241   :  { %13141 = vst [vmem:[#allocation35_spill] sm:$0xff] %v10731_v61  ;;  %v10733_v1 = vpop.f32.mrb[14].mxu1 }
 0x242   :  { %13142 = vst [vmem:[#allocation36_spill] sm:$0xff] %v10733_v1  ;;  %v10735_v3 = vpop.f32.mrb[15].mxu1  ;;  %v10752_v1 = vsub.s32 2, %v336_v10 }
 0x243   :  { %13143 = vst [vmem:[#allocation37_spill] sm:$0xff] %v10735_v3 }
 0x244   :  { %13146 = vst [vmem:[#allocation40_spill] sm:$0xff] %v10752_v1 }
 0x253   :  { %v984_v4 = vpop.f32.mrb[0].mxu0 }
 0x254   :  { %v986_v5 = vpop.f32.mrb[1].mxu0  ;;  %v8207_v20 = vadd.f32 %v984_v4, %v10746_v17  ;;  %v10760_v4 = vrot.slane %v333_v13, %v10754_v11 }
 0x255   :  { %v988_v6 = vpop.f32.mrb[2].mxu0  ;;  %v8208_v18 = vadd.f32 %v986_v5, %v10743_v16  ;;  %v10757_v5 = vrot.slane %v333_v13, %v10752_v1 }
 0x256   :  { %v990_v8 = vpop.f32.mrb[3].mxu0  ;;  %v8209_v27 = vadd.f32 %v988_v6, %v10746_v17  ;;  %v1044_v32 = vmul.f32 0.5, %v8207_v20 }
 0x257   :  { %v8210_v26 = vadd.f32 %v990_v8, %v10743_v16  ;;  %v1052_v29 = vmul.f32 0.5, %v8208_v18 }
 0x258   :  { %v1045_v3 = vmul.f32 0.5, %v8209_v27 }
 0x259   :  { %v1053_v0 = vmul.f32 0.5, %v8210_v26  ;;  %9104 = vtanh.f32 %v1052_v29 }
 0x25a   :  { %9106 = vtanh.f32 %v1044_v32 }
 0x25b   :  { %9108 = vtanh.f32 %v1053_v0 }
 0x25c   :  { %9110 = vtanh.f32 %v1045_v3 }
 0x263   :  { %v9105_v26 = vpop.eup %9104 }
 0x264   :  { %v9107_v27 = vpop.eup %9106  ;;  %v1056_v1 = vmul.f32 0.5, %v9105_v26 }
 0x265   :  { %v9109_v32 = vpop.eup %9108  ;;  %v1048_v15 = vmul.f32 0.5, %v9107_v27 }
 0x266   :  { %v9111_v13 = vpop.eup %9110  ;;  %v1057_v61 = vmul.f32 0.5, %v9109_v32  ;;  %v1058_v60 = vadd.f32 0.5, %v1056_v1 }
 0x267   :  { %v1049_v59 = vmul.f32 0.5, %v9111_v13 }
 0x268   :  { %v1059_v58 = vadd.f32 0.5, %v1057_v61 }
 0x269   :  { %v1051_v57 = vadd.f32 0.5, %v1049_v59 }
 0x287   :  { %v1027_v8 = vpop.f32.mrb[16].mxu1 }
 0x288   :  { %v8255_v6 = vadd.f32 %v1027_v8, %v10757_v5  ;;  %v1029_v18 = vpop.f32.mrb[17].mxu1 }
 0x289   :  { %v1031_v20 = vpop.f32.mrb[18].mxu1  ;;  %v8256_v29 = vadd.f32 %v1029_v18, %v10760_v4 }
 0x28a   :  { %9112 = vtanh.f32 %v8255_v6  ;;  %v8257_v0 = vadd.f32 %v1031_v20, %v10757_v5  ;;  %v1033_v10 = vpop.f32.mrb[19].mxu1  ;;  %v1050_v6 = vadd.f32 0.5, %v1048_v15  ;;  %v1070_v20 = vmul.f32 0.0, %v1058_v60 }
 0x28b   :  { %v8258_v3 = vadd.f32 %v1033_v10, %v10760_v4  ;;  %v1062_v11 = vmul.f32 0.5, %v8256_v29  ;;  %v1071_v10 = vmul.f32 0.0, %v1059_v58 }
 0x28c   :  { %9114 = vtanh.f32 %v8257_v0 }
 0x28d   :  { %v1063_v8 = vmul.f32 0.5, %v8258_v3  ;;  %9116 = vtanh.f32 %v1062_v11 }
 0x28f   :  { %9118 = vtanh.f32 %v1063_v8 }
 0x294   :  { %v9113_v18 = vpop.eup %9112 }
 0x295   :  { %v1072_v55 = vmul.f32 %v9113_v18, %v1050_v6 }
 0x296   :  { %v9115_v53 = vpop.eup %9114 }
 0x297   :  { %v10766_v52 = vadd.f32 %v1072_v55, %v1070_v20  ;;  %v1073_v26 = vmul.f32 %v9115_v53, %v1051_v57  ;;  %v9117_v1 = vpop.eup %9116  ;;  %v13149_v53 = vmov 0   ;;  %v10808_v55 = vld [vmem:[#allocation11 + $0x4] ss:$16 sps:$4 sm:$0xff]  }
 0x298   :  { %v1066_v15 = vmul.f32 0.5, %v9117_v1 }
 0x299   :  { %9120 = vtanh.f32 %v10766_v52  ;;  %v10769_v29 = vadd.f32 %v1073_v26, %v1071_v10  ;;  %v9119_v11 = vpop.eup %9118 }
 0x29a   :  { %v1067_v61 = vmul.f32 0.5, %v9119_v11  ;;  %v1068_v27 = vadd.f32 0.5, %v1066_v15 }
 0x29b   :  { %9122 = vtanh.f32 %v10769_v29 }
 0x29c   :  { %v1069_v60 = vadd.f32 0.5, %v1067_v61 }
 0x2a3   :  { %v9121_v0 = vpop.eup %9120 }
 0x2a4   :  { %v1078_v3 = vmul.f32 %v9121_v0, %v1068_v27 }
 0x2a5   :  { %v9123_v59 = vpop.eup %9122 }
 0x2a6   :  { %v1079_v32 = vmul.f32 %v9123_v59, %v1069_v60 }
 0x2a8   :  { %v10772_v58 = vpack.c.bf16 %v1079_v32, %v1078_v3 }
 0x2aa   :  { %13148 = vst [vmem:[#allocation42_spill] sm:$0xff] %v10772_v58  ;;  %1124 = vmatmul.mubr.bf16.vlgmr.msra.gmra.mrb[4].mxu0 %v10772_v58  ;;  %1167 = vmatmul.mubr.bf16.vlgmr.msra.gmra.mrb[20].mxu1 %v10772_v58 }
 0x2ab   :  { %1233 = vmatpush1.bf16.msra.mxu0 %v10510_v54  ;;  %1276 = vmatpush1.bf16.msra.mxu1 %v10580_v23 }
 0x2ac   :  { %1234 = vmatprep.subr.bf16.mxu0 %v10515_v56  ;;  %1277 = vmatprep.subr.bf16.mxu1 %v10590_v30 }
 0x2ad   :  { %1264 = vmatprep.mubr.bf16.mxu0 %v13149_v53  ;;  %1307 = vmatprep.mubr.bf16.mxu1 %v13149_v53 }
 0x2af   :  { %1235 = vmatpush1.bf16.msra.mxu0 %v10529_v63  ;;  %1278 = vmatpush1.bf16.msra.mxu1 %v10598_v31 }
 0x2b0   :  { %1236 = vmatprep.subr.bf16.mxu0 %v10535_v2  ;;  %1279 = vmatprep.subr.bf16.mxu1 %v10605_v33 }
 0x2b3   :  { %1237 = vmatpush1.bf16.msra.mxu0 %v10545_v7  ;;  %1280 = vmatpush1.bf16.msra.mxu1 %v10614_v36 }
 0x2b4   :  { %1238 = vmatprep.subr.bf16.mxu0 %v10549_v9  ;;  %1281 = vmatprep.subr.bf16.mxu1 %v10617_v38 }
 0x2b7   :  { %1239 = vmatpush1.bf16.msra.mxu0 %v10557_v12  ;;  %1282 = vmatpush1.bf16.msra.mxu1 %v10623_v39 }
 0x2b8   :  { %1240 = vmatprep.subr.bf16.mxu0 %v10563_v14  ;;  %1283 = vmatprep.subr.bf16.mxu1 %v10627_v40 }
 0x2bb   :  { %1241 = vmatpush1.bf16.msra.mxu0 %v10570_v19  ;;  %1284 = vmatpush1.bf16.msra.mxu1 %v10633_v41 }
 0x2bc   :  { %1242 = vmatprep.subr.bf16.mxu0 %v10574_v21  ;;  %1285 = vmatprep.subr.bf16.mxu1 %v10637_v42 }
 0x2bf   :  { %1243 = vmatpush1.bf16.msra.mxu0 %v10582_v24  ;;  %1286 = vmatpush1.bf16.msra.mxu1 %v10643_v43 }
 0x2c0   :  { %1244 = vmatprep.subr.bf16.mxu0 %v10586_v25  ;;  %1287 = vmatprep.subr.bf16.mxu1 %v10647_v44 }
 0x2c3   :  { %1245 = vmatpush1.bf16.msra.mxu0 %v10596_v28  ;;  %1288 = vmatpush1.bf16.msra.mxu1 %v10651_v45 }
 0x2c4   :  { %1246 = vmatprep.subr.bf16.mxu0 %v10602_v34  ;;  %1289 = vmatprep.subr.bf16.mxu1 %v10655_v46 }
 0x2c7   :  { %1247 = vmatpush1.bf16.msra.mxu0 %v10610_v35  ;;  %1290 = vmatpush1.bf16.msra.mxu1 %v10661_v47 }
 0x2c8   :  { %1373 = vmatprep.subr.bf16.mxu0 %v10808_v55  ;;  %1416 = vmatprep.subr.bf16.mxu1 %v10522_v62 }
 0x37d   :  { %v1125_v57 = vpop.f32.mrb[4].mxu0  ;;  %v1168_v13 = vpop.f32.mrb[20].mxu1 }
 0x37e   :  { %v8211_v8 = vadd.f32 %v1125_v57, %v10746_v17  ;;  %v1127_v6 = vpop.f32.mrb[5].mxu0  ;;  %v1170_v18 = vpop.f32.mrb[21].mxu1  ;;  %v8259_v60 = vadd.f32 %v1168_v13, %v10757_v5 }
 0x37f   :  { %v8212_v20 = vadd.f32 %v1127_v6, %v10743_v16  ;;  %v1129_v10 = vpop.f32.mrb[6].mxu0  ;;  %v1172_v26 = vpop.f32.mrb[22].mxu1  ;;  %v8260_v57 = vadd.f32 %v1170_v18, %v10760_v4 }
 0x380   :  { %v1185_v1 = vmul.f32 0.5, %v8211_v8  ;;  %v8213_v11 = vadd.f32 %v1129_v10, %v10746_v17  ;;  %v1131_v15 = vpop.f32.mrb[7].mxu0  ;;  %v1174_v61 = vpop.f32.mrb[23].mxu1  ;;  %v8261_v32 = vadd.f32 %v1172_v26, %v10757_v5 }
 0x381   :  { %v1193_v0 = vmul.f32 0.5, %v8212_v20  ;;  %v8214_v27 = vadd.f32 %v1131_v15, %v10743_v16  ;;  %v8262_v8 = vadd.f32 %v1174_v61, %v10760_v4  ;;  %v1203_v15 = vmul.f32 0.5, %v8260_v57 }
 0x382   :  { %9124 = vtanh.f32 %v1185_v1  ;;  %v1186_v59 = vmul.f32 0.5, %v8213_v11 }
 0x383   :  { %9126 = vtanh.f32 %v1193_v0  ;;  %v1194_v3 = vmul.f32 0.5, %v8214_v27  ;;  %v1204_v58 = vmul.f32 0.5, %v8262_v8 }
 0x384   :  { %9128 = vtanh.f32 %v1186_v59 }
 0x385   :  { %9130 = vtanh.f32 %v8259_v60 }
 0x386   :  { %9132 = vtanh.f32 %v1194_v3 }
 0x387   :  { %9134 = vtanh.f32 %v8261_v32 }
 0x388   :  { %9136 = vtanh.f32 %v1203_v15 }
 0x389   :  { %9138 = vtanh.f32 %v1204_v58 }
 0x38c   :  { %v9125_v6 = vpop.eup %9124 }
 0x38d   :  { %v9127_v20 = vpop.eup %9126  ;;  %v1189_v10 = vmul.f32 0.5, %v9125_v6 }
 0x38e   :  { %v1197_v1 = vmul.f32 0.5, %v9127_v20  ;;  %v9129_v13 = vpop.eup %9128 }
 0x38f   :  { %v1191_v11 = vadd.f32 0.5, %v1189_v10  ;;  %v9131_v0 = vpop.eup %9130  ;;  %v1190_v59 = vmul.f32 0.5, %v9129_v13 }
 0x390   :  { %v1199_v27 = vadd.f32 0.5, %v1197_v1  ;;  %v9133_v51 = vpop.eup %9132 }
 0x391   :  { %v1213_v26 = vmul.f32 %v9131_v0, %v1191_v11  ;;  %v1192_v18 = vadd.f32 0.5, %v1190_v59  ;;  %v1198_v3 = vmul.f32 0.5, %v9133_v51  ;;  %v9135_v61 = vpop.eup %9134 }
 0x392   :  { %v1211_v60 = vmul.f32 %v1199_v27, %v10766_v52  ;;  %v9137_v10 = vpop.eup %9136 }
 0x393   :  { %v1200_v6 = vadd.f32 0.5, %v1198_v3  ;;  %v1214_v57 = vmul.f32 %v9135_v61, %v1192_v18  ;;  %v9139_v15 = vpop.eup %9138  ;;  %v1207_v1 = vmul.f32 0.5, %v9137_v10 }
 0x394   :  { %v10821_v32 = vadd.f32 %v1213_v26, %v1211_v60  ;;  %v1208_v52 = vmul.f32 0.5, %v9139_v15 }
 0x395   :  { %v1212_v8 = vmul.f32 %v1200_v6, %v10769_v29  ;;  %v1209_v51 = vadd.f32 0.5, %v1207_v1 }
 0x396   :  { %9140 = vtanh.f32 %v10821_v32  ;;  %v1210_v58 = vadd.f32 0.5, %v1208_v52 }
 0x397   :  { %v10825_v20 = vadd.f32 %v1214_v57, %v1212_v8 }
 0x399   :  { %9142 = vtanh.f32 %v10825_v20 }
 0x3a0   :  { %v9141_v13 = vpop.eup %9140 }
 0x3a1   :  { %v1219_v0 = vmul.f32 %v9141_v13, %v1209_v51 }
 0x3a3   :  { %v9143_v11 = vpop.eup %9142 }
 0x3a4   :  { %v1220_v27 = vmul.f32 %v9143_v11, %v1210_v58 }
 0x3a6   :  { %v10828_v59 = vpack.c.bf16 %v1220_v27, %v1219_v0 }
 0x3a8   :  { %13150 = vst [vmem:[#allocation43_spill] sm:$0xff] %v10828_v59  ;;  %1265 = vmatmul.mubr.bf16.vlgmr.msra.gmra.mrb[8].mxu0 %v10828_v59  ;;  %1308 = vmatmul.mubr.bf16.vlgmr.msra.gmra.mrb[24].mxu1 %v10828_v59 }
 0x3a9   :  { %1374 = vmatpush1.bf16.msra.mxu0 %v10510_v54  ;;  %1417 = vmatpush1.bf16.msra.mxu1 %v10580_v23 }
 0x3aa   :  { %1375 = vmatprep.subr.bf16.mxu0 %v10515_v56  ;;  %1418 = vmatprep.subr.bf16.mxu1 %v10590_v30 }
 0x3ab   :  { %1405 = vmatprep.mubr.bf16.mxu0 %v13149_v53  ;;  %1448 = vmatprep.mubr.bf16.mxu1 %v13149_v53 }
 0x3ad   :  { %1376 = vmatpush1.bf16.msra.mxu0 %v10529_v63  ;;  %1419 = vmatpush1.bf16.msra.mxu1 %v10598_v31 }
 0x3ae   :  { %1377 = vmatprep.subr.bf16.mxu0 %v10535_v2  ;;  %1420 = vmatprep.subr.bf16.mxu1 %v10605_v33 }
 0x3b1   :  { %1378 = vmatpush1.bf16.msra.mxu0 %v10545_v7  ;;  %1421 = vmatpush1.bf16.msra.mxu1 %v10614_v36 }
 0x3b2   :  { %1379 = vmatprep.subr.bf16.mxu0 %v10549_v9  ;;  %1422 = vmatprep.subr.bf16.mxu1 %v10617_v38 }
 0x3b5   :  { %1380 = vmatpush1.bf16.msra.mxu0 %v10557_v12  ;;  %1423 = vmatpush1.bf16.msra.mxu1 %v10623_v39 }
 0x3b6   :  { %1381 = vmatprep.subr.bf16.mxu0 %v10563_v14  ;;  %1424 = vmatprep.subr.bf16.mxu1 %v10627_v40 }
 0x3b9   :  { %1382 = vmatpush1.bf16.msra.mxu0 %v10570_v19  ;;  %1425 = vmatpush1.bf16.msra.mxu1 %v10633_v41 }
 0x3ba   :  { %1383 = vmatprep.subr.bf16.mxu0 %v10574_v21  ;;  %1426 = vmatprep.subr.bf16.mxu1 %v10637_v42 }
 0x3bd   :  { %1384 = vmatpush1.bf16.msra.mxu0 %v10582_v24  ;;  %1427 = vmatpush1.bf16.msra.mxu1 %v10643_v43 }
 0x3be   :  { %1385 = vmatprep.subr.bf16.mxu0 %v10586_v25  ;;  %1428 = vmatprep.subr.bf16.mxu1 %v10647_v44 }
 0x3c1   :  { %1386 = vmatpush1.bf16.msra.mxu0 %v10596_v28  ;;  %1429 = vmatpush1.bf16.msra.mxu1 %v10651_v45 }
 0x3c2   :  { %1387 = vmatprep.subr.bf16.mxu0 %v10602_v34  ;;  %1430 = vmatprep.subr.bf16.mxu1 %v10655_v46 }
 0x3c5   :  { %1388 = vmatpush1.bf16.msra.mxu0 %v10610_v35  ;;  %1431 = vmatpush1.bf16.msra.mxu1 %v10661_v47 }
 0x3c6   :  { %1514 = vmatprep.subr.bf16.mxu0 %v10808_v55  ;;  %1557 = vmatprep.subr.bf16.mxu1 %v10522_v62 }
 0x47b   :  { %v1266_v29 = vpop.f32.mrb[8].mxu0  ;;  %v1309_v26 = vpop.f32.mrb[24].mxu1 }
 0x47c   :  { %v8215_v60 = vadd.f32 %v1266_v29, %v10746_v17  ;;  %v1268_v18 = vpop.f32.mrb[9].mxu0  ;;  %v1311_v3 = vpop.f32.mrb[25].mxu1  ;;  %v8263_v51 = vadd.f32 %v1309_v26, %v10757_v5 }
 0x47d   :  { %v8216_v61 = vadd.f32 %v1268_v18, %v10743_v16  ;;  %v1270_v6 = vpop.f32.mrb[10].mxu0  ;;  %v1313_v57 = vpop.f32.mrb[26].mxu1  ;;  %v8264_v27 = vadd.f32 %v1311_v3, %v10760_v4 }
 0x47e   :  { %v1326_v8 = vmul.f32 0.5, %v8215_v60  ;;  %v8217_v10 = vadd.f32 %v1270_v6, %v10746_v17  ;;  %v1272_v15 = vpop.f32.mrb[11].mxu0  ;;  %v1315_v1 = vpop.f32.mrb[27].mxu1  ;;  %v8265_v0 = vadd.f32 %v1313_v57, %v10757_v5 }
 0x47f   :  { %v1334_v52 = vmul.f32 0.5, %v8216_v61  ;;  %v8218_v13 = vadd.f32 %v1272_v15, %v10743_v16  ;;  %v8266_v29 = vadd.f32 %v1315_v1, %v10760_v4  ;;  %v1344_v6 = vmul.f32 0.5, %v8264_v27 }
 0x480   :  { %9144 = vtanh.f32 %v1326_v8  ;;  %v1327_v58 = vmul.f32 0.5, %v8217_v10 }
 0x481   :  { %9146 = vtanh.f32 %v1334_v52  ;;  %v1335_v11 = vmul.f32 0.5, %v8218_v13  ;;  %v1345_v15 = vmul.f32 0.5, %v8266_v29 }
 0x482   :  { %9148 = vtanh.f32 %v1327_v58 }
 0x483   :  { %9150 = vtanh.f32 %v8263_v51 }
 0x484   :  { %9152 = vtanh.f32 %v1335_v11 }
 0x485   :  { %9154 = vtanh.f32 %v8265_v0 }
 0x486   :  { %9156 = vtanh.f32 %v1344_v6 }
 0x487   :  { %9158 = vtanh.f32 %v1345_v15 }
 0x48a   :  { %v9145_v60 = vpop.eup %9144 }
 0x48b   :  { %v9147_v18 = vpop.eup %9146  ;;  %v1330_v61 = vmul.f32 0.5, %v9145_v60 }
 0x48c   :  { %v1338_v8 = vmul.f32 0.5, %v9147_v18  ;;  %v9149_v26 = vpop.eup %9148 }
 0x48d   :  { %v1332_v10 = vadd.f32 0.5, %v1330_v61  ;;  %v9151_v52 = vpop.eup %9150  ;;  %v1331_v58 = vmul.f32 0.5, %v9149_v26 }
 0x48e   :  { %v1340_v13 = vadd.f32 0.5, %v1338_v8  ;;  %v9153_v59 = vpop.eup %9152 }
 0x48f   :  { %v1354_v57 = vmul.f32 %v9151_v52, %v1332_v10  ;;  %v1333_v3 = vadd.f32 0.5, %v1331_v58  ;;  %v1339_v11 = vmul.f32 0.5, %v9153_v59  ;;  %v9155_v1 = vpop.eup %9154 }
 0x490   :  { %v1352_v51 = vmul.f32 %v1340_v13, %v10821_v32  ;;  %v9157_v61 = vpop.eup %9156 }
 0x491   :  { %v1341_v60 = vadd.f32 0.5, %v1339_v11  ;;  %v1355_v27 = vmul.f32 %v9155_v1, %v1333_v3  ;;  %v9159_v6 = vpop.eup %9158  ;;  %v1348_v8 = vmul.f32 0.5, %v9157_v61 }
 0x492   :  { %v10875_v0 = vadd.f32 %v1354_v57, %v1352_v51  ;;  %v1349_v32 = vmul.f32 0.5, %v9159_v6 }
 0x493   :  { %v1353_v29 = vmul.f32 %v1341_v60, %v10825_v20  ;;  %v1350_v59 = vadd.f32 0.5, %v1348_v8 }
 0x494   :  { %9160 = vtanh.f32 %v10875_v0  ;;  %v1351_v15 = vadd.f32 0.5, %v1349_v32 }
 0x495   :  { %v10879_v18 = vadd.f32 %v1355_v27, %v1353_v29 }
 0x497   :  { %9162 = vtanh.f32 %v10879_v18 }
 0x49e   :  { %v9161_v26 = vpop.eup %9160 }
 0x49f   :  { %v1360_v52 = vmul.f32 %v9161_v26, %v1350_v59 }
 0x4a1   :  { %v9163_v10 = vpop.eup %9162 }
 0x4a2   :  { %v1361_v13 = vmul.f32 %v9163_v10, %v1351_v15 }
 0x4a4   :  { %v10882_v58 = vpack.c.bf16 %v1361_v13, %v1360_v52 }
 0x4a6   :  { %1406 = vmatmul.mubr.bf16.vlgmr.msra.gmra.mrb[12].mxu0 %v10882_v58  ;;  %1449 = vmatmul.mubr.bf16.vlgmr.msra.gmra.mrb[28].mxu1 %v10882_v58 }
 0x4a7   :  { %1515 = vmatpush1.bf16.msra.mxu0 %v10510_v54  ;;  %1558 = vmatpush1.bf16.msra.mxu1 %v10580_v23 }
 0x4a8   :  { %1516 = vmatprep.subr.bf16.mxu0 %v10515_v56  ;;  %1559 = vmatprep.subr.bf16.mxu1 %v10590_v30 }
 0x4a9   :  { %1546 = vmatprep.mubr.bf16.mxu0 %v13149_v53  ;;  %1589 = vmatprep.mubr.bf16.mxu1 %v13149_v53 }
 0x4ab   :  { %1517 = vmatpush1.bf16.msra.mxu0 %v10529_v63  ;;  %1560 = vmatpush1.bf16.msra.mxu1 %v10598_v31 }
 0x4ac   :  { %1518 = vmatprep.subr.bf16.mxu0 %v10535_v2  ;;  %1561 = vmatprep.subr.bf16.mxu1 %v10605_v33 }
 0x4af   :  { %1519 = vmatpush1.bf16.msra.mxu0 %v10545_v7  ;;  %1562 = vmatpush1.bf16.msra.mxu1 %v10614_v36 }
 0x4b0   :  { %1520 = vmatprep.subr.bf16.mxu0 %v10549_v9  ;;  %1563 = vmatprep.subr.bf16.mxu1 %v10617_v38 }
 0x4b3   :  { %1521 = vmatpush1.bf16.msra.mxu0 %v10557_v12  ;;  %1564 = vmatpush1.bf16.msra.mxu1 %v10623_v39 }
 0x4b4   :  { %1522 = vmatprep.subr.bf16.mxu0 %v10563_v14  ;;  %1565 = vmatprep.subr.bf16.mxu1 %v10627_v40 }
 0x4b7   :  { %1523 = vmatpush1.bf16.msra.mxu0 %v10570_v19  ;;  %1566 = vmatpush1.bf16.msra.mxu1 %v10633_v41 }
 0x4b8   :  { %1524 = vmatprep.subr.bf16.mxu0 %v10574_v21  ;;  %1567 = vmatprep.subr.bf16.mxu1 %v10637_v42 }
 0x4bb   :  { %1525 = vmatpush1.bf16.msra.mxu0 %v10582_v24  ;;  %1568 = vmatpush1.bf16.msra.mxu1 %v10643_v43 }
 0x4bc   :  { %1526 = vmatprep.subr.bf16.mxu0 %v10586_v25  ;;  %1569 = vmatprep.subr.bf16.mxu1 %v10647_v44 }
 0x4bf   :  { %1527 = vmatpush1.bf16.msra.mxu0 %v10596_v28  ;;  %1570 = vmatpush1.bf16.msra.mxu1 %v10651_v45 }
 0x4c0   :  { %1528 = vmatprep.subr.bf16.mxu0 %v10602_v34  ;;  %1571 = vmatprep.subr.bf16.mxu1 %v10655_v46 }
 0x4c3   :  { %1529 = vmatpush1.bf16.msra.mxu0 %v10610_v35  ;;  %1572 = vmatpush1.bf16.msra.mxu1 %v10661_v47 }
 0x4c4   :  { %1655 = vmatprep.subr.bf16.mxu0 %v10808_v55  ;;  %1698 = vmatprep.subr.bf16.mxu1 %v10522_v62 }
 0x579   :  { %v1407_v54 = vpop.f32.mrb[12].mxu0  ;;  %v1450_v56 = vpop.f32.mrb[28].mxu1 }
 0x57a   :  { %v8219_v63 = vadd.f32 %v1407_v54, %v10746_v17  ;;  %v1409_v2 = vpop.f32.mrb[13].mxu0  ;;  %v1452_v7 = vpop.f32.mrb[29].mxu1  ;;  %v8267_v62 = vadd.f32 %v1450_v56, %v10757_v5 }
 0x57b   :  { %v8220_v9 = vadd.f32 %v1409_v2, %v10743_v16  ;;  %v1411_v12 = vpop.f32.mrb[14].mxu0  ;;  %v1454_v14 = vpop.f32.mrb[30].mxu1  ;;  %v8268_v27 = vadd.f32 %v1452_v7, %v10760_v4 }
 0x57c   :  { %v1467_v19 = vmul.f32 0.5, %v8219_v63  ;;  %v8221_v21 = vadd.f32 %v1411_v12, %v10746_v17  ;;  %v1413_v20 = vpop.f32.mrb[15].mxu0  ;;  %v1456_v57 = vpop.f32.mrb[31].mxu1  ;;  %v8269_v60 = vadd.f32 %v1454_v14, %v10757_v5 }
 0x57d   :  { %v1475_v51 = vmul.f32 0.5, %v8220_v9  ;;  %v8222_v3 = vadd.f32 %v1413_v20, %v10743_v16  ;;  %v8270_v29 = vadd.f32 %v1456_v57, %v10760_v4  ;;  %v1485_v32 = vmul.f32 0.5, %v8268_v27 }
 0x57e   :  { %9164 = vtanh.f32 %v1467_v19  ;;  %v1468_v11 = vmul.f32 0.5, %v8221_v21 }
 0x57f   :  { %9166 = vtanh.f32 %v1475_v51  ;;  %v1476_v1 = vmul.f32 0.5, %v8222_v3  ;;  %v1486_v59 = vmul.f32 0.5, %v8270_v29 }
 0x580   :  { %9168 = vtanh.f32 %v1468_v11 }
 0x581   :  { %9170 = vtanh.f32 %v8267_v62 }
 0x582   :  { %9172 = vtanh.f32 %v1476_v1 }
 0x583   :  { %9174 = vtanh.f32 %v8269_v60 }
 0x584   :  { %9176 = vtanh.f32 %v1485_v32  ;;  %v10950_v32 = vld [vmem:[#allocation11 + $0x20] ss:$16 sps:$4 sm:$0xff]  }
 0x585   :  { %9178 = vtanh.f32 %v1486_v59  ;;  %v10966_v59 = vld [vmem:[#allocation11 + $0x60] ss:$16 sps:$4 sm:$0xff]  }
 0x588   :  { %v9165_v61 = vpop.eup %9164 }
 0x589   :  { %v9167_v6 = vpop.eup %9166  ;;  %v1471_v8 = vmul.f32 0.5, %v9165_v61 }
 0x58a   :  { %v1479_v26 = vmul.f32 0.5, %v9167_v6  ;;  %v9169_v15 = vpop.eup %9168 }
 0x58b   :  { %v1473_v10 = vadd.f32 0.5, %v1471_v8  ;;  %v9171_v52 = vpop.eup %9170  ;;  %v1472_v54 = vmul.f32 0.5, %v9169_v15  ;;  %v10944_v8 = vld [vmem:[#allocation11 + $0x24] ss:$16 sps:$4 sm:$0xff]  }
 0x58c   :  { %v1481_v13 = vadd.f32 0.5, %v1479_v26  ;;  %v9173_v56 = vpop.eup %9172  ;;  %v10954_v26 = vld [vmem:[#allocation11 + $0x44] ss:$16 sps:$4 sm:$0xff]  }
 0x58d   :  { %v1495_v63 = vmul.f32 %v9171_v52, %v1473_v10  ;;  %v1474_v7 = vadd.f32 0.5, %v1472_v54  ;;  %v1480_v9 = vmul.f32 0.5, %v9173_v56  ;;  %v9175_v12 = vpop.eup %9174 }
 0x58e   :  { %v1493_v2 = vmul.f32 %v1481_v13, %v10875_v0  ;;  %v9177_v51 = vpop.eup %9176 }
 0x58f   :  { %v1482_v19 = vadd.f32 0.5, %v1480_v9  ;;  %v1496_v21 = vmul.f32 %v9175_v12, %v1474_v7  ;;  %v9179_v3 = vpop.eup %9178  ;;  %v1489_v62 = vmul.f32 0.5, %v9177_v51 }
 0x590   :  { %v10929_v14 = vadd.f32 %v1495_v63, %v1493_v2  ;;  %v1490_v0 = vmul.f32 0.5, %v9179_v3 }
 0x591   :  { %v1494_v20 = vmul.f32 %v1482_v19, %v10879_v18  ;;  %v1491_v1 = vadd.f32 0.5, %v1489_v62  ;;  %v10940_v18 = vld [vmem:[#allocation11] ss:$16 sps:$4 sm:$0xff]  }
 0x592   :  { %9180 = vtanh.f32 %v10929_v14  ;;  %v1492_v60 = vadd.f32 0.5, %v1490_v0 }
 0x593   :  { %v10933_v57 = vadd.f32 %v1496_v21, %v1494_v20 }
 0x595   :  { %9182 = vtanh.f32 %v10933_v57 }
 0x59c   :  { %v9181_v11 = vpop.eup %9180 }
 0x59d   :  { %v1501_v29 = vmul.f32 %v9181_v11, %v1491_v1 }
 0x59f   :  { %v9183_v27 = vpop.eup %9182 }
 0x5a0   :  { %v1502_v61 = vmul.f32 %v9183_v27, %v1492_v60 }
 0x5a2   :  { %v10936_v6 = vpack.c.bf16 %v1502_v61, %v1501_v29 }
 0x5a4   :  { %1547 = vmatmul.mubr.bf16.vlgmr.msra.gmra.mrb[16].mxu0 %v10936_v6  ;;  %1590 = vmatmul.mubr.bf16.vlgmr.msra.gmra.mrb[32].mxu1 %v10936_v6 }
 0x5a5   :  { %1656 = vmatpush1.bf16.msra.mxu0 %v10940_v18  ;;  %1699 = vmatpush1.bf16.msra.mxu1 %v10580_v23  ;;  %v10958_v23 = vld [vmem:[#allocation11 + $0x40] ss:$16 sps:$4 sm:$0xff]  }
 0x5a6   :  { %1657 = vmatprep.subr.bf16.mxu0 %v10944_v8  ;;  %1700 = vmatprep.subr.bf16.mxu1 %v10590_v30  ;;  %v10962_v30 = vld [vmem:[#allocation11 + $0x64] ss:$16 sps:$4 sm:$0xff]  }
 0x5a7   :  { %1687 = vmatprep.mubr.bf16.mxu0 %v13149_v53  ;;  %1730 = vmatprep.mubr.bf16.mxu1 %v13149_v53 }
 0x5a9   :  { %1658 = vmatpush1.bf16.msra.mxu0 %v10950_v32  ;;  %1701 = vmatpush1.bf16.msra.mxu1 %v10598_v31  ;;  %v10970_v31 = vld [vmem:[#allocation11 + $0x84] ss:$16 sps:$4 sm:$0xff]  }
 0x5aa   :  { %1659 = vmatprep.subr.bf16.mxu0 %v10954_v26  ;;  %1702 = vmatprep.subr.bf16.mxu1 %v10605_v33  ;;  %v10974_v33 = vld [vmem:[#allocation11 + $0x80] ss:$16 sps:$4 sm:$0xff]  }
 0x5ad   :  { %1660 = vmatpush1.bf16.msra.mxu0 %v10958_v23  ;;  %1703 = vmatpush1.bf16.msra.mxu1 %v10614_v36  ;;  %v10978_v36 = vld [vmem:[#allocation11 + $0xa4] ss:$16 sps:$4 sm:$0xff]  }
 0x5ae   :  { %1661 = vmatprep.subr.bf16.mxu0 %v10962_v30  ;;  %1704 = vmatprep.subr.bf16.mxu1 %v10617_v38 }
 0x5b1   :  { %1662 = vmatpush1.bf16.msra.mxu0 %v10966_v59  ;;  %1705 = vmatpush1.bf16.msra.mxu1 %v10623_v39  ;;  %v539_v39 = vadd.f32 %v10709_v48, %v10746_v17 }
 0x5b2   :  { %1663 = vmatprep.subr.bf16.mxu0 %v10970_v31  ;;  %1706 = vmatprep.subr.bf16.mxu1 %v10627_v40 }
 0x5b5   :  { %1664 = vmatpush1.bf16.msra.mxu0 %v10974_v33  ;;  %1707 = vmatpush1.bf16.msra.mxu1 %v10633_v41 }
 0x5b6   :  { %1665 = vmatprep.subr.bf16.mxu0 %v10978_v36  ;;  %1708 = vmatprep.subr.bf16.mxu1 %v10637_v42  ;;  %v541_v42 = vadd.f32 %v10711_v49, %v10743_v16 }
 0x5b9   :  { %1666 = vmatpush1.bf16.msra.mxu0 %v10582_v24  ;;  %1709 = vmatpush1.bf16.msra.mxu1 %v10643_v43  ;;  %v10993_v24 = vld [vmem:[#allocation11 + $0xc] ss:$16 sps:$4 sm:$0xff]  }
 0x5ba   :  { %1667 = vmatprep.subr.bf16.mxu0 %v10586_v25  ;;  %1710 = vmatprep.subr.bf16.mxu1 %v10647_v44  ;;  %v535_v25 = vadd.f32 %v10705_v22, %v10746_v17 }
 0x5bd   :  { %1668 = vmatpush1.bf16.msra.mxu0 %v10596_v28  ;;  %1711 = vmatpush1.bf16.msra.mxu1 %v10651_v45  ;;  %v537_v28 = vadd.f32 %v10707_v37, %v10743_v16 }
 0x5be   :  { %1669 = vmatprep.subr.bf16.mxu0 %v10602_v34  ;;  %1712 = vmatprep.subr.bf16.mxu1 %v10655_v46 }
 0x5c1   :  { %1670 = vmatpush1.bf16.msra.mxu0 %v10610_v35  ;;  %1713 = vmatpush1.bf16.msra.mxu1 %v10661_v47 }
 0x5c2   :  { %1796 = vmatprep.subr.bf16.mxu0 %v10808_v55  ;;  %1839 = vmatprep.subr.bf16.mxu1 %v10993_v24 }
 0x677   :  { %v1548_v38 = vpop.f32.mrb[16].mxu0  ;;  %v1591_v34 = vpop.f32.mrb[32].mxu1 }
 0x678   :  { %v1600_v35 = vadd.f32 %v1548_v38, %v535_v25  ;;  %v1550_v40 = vpop.f32.mrb[17].mxu0  ;;  %v1593_v41 = vpop.f32.mrb[33].mxu1  ;;  %v8271_v52 = vadd.f32 %v1591_v34, %v10757_v5 }
 0x679   :  { %v1601_v43 = vadd.f32 %v1550_v40, %v537_v28  ;;  %v1552_v44 = vpop.f32.mrb[18].mxu0  ;;  %v1595_v45 = vpop.f32.mrb[34].mxu1  ;;  %v8272_v49 = vadd.f32 %v1593_v41, %v10760_v4 }
 0x67a   :  { %v1608_v46 = vmul.f32 0.5, %v1600_v35  ;;  %v1604_v47 = vadd.f32 %v1552_v44, %v539_v39  ;;  %v1554_v22 = vpop.f32.mrb[19].mxu0  ;;  %v1597_v15 = vpop.f32.mrb[35].mxu1  ;;  %v8273_v54 = vadd.f32 %v1595_v45, %v10757_v5 }
 0x67b   :  { %v1616_v10 = vmul.f32 0.5, %v1601_v43  ;;  %v1605_v37 = vadd.f32 %v1554_v22, %v541_v42  ;;  %v8274_v56 = vadd.f32 %v1597_v15, %v10760_v4  ;;  %v1626_v9 = vmul.f32 0.5, %v8272_v49  ;;  %v11025_v22 = vld [vmem:[#allocation11 + $0x2c] ss:$16 sps:$4 sm:$0xff]   ;;  %v11031_v15 = vld [vmem:[#allocation11 + $0x28] ss:$16 sps:$4 sm:$0xff]  }
 0x67c   :  { %9184 = vtanh.f32 %v1608_v46  ;;  %v1609_v13 = vmul.f32 0.5, %v1604_v47  ;;  %v11059_v49 = vld [vmem:[#allocation11 + $0xac] ss:$16 sps:$4 sm:$0xff]  }
 0x67d   :  { %9186 = vtanh.f32 %v1616_v10  ;;  %v1617_v48 = vmul.f32 0.5, %v1605_v37  ;;  %v1627_v19 = vmul.f32 0.5, %v8274_v56  ;;  %v11035_v10 = vld [vmem:[#allocation11 + $0x4c] ss:$16 sps:$4 sm:$0xff]   ;;  %v11039_v37 = vld [vmem:[#allocation11 + $0x48] ss:$16 sps:$4 sm:$0xff]  }
 0x67e   :  { %9188 = vtanh.f32 %v1609_v13  ;;  %v11047_v13 = vld [vmem:[#allocation11 + $0x68] ss:$16 sps:$4 sm:$0xff]   ;;  %v11062_v56 = vld [vmem:[#allocation11 + $0xa0] ss:$16 sps:$4 sm:$0xff]  }
 0x67f   :  { %9190 = vtanh.f32 %v8271_v52  ;;  %v11043_v52 = vld [vmem:[#allocation11 + $0x6c] ss:$16 sps:$4 sm:$0xff]  }
 0x680   :  { %9192 = vtanh.f32 %v1617_v48  ;;  %v11051_v48 = vld [vmem:[#allocation11 + $0x8c] ss:$16 sps:$4 sm:$0xff]  }
 0x681   :  { %9194 = vtanh.f32 %v8273_v54  ;;  %v11055_v54 = vld [vmem:[#allocation11 + $0x88] ss:$16 sps:$4 sm:$0xff]  }
 0x682   :  { %9196 = vtanh.f32 %v1626_v9  ;;  %v11074_v9 = vld [vmem:[#allocation11 + $0xc0] ss:$16 sps:$4 sm:$0xff]  }
 0x683   :  { %9198 = vtanh.f32 %v1627_v19  ;;  %v11080_v19 = vld [vmem:[#allocation11 + $0xe4] ss:$16 sps:$4 sm:$0xff]  }
 0x686   :  { %v9185_v63 = vpop.eup %9184 }
 0x687   :  { %v9187_v2 = vpop.eup %9186  ;;  %v1612_v7 = vmul.f32 0.5, %v9185_v63  ;;  %v11065_v63 = vld [vmem:[#allocation11 + $0xa8] ss:$16 sps:$4 sm:$0xff]  }
 0x688   :  { %v1620_v12 = vmul.f32 0.5, %v9187_v2  ;;  %v9189_v21 = vpop.eup %9188  ;;  %v11068_v2 = vld [vmem:[#allocation11 + $0xc4] ss:$16 sps:$4 sm:$0xff]  }
 0x689   :  { %v1614_v20 = vadd.f32 0.5, %v1612_v7  ;;  %v9191_v51 = vpop.eup %9190  ;;  %v1613_v62 = vmul.f32 0.5, %v9189_v21  ;;  %v11071_v7 = vld [vmem:[#allocation11 + $0xcc] ss:$16 sps:$4 sm:$0xff]  }
 0x68a   :  { %v1622_v3 = vadd.f32 0.5, %v1620_v12  ;;  %v9193_v0 = vpop.eup %9192  ;;  %v11077_v12 = vld [vmem:[#allocation11 + $0xc8] ss:$16 sps:$4 sm:$0xff]   ;;  %v11083_v21 = vld [vmem:[#allocation11 + $0xec] ss:$16 sps:$4 sm:$0xff]  }
 0x68b   :  { %v1636_v11 = vmul.f32 %v9191_v51, %v1614_v20  ;;  %v1615_v60 = vadd.f32 0.5, %v1613_v62  ;;  %v1621_v27 = vmul.f32 0.5, %v9193_v0  ;;  %v9195_v29 = vpop.eup %9194  ;;  %v11086_v20 = vld [vmem:[#allocation11 + $0xe0] ss:$16 sps:$4 sm:$0xff]   ;;  %v11089_v51 = vld [vmem:[#allocation11 + $0xe8] ss:$16 sps:$4 sm:$0xff]  }
 0x68c   :  { %v1634_v1 = vmul.f32 %v1622_v3, %v10929_v14  ;;  %v9197_v39 = vpop.eup %9196  ;;  %v545_v3 = vadd.f32 %v10713_v50, %v10746_v17  ;;  %v13151_v62 = vld [vmem:[#allocation27_spill] sm:$0xff] }
 0x68d   :  { %v1623_v25 = vadd.f32 0.5, %v1621_v27  ;;  %v1637_v28 = vmul.f32 %v9195_v29, %v1615_v60  ;;  %v9199_v35 = vpop.eup %9198  ;;  %v1630_v40 = vmul.f32 0.5, %v9197_v39  ;;  %v547_v0 = vadd.f32 %v13151_v62, %v10743_v16  ;;  %v13152_v60 = vld [vmem:[#allocation28_spill] sm:$0xff] }
 0x68e   :  { %v11009_v61 = vadd.f32 %v1636_v11, %v1634_v1  ;;  %v1631_v14 = vmul.f32 0.5, %v9199_v35  ;;  %v549_v27 = vadd.f32 %v13152_v60, %v10746_v17 }
 0x68f   :  { %v1635_v38 = vmul.f32 %v1623_v25, %v10933_v57  ;;  %v1632_v42 = vadd.f32 0.5, %v1630_v40  ;;  %v11021_v57 = vld [vmem:[#allocation11 + $0x8] ss:$16 sps:$4 sm:$0xff]  }
 0x690   :  { %9200 = vtanh.f32 %v11009_v61  ;;  %v1633_v43 = vadd.f32 0.5, %v1631_v14 }
 0x691   :  { %v11013_v34 = vadd.f32 %v1637_v28, %v1635_v38  ;;  %v13153_v38 = vld [vmem:[#allocation29_spill] sm:$0xff] }
 0x692   :  { %v551_v39 = vadd.f32 %v13153_v38, %v10743_v16 }
 0x693   :  { %9202 = vtanh.f32 %v11013_v34 }
 0x69a   :  { %v9201_v41 = vpop.eup %9200 }
 0x69b   :  { %v1642_v45 = vmul.f32 %v9201_v41, %v1632_v42 }
 0x69d   :  { %v9203_v44 = vpop.eup %9202 }
 0x69e   :  { %v1643_v46 = vmul.f32 %v9203_v44, %v1633_v43 }
 0x6a0   :  { %v11016_v47 = vpack.c.bf16 %v1643_v46, %v1642_v45 }
 0x6a2   :  { %1688 = vmatmul.mubr.bf16.vlgmr.msra.gmra.mrb[20].mxu0 %v11016_v47  ;;  %1731 = vmatmul.mubr.bf16.vlgmr.msra.gmra.mrb[36].mxu1 %v11016_v47 }
 0x6a3   :  { %1797 = vmatpush1.bf16.msra.mxu0 %v10940_v18  ;;  %1840 = vmatpush1.bf16.msra.mxu1 %v11021_v57 }
 0x6a4   :  { %1798 = vmatprep.subr.bf16.mxu0 %v10944_v8  ;;  %1841 = vmatprep.subr.bf16.mxu1 %v11025_v22 }
 0x6a5   :  { %1828 = vmatprep.mubr.bf16.mxu0 %v13149_v53  ;;  %1871 = vmatprep.mubr.bf16.mxu1 %v13149_v53 }
 0x6a7   :  { %1799 = vmatpush1.bf16.msra.mxu0 %v10950_v32  ;;  %1842 = vmatpush1.bf16.msra.mxu1 %v11031_v15 }
 0x6a8   :  { %1800 = vmatprep.subr.bf16.mxu0 %v10954_v26  ;;  %1843 = vmatprep.subr.bf16.mxu1 %v11035_v10 }
 0x6ab   :  { %1801 = vmatpush1.bf16.msra.mxu0 %v10958_v23  ;;  %1844 = vmatpush1.bf16.msra.mxu1 %v11039_v37 }
 0x6ac   :  { %1802 = vmatprep.subr.bf16.mxu0 %v10962_v30  ;;  %1845 = vmatprep.subr.bf16.mxu1 %v11043_v52 }
 0x6af   :  { %1803 = vmatpush1.bf16.msra.mxu0 %v10966_v59  ;;  %1846 = vmatpush1.bf16.msra.mxu1 %v11047_v13 }
 0x6b0   :  { %1804 = vmatprep.subr.bf16.mxu0 %v10970_v31  ;;  %1847 = vmatprep.subr.bf16.mxu1 %v11051_v48 }
 0x6b3   :  { %1805 = vmatpush1.bf16.msra.mxu0 %v10974_v33  ;;  %1848 = vmatpush1.bf16.msra.mxu1 %v11055_v54 }
 0x6b4   :  { %1806 = vmatprep.subr.bf16.mxu0 %v10978_v36  ;;  %1849 = vmatprep.subr.bf16.mxu1 %v11059_v49 }
 0x6b7   :  { %1807 = vmatpush1.bf16.msra.mxu0 %v11062_v56  ;;  %1850 = vmatpush1.bf16.msra.mxu1 %v11065_v63 }
 0x6b8   :  { %1808 = vmatprep.subr.bf16.mxu0 %v11068_v2  ;;  %1851 = vmatprep.subr.bf16.mxu1 %v11071_v7 }
 0x6bb   :  { %1809 = vmatpush1.bf16.msra.mxu0 %v11074_v9  ;;  %1852 = vmatpush1.bf16.msra.mxu1 %v11077_v12 }
 0x6bc   :  { %1810 = vmatprep.subr.bf16.mxu0 %v11080_v19  ;;  %1853 = vmatprep.subr.bf16.mxu1 %v11083_v21 }
 0x6bf   :  { %1811 = vmatpush1.bf16.msra.mxu0 %v11086_v20  ;;  %1854 = vmatpush1.bf16.msra.mxu1 %v11089_v51 }
 0x6c0   :  { %1937 = vmatprep.subr.bf16.mxu0 %v10808_v55  ;;  %1980 = vmatprep.subr.bf16.mxu1 %v10993_v24 }
 0x775   :  { %v1689_v11 = vpop.f32.mrb[20].mxu0  ;;  %v1732_v1 = vpop.f32.mrb[36].mxu1 }
 0x776   :  { %v1741_v29 = vadd.f32 %v1689_v11, %v545_v3  ;;  %v1691_v25 = vpop.f32.mrb[21].mxu0  ;;  %v1734_v28 = vpop.f32.mrb[37].mxu1  ;;  %v8275_v44 = vadd.f32 %v1732_v1, %v10757_v5 }
 0x777   :  { %v1742_v55 = vadd.f32 %v1691_v25, %v547_v0  ;;  %v1693_v35 = vpop.f32.mrb[22].mxu0  ;;  %v1736_v24 = vpop.f32.mrb[38].mxu1  ;;  %v8276_v62 = vadd.f32 %v1734_v28, %v10760_v4 }
 0x778   :  { %v1749_v40 = vmul.f32 0.5, %v1741_v29  ;;  %v1745_v14 = vadd.f32 %v1693_v35, %v549_v27  ;;  %v1695_v50 = vpop.f32.mrb[23].mxu0  ;;  %v1738_v41 = vpop.f32.mrb[39].mxu1  ;;  %v8277_v3 = vadd.f32 %v1736_v24, %v10757_v5 }
 0x779   :  { %v1757_v42 = vmul.f32 0.5, %v1742_v55  ;;  %v1746_v43 = vadd.f32 %v1695_v50, %v551_v39  ;;  %v8278_v0 = vadd.f32 %v1738_v41, %v10760_v4  ;;  %v1767_v29 = vmul.f32 0.5, %v8276_v62 }
 0x77a   :  { %9204 = vtanh.f32 %v1749_v40  ;;  %v1750_v45 = vmul.f32 0.5, %v1745_v14 }
 0x77b   :  { %9206 = vtanh.f32 %v1757_v42  ;;  %v1758_v46 = vmul.f32 0.5, %v1746_v43  ;;  %v1768_v38 = vmul.f32 0.5, %v8278_v0 }
 0x77c   :  { %9208 = vtanh.f32 %v1750_v45 }
 0x77d   :  { %9210 = vtanh.f32 %v8275_v44 }
 0x77e   :  { %9212 = vtanh.f32 %v1758_v46 }
 0x77f   :  { %9214 = vtanh.f32 %v8277_v3 }
 0x780   :  { %9216 = vtanh.f32 %v1767_v29 }
 0x781   :  { %9218 = vtanh.f32 %v1768_v38 }
 0x784   :  { %v9205_v11 = vpop.eup %9204 }
 0x785   :  { %v9207_v60 = vpop.eup %9206  ;;  %v1753_v27 = vmul.f32 0.5, %v9205_v11 }
 0x786   :  { %v1761_v25 = vmul.f32 0.5, %v9207_v60  ;;  %v9209_v1 = vpop.eup %9208 }
 0x787   :  { %v1755_v39 = vadd.f32 0.5, %v1753_v27  ;;  %v9211_v55 = vpop.eup %9210  ;;  %v1754_v40 = vmul.f32 0.5, %v9209_v1 }
 0x788   :  { %v1763_v35 = vadd.f32 0.5, %v1761_v25  ;;  %v9213_v14 = vpop.eup %9212 }
 0x789   :  { %v1777_v24 = vmul.f32 %v9211_v55, %v1755_v39  ;;  %v1756_v28 = vadd.f32 0.5, %v1754_v40  ;;  %v1762_v42 = vmul.f32 0.5, %v9213_v14  ;;  %v9215_v41 = vpop.eup %9214 }
 0x78a   :  { %v1775_v50 = vmul.f32 %v1763_v35, %v11009_v61  ;;  %v9217_v62 = vpop.eup %9216 }
 0x78b   :  { %v1764_v44 = vadd.f32 0.5, %v1762_v42  ;;  %v1778_v45 = vmul.f32 %v9215_v41, %v1756_v28  ;;  %v9219_v0 = vpop.eup %9218  ;;  %v1771_v11 = vmul.f32 0.5, %v9217_v62 }
 0x78c   :  { %v11107_v43 = vadd.f32 %v1777_v24, %v1775_v50  ;;  %v1772_v61 = vmul.f32 0.5, %v9219_v0 }
 0x78d   :  { %v1776_v46 = vmul.f32 %v1764_v44, %v11013_v34  ;;  %v1773_v27 = vadd.f32 0.5, %v1771_v11 }
 0x78e   :  { %9220 = vtanh.f32 %v11107_v43  ;;  %v1774_v29 = vadd.f32 0.5, %v1772_v61 }
 0x78f   :  { %v11111_v3 = vadd.f32 %v1778_v45, %v1776_v46 }
 0x791   :  { %9222 = vtanh.f32 %v11111_v3 }
 0x798   :  { %v9221_v60 = vpop.eup %9220 }
 0x799   :  { %v1783_v38 = vmul.f32 %v9221_v60, %v1773_v27 }
 0x79b   :  { %v9223_v25 = vpop.eup %9222 }
 0x79c   :  { %v1784_v1 = vmul.f32 %v9223_v25, %v1774_v29 }
 0x79e   :  { %v11114_v39 = vpack.c.bf16 %v1784_v1, %v1783_v38 }
 0x7a0   :  { %1829 = vmatmul.mubr.bf16.vlgmr.msra.gmra.mrb[24].mxu0 %v11114_v39  ;;  %1872 = vmatmul.mubr.bf16.vlgmr.msra.gmra.mrb[40].mxu1 %v11114_v39 }
 0x7a1   :  { %1938 = vmatpush1.bf16.msra.mxu0 %v10940_v18  ;;  %1981 = vmatpush1.bf16.msra.mxu1 %v11021_v57  ;;  %v8810_v18 = vld [vmem:[#allocation6 + $0x4] ss:$16 sps:$4 sm:$0xff]  }
 0x7a2   :  { %1939 = vmatprep.subr.bf16.mxu0 %v10944_v8  ;;  %1982 = vmatprep.subr.bf16.mxu1 %v11025_v22  ;;  %v8813_v8 = vld [vmem:[#allocation6 + $0xc] ss:$16 sps:$4 sm:$0xff]  }
 0x7a3   :  { %1969 = vmatprep.mubr.bf16.mxu0 %v13149_v53  ;;  %2012 = vmatprep.mubr.bf16.mxu1 %v13149_v53 }
 0x7a5   :  { %1940 = vmatpush1.bf16.msra.mxu0 %v10950_v32  ;;  %1983 = vmatpush1.bf16.msra.mxu1 %v11031_v15  ;;  %v13154_v32 = vld [vmem:[#allocation30_spill] sm:$0xff]  ;;  %v13157_v15 = vld [vmem:[#allocation33_spill] sm:$0xff] }
 0x7a6   :  { %1941 = vmatprep.subr.bf16.mxu0 %v10954_v26  ;;  %1984 = vmatprep.subr.bf16.mxu1 %v11035_v10  ;;  %v555_v26 = vadd.f32 %v13154_v32, %v10746_v17  ;;  %v561_v10 = vadd.f32 %v13157_v15, %v10743_v16  ;;  %v8817_v15 = vld [vmem:[#allocation6 + $0x28] ss:$16 sps:$4 sm:$0xff]  }
 0x7a9   :  { %1942 = vmatpush1.bf16.msra.mxu0 %v10958_v23  ;;  %1985 = vmatpush1.bf16.msra.mxu1 %v11039_v37  ;;  %v13155_v23 = vld [vmem:[#allocation31_spill] sm:$0xff] }
 0x7aa   :  { %1943 = vmatprep.subr.bf16.mxu0 %v10962_v30  ;;  %1986 = vmatprep.subr.bf16.mxu1 %v11043_v52  ;;  %v557_v30 = vadd.f32 %v13155_v23, %v10743_v16 }
 0x7ad   :  { %1944 = vmatpush1.bf16.msra.mxu0 %v10966_v59  ;;  %1987 = vmatpush1.bf16.msra.mxu1 %v11047_v13 }
 0x7ae   :  { %1945 = vmatprep.subr.bf16.mxu0 %v10970_v31  ;;  %1988 = vmatprep.subr.bf16.mxu1 %v11051_v48 }
 0x7b1   :  { %1946 = vmatpush1.bf16.msra.mxu0 %v10974_v33  ;;  %1989 = vmatpush1.bf16.msra.mxu1 %v11055_v54  ;;  %v13156_v33 = vld [vmem:[#allocation32_spill] sm:$0xff] }
 0x7b2   :  { %1947 = vmatprep.subr.bf16.mxu0 %v10978_v36  ;;  %1990 = vmatprep.subr.bf16.mxu1 %v11059_v49  ;;  %v559_v36 = vadd.f32 %v13156_v33, %v10746_v17  ;;  %v8808_v33 = vld [vmem:[#allocation6] ss:$16 sps:$4 sm:$0xff]  }
 0x7b5   :  { %1948 = vmatpush1.bf16.msra.mxu0 %v11062_v56  ;;  %1991 = vmatpush1.bf16.msra.mxu1 %v11065_v63 }
 0x7b6   :  { %1949 = vmatprep.subr.bf16.mxu0 %v11068_v2  ;;  %1992 = vmatprep.subr.bf16.mxu1 %v11071_v7 }
 0x7b9   :  { %1950 = vmatpush1.bf16.msra.mxu0 %v11074_v9  ;;  %1993 = vmatpush1.bf16.msra.mxu1 %v11077_v12 }
 0x7ba   :  { %1951 = vmatprep.subr.bf16.mxu0 %v11080_v19  ;;  %1994 = vmatprep.subr.bf16.mxu1 %v11083_v21 }
 0x7bd   :  { %1952 = vmatpush1.bf16.msra.mxu0 %v11086_v20  ;;  %1995 = vmatpush1.bf16.msra.mxu1 %v11089_v51 }
 0x7be   :  { %2311 = vmatprep.subr.bf16.mxu0 %v8810_v18  ;;  %2424 = vmatprep.subr.bf16.mxu1 %v8813_v8 }
 0x873   :  { %v1830_v59 = vpop.f32.mrb[24].mxu0  ;;  %v1873_v31 = vpop.f32.mrb[40].mxu1 }
 0x874   :  { %v1882_v34 = vadd.f32 %v1830_v59, %v555_v26  ;;  %v1832_v57 = vpop.f32.mrb[25].mxu0  ;;  %v1875_v22 = vpop.f32.mrb[41].mxu1  ;;  %v8279_v7 = vadd.f32 %v1873_v31, %v10757_v5 }
 0x875   :  { %v1883_v37 = vadd.f32 %v1832_v57, %v557_v30  ;;  %v1834_v52 = vpop.f32.mrb[26].mxu0  ;;  %v1877_v13 = vpop.f32.mrb[42].mxu1  ;;  %v8280_v21 = vadd.f32 %v1875_v22, %v10760_v4  ;;  %v8819_v57 = vld [vmem:[#allocation6 + $0x2c] ss:$16 sps:$4 sm:$0xff]   ;;  %v8814_v22 = vld [vmem:[#allocation6 + $0x20] ss:$16 sps:$4 sm:$0xff]  }
 0x876   :  { %v1890_v48 = vmul.f32 0.5, %v1882_v34  ;;  %v1886_v54 = vadd.f32 %v1834_v52, %v559_v36  ;;  %v1836_v49 = vpop.f32.mrb[27].mxu0  ;;  %v1879_v56 = vpop.f32.mrb[43].mxu1  ;;  %v8281_v19 = vadd.f32 %v1877_v13, %v10757_v5  ;;  %v8811_v36 = vld [vmem:[#allocation6 + $0x8] ss:$16 sps:$4 sm:$0xff]  }
 0x877   :  { %v1898_v63 = vmul.f32 0.5, %v1883_v37  ;;  %v1887_v2 = vadd.f32 %v1836_v49, %v561_v10  ;;  %v8282_v20 = vadd.f32 %v1879_v56, %v10760_v4  ;;  %v1908_v40 = vmul.f32 0.5, %v8280_v21  ;;  %v8822_v10 = vld [vmem:[#allocation6 + $0x44] ss:$16 sps:$4 sm:$0xff]   ;;  %v8825_v37 = vld [vmem:[#allocation6 + $0x4c] ss:$16 sps:$4 sm:$0xff]  }
 0x878   :  { %9224 = vtanh.f32 %v1890_v48  ;;  %v1891_v9 = vmul.f32 0.5, %v1886_v54  ;;  %v8820_v52 = vld [vmem:[#allocation6 + $0x40] ss:$16 sps:$4 sm:$0xff]   ;;  %v8823_v13 = vld [vmem:[#allocation6 + $0x48] ss:$16 sps:$4 sm:$0xff]  }
 0x879   :  { %9226 = vtanh.f32 %v1898_v63  ;;  %v1899_v12 = vmul.f32 0.5, %v1887_v2  ;;  %v1909_v24 = vmul.f32 0.5, %v8282_v20  ;;  %v8828_v48 = vld [vmem:[#allocation6 + $0x64] ss:$16 sps:$4 sm:$0xff]   ;;  %v8831_v54 = vld [vmem:[#allocation6 + $0x6c] ss:$16 sps:$4 sm:$0xff]  }
 0x87a   :  { %9228 = vtanh.f32 %v1891_v9  ;;  %v8826_v49 = vld [vmem:[#allocation6 + $0x60] ss:$16 sps:$4 sm:$0xff]   ;;  %v8829_v56 = vld [vmem:[#allocation6 + $0x68] ss:$16 sps:$4 sm:$0xff]   ;;  %v8834_v63 = vld [vmem:[#allocation6 + $0x84] ss:$16 sps:$4 sm:$0xff]  }
 0x87b   :  { %9230 = vtanh.f32 %v8279_v7  ;;  %v8837_v2 = vld [vmem:[#allocation6 + $0x8c] ss:$16 sps:$4 sm:$0xff]   ;;  %v8832_v7 = vld [vmem:[#allocation6 + $0x80] ss:$16 sps:$4 sm:$0xff]   ;;  %v8835_v9 = vld [vmem:[#allocation6 + $0x88] ss:$16 sps:$4 sm:$0xff]  }
 0x87c   :  { %9232 = vtanh.f32 %v1899_v12  ;;  %v8840_v12 = vld [vmem:[#allocation6 + $0xa4] ss:$16 sps:$4 sm:$0xff]   ;;  %v8838_v21 = vld [vmem:[#allocation6 + $0xa0] ss:$16 sps:$4 sm:$0xff]   ;;  %v8841_v20 = vld [vmem:[#allocation6 + $0xa8] ss:$16 sps:$4 sm:$0xff]  }
 0x87d   :  { %9234 = vtanh.f32 %v8281_v19  ;;  %v8843_v19 = vld [vmem:[#allocation6 + $0xac] ss:$16 sps:$4 sm:$0xff]  }
 0x87e   :  { %9236 = vtanh.f32 %v1908_v40  ;;  %v8847_v40 = vld [vmem:[#allocation6 + $0xc8] ss:$16 sps:$4 sm:$0xff]  }
 0x87f   :  { %9238 = vtanh.f32 %v1909_v24  ;;  %v8855_v24 = vld [vmem:[#allocation6 + $0xec] ss:$16 sps:$4 sm:$0xff]  }
 0x882   :  { %v9225_v51 = vpop.eup %9224 }
 0x883   :  { %v9227_v55 = vpop.eup %9226  ;;  %v1894_v35 = vmul.f32 0.5, %v9225_v51  ;;  %v8846_v51 = vld [vmem:[#allocation6 + $0xc4] ss:$16 sps:$4 sm:$0xff]  }
 0x884   :  { %v1902_v14 = vmul.f32 0.5, %v9227_v55  ;;  %v9229_v50 = vpop.eup %9228  ;;  %v8849_v55 = vld [vmem:[#allocation6 + $0xcc] ss:$16 sps:$4 sm:$0xff]  }
 0x885   :  { %v1896_v28 = vadd.f32 0.5, %v1894_v35  ;;  %v9231_v42 = vpop.eup %9230  ;;  %v1895_v44 = vmul.f32 0.5, %v9229_v50  ;;  %v8844_v35 = vld [vmem:[#allocation6 + $0xc0] ss:$16 sps:$4 sm:$0xff]  }
 0x886   :  { %v1904_v41 = vadd.f32 0.5, %v1902_v14  ;;  %v9233_v45 = vpop.eup %9232  ;;  %v8852_v14 = vld [vmem:[#allocation6 + $0xe4] ss:$16 sps:$4 sm:$0xff]   ;;  %v8850_v50 = vld [vmem:[#allocation6 + $0xe0] ss:$16 sps:$4 sm:$0xff]  }
 0x887   :  { %v1918_v46 = vmul.f32 %v9231_v42, %v1896_v28  ;;  %v1897_v0 = vadd.f32 0.5, %v1895_v44  ;;  %v1903_v11 = vmul.f32 0.5, %v9233_v45  ;;  %v9235_v61 = vpop.eup %9234  ;;  %v8853_v28 = vld [vmem:[#allocation6 + $0xe8] ss:$16 sps:$4 sm:$0xff]   ;;  %v11176_v42 = vld [vmem:[#allocation12 + $0x4] ss:$16 sps:$4 sm:$0xff]  }
 0x888   :  { %v1916_v62 = vmul.f32 %v1904_v41, %v11107_v43  ;;  %v9237_v1 = vpop.eup %9236  ;;  %v11178_v41 = vld [vmem:[#allocation12 + $0xc] ss:$16 sps:$4 sm:$0xff]   ;;  %v11181_v44 = vld [vmem:[#allocation12] ss:$16 sps:$4 sm:$0xff]   ;;  %v11184_v45 = vld [vmem:[#allocation12 + $0x8] ss:$16 sps:$4 sm:$0xff]  }
 0x889   :  { %v1905_v27 = vadd.f32 0.5, %v1903_v11  ;;  %v1919_v29 = vmul.f32 %v9235_v61, %v1897_v0  ;;  %v9239_v18 = vpop.eup %9238  ;;  %v1912_v8 = vmul.f32 0.5, %v9237_v1  ;;  %v11194_v0 = vld [vmem:[#allocation12 + $0x20] ss:$16 sps:$4 sm:$0xff]   ;;  %v11234_v61 = vld [vmem:[#allocation12 + $0x4c] ss:$16 sps:$4 sm:$0xff]  }
 0x88a   :  { %v11163_v60 = vadd.f32 %v1918_v46, %v1916_v62  ;;  %v1913_v43 = vmul.f32 0.5, %v9239_v18  ;;  %v11186_v46 = vld [vmem:[#allocation12 + $0x24] ss:$16 sps:$4 sm:$0xff]   ;;  %v13159_v11 = vld [vmem:[#allocation43_spill] sm:$0xff] }
 0x88b   :  { %v1917_v25 = vmul.f32 %v1905_v27, %v11111_v3  ;;  %v1914_v26 = vadd.f32 0.5, %v1912_v8  ;;  %v8816_v3 = vld [vmem:[#allocation6 + $0x24] ss:$16 sps:$4 sm:$0xff]   ;;  %v11243_v1 = vld [vmem:[#allocation12 + $0x6c] ss:$16 sps:$4 sm:$0xff]  }
 0x88c   :  { %9240 = vtanh.f32 %v11163_v60  ;;  %v1915_v23 = vadd.f32 0.5, %v1913_v43  ;;  %v13158_v62 = vld [vmem:[#allocation42_spill] sm:$0xff]  ;;  %v11253_v43 = vld [vmem:[#allocation12 + $0x80] ss:$16 sps:$4 sm:$0xff]  }
 0x88d   :  { %v11167_v38 = vadd.f32 %v1919_v29, %v1917_v25  ;;  %v11236_v27 = vld [vmem:[#allocation12 + $0x64] ss:$16 sps:$4 sm:$0xff]   ;;  %v11238_v29 = vld [vmem:[#allocation12 + $0x48] ss:$16 sps:$4 sm:$0xff]   ;;  %v11240_v25 = vld [vmem:[#allocation12 + $0x60] ss:$16 sps:$4 sm:$0xff]  }
 0x88e   :  { %v11245_v18 = vld [vmem:[#allocation12 + $0x84] ss:$16 sps:$4 sm:$0xff]   ;;  %v11249_v8 = vld [vmem:[#allocation12 + $0x68] ss:$16 sps:$4 sm:$0xff]  }
 0x88f   :  { %9242 = vtanh.f32 %v11167_v38 }
 0x896   :  { %v9241_v32 = vpop.eup %9240 }
 0x897   :  { %v1924_v59 = vmul.f32 %v9241_v32, %v1914_v26  ;;  %v11255_v32 = vld [vmem:[#allocation12 + $0x8c] ss:$16 sps:$4 sm:$0xff]   ;;  %v11258_v26 = vld [vmem:[#allocation12 + $0xa4] ss:$16 sps:$4 sm:$0xff]  }
 0x899   :  { %v9243_v30 = vpop.eup %9242 }
 0x89a   :  { %v1925_v31 = vmul.f32 %v9243_v30, %v1915_v23  ;;  %v11261_v23 = vld [vmem:[#allocation12 + $0x88] ss:$16 sps:$4 sm:$0xff]   ;;  %v11265_v30 = vld [vmem:[#allocation12 + $0xa0] ss:$16 sps:$4 sm:$0xff]  }
 0x89c   :  { %v11170_v34 = vpack.c.bf16 %v1925_v31, %v1924_v59  ;;  %v11267_v59 = vld [vmem:[#allocation12 + $0xac] ss:$16 sps:$4 sm:$0xff]   ;;  %v11270_v31 = vld [vmem:[#allocation12 + $0xc4] ss:$16 sps:$4 sm:$0xff]  }
 0x89e   :  { %1970 = vmatmul.mubr.bf16.vlgmr.msra.gmra.mrb[28].mxu0 %v11170_v34  ;;  %2013 = vmatmul.mubr.bf16.vlgmr.msra.gmra.mrb[44].mxu1 %v11170_v34 }
 0x89f   :  { %2312 = vmatpush1.bf16.msra.mxu0 %v8808_v33  ;;  %2425 = vmatpush1.bf16.msra.mxu1 %v8811_v36  ;;  %v11273_v33 = vld [vmem:[#allocation12 + $0xa8] ss:$16 sps:$4 sm:$0xff]   ;;  %v11277_v36 = vld [vmem:[#allocation12 + $0xc0] ss:$16 sps:$4 sm:$0xff]  }
 0x8a0   :  { %2313 = vmatprep.subr.bf16.mxu0 %v8816_v3  ;;  %2426 = vmatprep.subr.bf16.mxu1 %v8819_v57  ;;  %v11282_v3 = vld [vmem:[#allocation12 + $0xe4] ss:$16 sps:$4 sm:$0xff]   ;;  %v11285_v57 = vld [vmem:[#allocation12 + $0xc8] ss:$16 sps:$4 sm:$0xff]  }
 0x8a1   :  { %2343 = vmatprep.mubr.bf16.mxu0 %v13149_v53  ;;  %2456 = vmatprep.mubr.bf16.mxu1 %v13149_v53 }
 0x8a3   :  { %2314 = vmatpush1.bf16.msra.mxu0 %v8814_v22  ;;  %2427 = vmatpush1.bf16.msra.mxu1 %v8817_v15  ;;  %v11289_v22 = vld [vmem:[#allocation12 + $0xe0] ss:$16 sps:$4 sm:$0xff]   ;;  %v11291_v15 = vld [vmem:[#allocation12 + $0xec] ss:$16 sps:$4 sm:$0xff]  }
 0x8a4   :  { %2315 = vmatprep.subr.bf16.mxu0 %v8822_v10  ;;  %2428 = vmatprep.subr.bf16.mxu1 %v8825_v37  ;;  %v11295_v10 = vld [vmem:[#allocation12 + $0xe8] ss:$16 sps:$4 sm:$0xff]  }
 0x8a5   :  { %v13160_v37 = vld [vmem:[#allocation34_spill] sm:$0xff] }
 0x8a7   :  { %2316 = vmatpush1.bf16.msra.mxu0 %v8820_v52  ;;  %2429 = vmatpush1.bf16.msra.mxu1 %v8823_v13  ;;  %v565_v52 = vadd.f32 %v13160_v37, %v10746_v17  ;;  %v13161_v13 = vld [vmem:[#allocation35_spill] sm:$0xff] }
 0x8a8   :  { %2317 = vmatprep.subr.bf16.mxu0 %v8828_v48  ;;  %2430 = vmatprep.subr.bf16.mxu1 %v8831_v54  ;;  %v567_v48 = vadd.f32 %v13161_v13, %v10743_v16 }
 0x8ab   :  { %2318 = vmatpush1.bf16.msra.mxu0 %v8826_v49  ;;  %2431 = vmatpush1.bf16.msra.mxu1 %v8829_v56  ;;  %v13162_v56 = vld [vmem:[#allocation36_spill] sm:$0xff] }
 0x8ac   :  { %2319 = vmatprep.subr.bf16.mxu0 %v8834_v63  ;;  %2432 = vmatprep.subr.bf16.mxu1 %v8837_v2  ;;  %v569_v63 = vadd.f32 %v13162_v56, %v10746_v17 }
 0x8af   :  { %2320 = vmatpush1.bf16.msra.mxu0 %v8832_v7  ;;  %2433 = vmatpush1.bf16.msra.mxu1 %v8835_v9 }
 0x8b0   :  { %2321 = vmatprep.subr.bf16.mxu0 %v8840_v12  ;;  %2434 = vmatprep.subr.bf16.mxu1 %v8843_v19  ;;  %v13163_v12 = vld [vmem:[#allocation37_spill] sm:$0xff] }
 0x8b1   :  { %v571_v19 = vadd.f32 %v13163_v12, %v10743_v16 }
 0x8b3   :  { %2322 = vmatpush1.bf16.msra.mxu0 %v8838_v21  ;;  %2435 = vmatpush1.bf16.msra.mxu1 %v8841_v20 }
 0x8b4   :  { %2323 = vmatprep.subr.bf16.mxu0 %v8846_v51  ;;  %2436 = vmatprep.subr.bf16.mxu1 %v8849_v55 }
 0x8b7   :  { %2324 = vmatpush1.bf16.msra.mxu0 %v8844_v35  ;;  %2437 = vmatpush1.bf16.msra.mxu1 %v8847_v40 }
 0x8b8   :  { %2325 = vmatprep.subr.bf16.mxu0 %v8852_v14  ;;  %2438 = vmatprep.subr.bf16.mxu1 %v8855_v24 }
 0x8bb   :  { %2326 = vmatpush1.bf16.msra.mxu0 %v8850_v50  ;;  %2439 = vmatpush1.bf16.msra.mxu1 %v8853_v28 }
 0x8bc   :  { %2801 = vmatprep.subr.bf16.mxu0 %v11176_v42  ;;  %2844 = vmatprep.subr.bf16.mxu1 %v11178_v41 }
 0x8be   :  { %2344 = vmatmul.mubr.bf16.vlgmr.msra.gmra.mrb[32].mxu0 %v13158_v62  ;;  %2457 = vmatmul.mubr.bf16.vlgmr.msra.gmra.mrb[48].mxu1 %v13158_v62 }
 0x8bf   :  { %2353 = vmatprep.mubr.bf16.mxu0 %v13149_v53  ;;  %2466 = vmatprep.mubr.bf16.mxu1 %v13149_v53 }
 0x8c0   :  { %2802 = vmatpush1.bf16.msra.mxu0 %v11181_v44  ;;  %2845 = vmatpush1.bf16.msra.mxu1 %v11184_v45 }
 0x8c1   :  { %2803 = vmatprep.subr.bf16.mxu0 %v11186_v46 }
 0x8c4   :  { %2804 = vmatpush1.bf16.msra.mxu0 %v11194_v0 }
 0x8c6   :  { %2354 = vmatmul.mubr.bf16.gmra.mrb[36].mxu0 %v13159_v11  ;;  %2467 = vmatmul.mubr.bf16.gmra.mrb[52].mxu1 %v13159_v11 }
 0x8c7   :  { %2363 = vmatprep.mubr.bf16.mxu0 %v13149_v53  ;;  %2476 = vmatprep.mubr.bf16.mxu1 %v13149_v53 }
 0x8ce   :  { %2364 = vmatmul.mubr.bf16.gmra.mrb[40].mxu0 %v10882_v58  ;;  %2477 = vmatmul.mubr.bf16.gmra.mrb[56].mxu1 %v10882_v58  ;;  %v11222_v58 = vld [vmem:[#allocation12 + $0x2c] ss:$16 sps:$4 sm:$0xff]  }
 0x8cf   :  { %2373 = vmatprep.mubr.bf16.mxu0 %v13149_v53  ;;  %2486 = vmatprep.mubr.bf16.mxu1 %v13149_v53 }
 0x8d0   :  { %2846 = vmatprep.subr.bf16.mxu1 %v11222_v58 }
 0x8d6   :  { %2374 = vmatmul.mubr.bf16.gmra.mrb[44].mxu0 %v10936_v6  ;;  %2487 = vmatmul.mubr.bf16.gmra.mrb[60].mxu1 %v10936_v6  ;;  %v11225_v6 = vld [vmem:[#allocation12 + $0x28] ss:$16 sps:$4 sm:$0xff]  }
 0x8d7   :  { %2383 = vmatprep.mubr.bf16.mxu0 %v13149_v53  ;;  %2496 = vmatprep.mubr.bf16.mxu1 %v13149_v53 }
 0x8d8   :  { %2847 = vmatpush1.bf16.msra.mxu1 %v11225_v6 }
 0x8d9   :  { %2848 = vmatprep.subr.bf16.mxu1 %v11234_v61 }
 0x8dc   :  { %2849 = vmatpush1.bf16.msra.mxu1 %v11238_v29 }
 0x8dd   :  { %2850 = vmatprep.subr.bf16.mxu1 %v11243_v1 }
 0x8de   :  { %2384 = vmatmul.mubr.bf16.gmra.mrb[48].mxu0 %v11016_v47  ;;  %2497 = vmatmul.mubr.bf16.gmra.mrb[64].mxu1 %v11016_v47  ;;  %v11227_v47 = vld [vmem:[#allocation12 + $0x44] ss:$16 sps:$4 sm:$0xff]  }
 0x8df   :  { %2393 = vmatprep.mubr.bf16.mxu0 %v13149_v53  ;;  %2506 = vmatprep.mubr.bf16.mxu1 %v13149_v53 }
 0x8e0   :  { %2805 = vmatprep.subr.bf16.mxu0 %v11227_v47  ;;  %2851 = vmatpush1.bf16.msra.mxu1 %v11249_v8 }
 0x8e1   :  { %2852 = vmatprep.subr.bf16.mxu1 %v11255_v32 }
 0x8e4   :  { %2853 = vmatpush1.bf16.msra.mxu1 %v11261_v23 }
 0x8e5   :  { %2854 = vmatprep.subr.bf16.mxu1 %v11267_v59 }
 0x8e6   :  { %2394 = vmatmul.mubr.bf16.gmra.mrb[52].mxu0 %v11114_v39  ;;  %2507 = vmatmul.mubr.bf16.gmra.mrb[68].mxu1 %v11114_v39  ;;  %v11230_v39 = vld [vmem:[#allocation12 + $0x40] ss:$16 sps:$4 sm:$0xff]  }
 0x8e7   :  { %2403 = vmatprep.mubr.bf16.mxu0 %v13149_v53  ;;  %2516 = vmatprep.mubr.bf16.mxu1 %v13149_v53 }
 0x8e8   :  { %2806 = vmatpush1.bf16.msra.mxu0 %v11230_v39  ;;  %2855 = vmatpush1.bf16.msra.mxu1 %v11273_v33 }
 0x8e9   :  { %2807 = vmatprep.subr.bf16.mxu0 %v11236_v27 }
 0x8ec   :  { %2808 = vmatpush1.bf16.msra.mxu0 %v11240_v25 }
 0x8ed   :  { %2809 = vmatprep.subr.bf16.mxu0 %v11245_v18 }
 0x8ee   :  { %2404 = vmatmul.mubr.bf16.gmra.mrb[56].mxu0 %v11170_v34  ;;  %2517 = vmatmul.mubr.bf16.gmra.mrb[72].mxu1 %v11170_v34  ;;  %v11279_v34 = vld [vmem:[#allocation12 + $0xcc] ss:$16 sps:$4 sm:$0xff]  }
 0x8ef   :  { %2413 = vmatprep.mubr.bf16.mxu0 %v13149_v53  ;;  %2526 = vmatprep.mubr.bf16.mxu1 %v13149_v53 }
 0x8f0   :  { %2810 = vmatpush1.bf16.msra.mxu0 %v11253_v43  ;;  %2856 = vmatprep.subr.bf16.mxu1 %v11279_v34 }
 0x8f1   :  { %2811 = vmatprep.subr.bf16.mxu0 %v11258_v26  ;;  %2857 = vmatpush1.bf16.msra.mxu1 %v11285_v57 }
 0x8f2   :  { %2858 = vmatprep.subr.bf16.mxu1 %v11291_v15 }
 0x8f4   :  { %2812 = vmatpush1.bf16.msra.mxu0 %v11265_v30 }
 0x8f5   :  { %2813 = vmatprep.subr.bf16.mxu0 %v11270_v31  ;;  %2859 = vmatpush1.bf16.msra.mxu1 %v11295_v10 }
 0x8f6   :  { %2985 = vmatprep.subr.bf16.mxu1 %v11178_v41 }
 0x8f8   :  { %2814 = vmatpush1.bf16.msra.mxu0 %v11277_v36 }
 0x8f9   :  { %2815 = vmatprep.subr.bf16.mxu0 %v11282_v3 }
 0x8fc   :  { %2816 = vmatpush1.bf16.msra.mxu0 %v11289_v22 }
 0x8fd   :  { %2942 = vmatprep.subr.bf16.mxu0 %v11176_v42 }
 0x971   :  { %v1971_v54 = vpop.f32.mrb[28].mxu0  ;;  %v2014_v49 = vpop.f32.mrb[44].mxu1 }
 0x972   :  { %v2023_v2 = vadd.f32 %v1971_v54, %v565_v52  ;;  %v1973_v7 = vpop.f32.mrb[29].mxu0  ;;  %v2016_v9 = vpop.f32.mrb[45].mxu1  ;;  %v8283_v28 = vadd.f32 %v2014_v49, %v10757_v5 }
 0x973   :  { %v2024_v21 = vadd.f32 %v1973_v7, %v567_v48  ;;  %v1975_v20 = vpop.f32.mrb[30].mxu0  ;;  %v2018_v51 = vpop.f32.mrb[46].mxu1  ;;  %v8284_v16 = vadd.f32 %v2016_v9, %v10760_v4 }
 0x974   :  { %v2031_v55 = vmul.f32 0.5, %v2023_v2  ;;  %v2027_v35 = vadd.f32 %v1975_v20, %v569_v63  ;;  %v1977_v40 = vpop.f32.mrb[31].mxu0  ;;  %v2020_v14 = vpop.f32.mrb[47].mxu1  ;;  %v8285_v11 = vadd.f32 %v2018_v51, %v10757_v5 }
 0x975   :  { %v2039_v24 = vmul.f32 0.5, %v2024_v21  ;;  %v2028_v50 = vadd.f32 %v1977_v40, %v571_v19  ;;  %v2049_v37 = vmul.f32 0.5, %v8284_v16  ;;  %v8286_v52 = vadd.f32 %v2020_v14, %v10760_v4 }
 0x976   :  { %9244 = vtanh.f32 %v2031_v55  ;;  %v2032_v62 = vmul.f32 0.5, %v2027_v35 }
 0x977   :  { %9246 = vtanh.f32 %v2039_v24  ;;  %v2040_v17 = vmul.f32 0.5, %v2028_v50  ;;  %v2050_v49 = vmul.f32 0.5, %v8286_v52 }
 0x978   :  { %9248 = vtanh.f32 %v2032_v62 }
 0x979   :  { %9250 = vtanh.f32 %v8283_v28 }
 0x97a   :  { %9252 = vtanh.f32 %v2040_v17 }
 0x97b   :  { %9254 = vtanh.f32 %v8285_v11 }
 0x97c   :  { %9256 = vtanh.f32 %v2049_v37 }
 0x97d   :  { %9258 = vtanh.f32 %v2050_v49  ;;  %v13165_v49 = vld [vmem:[#allocation38_spill] sm:$0xff] }
 0x980   :  { %v9245_v13 = vpop.eup %9244 }
 0x981   :  { %v9247_v48 = vpop.eup %9246  ;;  %v2035_v54 = vmul.f32 0.5, %v9245_v13 }
 0x982   :  { %v2043_v56 = vmul.f32 0.5, %v9247_v48  ;;  %v9249_v63 = vpop.eup %9248  ;;  %v2129_v48 = vld [vmem:[#allocation17] sm:$0xf] }
 0x983   :  { %v2037_v2 = vadd.f32 0.5, %v2035_v54  ;;  %v9251_v7 = vpop.eup %9250  ;;  %v2036_v19 = vmul.f32 0.5, %v9249_v63  ;;  %v13164_v54 = vld [vmem:[#allocation39_spill] sm:$0xff]  ;;  %v11370_v63 = vrot.slane %v2129_v48, %v13165_v49 }
 0x984   :  { %v2045_v12 = vadd.f32 0.5, %v2043_v56  ;;  %v9253_v5 = vpop.eup %9252  ;;  %v11367_v56 = vrot.slane %v2129_v48, %v13164_v54 }
 0x985   :  { %v2059_v21 = vmul.f32 %v9251_v7, %v2037_v2  ;;  %v2038_v20 = vadd.f32 0.5, %v2036_v19  ;;  %v2044_v51 = vmul.f32 0.5, %v9253_v5  ;;  %v9255_v55 = vpop.eup %9254  ;;  %v13166_v19 = vld [vmem:[#allocation40_spill] sm:$0xff] }
 0x986   :  { %v2057_v9 = vmul.f32 %v2045_v12, %v11163_v60  ;;  %v9257_v24 = vpop.eup %9256  ;;  %v11374_v5 = vrot.slane %v2129_v48, %v13166_v19 }
 0x987   :  { %v2046_v35 = vadd.f32 0.5, %v2044_v51  ;;  %v2060_v40 = vmul.f32 %v9255_v55, %v2038_v20  ;;  %v2053_v60 = vmul.f32 0.5, %v9257_v24  ;;  %v9259_v28 = vpop.eup %9258 }
 0x988   :  { %v2061_v4 = vadd.f32 %v2059_v21, %v2057_v9  ;;  %v2054_v17 = vmul.f32 0.5, %v9259_v28 }
 0x989   :  { %v2058_v14 = vmul.f32 %v2046_v35, %v11167_v38  ;;  %v2055_v62 = vadd.f32 0.5, %v2053_v60 }
 0x98a   :  { %9260 = vtanh.f32 %v2061_v4  ;;  %2071 = vst [vmem:[%s13110_s17] sm:$0xff] %v2061_v4  ;;  %v2056_v37 = vadd.f32 0.5, %v2054_v17  ;;  %v13167_v17 = vld [vmem:[#allocation41_spill] sm:$0xff] }
 0x98b   :  { %v2062_v50 = vadd.f32 %v2060_v40, %v2058_v14 }
 0x98d   :  { %9262 = vtanh.f32 %v2062_v50  ;;  %2072 = vst [vmem:[%s13110_s17 + $0x8] sm:$0xff] %v2062_v50 }
 0x994   :  { %v9261_v11 = vpop.eup %9260 }
 0x995   :  { %v2065_v16 = vmul.f32 %v9261_v11, %v2055_v62  ;;  %v11381_v11 = vrot.slane %v2129_v48, %v13167_v17 }
 0x997   :  { %2069 = vst [vmem:[%s13109_s16] sm:$0xff] %v2065_v16  ;;  %v9263_v52 = vpop.eup %9262 }
 0x998   :  { %v2066_v38 = vmul.f32 %v9263_v52, %v2056_v37 }
 0x99a   :  { %2070 = vst [vmem:[%s13109_s16 + $0x8] sm:$0xff] %v2066_v38  ;;  %v2096_v13 = vpack.c.bf16 %v2066_v38, %v2065_v16 }
 0x99c   :  { %2414 = vmatmul.mubr.bf16.gmra.mrb[60].mxu0 %v2096_v13  ;;  %2527 = vmatmul.mubr.bf16.gmra.mrb[76].mxu1 %v2096_v13 }
 0x99d   :  { %2833 = vmatprep.mubr.bf16.mxu0 %v13149_v53  ;;  %2876 = vmatprep.mubr.bf16.mxu1 %v13149_v53 }
 0x9a4   :  { %2834 = vmatmul.mubr.bf16.vlgmr.msra.gmra.mrb[32].mxu0 %v13149_v53  ;;  %2877 = vmatmul.mubr.bf16.vlgmr.msra.gmra.mrb[48].mxu1 %v13149_v53 }
 0x9a5   :  { %2943 = vmatpush1.bf16.msra.mxu0 %v11181_v44  ;;  %2986 = vmatpush1.bf16.msra.mxu1 %v11184_v45 }
 0x9a6   :  { %2944 = vmatprep.subr.bf16.mxu0 %v11186_v46  ;;  %2987 = vmatprep.subr.bf16.mxu1 %v11222_v58 }
 0x9a7   :  { %2974 = vmatprep.mubr.bf16.mxu0 %v13149_v53  ;;  %3017 = vmatprep.mubr.bf16.mxu1 %v13149_v53 }
 0x9a9   :  { %2945 = vmatpush1.bf16.msra.mxu0 %v11194_v0  ;;  %2988 = vmatpush1.bf16.msra.mxu1 %v11225_v6 }
 0x9aa   :  { %2946 = vmatprep.subr.bf16.mxu0 %v11227_v47  ;;  %2989 = vmatprep.subr.bf16.mxu1 %v11234_v61 }
 0x9ad   :  { %2947 = vmatpush1.bf16.msra.mxu0 %v11230_v39  ;;  %2990 = vmatpush1.bf16.msra.mxu1 %v11238_v29 }
 0x9ae   :  { %2948 = vmatprep.subr.bf16.mxu0 %v11236_v27  ;;  %2991 = vmatprep.subr.bf16.mxu1 %v11243_v1 }
 0x9b1   :  { %2949 = vmatpush1.bf16.msra.mxu0 %v11240_v25  ;;  %2992 = vmatpush1.bf16.msra.mxu1 %v11249_v8 }
 0x9b2   :  { %2950 = vmatprep.subr.bf16.mxu0 %v11245_v18  ;;  %2993 = vmatprep.subr.bf16.mxu1 %v11255_v32 }
 0x9b5   :  { %2951 = vmatpush1.bf16.msra.mxu0 %v11253_v43  ;;  %2994 = vmatpush1.bf16.msra.mxu1 %v11261_v23 }
 0x9b6   :  { %2952 = vmatprep.subr.bf16.mxu0 %v11258_v26  ;;  %2995 = vmatprep.subr.bf16.mxu1 %v11267_v59 }
 0x9b9   :  { %2953 = vmatpush1.bf16.msra.mxu0 %v11265_v30  ;;  %2996 = vmatpush1.bf16.msra.mxu1 %v11273_v33 }
 0x9ba   :  { %2954 = vmatprep.subr.bf16.mxu0 %v11270_v31  ;;  %2997 = vmatprep.subr.bf16.mxu1 %v11279_v34 }
 0x9bd   :  { %2955 = vmatpush1.bf16.msra.mxu0 %v11277_v36  ;;  %2998 = vmatpush1.bf16.msra.mxu1 %v11285_v57 }
 0x9be   :  { %2956 = vmatprep.subr.bf16.mxu0 %v11282_v3  ;;  %2999 = vmatprep.subr.bf16.mxu1 %v11291_v15 }
 0x9c1   :  { %2957 = vmatpush1.bf16.msra.mxu0 %v11289_v22  ;;  %3000 = vmatpush1.bf16.msra.mxu1 %v11295_v10 }
 0x9c2   :  { %3083 = vmatprep.subr.bf16.mxu0 %v11176_v42  ;;  %3126 = vmatprep.subr.bf16.mxu1 %v11178_v41 }
 0xa77   :  { %v2835_v2 = vpop.f32.mrb[32].mxu0  ;;  %v2878_v7 = vpop.f32.mrb[48].mxu1 }
 0xa78   :  { %v8287_v12 = vadd.f32 %v2835_v2, %v11367_v56  ;;  %v2837_v21 = vpop.f32.mrb[33].mxu0  ;;  %v2880_v9 = vpop.f32.mrb[49].mxu1  ;;  %v8319_v60 = vadd.f32 %v2878_v7, %v11374_v5 }
 0xa79   :  { %v8288_v20 = vadd.f32 %v2837_v21, %v11370_v63  ;;  %v2839_v51 = vpop.f32.mrb[34].mxu0  ;;  %v2882_v55 = vpop.f32.mrb[50].mxu1  ;;  %v8320_v37 = vadd.f32 %v2880_v9, %v11381_v11 }
 0xa7a   :  { %v2895_v4 = vmul.f32 0.5, %v8287_v12  ;;  %v8289_v35 = vadd.f32 %v2839_v51, %v11367_v56  ;;  %v2841_v40 = vpop.f32.mrb[35].mxu0  ;;  %v2884_v14 = vpop.f32.mrb[51].mxu1  ;;  %v8321_v16 = vadd.f32 %v2882_v55, %v11374_v5 }
 0xa7b   :  { %v2903_v24 = vmul.f32 0.5, %v8288_v20  ;;  %v8290_v50 = vadd.f32 %v2841_v40, %v11370_v63  ;;  %v8322_v52 = vadd.f32 %v2884_v14, %v11381_v11  ;;  %v2913_v7 = vmul.f32 0.5, %v8320_v37 }
 0xa7c   :  { %9264 = vtanh.f32 %v2895_v4  ;;  %v2896_v28 = vmul.f32 0.5, %v8289_v35 }
 0xa7d   :  { %9266 = vtanh.f32 %v2903_v24  ;;  %v2904_v62 = vmul.f32 0.5, %v8290_v50  ;;  %v2914_v21 = vmul.f32 0.5, %v8322_v52 }
 0xa7e   :  { %9268 = vtanh.f32 %v2896_v28 }
 0xa7f   :  { %9270 = vtanh.f32 %v8319_v60 }
 0xa80   :  { %9272 = vtanh.f32 %v2904_v62 }
 0xa81   :  { %9274 = vtanh.f32 %v8321_v16 }
 0xa82   :  { %9276 = vtanh.f32 %v2913_v7 }
 0xa83   :  { %9278 = vtanh.f32 %v2914_v21 }
 0xa86   :  { %v9265_v38 = vpop.eup %9264 }
 0xa87   :  { %v9267_v13 = vpop.eup %9266  ;;  %v2899_v2 = vmul.f32 0.5, %v9265_v38 }
 0xa88   :  { %v2907_v12 = vmul.f32 0.5, %v9267_v13  ;;  %v9269_v20 = vpop.eup %9268 }
 0xa89   :  { %v2901_v51 = vadd.f32 0.5, %v2899_v2  ;;  %v9271_v48 = vpop.eup %9270  ;;  %v2900_v35 = vmul.f32 0.5, %v9269_v20 }
 0xa8a   :  { %v2909_v4 = vadd.f32 0.5, %v2907_v12  ;;  %v9273_v40 = vpop.eup %9272 }
 0xa8b   :  { %v2923_v55 = vmul.f32 %v9271_v48, %v2901_v51  ;;  %v2902_v50 = vadd.f32 0.5, %v2900_v35  ;;  %v2908_v9 = vmul.f32 0.5, %v9273_v40  ;;  %v9275_v60 = vpop.eup %9274 }
 0xa8c   :  { %v2921_v24 = vmul.f32 0.0, %v2909_v4  ;;  %v9277_v52 = vpop.eup %9276 }
 0xa8d   :  { %v2910_v28 = vadd.f32 0.5, %v2908_v9  ;;  %v2924_v62 = vmul.f32 %v9275_v60, %v2902_v50  ;;  %v9279_v38 = vpop.eup %9278  ;;  %v2917_v13 = vmul.f32 0.5, %v9277_v52 }
 0xa8e   :  { %v11386_v14 = vadd.f32 %v2923_v55, %v2921_v24  ;;  %v2918_v2 = vmul.f32 0.5, %v9279_v38 }
 0xa8f   :  { %v2922_v16 = vmul.f32 0.0, %v2910_v28  ;;  %v2919_v12 = vadd.f32 0.5, %v2917_v13 }
 0xa90   :  { %9280 = vtanh.f32 %v11386_v14  ;;  %v2920_v20 = vadd.f32 0.5, %v2918_v2 }
 0xa91   :  { %v11389_v37 = vadd.f32 %v2924_v62, %v2922_v16 }
 0xa93   :  { %9282 = vtanh.f32 %v11389_v37 }
 0xa9a   :  { %v9281_v7 = vpop.eup %9280 }
 0xa9b   :  { %v2929_v51 = vmul.f32 %v9281_v7, %v2919_v12 }
 0xa9d   :  { %v9283_v21 = vpop.eup %9282 }
 0xa9e   :  { %v2930_v48 = vmul.f32 %v9283_v21, %v2920_v20 }
 0xaa0   :  { %v11392_v4 = vpack.c.bf16 %v2930_v48, %v2929_v51 }
 0xaa2   :  { %2975 = vmatmul.mubr.bf16.vlgmr.msra.gmra.mrb[36].mxu0 %v11392_v4  ;;  %3018 = vmatmul.mubr.bf16.vlgmr.msra.gmra.mrb[52].mxu1 %v11392_v4 }
 0xaa3   :  { %3084 = vmatpush1.bf16.msra.mxu0 %v11181_v44  ;;  %3127 = vmatpush1.bf16.msra.mxu1 %v11184_v45 }
 0xaa4   :  { %3085 = vmatprep.subr.bf16.mxu0 %v11186_v46  ;;  %3128 = vmatprep.subr.bf16.mxu1 %v11222_v58 }
 0xaa5   :  { %3115 = vmatprep.mubr.bf16.mxu0 %v13149_v53  ;;  %3158 = vmatprep.mubr.bf16.mxu1 %v13149_v53 }
 0xaa7   :  { %3086 = vmatpush1.bf16.msra.mxu0 %v11194_v0  ;;  %3129 = vmatpush1.bf16.msra.mxu1 %v11225_v6 }
 0xaa8   :  { %3087 = vmatprep.subr.bf16.mxu0 %v11227_v47  ;;  %3130 = vmatprep.subr.bf16.mxu1 %v11234_v61 }
 0xaab   :  { %3088 = vmatpush1.bf16.msra.mxu0 %v11230_v39  ;;  %3131 = vmatpush1.bf16.msra.mxu1 %v11238_v29 }
 0xaac   :  { %3089 = vmatprep.subr.bf16.mxu0 %v11236_v27  ;;  %3132 = vmatprep.subr.bf16.mxu1 %v11243_v1 }
 0xaaf   :  { %3090 = vmatpush1.bf16.msra.mxu0 %v11240_v25  ;;  %3133 = vmatpush1.bf16.msra.mxu1 %v11249_v8 }
 0xab0   :  { %3091 = vmatprep.subr.bf16.mxu0 %v11245_v18  ;;  %3134 = vmatprep.subr.bf16.mxu1 %v11255_v32 }
 0xab3   :  { %3092 = vmatpush1.bf16.msra.mxu0 %v11253_v43  ;;  %3135 = vmatpush1.bf16.msra.mxu1 %v11261_v23 }
 0xab4   :  { %3093 = vmatprep.subr.bf16.mxu0 %v11258_v26  ;;  %3136 = vmatprep.subr.bf16.mxu1 %v11267_v59 }
 0xab7   :  { %3094 = vmatpush1.bf16.msra.mxu0 %v11265_v30  ;;  %3137 = vmatpush1.bf16.msra.mxu1 %v11273_v33 }
 0xab8   :  { %3095 = vmatprep.subr.bf16.mxu0 %v11270_v31  ;;  %3138 = vmatprep.subr.bf16.mxu1 %v11279_v34 }
 0xabb   :  { %3096 = vmatpush1.bf16.msra.mxu0 %v11277_v36  ;;  %3139 = vmatpush1.bf16.msra.mxu1 %v11285_v57 }
 0xabc   :  { %3097 = vmatprep.subr.bf16.mxu0 %v11282_v3  ;;  %3140 = vmatprep.subr.bf16.mxu1 %v11291_v15 }
 0xabf   :  { %3098 = vmatpush1.bf16.msra.mxu0 %v11289_v22  ;;  %3141 = vmatpush1.bf16.msra.mxu1 %v11295_v10 }
 0xac0   :  { %3224 = vmatprep.subr.bf16.mxu0 %v11176_v42  ;;  %3267 = vmatprep.subr.bf16.mxu1 %v11178_v41 }
 0xb75   :  { %v2976_v35 = vpop.f32.mrb[36].mxu0  ;;  %v3019_v40 = vpop.f32.mrb[52].mxu1 }
 0xb76   :  { %v8291_v55 = vadd.f32 %v2976_v35, %v11367_v56  ;;  %v2978_v24 = vpop.f32.mrb[37].mxu0  ;;  %v3021_v50 = vpop.f32.mrb[53].mxu1  ;;  %v8323_v7 = vadd.f32 %v3019_v40, %v11374_v5 }
 0xb77   :  { %v8292_v9 = vadd.f32 %v2978_v24, %v11370_v63  ;;  %v2980_v60 = vpop.f32.mrb[38].mxu0  ;;  %v3023_v28 = vpop.f32.mrb[54].mxu1  ;;  %v8324_v51 = vadd.f32 %v3021_v50, %v11381_v11 }
 0xb78   :  { %v3036_v62 = vmul.f32 0.5, %v8291_v55  ;;  %v8293_v16 = vadd.f32 %v2980_v60, %v11367_v56  ;;  %v2982_v52 = vpop.f32.mrb[39].mxu0  ;;  %v3025_v38 = vpop.f32.mrb[55].mxu1  ;;  %v8325_v21 = vadd.f32 %v3023_v28, %v11374_v5 }
 0xb79   :  { %v3044_v13 = vmul.f32 0.5, %v8292_v9  ;;  %v8294_v2 = vadd.f32 %v2982_v52, %v11370_v63  ;;  %v8326_v48 = vadd.f32 %v3025_v38, %v11381_v11  ;;  %v3054_v9 = vmul.f32 0.5, %v8324_v51 }
 0xb7a   :  { %9284 = vtanh.f32 %v3036_v62  ;;  %v3037_v12 = vmul.f32 0.5, %v8293_v16 }
 0xb7b   :  { %9286 = vtanh.f32 %v3044_v13  ;;  %v3045_v20 = vmul.f32 0.5, %v8294_v2  ;;  %v3055_v62 = vmul.f32 0.5, %v8326_v48 }
 0xb7c   :  { %9288 = vtanh.f32 %v3037_v12 }
 0xb7d   :  { %9290 = vtanh.f32 %v8323_v7 }
 0xb7e   :  { %9292 = vtanh.f32 %v3045_v20 }
 0xb7f   :  { %9294 = vtanh.f32 %v8325_v21 }
 0xb80   :  { %9296 = vtanh.f32 %v3054_v9 }
 0xb81   :  { %9298 = vtanh.f32 %v3055_v62 }
 0xb84   :  { %v9285_v35 = vpop.eup %9284 }
 0xb85   :  { %v9287_v55 = vpop.eup %9286  ;;  %v3040_v24 = vmul.f32 0.5, %v9285_v35 }
 0xb86   :  { %v3048_v60 = vmul.f32 0.5, %v9287_v55  ;;  %v9289_v40 = vpop.eup %9288 }
 0xb87   :  { %v3042_v16 = vadd.f32 0.5, %v3040_v24  ;;  %v9291_v52 = vpop.eup %9290  ;;  %v3041_v2 = vmul.f32 0.5, %v9289_v40 }
 0xb88   :  { %v3050_v13 = vadd.f32 0.5, %v3048_v60  ;;  %v9293_v12 = vpop.eup %9292 }
 0xb89   :  { %v3064_v28 = vmul.f32 %v9291_v52, %v3042_v16  ;;  %v3043_v50 = vadd.f32 0.5, %v3041_v2  ;;  %v3049_v20 = vmul.f32 0.5, %v9293_v12  ;;  %v9295_v38 = vpop.eup %9294 }
 0xb8a   :  { %v3062_v7 = vmul.f32 %v3050_v13, %v11386_v14  ;;  %v9297_v24 = vpop.eup %9296 }
 0xb8b   :  { %v3051_v35 = vadd.f32 0.5, %v3049_v20  ;;  %v3065_v51 = vmul.f32 %v9295_v38, %v3043_v50  ;;  %v9299_v9 = vpop.eup %9298  ;;  %v3058_v60 = vmul.f32 0.5, %v9297_v24 }
 0xb8c   :  { %v11439_v21 = vadd.f32 %v3064_v28, %v3062_v7  ;;  %v3059_v14 = vmul.f32 0.5, %v9299_v9 }
 0xb8d   :  { %v3063_v48 = vmul.f32 %v3051_v35, %v11389_v37  ;;  %v3060_v16 = vadd.f32 0.5, %v3058_v60 }
 0xb8e   :  { %9300 = vtanh.f32 %v11439_v21  ;;  %v3061_v62 = vadd.f32 0.5, %v3059_v14 }
 0xb8f   :  { %v11443_v55 = vadd.f32 %v3065_v51, %v3063_v48 }
 0xb91   :  { %9302 = vtanh.f32 %v11443_v55 }
 0xb98   :  { %v9301_v40 = vpop.eup %9300 }
 0xb99   :  { %v3070_v13 = vmul.f32 %v9301_v40, %v3060_v16 }
 0xb9b   :  { %v9303_v52 = vpop.eup %9302 }
 0xb9c   :  { %v3071_v2 = vmul.f32 %v9303_v52, %v3061_v62 }
 0xb9e   :  { %v11446_v12 = vpack.c.bf16 %v3071_v2, %v3070_v13 }
 0xba0   :  { %3116 = vmatmul.mubr.bf16.vlgmr.msra.gmra.mrb[40].mxu0 %v11446_v12  ;;  %3159 = vmatmul.mubr.bf16.vlgmr.msra.gmra.mrb[56].mxu1 %v11446_v12 }
 0xba1   :  { %3225 = vmatpush1.bf16.msra.mxu0 %v11181_v44  ;;  %3268 = vmatpush1.bf16.msra.mxu1 %v11184_v45 }
 0xba2   :  { %3226 = vmatprep.subr.bf16.mxu0 %v11186_v46  ;;  %3269 = vmatprep.subr.bf16.mxu1 %v11222_v58 }
 0xba3   :  { %3256 = vmatprep.mubr.bf16.mxu0 %v13149_v53  ;;  %3299 = vmatprep.mubr.bf16.mxu1 %v13149_v53 }
 0xba5   :  { %3227 = vmatpush1.bf16.msra.mxu0 %v11194_v0  ;;  %3270 = vmatpush1.bf16.msra.mxu1 %v11225_v6 }
 0xba6   :  { %3228 = vmatprep.subr.bf16.mxu0 %v11227_v47  ;;  %3271 = vmatprep.subr.bf16.mxu1 %v11234_v61 }
 0xba9   :  { %3229 = vmatpush1.bf16.msra.mxu0 %v11230_v39  ;;  %3272 = vmatpush1.bf16.msra.mxu1 %v11238_v29 }
 0xbaa   :  { %3230 = vmatprep.subr.bf16.mxu0 %v11236_v27  ;;  %3273 = vmatprep.subr.bf16.mxu1 %v11243_v1 }
 0xbad   :  { %3231 = vmatpush1.bf16.msra.mxu0 %v11240_v25  ;;  %3274 = vmatpush1.bf16.msra.mxu1 %v11249_v8 }
 0xbae   :  { %3232 = vmatprep.subr.bf16.mxu0 %v11245_v18  ;;  %3275 = vmatprep.subr.bf16.mxu1 %v11255_v32 }
 0xbb1   :  { %3233 = vmatpush1.bf16.msra.mxu0 %v11253_v43  ;;  %3276 = vmatpush1.bf16.msra.mxu1 %v11261_v23 }
 0xbb2   :  { %3234 = vmatprep.subr.bf16.mxu0 %v11258_v26  ;;  %3277 = vmatprep.subr.bf16.mxu1 %v11267_v59 }
 0xbb5   :  { %3235 = vmatpush1.bf16.msra.mxu0 %v11265_v30  ;;  %3278 = vmatpush1.bf16.msra.mxu1 %v11273_v33 }
 0xbb6   :  { %3236 = vmatprep.subr.bf16.mxu0 %v11270_v31  ;;  %3279 = vmatprep.subr.bf16.mxu1 %v11279_v34 }
 0xbb9   :  { %3237 = vmatpush1.bf16.msra.mxu0 %v11277_v36  ;;  %3280 = vmatpush1.bf16.msra.mxu1 %v11285_v57 }
 0xbba   :  { %3238 = vmatprep.subr.bf16.mxu0 %v11282_v3  ;;  %3281 = vmatprep.subr.bf16.mxu1 %v11291_v15 }
 0xbbd   :  { %3239 = vmatpush1.bf16.msra.mxu0 %v11289_v22  ;;  %3282 = vmatpush1.bf16.msra.mxu1 %v11295_v10 }
 0xbbe   :  { %3365 = vmatprep.subr.bf16.mxu0 %v11176_v42  ;;  %3408 = vmatprep.subr.bf16.mxu1 %v11178_v41 }
 0xc73   :  { %v3117_v37 = vpop.f32.mrb[40].mxu0  ;;  %v3160_v28 = vpop.f32.mrb[56].mxu1 }
 0xc74   :  { %v8295_v7 = vadd.f32 %v3117_v37, %v11367_v56  ;;  %v3119_v50 = vpop.f32.mrb[41].mxu0  ;;  %v3162_v20 = vpop.f32.mrb[57].mxu1  ;;  %v8327_v16 = vadd.f32 %v3160_v28, %v11374_v5 }
 0xc75   :  { %v8296_v38 = vadd.f32 %v3119_v50, %v11370_v63  ;;  %v3121_v35 = vpop.f32.mrb[42].mxu0  ;;  %v3164_v51 = vpop.f32.mrb[58].mxu1  ;;  %v8328_v2 = vadd.f32 %v3162_v20, %v11381_v11 }
 0xc76   :  { %v3177_v48 = vmul.f32 0.5, %v8295_v7  ;;  %v8297_v24 = vadd.f32 %v3121_v35, %v11367_v56  ;;  %v3123_v9 = vpop.f32.mrb[43].mxu0  ;;  %v3166_v60 = vpop.f32.mrb[59].mxu1  ;;  %v8329_v13 = vadd.f32 %v3164_v51, %v11374_v5 }
 0xc77   :  { %v3185_v14 = vmul.f32 0.5, %v8296_v38  ;;  %v8298_v40 = vadd.f32 %v3123_v9, %v11370_v63  ;;  %v8330_v37 = vadd.f32 %v3166_v60, %v11381_v11  ;;  %v3195_v35 = vmul.f32 0.5, %v8328_v2 }
 0xc78   :  { %9304 = vtanh.f32 %v3177_v48  ;;  %v3178_v62 = vmul.f32 0.5, %v8297_v24 }
 0xc79   :  { %9306 = vtanh.f32 %v3185_v14  ;;  %v3186_v52 = vmul.f32 0.5, %v8298_v40  ;;  %v3196_v9 = vmul.f32 0.5, %v8330_v37 }
 0xc7a   :  { %9308 = vtanh.f32 %v3178_v62 }
 0xc7b   :  { %9310 = vtanh.f32 %v8327_v16 }
 0xc7c   :  { %9312 = vtanh.f32 %v3186_v52 }
 0xc7d   :  { %9314 = vtanh.f32 %v8329_v13 }
 0xc7e   :  { %9316 = vtanh.f32 %v3195_v35 }
 0xc7f   :  { %9318 = vtanh.f32 %v3196_v9 }
 0xc82   :  { %v9305_v7 = vpop.eup %9304 }
 0xc83   :  { %v9307_v50 = vpop.eup %9306  ;;  %v3181_v38 = vmul.f32 0.5, %v9305_v7 }
 0xc84   :  { %v3189_v48 = vmul.f32 0.5, %v9307_v50  ;;  %v9309_v28 = vpop.eup %9308 }
 0xc85   :  { %v3183_v24 = vadd.f32 0.5, %v3181_v38  ;;  %v9311_v14 = vpop.eup %9310  ;;  %v3182_v62 = vmul.f32 0.5, %v9309_v28 }
 0xc86   :  { %v3191_v40 = vadd.f32 0.5, %v3189_v48  ;;  %v9313_v17 = vpop.eup %9312 }
 0xc87   :  { %v3205_v51 = vmul.f32 %v9311_v14, %v3183_v24  ;;  %v3184_v20 = vadd.f32 0.5, %v3182_v62  ;;  %v3190_v52 = vmul.f32 0.5, %v9313_v17  ;;  %v9315_v60 = vpop.eup %9314 }
 0xc88   :  { %v3203_v16 = vmul.f32 %v3191_v40, %v11439_v21  ;;  %v9317_v38 = vpop.eup %9316 }
 0xc89   :  { %v3192_v7 = vadd.f32 0.5, %v3190_v52  ;;  %v3206_v2 = vmul.f32 %v9315_v60, %v3184_v20  ;;  %v9319_v35 = vpop.eup %9318  ;;  %v3199_v48 = vmul.f32 0.5, %v9317_v38 }
 0xc8a   :  { %v11493_v13 = vadd.f32 %v3205_v51, %v3203_v16  ;;  %v3200_v21 = vmul.f32 0.5, %v9319_v35 }
 0xc8b   :  { %v3204_v37 = vmul.f32 %v3192_v7, %v11443_v55  ;;  %v3201_v17 = vadd.f32 0.5, %v3199_v48 }
 0xc8c   :  { %9320 = vtanh.f32 %v11493_v13  ;;  %v3202_v9 = vadd.f32 0.5, %v3200_v21 }
 0xc8d   :  { %v11497_v50 = vadd.f32 %v3206_v2, %v3204_v37 }
 0xc8f   :  { %9322 = vtanh.f32 %v11497_v50 }
 0xc96   :  { %v9321_v28 = vpop.eup %9320 }
 0xc97   :  { %v3211_v14 = vmul.f32 %v9321_v28, %v3201_v17 }
 0xc99   :  { %v9323_v24 = vpop.eup %9322 }
 0xc9a   :  { %v3212_v40 = vmul.f32 %v9323_v24, %v3202_v9 }
 0xc9c   :  { %v11500_v62 = vpack.c.bf16 %v3212_v40, %v3211_v14 }
 0xc9e   :  { %3257 = vmatmul.mubr.bf16.vlgmr.msra.gmra.mrb[44].mxu0 %v11500_v62  ;;  %3300 = vmatmul.mubr.bf16.vlgmr.msra.gmra.mrb[60].mxu1 %v11500_v62 }
 0xc9f   :  { %3366 = vmatpush1.bf16.msra.mxu0 %v11181_v44  ;;  %3409 = vmatpush1.bf16.msra.mxu1 %v11184_v45 }
 0xca0   :  { %3367 = vmatprep.subr.bf16.mxu0 %v11186_v46  ;;  %3410 = vmatprep.subr.bf16.mxu1 %v11222_v58 }
 0xca1   :  { %3397 = vmatprep.mubr.bf16.mxu0 %v13149_v53  ;;  %3440 = vmatprep.mubr.bf16.mxu1 %v13149_v53 }
 0xca3   :  { %3368 = vmatpush1.bf16.msra.mxu0 %v11194_v0  ;;  %3411 = vmatpush1.bf16.msra.mxu1 %v11225_v6 }
 0xca4   :  { %3369 = vmatprep.subr.bf16.mxu0 %v11227_v47  ;;  %3412 = vmatprep.subr.bf16.mxu1 %v11234_v61 }
 0xca7   :  { %3370 = vmatpush1.bf16.msra.mxu0 %v11230_v39  ;;  %3413 = vmatpush1.bf16.msra.mxu1 %v11238_v29 }
 0xca8   :  { %3371 = vmatprep.subr.bf16.mxu0 %v11236_v27  ;;  %3414 = vmatprep.subr.bf16.mxu1 %v11243_v1 }
 0xcab   :  { %3372 = vmatpush1.bf16.msra.mxu0 %v11240_v25  ;;  %3415 = vmatpush1.bf16.msra.mxu1 %v11249_v8 }
 0xcac   :  { %3373 = vmatprep.subr.bf16.mxu0 %v11245_v18  ;;  %3416 = vmatprep.subr.bf16.mxu1 %v11255_v32 }
 0xcaf   :  { %3374 = vmatpush1.bf16.msra.mxu0 %v11253_v43  ;;  %3417 = vmatpush1.bf16.msra.mxu1 %v11261_v23 }
 0xcb0   :  { %3375 = vmatprep.subr.bf16.mxu0 %v11258_v26  ;;  %3418 = vmatprep.subr.bf16.mxu1 %v11267_v59 }
 0xcb3   :  { %3376 = vmatpush1.bf16.msra.mxu0 %v11265_v30  ;;  %3419 = vmatpush1.bf16.msra.mxu1 %v11273_v33 }
 0xcb4   :  { %3377 = vmatprep.subr.bf16.mxu0 %v11270_v31  ;;  %3420 = vmatprep.subr.bf16.mxu1 %v11279_v34 }
 0xcb7   :  { %3378 = vmatpush1.bf16.msra.mxu0 %v11277_v36  ;;  %3421 = vmatpush1.bf16.msra.mxu1 %v11285_v57 }
 0xcb8   :  { %3379 = vmatprep.subr.bf16.mxu0 %v11282_v3  ;;  %3422 = vmatprep.subr.bf16.mxu1 %v11291_v15 }
 0xcbb   :  { %3380 = vmatpush1.bf16.msra.mxu0 %v11289_v22  ;;  %3423 = vmatpush1.bf16.msra.mxu1 %v11295_v10 }
 0xcbc   :  { %3506 = vmatprep.subr.bf16.mxu0 %v11176_v42  ;;  %3549 = vmatprep.subr.bf16.mxu1 %v11178_v41 }
 0xd71   :  { %v3258_v44 = vpop.f32.mrb[44].mxu0  ;;  %v3301_v45 = vpop.f32.mrb[60].mxu1 }
 0xd72   :  { %v8299_v46 = vadd.f32 %v3258_v44, %v11367_v56  ;;  %v3260_v0 = vpop.f32.mrb[45].mxu0  ;;  %v3303_v58 = vpop.f32.mrb[61].mxu1  ;;  %v8331_v41 = vadd.f32 %v3301_v45, %v11374_v5  ;;  %v11561_v45 = vld [vmem:[#allocation12 + $0x8] ss:$16 sps:$4 sm:$0xff]  }
 0xd73   :  { %v8300_v6 = vadd.f32 %v3260_v0, %v11370_v63  ;;  %v3262_v47 = vpop.f32.mrb[46].mxu0  ;;  %v3305_v39 = vpop.f32.mrb[62].mxu1  ;;  %v8332_v32 = vadd.f32 %v3303_v58, %v11381_v11  ;;  %v11567_v0 = vld [vmem:[#allocation12 + $0x2c] ss:$16 sps:$4 sm:$0xff]   ;;  %v11572_v58 = vld [vmem:[#allocation12 + $0x20] ss:$16 sps:$4 sm:$0xff]  }
 0xd74   :  { %v3318_v61 = vmul.f32 0.5, %v8299_v46  ;;  %v8301_v27 = vadd.f32 %v3262_v47, %v11367_v56  ;;  %v3264_v29 = vpop.f32.mrb[47].mxu0  ;;  %v3307_v25 = vpop.f32.mrb[63].mxu1  ;;  %v8333_v43 = vadd.f32 %v3305_v39, %v11374_v5  ;;  %v11564_v46 = vld [vmem:[#allocation12 + $0x24] ss:$16 sps:$4 sm:$0xff]  }
 0xd75   :  { %v3326_v1 = vmul.f32 0.5, %v8300_v6  ;;  %v8302_v42 = vadd.f32 %v3264_v29, %v11370_v63  ;;  %v8334_v26 = vadd.f32 %v3307_v25, %v11381_v11  ;;  %v3336_v31 = vmul.f32 0.5, %v8332_v32  ;;  %v11575_v6 = vld [vmem:[#allocation12 + $0x28] ss:$16 sps:$4 sm:$0xff]   ;;  %v11578_v47 = vld [vmem:[#allocation12 + $0x44] ss:$16 sps:$4 sm:$0xff]  }
 0xd76   :  { %9324 = vtanh.f32 %v3318_v61  ;;  %v3319_v18 = vmul.f32 0.5, %v8301_v27  ;;  %v11581_v39 = vld [vmem:[#allocation12 + $0x4c] ss:$16 sps:$4 sm:$0xff]   ;;  %v11584_v61 = vld [vmem:[#allocation12 + $0x40] ss:$16 sps:$4 sm:$0xff]  }
 0xd77   :  { %9326 = vtanh.f32 %v3326_v1  ;;  %v3327_v8 = vmul.f32 0.5, %v8302_v42  ;;  %v3337_v36 = vmul.f32 0.5, %v8334_v26  ;;  %v11587_v27 = vld [vmem:[#allocation12 + $0x48] ss:$16 sps:$4 sm:$0xff]   ;;  %v11590_v29 = vld [vmem:[#allocation12 + $0x64] ss:$16 sps:$4 sm:$0xff]  }
 0xd78   :  { %9328 = vtanh.f32 %v3319_v18  ;;  %v11593_v25 = vld [vmem:[#allocation12 + $0x6c] ss:$16 sps:$4 sm:$0xff]   ;;  %v11596_v1 = vld [vmem:[#allocation12 + $0x60] ss:$16 sps:$4 sm:$0xff]   ;;  %v11599_v42 = vld [vmem:[#allocation12 + $0x68] ss:$16 sps:$4 sm:$0xff]  }
 0xd79   :  { %9330 = vtanh.f32 %v8331_v41  ;;  %v11602_v41 = vld [vmem:[#allocation12 + $0x84] ss:$16 sps:$4 sm:$0xff]   ;;  %v11605_v18 = vld [vmem:[#allocation12 + $0x8c] ss:$16 sps:$4 sm:$0xff]  }
 0xd7a   :  { %9332 = vtanh.f32 %v3327_v8  ;;  %v11608_v8 = vld [vmem:[#allocation12 + $0x80] ss:$16 sps:$4 sm:$0xff]   ;;  %v11614_v32 = vld [vmem:[#allocation12 + $0xa4] ss:$16 sps:$4 sm:$0xff]   ;;  %v11617_v26 = vld [vmem:[#allocation12 + $0xac] ss:$16 sps:$4 sm:$0xff]  }
 0xd7b   :  { %9334 = vtanh.f32 %v8333_v43  ;;  %v11611_v43 = vld [vmem:[#allocation12 + $0x88] ss:$16 sps:$4 sm:$0xff]  }
 0xd7c   :  { %9336 = vtanh.f32 %v3336_v31  ;;  %v11629_v31 = vld [vmem:[#allocation12 + $0xcc] ss:$16 sps:$4 sm:$0xff]  }
 0xd7d   :  { %9338 = vtanh.f32 %v3337_v36  ;;  %v11635_v36 = vld [vmem:[#allocation12 + $0xc8] ss:$16 sps:$4 sm:$0xff]  }
 0xd80   :  { %v9325_v23 = vpop.eup %9324 }
 0xd81   :  { %v9327_v30 = vpop.eup %9326  ;;  %v3322_v59 = vmul.f32 0.5, %v9325_v23  ;;  %v11620_v23 = vld [vmem:[#allocation12 + $0xa0] ss:$16 sps:$4 sm:$0xff]  }
 0xd82   :  { %v3330_v33 = vmul.f32 0.5, %v9327_v30  ;;  %v9329_v34 = vpop.eup %9328  ;;  %v11623_v30 = vld [vmem:[#allocation12 + $0xa8] ss:$16 sps:$4 sm:$0xff]  }
 0xd83   :  { %v3324_v3 = vadd.f32 0.5, %v3322_v59  ;;  %v9331_v57 = vpop.eup %9330  ;;  %v3323_v15 = vmul.f32 0.5, %v9329_v34  ;;  %v11626_v59 = vld [vmem:[#allocation12 + $0xc4] ss:$16 sps:$4 sm:$0xff]  }
 0xd84   :  { %v3332_v22 = vadd.f32 0.5, %v3330_v33  ;;  %v9333_v10 = vpop.eup %9332  ;;  %v11632_v33 = vld [vmem:[#allocation12 + $0xc0] ss:$16 sps:$4 sm:$0xff]   ;;  %v11638_v34 = vld [vmem:[#allocation12 + $0xe4] ss:$16 sps:$4 sm:$0xff]  }
 0xd85   :  { %v3346_v55 = vmul.f32 %v9331_v57, %v3324_v3  ;;  %v3325_v16 = vadd.f32 0.5, %v3323_v15  ;;  %v3331_v20 = vmul.f32 0.5, %v9333_v10  ;;  %v9335_v52 = vpop.eup %9334  ;;  %v11641_v3 = vld [vmem:[#allocation12 + $0xec] ss:$16 sps:$4 sm:$0xff]   ;;  %v11644_v57 = vld [vmem:[#allocation12 + $0xe0] ss:$16 sps:$4 sm:$0xff]  }
 0xd86   :  { %v3344_v51 = vmul.f32 %v3332_v22, %v11493_v13  ;;  %v9337_v35 = vpop.eup %9336  ;;  %v11647_v22 = vld [vmem:[#allocation12 + $0xe8] ss:$16 sps:$4 sm:$0xff]   ;;  %v11650_v15 = vld [vmem:[#allocation12 + $0x4] ss:$16 sps:$4 sm:$0xff]   ;;  %v11653_v10 = vld [vmem:[#allocation12 + $0xc] ss:$16 sps:$4 sm:$0xff]  }
 0xd87   :  { %v3333_v7 = vadd.f32 0.5, %v3331_v20  ;;  %v3347_v2 = vmul.f32 %v9335_v52, %v3325_v16  ;;  %v9339_v48 = vpop.eup %9338  ;;  %v3340_v21 = vmul.f32 0.5, %v9337_v35 }
 0xd88   :  { %v11547_v60 = vadd.f32 %v3346_v55, %v3344_v51  ;;  %v3341_v13 = vmul.f32 0.5, %v9339_v48 }
 0xd89   :  { %v3345_v37 = vmul.f32 %v3333_v7, %v11497_v50  ;;  %v3342_v17 = vadd.f32 0.5, %v3340_v21  ;;  %v11558_v50 = vld [vmem:[#allocation12] ss:$16 sps:$4 sm:$0xff]  }
 0xd8a   :  { %9340 = vtanh.f32 %v11547_v60  ;;  %v3343_v9 = vadd.f32 0.5, %v3341_v13 }
 0xd8b   :  { %v11551_v38 = vadd.f32 %v3347_v2, %v3345_v37 }
 0xd8d   :  { %9342 = vtanh.f32 %v11551_v38 }
 0xd94   :  { %v9341_v28 = vpop.eup %9340 }
 0xd95   :  { %v3352_v14 = vmul.f32 %v9341_v28, %v3342_v17 }
 0xd97   :  { %v9343_v24 = vpop.eup %9342 }
 0xd98   :  { %v3353_v40 = vmul.f32 %v9343_v24, %v3343_v9 }
 0xd9a   :  { %v11554_v44 = vpack.c.bf16 %v3353_v40, %v3352_v14 }
 0xd9c   :  { %3398 = vmatmul.mubr.bf16.vlgmr.msra.gmra.mrb[48].mxu0 %v11554_v44  ;;  %3441 = vmatmul.mubr.bf16.vlgmr.msra.gmra.mrb[64].mxu1 %v11554_v44 }
 0xd9d   :  { %3507 = vmatpush1.bf16.msra.mxu0 %v11558_v50  ;;  %3550 = vmatpush1.bf16.msra.mxu1 %v11561_v45 }
 0xd9e   :  { %3508 = vmatprep.subr.bf16.mxu0 %v11564_v46  ;;  %3551 = vmatprep.subr.bf16.mxu1 %v11567_v0 }
 0xd9f   :  { %3538 = vmatprep.mubr.bf16.mxu0 %v13149_v53  ;;  %3581 = vmatprep.mubr.bf16.mxu1 %v13149_v53 }
 0xda1   :  { %3509 = vmatpush1.bf16.msra.mxu0 %v11572_v58  ;;  %3552 = vmatpush1.bf16.msra.mxu1 %v11575_v6 }
 0xda2   :  { %3510 = vmatprep.subr.bf16.mxu0 %v11578_v47  ;;  %3553 = vmatprep.subr.bf16.mxu1 %v11581_v39 }
 0xda5   :  { %3511 = vmatpush1.bf16.msra.mxu0 %v11584_v61  ;;  %3554 = vmatpush1.bf16.msra.mxu1 %v11587_v27 }
 0xda6   :  { %3512 = vmatprep.subr.bf16.mxu0 %v11590_v29  ;;  %3555 = vmatprep.subr.bf16.mxu1 %v11593_v25 }
 0xda9   :  { %3513 = vmatpush1.bf16.msra.mxu0 %v11596_v1  ;;  %3556 = vmatpush1.bf16.msra.mxu1 %v11599_v42 }
 0xdaa   :  { %3514 = vmatprep.subr.bf16.mxu0 %v11602_v41  ;;  %3557 = vmatprep.subr.bf16.mxu1 %v11605_v18 }
 0xdad   :  { %3515 = vmatpush1.bf16.msra.mxu0 %v11608_v8  ;;  %3558 = vmatpush1.bf16.msra.mxu1 %v11611_v43 }
 0xdae   :  { %3516 = vmatprep.subr.bf16.mxu0 %v11614_v32  ;;  %3559 = vmatprep.subr.bf16.mxu1 %v11617_v26 }
 0xdb1   :  { %3517 = vmatpush1.bf16.msra.mxu0 %v11620_v23  ;;  %3560 = vmatpush1.bf16.msra.mxu1 %v11623_v30 }
 0xdb2   :  { %3518 = vmatprep.subr.bf16.mxu0 %v11626_v59  ;;  %3561 = vmatprep.subr.bf16.mxu1 %v11629_v31 }
 0xdb5   :  { %3519 = vmatpush1.bf16.msra.mxu0 %v11632_v33  ;;  %3562 = vmatpush1.bf16.msra.mxu1 %v11635_v36 }
 0xdb6   :  { %3520 = vmatprep.subr.bf16.mxu0 %v11638_v34  ;;  %3563 = vmatprep.subr.bf16.mxu1 %v11641_v3 }
 0xdb9   :  { %3521 = vmatpush1.bf16.msra.mxu0 %v11644_v57  ;;  %3564 = vmatpush1.bf16.msra.mxu1 %v11647_v22 }
 0xdba   :  { %3647 = vmatprep.subr.bf16.mxu0 %v11650_v15  ;;  %3690 = vmatprep.subr.bf16.mxu1 %v11653_v10 }
 0xe6f   :  { %v3399_v55 = vpop.f32.mrb[48].mxu0  ;;  %v3442_v51 = vpop.f32.mrb[64].mxu1 }
 0xe70   :  { %v8303_v16 = vadd.f32 %v3399_v55, %v11367_v56  ;;  %v3401_v20 = vpop.f32.mrb[49].mxu0  ;;  %v3444_v52 = vpop.f32.mrb[65].mxu1  ;;  %v8335_v9 = vadd.f32 %v3442_v51, %v11374_v5 }
 0xe71   :  { %v8304_v7 = vadd.f32 %v3401_v20, %v11370_v63  ;;  %v3403_v2 = vpop.f32.mrb[50].mxu0  ;;  %v3446_v37 = vpop.f32.mrb[66].mxu1  ;;  %v8336_v55 = vadd.f32 %v3444_v52, %v11381_v11 }
 0xe72   :  { %v3459_v35 = vmul.f32 0.5, %v8303_v16  ;;  %v8305_v48 = vadd.f32 %v3403_v2, %v11367_v56  ;;  %v3405_v21 = vpop.f32.mrb[51].mxu0  ;;  %v3448_v13 = vpop.f32.mrb[67].mxu1  ;;  %v8337_v40 = vadd.f32 %v3446_v37, %v11374_v5 }
 0xe73   :  { %v3467_v28 = vmul.f32 0.5, %v8304_v7  ;;  %v8306_v17 = vadd.f32 %v3405_v21, %v11370_v63  ;;  %v8338_v16 = vadd.f32 %v3448_v13, %v11381_v11  ;;  %v3477_v21 = vmul.f32 0.5, %v8336_v55 }
 0xe74   :  { %9344 = vtanh.f32 %v3459_v35  ;;  %v3460_v24 = vmul.f32 0.5, %v8305_v48 }
 0xe75   :  { %9346 = vtanh.f32 %v3467_v28  ;;  %v3468_v14 = vmul.f32 0.5, %v8306_v17  ;;  %v3478_v19 = vmul.f32 0.5, %v8338_v16 }
 0xe76   :  { %9348 = vtanh.f32 %v3460_v24 }
 0xe77   :  { %9350 = vtanh.f32 %v8335_v9 }
 0xe78   :  { %9352 = vtanh.f32 %v3468_v14 }
 0xe79   :  { %9354 = vtanh.f32 %v8337_v40 }
 0xe7a   :  { %9356 = vtanh.f32 %v3477_v21 }
 0xe7b   :  { %9358 = vtanh.f32 %v3478_v19 }
 0xe7e   :  { %v9345_v20 = vpop.eup %9344 }
 0xe7f   :  { %v9347_v7 = vpop.eup %9346  ;;  %v3463_v2 = vmul.f32 0.5, %v9345_v20 }
 0xe80   :  { %v3471_v35 = vmul.f32 0.5, %v9347_v7  ;;  %v9349_v51 = vpop.eup %9348 }
 0xe81   :  { %v3465_v48 = vadd.f32 0.5, %v3463_v2  ;;  %v9351_v28 = vpop.eup %9350  ;;  %v3464_v24 = vmul.f32 0.5, %v9349_v51 }
 0xe82   :  { %v3473_v17 = vadd.f32 0.5, %v3471_v35  ;;  %v9353_v49 = vpop.eup %9352 }
 0xe83   :  { %v3487_v37 = vmul.f32 %v9351_v28, %v3465_v48  ;;  %v3466_v52 = vadd.f32 0.5, %v3464_v24  ;;  %v3472_v14 = vmul.f32 0.5, %v9353_v49  ;;  %v9355_v13 = vpop.eup %9354 }
 0xe84   :  { %v3485_v9 = vmul.f32 %v3473_v17, %v11547_v60  ;;  %v9357_v2 = vpop.eup %9356 }
 0xe85   :  { %v3474_v20 = vadd.f32 0.5, %v3472_v14  ;;  %v3488_v55 = vmul.f32 %v9355_v13, %v3466_v52  ;;  %v9359_v21 = vpop.eup %9358  ;;  %v3481_v35 = vmul.f32 0.5, %v9357_v2 }
 0xe86   :  { %v11665_v40 = vadd.f32 %v3487_v37, %v3485_v9  ;;  %v3482_v60 = vmul.f32 0.5, %v9359_v21 }
 0xe87   :  { %v3486_v16 = vmul.f32 %v3474_v20, %v11551_v38  ;;  %v3483_v49 = vadd.f32 0.5, %v3481_v35 }
 0xe88   :  { %9360 = vtanh.f32 %v11665_v40  ;;  %v3484_v19 = vadd.f32 0.5, %v3482_v60 }
 0xe89   :  { %v11669_v7 = vadd.f32 %v3488_v55, %v3486_v16 }
 0xe8b   :  { %9362 = vtanh.f32 %v11669_v7 }
 0xe92   :  { %v9361_v51 = vpop.eup %9360 }
 0xe93   :  { %v3493_v28 = vmul.f32 %v9361_v51, %v3483_v49 }
 0xe95   :  { %v9363_v48 = vpop.eup %9362 }
 0xe96   :  { %v3494_v17 = vmul.f32 %v9363_v48, %v3484_v19 }
 0xe98   :  { %v11672_v24 = vpack.c.bf16 %v3494_v17, %v3493_v28 }
 0xe9a   :  { %3539 = vmatmul.mubr.bf16.vlgmr.msra.gmra.mrb[52].mxu0 %v11672_v24  ;;  %3582 = vmatmul.mubr.bf16.vlgmr.msra.gmra.mrb[68].mxu1 %v11672_v24 }
 0xe9b   :  { %3648 = vmatpush1.bf16.msra.mxu0 %v11558_v50  ;;  %3691 = vmatpush1.bf16.msra.mxu1 %v11561_v45 }
 0xe9c   :  { %3649 = vmatprep.subr.bf16.mxu0 %v11564_v46  ;;  %3692 = vmatprep.subr.bf16.mxu1 %v11567_v0 }
 0xe9d   :  { %3679 = vmatprep.mubr.bf16.mxu0 %v13149_v53  ;;  %3722 = vmatprep.mubr.bf16.mxu1 %v13149_v53 }
 0xe9f   :  { %3650 = vmatpush1.bf16.msra.mxu0 %v11572_v58  ;;  %3693 = vmatpush1.bf16.msra.mxu1 %v11575_v6 }
 0xea0   :  { %3651 = vmatprep.subr.bf16.mxu0 %v11578_v47  ;;  %3694 = vmatprep.subr.bf16.mxu1 %v11581_v39 }
 0xea3   :  { %3652 = vmatpush1.bf16.msra.mxu0 %v11584_v61  ;;  %3695 = vmatpush1.bf16.msra.mxu1 %v11587_v27 }
 0xea4   :  { %3653 = vmatprep.subr.bf16.mxu0 %v11590_v29  ;;  %3696 = vmatprep.subr.bf16.mxu1 %v11593_v25 }
 0xea7   :  { %3654 = vmatpush1.bf16.msra.mxu0 %v11596_v1  ;;  %3697 = vmatpush1.bf16.msra.mxu1 %v11599_v42 }
 0xea8   :  { %3655 = vmatprep.subr.bf16.mxu0 %v11602_v41  ;;  %3698 = vmatprep.subr.bf16.mxu1 %v11605_v18 }
 0xeab   :  { %3656 = vmatpush1.bf16.msra.mxu0 %v11608_v8  ;;  %3699 = vmatpush1.bf16.msra.mxu1 %v11611_v43 }
 0xeac   :  { %3657 = vmatprep.subr.bf16.mxu0 %v11614_v32  ;;  %3700 = vmatprep.subr.bf16.mxu1 %v11617_v26 }
 0xeaf   :  { %3658 = vmatpush1.bf16.msra.mxu0 %v11620_v23  ;;  %3701 = vmatpush1.bf16.msra.mxu1 %v11623_v30 }
 0xeb0   :  { %3659 = vmatprep.subr.bf16.mxu0 %v11626_v59  ;;  %3702 = vmatprep.subr.bf16.mxu1 %v11629_v31 }
 0xeb3   :  { %3660 = vmatpush1.bf16.msra.mxu0 %v11632_v33  ;;  %3703 = vmatpush1.bf16.msra.mxu1 %v11635_v36 }
 0xeb4   :  { %3661 = vmatprep.subr.bf16.mxu0 %v11638_v34  ;;  %3704 = vmatprep.subr.bf16.mxu1 %v11641_v3 }
 0xeb7   :  { %3662 = vmatpush1.bf16.msra.mxu0 %v11644_v57  ;;  %3705 = vmatpush1.bf16.msra.mxu1 %v11647_v22 }
 0xeb8   :  { %3788 = vmatprep.subr.bf16.mxu0 %v11650_v15  ;;  %3831 = vmatprep.subr.bf16.mxu1 %v11653_v10 }
 0xf6d   :  { %v3540_v38 = vpop.f32.mrb[52].mxu0  ;;  %v3583_v37 = vpop.f32.mrb[68].mxu1 }
 0xf6e   :  { %v8307_v9 = vadd.f32 %v3540_v38, %v11367_v56  ;;  %v3542_v52 = vpop.f32.mrb[53].mxu0  ;;  %v3585_v14 = vpop.f32.mrb[69].mxu1  ;;  %v8339_v10 = vadd.f32 %v3583_v37, %v11374_v5 }
 0xf6f   :  { %v8308_v13 = vadd.f32 %v3542_v52, %v11370_v63  ;;  %v3544_v20 = vpop.f32.mrb[54].mxu0  ;;  %v3587_v55 = vpop.f32.mrb[70].mxu1  ;;  %v8340_v48 = vadd.f32 %v3585_v14, %v11381_v11 }
 0xf70   :  { %v3600_v16 = vmul.f32 0.5, %v8307_v9  ;;  %v8309_v2 = vadd.f32 %v3544_v20, %v11367_v56  ;;  %v3546_v21 = vpop.f32.mrb[55].mxu0  ;;  %v3589_v35 = vpop.f32.mrb[71].mxu1  ;;  %v8341_v19 = vadd.f32 %v3587_v55, %v11374_v5 }
 0xf71   :  { %v3608_v60 = vmul.f32 0.5, %v8308_v13  ;;  %v8310_v15 = vadd.f32 %v3546_v21, %v11370_v63  ;;  %v8342_v28 = vadd.f32 %v3589_v35, %v11381_v11  ;;  %v3618_v52 = vmul.f32 0.5, %v8340_v48 }
 0xf72   :  { %9364 = vtanh.f32 %v3600_v16  ;;  %v3601_v51 = vmul.f32 0.5, %v8309_v2 }
 0xf73   :  { %9366 = vtanh.f32 %v3608_v60  ;;  %v3609_v49 = vmul.f32 0.5, %v8310_v15  ;;  %v3619_v20 = vmul.f32 0.5, %v8342_v28 }
 0xf74   :  { %9368 = vtanh.f32 %v3601_v51 }
 0xf75   :  { %9370 = vtanh.f32 %v8339_v10 }
 0xf76   :  { %9372 = vtanh.f32 %v3609_v49 }
 0xf77   :  { %9374 = vtanh.f32 %v8341_v19 }
 0xf78   :  { %9376 = vtanh.f32 %v3618_v52 }
 0xf79   :  { %9378 = vtanh.f32 %v3619_v20 }
 0xf7c   :  { %v9365_v17 = vpop.eup %9364 }
 0xf7d   :  { %v9367_v38 = vpop.eup %9366  ;;  %v3604_v9 = vmul.f32 0.5, %v9365_v17 }
 0xf7e   :  { %v3612_v13 = vmul.f32 0.5, %v9367_v38  ;;  %v9369_v37 = vpop.eup %9368 }
 0xf7f   :  { %v3606_v16 = vadd.f32 0.5, %v3604_v9  ;;  %v9371_v2 = vpop.eup %9370  ;;  %v3605_v60 = vmul.f32 0.5, %v9369_v37 }
 0xf80   :  { %v3614_v21 = vadd.f32 0.5, %v3612_v13  ;;  %v9373_v15 = vpop.eup %9372 }
 0xf81   :  { %v3628_v55 = vmul.f32 %v9371_v2, %v3606_v16  ;;  %v3607_v14 = vadd.f32 0.5, %v3605_v60  ;;  %v3613_v51 = vmul.f32 0.5, %v9373_v15  ;;  %v9375_v35 = vpop.eup %9374 }
 0xf82   :  { %v3626_v10 = vmul.f32 %v3614_v21, %v11665_v40  ;;  %v9377_v38 = vpop.eup %9376 }
 0xf83   :  { %v3615_v19 = vadd.f32 0.5, %v3613_v51  ;;  %v3629_v48 = vmul.f32 %v9375_v35, %v3607_v14  ;;  %v9379_v9 = vpop.eup %9378  ;;  %v3622_v52 = vmul.f32 0.5, %v9377_v38 }
 0xf84   :  { %v11719_v49 = vadd.f32 %v3628_v55, %v3626_v10  ;;  %v3623_v40 = vmul.f32 0.5, %v9379_v9 }
 0xf85   :  { %v3627_v28 = vmul.f32 %v3615_v19, %v11669_v7  ;;  %v3624_v37 = vadd.f32 0.5, %v3622_v52 }
 0xf86   :  { %9380 = vtanh.f32 %v11719_v49  ;;  %v3625_v20 = vadd.f32 0.5, %v3623_v40 }
 0xf87   :  { %v11723_v17 = vadd.f32 %v3629_v48, %v3627_v28 }
 0xf89   :  { %9382 = vtanh.f32 %v11723_v17 }
 0xf90   :  { %v9381_v13 = vpop.eup %9380 }
 0xf91   :  { %v3634_v2 = vmul.f32 %v9381_v13, %v3624_v37 }
 0xf93   :  { %v9383_v16 = vpop.eup %9382 }
 0xf94   :  { %v3635_v21 = vmul.f32 %v9383_v16, %v3625_v20 }
 0xf96   :  { %v11726_v60 = vpack.c.bf16 %v3635_v21, %v3634_v2 }
 0xf98   :  { %3680 = vmatmul.mubr.bf16.vlgmr.msra.gmra.mrb[56].mxu0 %v11726_v60  ;;  %3723 = vmatmul.mubr.bf16.vlgmr.msra.gmra.mrb[72].mxu1 %v11726_v60 }
 0xf99   :  { %3789 = vmatpush1.bf16.msra.mxu0 %v11558_v50  ;;  %3832 = vmatpush1.bf16.msra.mxu1 %v11561_v45  ;;  %v8906_v50 = vld [vmem:[#allocation8 + $0x4] ss:$16 sps:$4 sm:$0xff]   ;;  %v8909_v45 = vld [vmem:[#allocation8 + $0xc] ss:$16 sps:$4 sm:$0xff]  }
 0xf9a   :  { %3790 = vmatprep.subr.bf16.mxu0 %v11564_v46  ;;  %3833 = vmatprep.subr.bf16.mxu1 %v11567_v0 }
 0xf9b   :  { %3820 = vmatprep.mubr.bf16.mxu0 %v13149_v53  ;;  %3863 = vmatprep.mubr.bf16.mxu1 %v13149_v53 }
 0xf9d   :  { %3791 = vmatpush1.bf16.msra.mxu0 %v11572_v58  ;;  %3834 = vmatpush1.bf16.msra.mxu1 %v11575_v6 }
 0xf9e   :  { %3792 = vmatprep.subr.bf16.mxu0 %v11578_v47  ;;  %3835 = vmatprep.subr.bf16.mxu1 %v11581_v39 }
 0xfa1   :  { %3793 = vmatpush1.bf16.msra.mxu0 %v11584_v61  ;;  %3836 = vmatpush1.bf16.msra.mxu1 %v11587_v27 }
 0xfa2   :  { %3794 = vmatprep.subr.bf16.mxu0 %v11590_v29  ;;  %3837 = vmatprep.subr.bf16.mxu1 %v11593_v25 }
 0xfa5   :  { %3795 = vmatpush1.bf16.msra.mxu0 %v11596_v1  ;;  %3838 = vmatpush1.bf16.msra.mxu1 %v11599_v42 }
 0xfa6   :  { %3796 = vmatprep.subr.bf16.mxu0 %v11602_v41  ;;  %3839 = vmatprep.subr.bf16.mxu1 %v11605_v18 }
 0xfa9   :  { %3797 = vmatpush1.bf16.msra.mxu0 %v11608_v8  ;;  %3840 = vmatpush1.bf16.msra.mxu1 %v11611_v43 }
 0xfaa   :  { %3798 = vmatprep.subr.bf16.mxu0 %v11614_v32  ;;  %3841 = vmatprep.subr.bf16.mxu1 %v11617_v26 }
 0xfad   :  { %3799 = vmatpush1.bf16.msra.mxu0 %v11620_v23  ;;  %3842 = vmatpush1.bf16.msra.mxu1 %v11623_v30 }
 0xfae   :  { %3800 = vmatprep.subr.bf16.mxu0 %v11626_v59  ;;  %3843 = vmatprep.subr.bf16.mxu1 %v11629_v31 }
 0xfb1   :  { %3801 = vmatpush1.bf16.msra.mxu0 %v11632_v33  ;;  %3844 = vmatpush1.bf16.msra.mxu1 %v11635_v36 }
 0xfb2   :  { %3802 = vmatprep.subr.bf16.mxu0 %v11638_v34  ;;  %3845 = vmatprep.subr.bf16.mxu1 %v11641_v3 }
 0xfb5   :  { %3803 = vmatpush1.bf16.msra.mxu0 %v11644_v57  ;;  %3846 = vmatpush1.bf16.msra.mxu1 %v11647_v22 }
 0xfb6   :  { %4164 = vmatprep.subr.bf16.mxu0 %v8906_v50  ;;  %4277 = vmatprep.subr.bf16.mxu1 %v8909_v45 }
0x106b   :  { %v3681_v46 = vpop.f32.mrb[56].mxu0  ;;  %v3724_v0 = vpop.f32.mrb[72].mxu1 }
0x106c   :  { %v8311_v58 = vadd.f32 %v3681_v46, %v11367_v56  ;;  %v3683_v6 = vpop.f32.mrb[57].mxu0  ;;  %v3726_v47 = vpop.f32.mrb[73].mxu1  ;;  %v8343_v8 = vadd.f32 %v3724_v0, %v11374_v5  ;;  %v8904_v0 = vld [vmem:[#allocation8] ss:$16 sps:$4 sm:$0xff]  }
0x106d   :  { %v8312_v39 = vadd.f32 %v3683_v6, %v11370_v63  ;;  %v3685_v61 = vpop.f32.mrb[58].mxu0  ;;  %v3728_v27 = vpop.f32.mrb[74].mxu1  ;;  %v8344_v23 = vadd.f32 %v3726_v47, %v11381_v11  ;;  %v8915_v47 = vld [vmem:[#allocation8 + $0x2c] ss:$16 sps:$4 sm:$0xff]  }
0x106e   :  { %v3741_v29 = vmul.f32 0.5, %v8311_v58  ;;  %v8313_v25 = vadd.f32 %v3685_v61, %v11367_v56  ;;  %v3687_v1 = vpop.f32.mrb[59].mxu0  ;;  %v3730_v42 = vpop.f32.mrb[75].mxu1  ;;  %v8345_v26 = vadd.f32 %v3728_v27, %v11374_v5  ;;  %v8907_v58 = vld [vmem:[#allocation8 + $0x8] ss:$16 sps:$4 sm:$0xff]  }
0x106f   :  { %v3749_v41 = vmul.f32 0.5, %v8312_v39  ;;  %v8314_v18 = vadd.f32 %v3687_v1, %v11370_v63  ;;  %v8346_v30 = vadd.f32 %v3730_v42, %v11381_v11  ;;  %v3759_v36 = vmul.f32 0.5, %v8344_v23  ;;  %v8910_v39 = vld [vmem:[#allocation8 + $0x20] ss:$16 sps:$4 sm:$0xff]   ;;  %v8913_v61 = vld [vmem:[#allocation8 + $0x28] ss:$16 sps:$4 sm:$0xff]  }
0x1070   :  { %9384 = vtanh.f32 %v3741_v29  ;;  %v3742_v43 = vmul.f32 0.5, %v8313_v25  ;;  %v8918_v27 = vld [vmem:[#allocation8 + $0x44] ss:$16 sps:$4 sm:$0xff]   ;;  %v8921_v29 = vld [vmem:[#allocation8 + $0x4c] ss:$16 sps:$4 sm:$0xff]  }
0x1071   :  { %9386 = vtanh.f32 %v3749_v41  ;;  %v3750_v32 = vmul.f32 0.5, %v8314_v18  ;;  %v3760_v3 = vmul.f32 0.5, %v8346_v30  ;;  %v8916_v25 = vld [vmem:[#allocation8 + $0x40] ss:$16 sps:$4 sm:$0xff]   ;;  %v8919_v1 = vld [vmem:[#allocation8 + $0x48] ss:$16 sps:$4 sm:$0xff]  }
0x1072   :  { %9388 = vtanh.f32 %v3742_v43  ;;  %v8924_v42 = vld [vmem:[#allocation8 + $0x64] ss:$16 sps:$4 sm:$0xff]   ;;  %v8927_v41 = vld [vmem:[#allocation8 + $0x6c] ss:$16 sps:$4 sm:$0xff]   ;;  %v8922_v18 = vld [vmem:[#allocation8 + $0x60] ss:$16 sps:$4 sm:$0xff]  }
0x1073   :  { %9390 = vtanh.f32 %v8343_v8  ;;  %v8925_v8 = vld [vmem:[#allocation8 + $0x68] ss:$16 sps:$4 sm:$0xff]   ;;  %v8930_v43 = vld [vmem:[#allocation8 + $0x84] ss:$16 sps:$4 sm:$0xff]  }
0x1074   :  { %9392 = vtanh.f32 %v3750_v32  ;;  %v8933_v32 = vld [vmem:[#allocation8 + $0x8c] ss:$16 sps:$4 sm:$0xff]   ;;  %v8931_v23 = vld [vmem:[#allocation8 + $0x88] ss:$16 sps:$4 sm:$0xff]   ;;  %v8936_v30 = vld [vmem:[#allocation8 + $0xa4] ss:$16 sps:$4 sm:$0xff]  }
0x1075   :  { %9394 = vtanh.f32 %v8345_v26  ;;  %v8928_v26 = vld [vmem:[#allocation8 + $0x80] ss:$16 sps:$4 sm:$0xff]  }
0x1076   :  { %9396 = vtanh.f32 %v3759_v36  ;;  %v8942_v36 = vld [vmem:[#allocation8 + $0xc4] ss:$16 sps:$4 sm:$0xff]  }
0x1077   :  { %9398 = vtanh.f32 %v3760_v3  ;;  %v8940_v3 = vld [vmem:[#allocation8 + $0xc0] ss:$16 sps:$4 sm:$0xff]  }
0x107a   :  { %v9385_v59 = vpop.eup %9384 }
0x107b   :  { %v9387_v31 = vpop.eup %9386  ;;  %v3745_v33 = vmul.f32 0.5, %v9385_v59  ;;  %v8939_v59 = vld [vmem:[#allocation8 + $0xac] ss:$16 sps:$4 sm:$0xff]  }
0x107c   :  { %v3753_v34 = vmul.f32 0.5, %v9387_v31  ;;  %v9389_v57 = vpop.eup %9388  ;;  %v8934_v31 = vld [vmem:[#allocation8 + $0xa0] ss:$16 sps:$4 sm:$0xff]  }
0x107d   :  { %v3747_v22 = vadd.f32 0.5, %v3745_v33  ;;  %v9391_v7 = vpop.eup %9390  ;;  %v3746_v55 = vmul.f32 0.5, %v9389_v57  ;;  %v8937_v33 = vld [vmem:[#allocation8 + $0xa8] ss:$16 sps:$4 sm:$0xff]  }
0x107e   :  { %v3755_v15 = vadd.f32 0.5, %v3753_v34  ;;  %v9393_v10 = vpop.eup %9392  ;;  %v8945_v34 = vld [vmem:[#allocation8 + $0xcc] ss:$16 sps:$4 sm:$0xff]   ;;  %v8943_v57 = vld [vmem:[#allocation8 + $0xc8] ss:$16 sps:$4 sm:$0xff]  }
0x107f   :  { %v3769_v14 = vmul.f32 %v9391_v7, %v3747_v22  ;;  %v3748_v35 = vadd.f32 0.5, %v3746_v55  ;;  %v3754_v19 = vmul.f32 0.5, %v9393_v10  ;;  %v9395_v48 = vpop.eup %9394  ;;  %v8948_v22 = vld [vmem:[#allocation8 + $0xe4] ss:$16 sps:$4 sm:$0xff]   ;;  %v8951_v7 = vld [vmem:[#allocation8 + $0xec] ss:$16 sps:$4 sm:$0xff]  }
0x1080   :  { %v3767_v51 = vmul.f32 %v3755_v15, %v11719_v49  ;;  %v9397_v13 = vpop.eup %9396  ;;  %v8946_v15 = vld [vmem:[#allocation8 + $0xe0] ss:$16 sps:$4 sm:$0xff]   ;;  %v8949_v55 = vld [vmem:[#allocation8 + $0xe8] ss:$16 sps:$4 sm:$0xff]   ;;  %v11784_v10 = vld [vmem:[#allocation14 + $0x4] ss:$16 sps:$4 sm:$0xff]  }
0x1081   :  { %v3756_v38 = vadd.f32 0.5, %v3754_v19  ;;  %v3770_v9 = vmul.f32 %v9395_v48, %v3748_v35  ;;  %v9399_v37 = vpop.eup %9398  ;;  %v3763_v20 = vmul.f32 0.5, %v9397_v13  ;;  %v11792_v35 = vld [vmem:[#allocation14 + $0x8] ss:$16 sps:$4 sm:$0xff]   ;;  %v11794_v19 = vld [vmem:[#allocation14 + $0x24] ss:$16 sps:$4 sm:$0xff]  }
0x1082   :  { %v11771_v28 = vadd.f32 %v3769_v14, %v3767_v51  ;;  %v3764_v49 = vmul.f32 0.5, %v9399_v37  ;;  %v11786_v14 = vld [vmem:[#allocation14 + $0xc] ss:$16 sps:$4 sm:$0xff]   ;;  %v11789_v51 = vld [vmem:[#allocation14] ss:$16 sps:$4 sm:$0xff]  }
0x1083   :  { %v3768_v52 = vmul.f32 %v3756_v38, %v11723_v17  ;;  %v3765_v2 = vadd.f32 0.5, %v3763_v20  ;;  %v8912_v17 = vld [vmem:[#allocation8 + $0x24] ss:$16 sps:$4 sm:$0xff]   ;;  %v11802_v48 = vld [vmem:[#allocation14 + $0x20] ss:$16 sps:$4 sm:$0xff]  }
0x1084   :  { %9400 = vtanh.f32 %v11771_v28  ;;  %v3766_v21 = vadd.f32 0.5, %v3764_v49  ;;  %v11846_v38 = vld [vmem:[#allocation14 + $0x48] ss:$16 sps:$4 sm:$0xff]   ;;  %v11853_v13 = vld [vmem:[#allocation14 + $0x84] ss:$16 sps:$4 sm:$0xff]  }
0x1085   :  { %v11775_v40 = vadd.f32 %v3770_v9, %v3768_v52  ;;  %v11848_v9 = vld [vmem:[#allocation14 + $0x60] ss:$16 sps:$4 sm:$0xff]   ;;  %v11851_v52 = vld [vmem:[#allocation14 + $0x6c] ss:$16 sps:$4 sm:$0xff]   ;;  %v11857_v37 = vld [vmem:[#allocation14 + $0x68] ss:$16 sps:$4 sm:$0xff]  }
0x1086   :  { %v11861_v20 = vld [vmem:[#allocation14 + $0x80] ss:$16 sps:$4 sm:$0xff]   ;;  %v11863_v49 = vld [vmem:[#allocation14 + $0x8c] ss:$16 sps:$4 sm:$0xff]  }
0x1087   :  { %9402 = vtanh.f32 %v11775_v40 }
0x108e   :  { %v9401_v16 = vpop.eup %9400 }
0x108f   :  { %v3775_v45 = vmul.f32 %v9401_v16, %v3765_v2  ;;  %v11866_v16 = vld [vmem:[#allocation14 + $0xa4] ss:$16 sps:$4 sm:$0xff]   ;;  %v11869_v2 = vld [vmem:[#allocation14 + $0x88] ss:$16 sps:$4 sm:$0xff]  }
0x1091   :  { %v9403_v50 = vpop.eup %9402 }
0x1092   :  { %v3776_v46 = vmul.f32 %v9403_v50, %v3766_v21  ;;  %v11873_v21 = vld [vmem:[#allocation14 + $0xa0] ss:$16 sps:$4 sm:$0xff]   ;;  %v11875_v50 = vld [vmem:[#allocation14 + $0xac] ss:$16 sps:$4 sm:$0xff]  }
0x1094   :  { %v11778_v6 = vpack.c.bf16 %v3776_v46, %v3775_v45  ;;  %v11878_v45 = vld [vmem:[#allocation14 + $0xc4] ss:$16 sps:$4 sm:$0xff]   ;;  %v11881_v46 = vld [vmem:[#allocation14 + $0xa8] ss:$16 sps:$4 sm:$0xff]  }
0x1096   :  { %3821 = vmatmul.mubr.bf16.vlgmr.msra.gmra.mrb[60].mxu0 %v11778_v6  ;;  %3864 = vmatmul.mubr.bf16.vlgmr.msra.gmra.mrb[76].mxu1 %v11778_v6 }
0x1097   :  { %4165 = vmatpush1.bf16.msra.mxu0 %v8904_v0  ;;  %4278 = vmatpush1.bf16.msra.mxu1 %v8907_v58  ;;  %v11885_v0 = vld [vmem:[#allocation14 + $0xc0] ss:$16 sps:$4 sm:$0xff]   ;;  %v11887_v58 = vld [vmem:[#allocation14 + $0xcc] ss:$16 sps:$4 sm:$0xff]  }
0x1098   :  { %4166 = vmatprep.subr.bf16.mxu0 %v8912_v17  ;;  %4279 = vmatprep.subr.bf16.mxu1 %v8915_v47  ;;  %v11893_v17 = vld [vmem:[#allocation14 + $0xc8] ss:$16 sps:$4 sm:$0xff]   ;;  %v11897_v47 = vld [vmem:[#allocation14 + $0xe0] ss:$16 sps:$4 sm:$0xff]  }
0x1099   :  { %4196 = vmatprep.mubr.bf16.mxu0 %v13149_v53  ;;  %4309 = vmatprep.mubr.bf16.mxu1 %v13149_v53 }
0x109b   :  { %4167 = vmatpush1.bf16.msra.mxu0 %v8910_v39  ;;  %4280 = vmatpush1.bf16.msra.mxu1 %v8913_v61  ;;  %v11899_v39 = vld [vmem:[#allocation14 + $0xec] ss:$16 sps:$4 sm:$0xff]   ;;  %v11903_v61 = vld [vmem:[#allocation14 + $0xe8] ss:$16 sps:$4 sm:$0xff]  }
0x109c   :  { %4168 = vmatprep.subr.bf16.mxu0 %v8918_v27  ;;  %4281 = vmatprep.subr.bf16.mxu1 %v8921_v29 }
0x109f   :  { %4169 = vmatpush1.bf16.msra.mxu0 %v8916_v25  ;;  %4282 = vmatpush1.bf16.msra.mxu1 %v8919_v1 }
0x10a0   :  { %4170 = vmatprep.subr.bf16.mxu0 %v8924_v42  ;;  %4283 = vmatprep.subr.bf16.mxu1 %v8927_v41 }
0x10a3   :  { %4171 = vmatpush1.bf16.msra.mxu0 %v8922_v18  ;;  %4284 = vmatpush1.bf16.msra.mxu1 %v8925_v8 }
0x10a4   :  { %4172 = vmatprep.subr.bf16.mxu0 %v8930_v43  ;;  %4285 = vmatprep.subr.bf16.mxu1 %v8933_v32 }
0x10a7   :  { %4173 = vmatpush1.bf16.msra.mxu0 %v8928_v26  ;;  %4286 = vmatpush1.bf16.msra.mxu1 %v8931_v23 }
0x10a8   :  { %4174 = vmatprep.subr.bf16.mxu0 %v8936_v30  ;;  %4287 = vmatprep.subr.bf16.mxu1 %v8939_v59 }
0x10ab   :  { %4175 = vmatpush1.bf16.msra.mxu0 %v8934_v31  ;;  %4288 = vmatpush1.bf16.msra.mxu1 %v8937_v33 }
0x10ac   :  { %4176 = vmatprep.subr.bf16.mxu0 %v8942_v36  ;;  %4289 = vmatprep.subr.bf16.mxu1 %v8945_v34 }
0x10af   :  { %4177 = vmatpush1.bf16.msra.mxu0 %v8940_v3  ;;  %4290 = vmatpush1.bf16.msra.mxu1 %v8943_v57 }
0x10b0   :  { %4178 = vmatprep.subr.bf16.mxu0 %v8948_v22  ;;  %4291 = vmatprep.subr.bf16.mxu1 %v8951_v7 }
0x10b3   :  { %4179 = vmatpush1.bf16.msra.mxu0 %v8946_v15  ;;  %4292 = vmatpush1.bf16.msra.mxu1 %v8949_v55 }
0x10b4   :  { %4654 = vmatprep.subr.bf16.mxu0 %v11784_v10  ;;  %4697 = vmatprep.subr.bf16.mxu1 %v11786_v14 }
0x10b6   :  { %4197 = vmatmul.mubr.bf16.vlgmr.msra.gmra.mrb[64].mxu0 %v11392_v4  ;;  %4310 = vmatmul.mubr.bf16.vlgmr.msra.gmra.mrb[80].mxu1 %v11392_v4  ;;  %v11830_v4 = vld [vmem:[#allocation14 + $0x2c] ss:$16 sps:$4 sm:$0xff]  }
0x10b7   :  { %4206 = vmatprep.mubr.bf16.mxu0 %v13149_v53  ;;  %4319 = vmatprep.mubr.bf16.mxu1 %v13149_v53 }
0x10b8   :  { %4655 = vmatpush1.bf16.msra.mxu0 %v11789_v51  ;;  %4698 = vmatpush1.bf16.msra.mxu1 %v11792_v35 }
0x10b9   :  { %4656 = vmatprep.subr.bf16.mxu0 %v11794_v19  ;;  %4699 = vmatprep.subr.bf16.mxu1 %v11830_v4 }
0x10bc   :  { %4657 = vmatpush1.bf16.msra.mxu0 %v11802_v48 }
0x10be   :  { %4207 = vmatmul.mubr.bf16.gmra.mrb[68].mxu0 %v11446_v12  ;;  %4320 = vmatmul.mubr.bf16.gmra.mrb[84].mxu1 %v11446_v12  ;;  %v11833_v12 = vld [vmem:[#allocation14 + $0x28] ss:$16 sps:$4 sm:$0xff]  }
0x10bf   :  { %4216 = vmatprep.mubr.bf16.mxu0 %v13149_v53  ;;  %4329 = vmatprep.mubr.bf16.mxu1 %v13149_v53 }
0x10c0   :  { %4700 = vmatpush1.bf16.msra.mxu1 %v11833_v12 }
0x10c6   :  { %4217 = vmatmul.mubr.bf16.gmra.mrb[72].mxu0 %v11500_v62  ;;  %4330 = vmatmul.mubr.bf16.gmra.mrb[88].mxu1 %v11500_v62  ;;  %v11835_v62 = vld [vmem:[#allocation14 + $0x44] ss:$16 sps:$4 sm:$0xff]  }
0x10c7   :  { %4226 = vmatprep.mubr.bf16.mxu0 %v13149_v53  ;;  %4339 = vmatprep.mubr.bf16.mxu1 %v13149_v53 }
0x10c8   :  { %4658 = vmatprep.subr.bf16.mxu0 %v11835_v62 }
0x10ce   :  { %4227 = vmatmul.mubr.bf16.gmra.mrb[76].mxu0 %v11554_v44  ;;  %4340 = vmatmul.mubr.bf16.gmra.mrb[92].mxu1 %v11554_v44  ;;  %v11838_v44 = vld [vmem:[#allocation14 + $0x40] ss:$16 sps:$4 sm:$0xff]  }
0x10cf   :  { %4236 = vmatprep.mubr.bf16.mxu0 %v13149_v53  ;;  %4349 = vmatprep.mubr.bf16.mxu1 %v13149_v53 }
0x10d0   :  { %4659 = vmatpush1.bf16.msra.mxu0 %v11838_v44 }
0x10d6   :  { %4237 = vmatmul.mubr.bf16.gmra.mrb[80].mxu0 %v11672_v24  ;;  %4350 = vmatmul.mubr.bf16.gmra.mrb[96].mxu1 %v11672_v24  ;;  %v11842_v24 = vld [vmem:[#allocation14 + $0x4c] ss:$16 sps:$4 sm:$0xff]  }
0x10d7   :  { %4246 = vmatprep.mubr.bf16.mxu0 %v13149_v53  ;;  %4359 = vmatprep.mubr.bf16.mxu1 %v13149_v53 }
0x10d8   :  { %4701 = vmatprep.subr.bf16.mxu1 %v11842_v24 }
0x10d9   :  { %4702 = vmatpush1.bf16.msra.mxu1 %v11846_v38 }
0x10da   :  { %4703 = vmatprep.subr.bf16.mxu1 %v11851_v52 }
0x10dd   :  { %4704 = vmatpush1.bf16.msra.mxu1 %v11857_v37 }
0x10de   :  { %4247 = vmatmul.mubr.bf16.gmra.mrb[84].mxu0 %v11726_v60  ;;  %4360 = vmatmul.mubr.bf16.gmra.mrb[100].mxu1 %v11726_v60  ;;  %v11844_v60 = vld [vmem:[#allocation14 + $0x64] ss:$16 sps:$4 sm:$0xff]  }
0x10df   :  { %4256 = vmatprep.mubr.bf16.mxu0 %v13149_v53  ;;  %4369 = vmatprep.mubr.bf16.mxu1 %v13149_v53 }
0x10e0   :  { %4660 = vmatprep.subr.bf16.mxu0 %v11844_v60  ;;  %4705 = vmatprep.subr.bf16.mxu1 %v11863_v49 }
0x10e1   :  { %4661 = vmatpush1.bf16.msra.mxu0 %v11848_v9  ;;  %4706 = vmatpush1.bf16.msra.mxu1 %v11869_v2 }
0x10e2   :  { %4662 = vmatprep.subr.bf16.mxu0 %v11853_v13  ;;  %4707 = vmatprep.subr.bf16.mxu1 %v11875_v50 }
0x10e5   :  { %4663 = vmatpush1.bf16.msra.mxu0 %v11861_v20  ;;  %4708 = vmatpush1.bf16.msra.mxu1 %v11881_v46 }
0x10e6   :  { %4257 = vmatmul.mubr.bf16.gmra.mrb[88].mxu0 %v11778_v6  ;;  %4370 = vmatmul.mubr.bf16.gmra.mrb[104].mxu1 %v11778_v6  ;;  %v11890_v6 = vld [vmem:[#allocation14 + $0xe4] ss:$16 sps:$4 sm:$0xff]  }
0x10e7   :  { %4266 = vmatprep.mubr.bf16.mxu0 %v13149_v53  ;;  %4379 = vmatprep.mubr.bf16.mxu1 %v13149_v53 }
0x10e8   :  { %4664 = vmatprep.subr.bf16.mxu0 %v11866_v16  ;;  %4709 = vmatprep.subr.bf16.mxu1 %v11887_v58 }
0x10e9   :  { %4665 = vmatpush1.bf16.msra.mxu0 %v11873_v21  ;;  %4710 = vmatpush1.bf16.msra.mxu1 %v11893_v17 }
0x10ea   :  { %4666 = vmatprep.subr.bf16.mxu0 %v11878_v45  ;;  %4711 = vmatprep.subr.bf16.mxu1 %v11899_v39 }
0x10ed   :  { %4667 = vmatpush1.bf16.msra.mxu0 %v11885_v0  ;;  %4712 = vmatpush1.bf16.msra.mxu1 %v11903_v61 }
0x10ee   :  { %4668 = vmatprep.subr.bf16.mxu0 %v11890_v6  ;;  %4838 = vmatprep.subr.bf16.mxu1 %v11786_v14 }
0x10f1   :  { %4669 = vmatpush1.bf16.msra.mxu0 %v11897_v47 }
0x10f2   :  { %4795 = vmatprep.subr.bf16.mxu0 %v11784_v10 }
0x1169   :  { %v3822_v27 = vpop.f32.mrb[60].mxu0  ;;  %v3865_v29 = vpop.f32.mrb[76].mxu1 }
0x116a   :  { %v8315_v25 = vadd.f32 %v3822_v27, %v11367_v56  ;;  %v3824_v1 = vpop.f32.mrb[61].mxu0  ;;  %v3867_v42 = vpop.f32.mrb[77].mxu1  ;;  %v8347_v31 = vadd.f32 %v3865_v29, %v11374_v5 }
0x116b   :  { %v8316_v41 = vadd.f32 %v3824_v1, %v11370_v63  ;;  %v3826_v18 = vpop.f32.mrb[62].mxu0  ;;  %v3869_v8 = vpop.f32.mrb[78].mxu1  ;;  %v8348_v3 = vadd.f32 %v3867_v42, %v11381_v11 }
0x116c   :  { %v3882_v43 = vmul.f32 0.5, %v8315_v25  ;;  %v8317_v32 = vadd.f32 %v3826_v18, %v11367_v56  ;;  %v3828_v26 = vpop.f32.mrb[63].mxu0  ;;  %v3871_v23 = vpop.f32.mrb[79].mxu1  ;;  %v8349_v34 = vadd.f32 %v3869_v8, %v11374_v5 }
0x116d   :  { %v3890_v30 = vmul.f32 0.5, %v8316_v41  ;;  %v8318_v59 = vadd.f32 %v3828_v26, %v11370_v63  ;;  %v3900_v56 = vmul.f32 0.5, %v8348_v3  ;;  %v8350_v57 = vadd.f32 %v3871_v23, %v11381_v11 }
0x116e   :  { %9404 = vtanh.f32 %v3882_v43  ;;  %v3883_v33 = vmul.f32 0.5, %v8317_v32 }
0x116f   :  { %9406 = vtanh.f32 %v3890_v30  ;;  %v3891_v36 = vmul.f32 0.5, %v8318_v59  ;;  %v3901_v55 = vmul.f32 0.5, %v8350_v57 }
0x1170   :  { %9408 = vtanh.f32 %v3883_v33 }
0x1171   :  { %9410 = vtanh.f32 %v8347_v31 }
0x1172   :  { %9412 = vtanh.f32 %v3891_v36 }
0x1173   :  { %9414 = vtanh.f32 %v8349_v34 }
0x1174   :  { %9416 = vtanh.f32 %v3900_v56 }
0x1175   :  { %9418 = vtanh.f32 %v3901_v55  ;;  %v13168_v55 = vld [vmem:[#allocation38_spill] sm:$0xff] }
0x1178   :  { %v9405_v22 = vpop.eup %9404 }
0x1179   :  { %v9407_v7 = vpop.eup %9406  ;;  %v3886_v63 = vmul.f32 0.5, %v9405_v22 }
0x117a   :  { %v3894_v15 = vmul.f32 0.5, %v9407_v7  ;;  %v9409_v27 = vpop.eup %9408 }
0x117b   :  { %v3888_v29 = vadd.f32 0.5, %v3886_v63  ;;  %v9411_v25 = vpop.eup %9410  ;;  %v3887_v41 = vmul.f32 0.5, %v9409_v27  ;;  %v3982_v63 = vld [vmem:[#allocation18] sm:$0xf] }
0x117c   :  { %v3896_v1 = vadd.f32 0.5, %v3894_v15  ;;  %v9413_v5 = vpop.eup %9412  ;;  %v11971_v15 = vrot.slane %v3982_v63, %v13164_v54  ;;  %v11974_v27 = vrot.slane %v3982_v63, %v13168_v55 }
0x117d   :  { %v3910_v18 = vmul.f32 %v9411_v25, %v3888_v29  ;;  %v3889_v8 = vadd.f32 0.5, %v3887_v41  ;;  %v3895_v43 = vmul.f32 0.5, %v9413_v5  ;;  %v9415_v32 = vpop.eup %9414  ;;  %v13169_v41 = vld [vmem:[#allocation40_spill] sm:$0xff] }
0x117e   :  { %v3908_v42 = vmul.f32 %v3896_v1, %v11771_v28  ;;  %v9417_v59 = vpop.eup %9416  ;;  %v11978_v5 = vrot.slane %v3982_v63, %v13169_v41 }
0x117f   :  { %v3897_v26 = vadd.f32 0.5, %v3895_v43  ;;  %v3911_v23 = vmul.f32 %v9415_v32, %v3889_v8  ;;  %v3904_v28 = vmul.f32 0.5, %v9417_v59  ;;  %v9419_v33 = vpop.eup %9418 }
0x1180   :  { %v3912_v11 = vadd.f32 %v3910_v18, %v3908_v42  ;;  %v3905_v34 = vmul.f32 0.5, %v9419_v33 }
0x1181   :  { %v3909_v30 = vmul.f32 %v3897_v26, %v11775_v40  ;;  %v3906_v36 = vadd.f32 0.5, %v3904_v28 }
0x1182   :  { %9420 = vtanh.f32 %v3912_v11  ;;  %8004 = vst [vmem:[%s13110_s17 + $0x10] sm:$0xff] %v3912_v11  ;;  %v3907_v57 = vadd.f32 0.5, %v3905_v34  ;;  %v13170_v34 = vld [vmem:[#allocation41_spill] sm:$0xff] }
0x1183   :  { %v3913_v31 = vadd.f32 %v3911_v23, %v3909_v30 }
0x1185   :  { %9422 = vtanh.f32 %v3913_v31  ;;  %8005 = vst [vmem:[%s13110_s17 + $0x18] sm:$0xff] %v3913_v31 }
0x118c   :  { %v9421_v3 = vpop.eup %9420 }
0x118d   :  { %v3916_v56 = vmul.f32 %v9421_v3, %v3906_v36  ;;  %v11985_v3 = vrot.slane %v3982_v63, %v13170_v34 }
0x118f   :  { %8002 = vst [vmem:[%s13109_s16 + $0x10] sm:$0xff] %v3916_v56  ;;  %v9423_v22 = vpop.eup %9422 }
0x1190   :  { %v3917_v40 = vmul.f32 %v9423_v22, %v3907_v57 }
0x1192   :  { %8003 = vst [vmem:[%s13109_s16 + $0x18] sm:$0xff] %v3917_v40  ;;  %v3949_v7 = vpack.c.bf16 %v3917_v40, %v3916_v56 }
0x1194   :  { %4267 = vmatmul.mubr.bf16.gmra.mrb[92].mxu0 %v3949_v7  ;;  %4380 = vmatmul.mubr.bf16.gmra.mrb[108].mxu1 %v3949_v7 }
0x1195   :  { %4686 = vmatprep.mubr.bf16.mxu0 %v13149_v53  ;;  %4729 = vmatprep.mubr.bf16.mxu1 %v13149_v53 }
0x119c   :  { %4687 = vmatmul.mubr.bf16.vlgmr.msra.gmra.mrb[64].mxu0 %v13149_v53  ;;  %4730 = vmatmul.mubr.bf16.vlgmr.msra.gmra.mrb[80].mxu1 %v13149_v53 }
0x119d   :  { %4796 = vmatpush1.bf16.msra.mxu0 %v11789_v51  ;;  %4839 = vmatpush1.bf16.msra.mxu1 %v11792_v35 }
0x119e   :  { %4797 = vmatprep.subr.bf16.mxu0 %v11794_v19  ;;  %4840 = vmatprep.subr.bf16.mxu1 %v11830_v4 }
0x119f   :  { %4827 = vmatprep.mubr.bf16.mxu0 %v13149_v53  ;;  %4870 = vmatprep.mubr.bf16.mxu1 %v13149_v53 }
0x11a1   :  { %4798 = vmatpush1.bf16.msra.mxu0 %v11802_v48  ;;  %4841 = vmatpush1.bf16.msra.mxu1 %v11833_v12 }
0x11a2   :  { %4799 = vmatprep.subr.bf16.mxu0 %v11835_v62  ;;  %4842 = vmatprep.subr.bf16.mxu1 %v11842_v24 }
0x11a5   :  { %4800 = vmatpush1.bf16.msra.mxu0 %v11838_v44  ;;  %4843 = vmatpush1.bf16.msra.mxu1 %v11846_v38 }
0x11a6   :  { %4801 = vmatprep.subr.bf16.mxu0 %v11844_v60  ;;  %4844 = vmatprep.subr.bf16.mxu1 %v11851_v52 }
0x11a9   :  { %4802 = vmatpush1.bf16.msra.mxu0 %v11848_v9  ;;  %4845 = vmatpush1.bf16.msra.mxu1 %v11857_v37 }
0x11aa   :  { %4803 = vmatprep.subr.bf16.mxu0 %v11853_v13  ;;  %4846 = vmatprep.subr.bf16.mxu1 %v11863_v49 }
0x11ad   :  { %4804 = vmatpush1.bf16.msra.mxu0 %v11861_v20  ;;  %4847 = vmatpush1.bf16.msra.mxu1 %v11869_v2 }
0x11ae   :  { %4805 = vmatprep.subr.bf16.mxu0 %v11866_v16  ;;  %4848 = vmatprep.subr.bf16.mxu1 %v11875_v50 }
0x11b1   :  { %4806 = vmatpush1.bf16.msra.mxu0 %v11873_v21  ;;  %4849 = vmatpush1.bf16.msra.mxu1 %v11881_v46 }
0x11b2   :  { %4807 = vmatprep.subr.bf16.mxu0 %v11878_v45  ;;  %4850 = vmatprep.subr.bf16.mxu1 %v11887_v58 }
0x11b5   :  { %4808 = vmatpush1.bf16.msra.mxu0 %v11885_v0  ;;  %4851 = vmatpush1.bf16.msra.mxu1 %v11893_v17 }
0x11b6   :  { %4809 = vmatprep.subr.bf16.mxu0 %v11890_v6  ;;  %4852 = vmatprep.subr.bf16.mxu1 %v11899_v39 }
0x11b9   :  { %4810 = vmatpush1.bf16.msra.mxu0 %v11897_v47  ;;  %4853 = vmatpush1.bf16.msra.mxu1 %v11903_v61 }
0x11ba   :  { %4936 = vmatprep.subr.bf16.mxu0 %v11784_v10  ;;  %4979 = vmatprep.subr.bf16.mxu1 %v11786_v14 }
0x126f   :  { %v4688_v29 = vpop.f32.mrb[64].mxu0  ;;  %v4731_v25 = vpop.f32.mrb[80].mxu1 }
0x1270   :  { %v8351_v1 = vadd.f32 %v4688_v29, %v11971_v15  ;;  %v4690_v18 = vpop.f32.mrb[65].mxu0  ;;  %v4733_v42 = vpop.f32.mrb[81].mxu1  ;;  %v8383_v28 = vadd.f32 %v4731_v25, %v11978_v5 }
0x1271   :  { %v8352_v8 = vadd.f32 %v4690_v18, %v11974_v27  ;;  %v4692_v43 = vpop.f32.mrb[66].mxu0  ;;  %v4735_v32 = vpop.f32.mrb[82].mxu1  ;;  %v8384_v57 = vadd.f32 %v4733_v42, %v11985_v3 }
0x1272   :  { %v4748_v11 = vmul.f32 0.5, %v8351_v1  ;;  %v8353_v26 = vadd.f32 %v4692_v43, %v11971_v15  ;;  %v4694_v23 = vpop.f32.mrb[67].mxu0  ;;  %v4737_v30 = vpop.f32.mrb[83].mxu1  ;;  %v8385_v56 = vadd.f32 %v4735_v32, %v11978_v5 }
0x1273   :  { %v4756_v59 = vmul.f32 0.5, %v8352_v8  ;;  %v8354_v31 = vadd.f32 %v4694_v23, %v11974_v27  ;;  %v8386_v22 = vadd.f32 %v4737_v30, %v11985_v3  ;;  %v4766_v25 = vmul.f32 0.5, %v8384_v57 }
0x1274   :  { %9424 = vtanh.f32 %v4748_v11  ;;  %v4749_v33 = vmul.f32 0.5, %v8353_v26 }
0x1275   :  { %9426 = vtanh.f32 %v4756_v59  ;;  %v4757_v36 = vmul.f32 0.5, %v8354_v31  ;;  %v4767_v18 = vmul.f32 0.5, %v8386_v22 }
0x1276   :  { %9428 = vtanh.f32 %v4749_v33 }
0x1277   :  { %9430 = vtanh.f32 %v8383_v28 }
0x1278   :  { %9432 = vtanh.f32 %v4757_v36 }
0x1279   :  { %9434 = vtanh.f32 %v8385_v56 }
0x127a   :  { %9436 = vtanh.f32 %v4766_v25 }
0x127b   :  { %9438 = vtanh.f32 %v4767_v18 }
0x127e   :  { %v9425_v40 = vpop.eup %9424 }
0x127f   :  { %v9427_v7 = vpop.eup %9426  ;;  %v4752_v29 = vmul.f32 0.5, %v9425_v40 }
0x1280   :  { %v4760_v1 = vmul.f32 0.5, %v9427_v7  ;;  %v9429_v8 = vpop.eup %9428 }
0x1281   :  { %v4754_v43 = vadd.f32 0.5, %v4752_v29  ;;  %v9431_v63 = vpop.eup %9430  ;;  %v4753_v26 = vmul.f32 0.5, %v9429_v8 }
0x1282   :  { %v4762_v11 = vadd.f32 0.5, %v4760_v1  ;;  %v9433_v23 = vpop.eup %9432 }
0x1283   :  { %v4776_v32 = vmul.f32 %v9431_v63, %v4754_v43  ;;  %v4755_v31 = vadd.f32 0.5, %v4753_v26  ;;  %v4761_v42 = vmul.f32 0.5, %v9433_v23  ;;  %v9435_v28 = vpop.eup %9434 }
0x1284   :  { %v4774_v59 = vmul.f32 0.0, %v4762_v11  ;;  %v9437_v22 = vpop.eup %9436 }
0x1285   :  { %v4763_v33 = vadd.f32 0.5, %v4761_v42  ;;  %v4777_v36 = vmul.f32 %v9435_v28, %v4755_v31  ;;  %v9439_v40 = vpop.eup %9438  ;;  %v4770_v7 = vmul.f32 0.5, %v9437_v22 }
0x1286   :  { %v11990_v30 = vadd.f32 %v4776_v32, %v4774_v59  ;;  %v4771_v29 = vmul.f32 0.5, %v9439_v40 }
0x1287   :  { %v4775_v56 = vmul.f32 0.0, %v4763_v33  ;;  %v4772_v1 = vadd.f32 0.5, %v4770_v7 }
0x1288   :  { %9440 = vtanh.f32 %v11990_v30  ;;  %v4773_v8 = vadd.f32 0.5, %v4771_v29 }
0x1289   :  { %v11993_v57 = vadd.f32 %v4777_v36, %v4775_v56 }
0x128b   :  { %9442 = vtanh.f32 %v11993_v57 }
0x1292   :  { %v9441_v25 = vpop.eup %9440 }
0x1293   :  { %v4782_v43 = vmul.f32 %v9441_v25, %v4772_v1 }
0x1295   :  { %v9443_v18 = vpop.eup %9442 }
0x1296   :  { %v4783_v63 = vmul.f32 %v9443_v18, %v4773_v8 }
0x1298   :  { %v11996_v11 = vpack.c.bf16 %v4783_v63, %v4782_v43 }
0x129a   :  { %4828 = vmatmul.mubr.bf16.vlgmr.msra.gmra.mrb[68].mxu0 %v11996_v11  ;;  %4871 = vmatmul.mubr.bf16.vlgmr.msra.gmra.mrb[84].mxu1 %v11996_v11 }
0x129b   :  { %4937 = vmatpush1.bf16.msra.mxu0 %v11789_v51  ;;  %4980 = vmatpush1.bf16.msra.mxu1 %v11792_v35 }
0x129c   :  { %4938 = vmatprep.subr.bf16.mxu0 %v11794_v19  ;;  %4981 = vmatprep.subr.bf16.mxu1 %v11830_v4 }
0x129d   :  { %4968 = vmatprep.mubr.bf16.mxu0 %v13149_v53  ;;  %5011 = vmatprep.mubr.bf16.mxu1 %v13149_v53 }
0x129f   :  { %4939 = vmatpush1.bf16.msra.mxu0 %v11802_v48  ;;  %4982 = vmatpush1.bf16.msra.mxu1 %v11833_v12 }
0x12a0   :  { %4940 = vmatprep.subr.bf16.mxu0 %v11835_v62  ;;  %4983 = vmatprep.subr.bf16.mxu1 %v11842_v24 }
0x12a3   :  { %4941 = vmatpush1.bf16.msra.mxu0 %v11838_v44  ;;  %4984 = vmatpush1.bf16.msra.mxu1 %v11846_v38 }
0x12a4   :  { %4942 = vmatprep.subr.bf16.mxu0 %v11844_v60  ;;  %4985 = vmatprep.subr.bf16.mxu1 %v11851_v52 }
0x12a7   :  { %4943 = vmatpush1.bf16.msra.mxu0 %v11848_v9  ;;  %4986 = vmatpush1.bf16.msra.mxu1 %v11857_v37 }
0x12a8   :  { %4944 = vmatprep.subr.bf16.mxu0 %v11853_v13  ;;  %4987 = vmatprep.subr.bf16.mxu1 %v11863_v49 }
0x12ab   :  { %4945 = vmatpush1.bf16.msra.mxu0 %v11861_v20  ;;  %4988 = vmatpush1.bf16.msra.mxu1 %v11869_v2 }
0x12ac   :  { %4946 = vmatprep.subr.bf16.mxu0 %v11866_v16  ;;  %4989 = vmatprep.subr.bf16.mxu1 %v11875_v50 }
0x12af   :  { %4947 = vmatpush1.bf16.msra.mxu0 %v11873_v21  ;;  %4990 = vmatpush1.bf16.msra.mxu1 %v11881_v46 }
0x12b0   :  { %4948 = vmatprep.subr.bf16.mxu0 %v11878_v45  ;;  %4991 = vmatprep.subr.bf16.mxu1 %v11887_v58 }
0x12b3   :  { %4949 = vmatpush1.bf16.msra.mxu0 %v11885_v0  ;;  %4992 = vmatpush1.bf16.msra.mxu1 %v11893_v17 }
0x12b4   :  { %4950 = vmatprep.subr.bf16.mxu0 %v11890_v6  ;;  %4993 = vmatprep.subr.bf16.mxu1 %v11899_v39 }
0x12b7   :  { %4951 = vmatpush1.bf16.msra.mxu0 %v11897_v47  ;;  %4994 = vmatpush1.bf16.msra.mxu1 %v11903_v61 }
0x12b8   :  { %5077 = vmatprep.subr.bf16.mxu0 %v11784_v10  ;;  %5120 = vmatprep.subr.bf16.mxu1 %v11786_v14 }
0x136d   :  { %v4829_v26 = vpop.f32.mrb[68].mxu0  ;;  %v4872_v23 = vpop.f32.mrb[84].mxu1 }
0x136e   :  { %v8355_v32 = vadd.f32 %v4829_v26, %v11971_v15  ;;  %v4831_v59 = vpop.f32.mrb[69].mxu0  ;;  %v4874_v31 = vpop.f32.mrb[85].mxu1  ;;  %v8387_v25 = vadd.f32 %v4872_v23, %v11978_v5 }
0x136f   :  { %v8356_v42 = vadd.f32 %v4831_v59, %v11974_v27  ;;  %v4833_v28 = vpop.f32.mrb[70].mxu0  ;;  %v4876_v33 = vpop.f32.mrb[86].mxu1  ;;  %v8388_v43 = vadd.f32 %v4874_v31, %v11985_v3 }
0x1370   :  { %v4889_v36 = vmul.f32 0.5, %v8355_v32  ;;  %v8357_v56 = vadd.f32 %v4833_v28, %v11971_v15  ;;  %v4835_v22 = vpop.f32.mrb[71].mxu0  ;;  %v4878_v40 = vpop.f32.mrb[87].mxu1  ;;  %v8389_v18 = vadd.f32 %v4876_v33, %v11978_v5 }
0x1371   :  { %v4897_v7 = vmul.f32 0.5, %v8356_v42  ;;  %v8358_v29 = vadd.f32 %v4835_v22, %v11974_v27  ;;  %v8390_v63 = vadd.f32 %v4878_v40, %v11985_v3  ;;  %v4907_v42 = vmul.f32 0.5, %v8388_v43 }
0x1372   :  { %9444 = vtanh.f32 %v4889_v36  ;;  %v4890_v1 = vmul.f32 0.5, %v8357_v56 }
0x1373   :  { %9446 = vtanh.f32 %v4897_v7  ;;  %v4898_v8 = vmul.f32 0.5, %v8358_v29  ;;  %v4908_v36 = vmul.f32 0.5, %v8390_v63 }
0x1374   :  { %9448 = vtanh.f32 %v4890_v1 }
0x1375   :  { %9450 = vtanh.f32 %v8387_v25 }
0x1376   :  { %9452 = vtanh.f32 %v4898_v8 }
0x1377   :  { %9454 = vtanh.f32 %v8389_v18 }
0x1378   :  { %9456 = vtanh.f32 %v4907_v42 }
0x1379   :  { %9458 = vtanh.f32 %v4908_v36 }
0x137c   :  { %v9445_v26 = vpop.eup %9444 }
0x137d   :  { %v9447_v32 = vpop.eup %9446  ;;  %v4893_v59 = vmul.f32 0.5, %v9445_v26 }
0x137e   :  { %v4901_v28 = vmul.f32 0.5, %v9447_v32  ;;  %v9449_v23 = vpop.eup %9448 }
0x137f   :  { %v4895_v56 = vadd.f32 0.5, %v4893_v59  ;;  %v9451_v22 = vpop.eup %9450  ;;  %v4894_v29 = vmul.f32 0.5, %v9449_v23 }
0x1380   :  { %v4903_v7 = vadd.f32 0.5, %v4901_v28  ;;  %v9453_v1 = vpop.eup %9452 }
0x1381   :  { %v4917_v33 = vmul.f32 %v9451_v22, %v4895_v56  ;;  %v4896_v31 = vadd.f32 0.5, %v4894_v29  ;;  %v4902_v8 = vmul.f32 0.5, %v9453_v1  ;;  %v9455_v40 = vpop.eup %9454 }
0x1382   :  { %v4915_v25 = vmul.f32 %v4903_v7, %v11990_v30  ;;  %v9457_v59 = vpop.eup %9456 }
0x1383   :  { %v4904_v26 = vadd.f32 0.5, %v4902_v8  ;;  %v4918_v43 = vmul.f32 %v9455_v40, %v4896_v31  ;;  %v9459_v42 = vpop.eup %9458  ;;  %v4911_v28 = vmul.f32 0.5, %v9457_v59 }
0x1384   :  { %v12043_v18 = vadd.f32 %v4917_v33, %v4915_v25  ;;  %v4912_v30 = vmul.f32 0.5, %v9459_v42 }
0x1385   :  { %v4916_v63 = vmul.f32 %v4904_v26, %v11993_v57  ;;  %v4913_v56 = vadd.f32 0.5, %v4911_v28 }
0x1386   :  { %9460 = vtanh.f32 %v12043_v18  ;;  %v4914_v36 = vadd.f32 0.5, %v4912_v30 }
0x1387   :  { %v12047_v32 = vadd.f32 %v4918_v43, %v4916_v63 }
0x1389   :  { %9462 = vtanh.f32 %v12047_v32 }
0x1390   :  { %v9461_v23 = vpop.eup %9460 }
0x1391   :  { %v4923_v7 = vmul.f32 %v9461_v23, %v4913_v56 }
0x1393   :  { %v9463_v22 = vpop.eup %9462 }
0x1394   :  { %v4924_v29 = vmul.f32 %v9463_v22, %v4914_v36 }
0x1396   :  { %v12050_v1 = vpack.c.bf16 %v4924_v29, %v4923_v7 }
0x1398   :  { %4969 = vmatmul.mubr.bf16.vlgmr.msra.gmra.mrb[72].mxu0 %v12050_v1  ;;  %5012 = vmatmul.mubr.bf16.vlgmr.msra.gmra.mrb[88].mxu1 %v12050_v1 }
0x1399   :  { %5078 = vmatpush1.bf16.msra.mxu0 %v11789_v51  ;;  %5121 = vmatpush1.bf16.msra.mxu1 %v11792_v35 }
0x139a   :  { %5079 = vmatprep.subr.bf16.mxu0 %v11794_v19  ;;  %5122 = vmatprep.subr.bf16.mxu1 %v11830_v4 }
0x139b   :  { %5109 = vmatprep.mubr.bf16.mxu0 %v13149_v53  ;;  %5152 = vmatprep.mubr.bf16.mxu1 %v13149_v53 }
0x139d   :  { %5080 = vmatpush1.bf16.msra.mxu0 %v11802_v48  ;;  %5123 = vmatpush1.bf16.msra.mxu1 %v11833_v12 }
0x139e   :  { %5081 = vmatprep.subr.bf16.mxu0 %v11835_v62  ;;  %5124 = vmatprep.subr.bf16.mxu1 %v11842_v24 }
0x13a1   :  { %5082 = vmatpush1.bf16.msra.mxu0 %v11838_v44  ;;  %5125 = vmatpush1.bf16.msra.mxu1 %v11846_v38 }
0x13a2   :  { %5083 = vmatprep.subr.bf16.mxu0 %v11844_v60  ;;  %5126 = vmatprep.subr.bf16.mxu1 %v11851_v52 }
0x13a5   :  { %5084 = vmatpush1.bf16.msra.mxu0 %v11848_v9  ;;  %5127 = vmatpush1.bf16.msra.mxu1 %v11857_v37 }
0x13a6   :  { %5085 = vmatprep.subr.bf16.mxu0 %v11853_v13  ;;  %5128 = vmatprep.subr.bf16.mxu1 %v11863_v49 }
0x13a9   :  { %5086 = vmatpush1.bf16.msra.mxu0 %v11861_v20  ;;  %5129 = vmatpush1.bf16.msra.mxu1 %v11869_v2 }
0x13aa   :  { %5087 = vmatprep.subr.bf16.mxu0 %v11866_v16  ;;  %5130 = vmatprep.subr.bf16.mxu1 %v11875_v50 }
0x13ad   :  { %5088 = vmatpush1.bf16.msra.mxu0 %v11873_v21  ;;  %5131 = vmatpush1.bf16.msra.mxu1 %v11881_v46 }
0x13ae   :  { %5089 = vmatprep.subr.bf16.mxu0 %v11878_v45  ;;  %5132 = vmatprep.subr.bf16.mxu1 %v11887_v58 }
0x13b1   :  { %5090 = vmatpush1.bf16.msra.mxu0 %v11885_v0  ;;  %5133 = vmatpush1.bf16.msra.mxu1 %v11893_v17 }
0x13b2   :  { %5091 = vmatprep.subr.bf16.mxu0 %v11890_v6  ;;  %5134 = vmatprep.subr.bf16.mxu1 %v11899_v39 }
0x13b5   :  { %5092 = vmatpush1.bf16.msra.mxu0 %v11897_v47  ;;  %5135 = vmatpush1.bf16.msra.mxu1 %v11903_v61 }
0x13b6   :  { %5218 = vmatprep.subr.bf16.mxu0 %v11784_v10  ;;  %5261 = vmatprep.subr.bf16.mxu1 %v11786_v14 }
0x146b   :  { %v4970_v57 = vpop.f32.mrb[72].mxu0  ;;  %v5013_v33 = vpop.f32.mrb[88].mxu1 }
0x146c   :  { %v8359_v25 = vadd.f32 %v4970_v57, %v11971_v15  ;;  %v4972_v31 = vpop.f32.mrb[73].mxu0  ;;  %v5015_v8 = vpop.f32.mrb[89].mxu1  ;;  %v8391_v56 = vadd.f32 %v5013_v33, %v11978_v5 }
0x146d   :  { %v8360_v40 = vadd.f32 %v4972_v31, %v11974_v27  ;;  %v4974_v26 = vpop.f32.mrb[74].mxu0  ;;  %v5017_v43 = vpop.f32.mrb[90].mxu1  ;;  %v8392_v29 = vadd.f32 %v5015_v8, %v11985_v3 }
0x146e   :  { %v5030_v63 = vmul.f32 0.5, %v8359_v25  ;;  %v8361_v59 = vadd.f32 %v4974_v26, %v11971_v15  ;;  %v4976_v42 = vpop.f32.mrb[75].mxu0  ;;  %v5019_v28 = vpop.f32.mrb[91].mxu1  ;;  %v8393_v7 = vadd.f32 %v5017_v43, %v11978_v5 }
0x146f   :  { %v5038_v30 = vmul.f32 0.5, %v8360_v40  ;;  %v8362_v23 = vadd.f32 %v4976_v42, %v11974_v27  ;;  %v8394_v57 = vadd.f32 %v5019_v28, %v11985_v3  ;;  %v5048_v26 = vmul.f32 0.5, %v8392_v29 }
0x1470   :  { %9464 = vtanh.f32 %v5030_v63  ;;  %v5031_v36 = vmul.f32 0.5, %v8361_v59 }
0x1471   :  { %9466 = vtanh.f32 %v5038_v30  ;;  %v5039_v22 = vmul.f32 0.5, %v8362_v23  ;;  %v5049_v42 = vmul.f32 0.5, %v8394_v57 }
0x1472   :  { %9468 = vtanh.f32 %v5031_v36 }
0x1473   :  { %9470 = vtanh.f32 %v8391_v56 }
0x1474   :  { %9472 = vtanh.f32 %v5039_v22 }
0x1475   :  { %9474 = vtanh.f32 %v8393_v7 }
0x1476   :  { %9476 = vtanh.f32 %v5048_v26 }
0x1477   :  { %9478 = vtanh.f32 %v5049_v42 }
0x147a   :  { %v9465_v25 = vpop.eup %9464 }
0x147b   :  { %v9467_v31 = vpop.eup %9466  ;;  %v5034_v40 = vmul.f32 0.5, %v9465_v25 }
0x147c   :  { %v5042_v63 = vmul.f32 0.5, %v9467_v31  ;;  %v9469_v33 = vpop.eup %9468 }
0x147d   :  { %v5036_v59 = vadd.f32 0.5, %v5034_v40  ;;  %v9471_v30 = vpop.eup %9470  ;;  %v5035_v36 = vmul.f32 0.5, %v9469_v33 }
0x147e   :  { %v5044_v23 = vadd.f32 0.5, %v5042_v63  ;;  %v9473_v34 = vpop.eup %9472 }
0x147f   :  { %v5058_v43 = vmul.f32 %v9471_v30, %v5036_v59  ;;  %v5037_v8 = vadd.f32 0.5, %v5035_v36  ;;  %v5043_v22 = vmul.f32 0.5, %v9473_v34  ;;  %v9475_v28 = vpop.eup %9474 }
0x1480   :  { %v5056_v56 = vmul.f32 %v5044_v23, %v12043_v18  ;;  %v9477_v40 = vpop.eup %9476 }
0x1481   :  { %v5045_v25 = vadd.f32 0.5, %v5043_v22  ;;  %v5059_v29 = vmul.f32 %v9475_v28, %v5037_v8  ;;  %v9479_v26 = vpop.eup %9478  ;;  %v5052_v63 = vmul.f32 0.5, %v9477_v40 }
0x1482   :  { %v12097_v7 = vadd.f32 %v5058_v43, %v5056_v56  ;;  %v5053_v18 = vmul.f32 0.5, %v9479_v26 }
0x1483   :  { %v5057_v57 = vmul.f32 %v5045_v25, %v12047_v32  ;;  %v5054_v34 = vadd.f32 0.5, %v5052_v63 }
0x1484   :  { %9480 = vtanh.f32 %v12097_v7  ;;  %v5055_v42 = vadd.f32 0.5, %v5053_v18 }
0x1485   :  { %v12101_v31 = vadd.f32 %v5059_v29, %v5057_v57 }
0x1487   :  { %9482 = vtanh.f32 %v12101_v31 }
0x148e   :  { %v9481_v33 = vpop.eup %9480 }
0x148f   :  { %v5064_v30 = vmul.f32 %v9481_v33, %v5054_v34 }
0x1491   :  { %v9483_v59 = vpop.eup %9482 }
0x1492   :  { %v5065_v23 = vmul.f32 %v9483_v59, %v5055_v42 }
0x1494   :  { %v12104_v36 = vpack.c.bf16 %v5065_v23, %v5064_v30 }
0x1496   :  { %5110 = vmatmul.mubr.bf16.vlgmr.msra.gmra.mrb[76].mxu0 %v12104_v36  ;;  %5153 = vmatmul.mubr.bf16.vlgmr.msra.gmra.mrb[92].mxu1 %v12104_v36 }
0x1497   :  { %5219 = vmatpush1.bf16.msra.mxu0 %v11789_v51  ;;  %5262 = vmatpush1.bf16.msra.mxu1 %v11792_v35 }
0x1498   :  { %5220 = vmatprep.subr.bf16.mxu0 %v11794_v19  ;;  %5263 = vmatprep.subr.bf16.mxu1 %v11830_v4 }
0x1499   :  { %5250 = vmatprep.mubr.bf16.mxu0 %v13149_v53  ;;  %5293 = vmatprep.mubr.bf16.mxu1 %v13149_v53 }
0x149b   :  { %5221 = vmatpush1.bf16.msra.mxu0 %v11802_v48  ;;  %5264 = vmatpush1.bf16.msra.mxu1 %v11833_v12 }
0x149c   :  { %5222 = vmatprep.subr.bf16.mxu0 %v11835_v62  ;;  %5265 = vmatprep.subr.bf16.mxu1 %v11842_v24 }
0x149f   :  { %5223 = vmatpush1.bf16.msra.mxu0 %v11838_v44  ;;  %5266 = vmatpush1.bf16.msra.mxu1 %v11846_v38 }
0x14a0   :  { %5224 = vmatprep.subr.bf16.mxu0 %v11844_v60  ;;  %5267 = vmatprep.subr.bf16.mxu1 %v11851_v52 }
0x14a3   :  { %5225 = vmatpush1.bf16.msra.mxu0 %v11848_v9  ;;  %5268 = vmatpush1.bf16.msra.mxu1 %v11857_v37 }
0x14a4   :  { %5226 = vmatprep.subr.bf16.mxu0 %v11853_v13  ;;  %5269 = vmatprep.subr.bf16.mxu1 %v11863_v49 }
0x14a7   :  { %5227 = vmatpush1.bf16.msra.mxu0 %v11861_v20  ;;  %5270 = vmatpush1.bf16.msra.mxu1 %v11869_v2 }
0x14a8   :  { %5228 = vmatprep.subr.bf16.mxu0 %v11866_v16  ;;  %5271 = vmatprep.subr.bf16.mxu1 %v11875_v50 }
0x14ab   :  { %5229 = vmatpush1.bf16.msra.mxu0 %v11873_v21  ;;  %5272 = vmatpush1.bf16.msra.mxu1 %v11881_v46 }
0x14ac   :  { %5230 = vmatprep.subr.bf16.mxu0 %v11878_v45  ;;  %5273 = vmatprep.subr.bf16.mxu1 %v11887_v58 }
0x14af   :  { %5231 = vmatpush1.bf16.msra.mxu0 %v11885_v0  ;;  %5274 = vmatpush1.bf16.msra.mxu1 %v11893_v17 }
0x14b0   :  { %5232 = vmatprep.subr.bf16.mxu0 %v11890_v6  ;;  %5275 = vmatprep.subr.bf16.mxu1 %v11899_v39 }
0x14b3   :  { %5233 = vmatpush1.bf16.msra.mxu0 %v11897_v47  ;;  %5276 = vmatpush1.bf16.msra.mxu1 %v11903_v61 }
0x14b4   :  { %5359 = vmatprep.subr.bf16.mxu0 %v11784_v10  ;;  %5402 = vmatprep.subr.bf16.mxu1 %v11786_v14 }
0x1569   :  { %v5111_v51 = vpop.f32.mrb[76].mxu0  ;;  %v5154_v35 = vpop.f32.mrb[92].mxu1 }
0x156a   :  { %v8363_v19 = vadd.f32 %v5111_v51, %v11971_v15  ;;  %v5113_v48 = vpop.f32.mrb[77].mxu0  ;;  %v5156_v4 = vpop.f32.mrb[93].mxu1  ;;  %v8395_v14 = vadd.f32 %v5154_v35, %v11978_v5 }
0x156b   :  { %v8364_v12 = vadd.f32 %v5113_v48, %v11974_v27  ;;  %v5115_v62 = vpop.f32.mrb[78].mxu0  ;;  %v5158_v44 = vpop.f32.mrb[94].mxu1  ;;  %v8396_v49 = vadd.f32 %v5156_v4, %v11985_v3  ;;  %v12168_v48 = vld [vmem:[#allocation14 + $0x24] ss:$16 sps:$4 sm:$0xff]   ;;  %v12171_v4 = vld [vmem:[#allocation14 + $0x2c] ss:$16 sps:$4 sm:$0xff]  }
0x156c   :  { %v5171_v24 = vmul.f32 0.5, %v8363_v19  ;;  %v8365_v60 = vadd.f32 %v5115_v62, %v11971_v15  ;;  %v5117_v38 = vpop.f32.mrb[79].mxu0  ;;  %v5160_v9 = vpop.f32.mrb[95].mxu1  ;;  %v8397_v20 = vadd.f32 %v5158_v44, %v11978_v5  ;;  %v12165_v19 = vld [vmem:[#allocation14 + $0x8] ss:$16 sps:$4 sm:$0xff]  }
0x156d   :  { %v5179_v52 = vmul.f32 0.5, %v8364_v12  ;;  %v8366_v10 = vadd.f32 %v5117_v38, %v11974_v27  ;;  %v8398_v16 = vadd.f32 %v5160_v9, %v11985_v3  ;;  %v5189_v45 = vmul.f32 0.5, %v8396_v49  ;;  %v12176_v12 = vld [vmem:[#allocation14 + $0x20] ss:$16 sps:$4 sm:$0xff]   ;;  %v12179_v62 = vld [vmem:[#allocation14 + $0x28] ss:$16 sps:$4 sm:$0xff]  }
0x156e   :  { %9484 = vtanh.f32 %v5171_v24  ;;  %v5172_v13 = vmul.f32 0.5, %v8365_v60  ;;  %v12182_v44 = vld [vmem:[#allocation14 + $0x44] ss:$16 sps:$4 sm:$0xff]   ;;  %v12185_v24 = vld [vmem:[#allocation14 + $0x4c] ss:$16 sps:$4 sm:$0xff]  }
0x156f   :  { %9486 = vtanh.f32 %v5179_v52  ;;  %v5180_v37 = vmul.f32 0.5, %v8366_v10  ;;  %v5190_v0 = vmul.f32 0.5, %v8398_v16  ;;  %v12188_v60 = vld [vmem:[#allocation14 + $0x40] ss:$16 sps:$4 sm:$0xff]   ;;  %v12191_v38 = vld [vmem:[#allocation14 + $0x48] ss:$16 sps:$4 sm:$0xff]  }
0x1570   :  { %9488 = vtanh.f32 %v5172_v13  ;;  %v12194_v9 = vld [vmem:[#allocation14 + $0x64] ss:$16 sps:$4 sm:$0xff]   ;;  %v12197_v52 = vld [vmem:[#allocation14 + $0x6c] ss:$16 sps:$4 sm:$0xff]   ;;  %v12200_v10 = vld [vmem:[#allocation14 + $0x60] ss:$16 sps:$4 sm:$0xff]  }
0x1571   :  { %9490 = vtanh.f32 %v8395_v14  ;;  %v12203_v14 = vld [vmem:[#allocation14 + $0x68] ss:$16 sps:$4 sm:$0xff]   ;;  %v12206_v13 = vld [vmem:[#allocation14 + $0x84] ss:$16 sps:$4 sm:$0xff]  }
0x1572   :  { %9492 = vtanh.f32 %v5180_v37  ;;  %v12209_v37 = vld [vmem:[#allocation14 + $0x8c] ss:$16 sps:$4 sm:$0xff]   ;;  %v12215_v49 = vld [vmem:[#allocation14 + $0x88] ss:$16 sps:$4 sm:$0xff]   ;;  %v12218_v16 = vld [vmem:[#allocation14 + $0xa4] ss:$16 sps:$4 sm:$0xff]  }
0x1573   :  { %9494 = vtanh.f32 %v8397_v20  ;;  %v12212_v20 = vld [vmem:[#allocation14 + $0x80] ss:$16 sps:$4 sm:$0xff]  }
0x1574   :  { %9496 = vtanh.f32 %v5189_v45  ;;  %v12230_v45 = vld [vmem:[#allocation14 + $0xc4] ss:$16 sps:$4 sm:$0xff]  }
0x1575   :  { %9498 = vtanh.f32 %v5190_v0  ;;  %v12236_v0 = vld [vmem:[#allocation14 + $0xc0] ss:$16 sps:$4 sm:$0xff]  }
0x1578   :  { %v9485_v2 = vpop.eup %9484 }
0x1579   :  { %v9487_v21 = vpop.eup %9486  ;;  %v5175_v50 = vmul.f32 0.5, %v9485_v2  ;;  %v12221_v2 = vld [vmem:[#allocation14 + $0xac] ss:$16 sps:$4 sm:$0xff]  }
0x157a   :  { %v5183_v46 = vmul.f32 0.5, %v9487_v21  ;;  %v9489_v58 = vpop.eup %9488  ;;  %v12224_v21 = vld [vmem:[#allocation14 + $0xa0] ss:$16 sps:$4 sm:$0xff]  }
0x157b   :  { %v5177_v6 = vadd.f32 0.5, %v5175_v50  ;;  %v9491_v17 = vpop.eup %9490  ;;  %v5176_v39 = vmul.f32 0.5, %v9489_v58  ;;  %v12227_v50 = vld [vmem:[#allocation14 + $0xa8] ss:$16 sps:$4 sm:$0xff]  }
0x157c   :  { %v5185_v47 = vadd.f32 0.5, %v5183_v46  ;;  %v9493_v32 = vpop.eup %9492  ;;  %v12233_v46 = vld [vmem:[#allocation14 + $0xcc] ss:$16 sps:$4 sm:$0xff]   ;;  %v12239_v58 = vld [vmem:[#allocation14 + $0xc8] ss:$16 sps:$4 sm:$0xff]  }
0x157d   :  { %v5199_v43 = vmul.f32 %v9491_v17, %v5177_v6  ;;  %v5178_v8 = vadd.f32 0.5, %v5176_v39  ;;  %v5184_v22 = vmul.f32 0.5, %v9493_v32  ;;  %v9495_v28 = vpop.eup %9494  ;;  %v12242_v6 = vld [vmem:[#allocation14 + $0xe4] ss:$16 sps:$4 sm:$0xff]   ;;  %v12245_v17 = vld [vmem:[#allocation14 + $0xec] ss:$16 sps:$4 sm:$0xff]  }
0x157e   :  { %v5197_v56 = vmul.f32 %v5185_v47, %v12097_v7  ;;  %v9497_v63 = vpop.eup %9496  ;;  %v12248_v47 = vld [vmem:[#allocation14 + $0xe0] ss:$16 sps:$4 sm:$0xff]   ;;  %v12252_v39 = vld [vmem:[#allocation14 + $0x4] ss:$16 sps:$4 sm:$0xff]   ;;  %v12255_v32 = vld [vmem:[#allocation14 + $0xc] ss:$16 sps:$4 sm:$0xff]  }
0x157f   :  { %v5186_v29 = vadd.f32 0.5, %v5184_v22  ;;  %v5200_v57 = vmul.f32 %v9495_v28, %v5178_v8  ;;  %v9499_v18 = vpop.eup %9498  ;;  %v5193_v33 = vmul.f32 0.5, %v9497_v63 }
0x1580   :  { %v12151_v25 = vadd.f32 %v5199_v43, %v5197_v56  ;;  %v5194_v7 = vmul.f32 0.5, %v9499_v18 }
0x1581   :  { %v5198_v40 = vmul.f32 %v5186_v29, %v12101_v31  ;;  %v5195_v42 = vadd.f32 0.5, %v5193_v33  ;;  %v12162_v31 = vld [vmem:[#allocation14] ss:$16 sps:$4 sm:$0xff]  }
0x1582   :  { %9500 = vtanh.f32 %v12151_v25  ;;  %v5196_v59 = vadd.f32 0.5, %v5194_v7 }
0x1583   :  { %v12155_v26 = vadd.f32 %v5200_v57, %v5198_v40 }
0x1585   :  { %9502 = vtanh.f32 %v12155_v26 }
0x158c   :  { %v9501_v34 = vpop.eup %9500 }
0x158d   :  { %v5205_v23 = vmul.f32 %v9501_v34, %v5195_v42 }
0x158f   :  { %v9503_v30 = vpop.eup %9502 }
0x1590   :  { %v5206_v51 = vmul.f32 %v9503_v30, %v5196_v59 }
0x1592   :  { %v12158_v35 = vpack.c.bf16 %v5206_v51, %v5205_v23 }
0x1594   :  { %5251 = vmatmul.mubr.bf16.vlgmr.msra.gmra.mrb[80].mxu0 %v12158_v35  ;;  %5294 = vmatmul.mubr.bf16.vlgmr.msra.gmra.mrb[96].mxu1 %v12158_v35 }
0x1595   :  { %5360 = vmatpush1.bf16.msra.mxu0 %v12162_v31  ;;  %5403 = vmatpush1.bf16.msra.mxu1 %v12165_v19 }
0x1596   :  { %5361 = vmatprep.subr.bf16.mxu0 %v12168_v48  ;;  %5404 = vmatprep.subr.bf16.mxu1 %v12171_v4 }
0x1597   :  { %5391 = vmatprep.mubr.bf16.mxu0 %v13149_v53  ;;  %5434 = vmatprep.mubr.bf16.mxu1 %v13149_v53 }
0x1599   :  { %5362 = vmatpush1.bf16.msra.mxu0 %v12176_v12  ;;  %5405 = vmatpush1.bf16.msra.mxu1 %v12179_v62 }
0x159a   :  { %5363 = vmatprep.subr.bf16.mxu0 %v12182_v44  ;;  %5406 = vmatprep.subr.bf16.mxu1 %v12185_v24 }
0x159d   :  { %5364 = vmatpush1.bf16.msra.mxu0 %v12188_v60  ;;  %5407 = vmatpush1.bf16.msra.mxu1 %v12191_v38 }
0x159e   :  { %5365 = vmatprep.subr.bf16.mxu0 %v12194_v9  ;;  %5408 = vmatprep.subr.bf16.mxu1 %v12197_v52 }
0x15a1   :  { %5366 = vmatpush1.bf16.msra.mxu0 %v12200_v10  ;;  %5409 = vmatpush1.bf16.msra.mxu1 %v12203_v14 }
0x15a2   :  { %5367 = vmatprep.subr.bf16.mxu0 %v12206_v13  ;;  %5410 = vmatprep.subr.bf16.mxu1 %v12209_v37 }
0x15a5   :  { %5368 = vmatpush1.bf16.msra.mxu0 %v12212_v20  ;;  %5411 = vmatpush1.bf16.msra.mxu1 %v12215_v49 }
0x15a6   :  { %5369 = vmatprep.subr.bf16.mxu0 %v12218_v16  ;;  %5412 = vmatprep.subr.bf16.mxu1 %v12221_v2 }
0x15a9   :  { %5370 = vmatpush1.bf16.msra.mxu0 %v12224_v21  ;;  %5413 = vmatpush1.bf16.msra.mxu1 %v12227_v50 }
0x15aa   :  { %5371 = vmatprep.subr.bf16.mxu0 %v12230_v45  ;;  %5414 = vmatprep.subr.bf16.mxu1 %v12233_v46 }
0x15ad   :  { %5372 = vmatpush1.bf16.msra.mxu0 %v12236_v0  ;;  %5415 = vmatpush1.bf16.msra.mxu1 %v12239_v58 }
0x15ae   :  { %5373 = vmatprep.subr.bf16.mxu0 %v12242_v6  ;;  %5416 = vmatprep.subr.bf16.mxu1 %v12245_v17 }
0x15b1   :  { %5374 = vmatpush1.bf16.msra.mxu0 %v12248_v47  ;;  %5417 = vmatpush1.bf16.msra.mxu1 %v11903_v61 }
0x15b2   :  { %5500 = vmatprep.subr.bf16.mxu0 %v12252_v39  ;;  %5543 = vmatprep.subr.bf16.mxu1 %v12255_v32 }
0x1667   :  { %v5252_v43 = vpop.f32.mrb[80].mxu0  ;;  %v5295_v56 = vpop.f32.mrb[96].mxu1 }
0x1668   :  { %v8367_v8 = vadd.f32 %v5252_v43, %v11971_v15  ;;  %v5254_v22 = vpop.f32.mrb[81].mxu0  ;;  %v5297_v28 = vpop.f32.mrb[97].mxu1  ;;  %v8399_v42 = vadd.f32 %v5295_v56, %v11978_v5 }
0x1669   :  { %v8368_v29 = vadd.f32 %v5254_v22, %v11974_v27  ;;  %v5256_v57 = vpop.f32.mrb[82].mxu0  ;;  %v5299_v40 = vpop.f32.mrb[98].mxu1  ;;  %v8400_v51 = vadd.f32 %v5297_v28, %v11985_v3 }
0x166a   :  { %v5312_v63 = vmul.f32 0.5, %v8367_v8  ;;  %v8369_v61 = vadd.f32 %v5256_v57, %v11971_v15  ;;  %v5258_v18 = vpop.f32.mrb[83].mxu0  ;;  %v5301_v33 = vpop.f32.mrb[99].mxu1  ;;  %v8401_v23 = vadd.f32 %v5299_v40, %v11978_v5 }
0x166b   :  { %v5320_v7 = vmul.f32 0.5, %v8368_v29  ;;  %v8370_v34 = vadd.f32 %v5258_v18, %v11974_v27  ;;  %v8402_v43 = vadd.f32 %v5301_v33, %v11985_v3  ;;  %v5330_v57 = vmul.f32 0.5, %v8400_v51 }
0x166c   :  { %9504 = vtanh.f32 %v5312_v63  ;;  %v5313_v59 = vmul.f32 0.5, %v8369_v61 }
0x166d   :  { %9506 = vtanh.f32 %v5320_v7  ;;  %v5321_v30 = vmul.f32 0.5, %v8370_v34  ;;  %v5331_v18 = vmul.f32 0.5, %v8402_v43 }
0x166e   :  { %9508 = vtanh.f32 %v5313_v59 }
0x166f   :  { %9510 = vtanh.f32 %v8399_v42 }
0x1670   :  { %9512 = vtanh.f32 %v5321_v30 }
0x1671   :  { %9514 = vtanh.f32 %v8401_v23 }
0x1672   :  { %9516 = vtanh.f32 %v5330_v57 }
0x1673   :  { %9518 = vtanh.f32 %v5331_v18 }
0x1676   :  { %v9505_v8 = vpop.eup %9504 }
0x1677   :  { %v9507_v22 = vpop.eup %9506  ;;  %v5316_v29 = vmul.f32 0.5, %v9505_v8 }
0x1678   :  { %v5324_v63 = vmul.f32 0.5, %v9507_v22  ;;  %v9509_v56 = vpop.eup %9508 }
0x1679   :  { %v5318_v61 = vadd.f32 0.5, %v5316_v29  ;;  %v9511_v7 = vpop.eup %9510  ;;  %v5317_v59 = vmul.f32 0.5, %v9509_v56 }
0x167a   :  { %v5326_v34 = vadd.f32 0.5, %v5324_v63  ;;  %v9513_v41 = vpop.eup %9512 }
0x167b   :  { %v5340_v40 = vmul.f32 %v9511_v7, %v5318_v61  ;;  %v5319_v28 = vadd.f32 0.5, %v5317_v59  ;;  %v5325_v30 = vmul.f32 0.5, %v9513_v41  ;;  %v9515_v33 = vpop.eup %9514 }
0x167c   :  { %v5338_v42 = vmul.f32 %v5326_v34, %v12151_v25  ;;  %v9517_v29 = vpop.eup %9516 }
0x167d   :  { %v5327_v8 = vadd.f32 0.5, %v5325_v30  ;;  %v5341_v51 = vmul.f32 %v9515_v33, %v5319_v28  ;;  %v9519_v57 = vpop.eup %9518  ;;  %v5334_v63 = vmul.f32 0.5, %v9517_v29 }
0x167e   :  { %v12267_v23 = vadd.f32 %v5340_v40, %v5338_v42  ;;  %v5335_v25 = vmul.f32 0.5, %v9519_v57 }
0x167f   :  { %v5339_v43 = vmul.f32 %v5327_v8, %v12155_v26  ;;  %v5336_v41 = vadd.f32 0.5, %v5334_v63  ;;  %v12309_v26 = vld [vmem:[#allocation14 + $0xe8] ss:$16 sps:$4 sm:$0xff]  }
0x1680   :  { %9520 = vtanh.f32 %v12267_v23  ;;  %v5337_v18 = vadd.f32 0.5, %v5335_v25 }
0x1681   :  { %v12271_v22 = vadd.f32 %v5341_v51, %v5339_v43 }
0x1683   :  { %9522 = vtanh.f32 %v12271_v22 }
0x168a   :  { %v9521_v56 = vpop.eup %9520 }
0x168b   :  { %v5346_v7 = vmul.f32 %v9521_v56, %v5336_v41 }
0x168d   :  { %v9523_v61 = vpop.eup %9522 }
0x168e   :  { %v5347_v34 = vmul.f32 %v9523_v61, %v5337_v18 }
0x1690   :  { %v12274_v59 = vpack.c.bf16 %v5347_v34, %v5346_v7 }
0x1692   :  { %5392 = vmatmul.mubr.bf16.vlgmr.msra.gmra.mrb[84].mxu0 %v12274_v59  ;;  %5435 = vmatmul.mubr.bf16.vlgmr.msra.gmra.mrb[100].mxu1 %v12274_v59 }
0x1693   :  { %5501 = vmatpush1.bf16.msra.mxu0 %v12162_v31  ;;  %5544 = vmatpush1.bf16.msra.mxu1 %v12165_v19 }
0x1694   :  { %5502 = vmatprep.subr.bf16.mxu0 %v12168_v48  ;;  %5545 = vmatprep.subr.bf16.mxu1 %v12171_v4 }
0x1695   :  { %5532 = vmatprep.mubr.bf16.mxu0 %v13149_v53  ;;  %5575 = vmatprep.mubr.bf16.mxu1 %v13149_v53 }
0x1697   :  { %5503 = vmatpush1.bf16.msra.mxu0 %v12176_v12  ;;  %5546 = vmatpush1.bf16.msra.mxu1 %v12179_v62 }
0x1698   :  { %5504 = vmatprep.subr.bf16.mxu0 %v12182_v44  ;;  %5547 = vmatprep.subr.bf16.mxu1 %v12185_v24 }
0x169b   :  { %5505 = vmatpush1.bf16.msra.mxu0 %v12188_v60  ;;  %5548 = vmatpush1.bf16.msra.mxu1 %v12191_v38 }
0x169c   :  { %5506 = vmatprep.subr.bf16.mxu0 %v12194_v9  ;;  %5549 = vmatprep.subr.bf16.mxu1 %v12197_v52 }
0x169f   :  { %5507 = vmatpush1.bf16.msra.mxu0 %v12200_v10  ;;  %5550 = vmatpush1.bf16.msra.mxu1 %v12203_v14 }
0x16a0   :  { %5508 = vmatprep.subr.bf16.mxu0 %v12206_v13  ;;  %5551 = vmatprep.subr.bf16.mxu1 %v12209_v37 }
0x16a3   :  { %5509 = vmatpush1.bf16.msra.mxu0 %v12212_v20  ;;  %5552 = vmatpush1.bf16.msra.mxu1 %v12215_v49 }
0x16a4   :  { %5510 = vmatprep.subr.bf16.mxu0 %v12218_v16  ;;  %5553 = vmatprep.subr.bf16.mxu1 %v12221_v2 }
0x16a7   :  { %5511 = vmatpush1.bf16.msra.mxu0 %v12224_v21  ;;  %5554 = vmatpush1.bf16.msra.mxu1 %v12227_v50 }
0x16a8   :  { %5512 = vmatprep.subr.bf16.mxu0 %v12230_v45  ;;  %5555 = vmatprep.subr.bf16.mxu1 %v12233_v46 }
0x16ab   :  { %5513 = vmatpush1.bf16.msra.mxu0 %v12236_v0  ;;  %5556 = vmatpush1.bf16.msra.mxu1 %v12239_v58 }
0x16ac   :  { %5514 = vmatprep.subr.bf16.mxu0 %v12242_v6  ;;  %5557 = vmatprep.subr.bf16.mxu1 %v12245_v17 }
0x16af   :  { %5515 = vmatpush1.bf16.msra.mxu0 %v12248_v47  ;;  %5558 = vmatpush1.bf16.msra.mxu1 %v12309_v26 }
0x16b0   :  { %5641 = vmatprep.subr.bf16.mxu0 %v12252_v39  ;;  %5684 = vmatprep.subr.bf16.mxu1 %v12255_v32 }
0x1765   :  { %v5393_v40 = vpop.f32.mrb[84].mxu0  ;;  %v5436_v42 = vpop.f32.mrb[100].mxu1 }
0x1766   :  { %v8371_v28 = vadd.f32 %v5393_v40, %v11971_v15  ;;  %v5395_v30 = vpop.f32.mrb[85].mxu0  ;;  %v5438_v33 = vpop.f32.mrb[101].mxu1  ;;  %v8403_v32 = vadd.f32 %v5436_v42, %v11978_v5 }
0x1767   :  { %v8372_v8 = vadd.f32 %v5395_v30, %v11974_v27  ;;  %v5397_v51 = vpop.f32.mrb[86].mxu0  ;;  %v5440_v43 = vpop.f32.mrb[102].mxu1  ;;  %v8404_v7 = vadd.f32 %v5438_v33, %v11985_v3 }
0x1768   :  { %v5453_v29 = vmul.f32 0.5, %v8371_v28  ;;  %v8373_v57 = vadd.f32 %v5397_v51, %v11971_v15  ;;  %v5399_v63 = vpop.f32.mrb[87].mxu0  ;;  %v5442_v25 = vpop.f32.mrb[103].mxu1  ;;  %v8405_v61 = vadd.f32 %v5440_v43, %v11978_v5 }
0x1769   :  { %v5461_v56 = vmul.f32 0.5, %v8372_v8  ;;  %v8374_v39 = vadd.f32 %v5399_v63, %v11974_v27  ;;  %v8406_v34 = vadd.f32 %v5442_v25, %v11985_v3  ;;  %v5471_v8 = vmul.f32 0.5, %v8404_v7 }
0x176a   :  { %9524 = vtanh.f32 %v5453_v29  ;;  %v5454_v41 = vmul.f32 0.5, %v8373_v57 }
0x176b   :  { %9526 = vtanh.f32 %v5461_v56  ;;  %v5462_v18 = vmul.f32 0.5, %v8374_v39  ;;  %v5472_v29 = vmul.f32 0.5, %v8406_v34 }
0x176c   :  { %9528 = vtanh.f32 %v5454_v41 }
0x176d   :  { %9530 = vtanh.f32 %v8403_v32 }
0x176e   :  { %9532 = vtanh.f32 %v5462_v18 }
0x176f   :  { %9534 = vtanh.f32 %v8405_v61 }
0x1770   :  { %9536 = vtanh.f32 %v5471_v8 }
0x1771   :  { %9538 = vtanh.f32 %v5472_v29 }
0x1774   :  { %v9525_v40 = vpop.eup %9524 }
0x1775   :  { %v9527_v28 = vpop.eup %9526  ;;  %v5457_v30 = vmul.f32 0.5, %v9525_v40 }
0x1776   :  { %v5465_v51 = vmul.f32 0.5, %v9527_v28  ;;  %v9529_v42 = vpop.eup %9528 }
0x1777   :  { %v5459_v57 = vadd.f32 0.5, %v5457_v30  ;;  %v9531_v63 = vpop.eup %9530  ;;  %v5458_v39 = vmul.f32 0.5, %v9529_v42 }
0x1778   :  { %v5467_v56 = vadd.f32 0.5, %v5465_v51  ;;  %v9533_v41 = vpop.eup %9532 }
0x1779   :  { %v5481_v43 = vmul.f32 %v9531_v63, %v5459_v57  ;;  %v5460_v33 = vadd.f32 0.5, %v5458_v39  ;;  %v5466_v18 = vmul.f32 0.5, %v9533_v41  ;;  %v9535_v25 = vpop.eup %9534 }
0x177a   :  { %v5479_v32 = vmul.f32 %v5467_v56, %v12267_v23  ;;  %v9537_v30 = vpop.eup %9536 }
0x177b   :  { %v5468_v40 = vadd.f32 0.5, %v5466_v18  ;;  %v5482_v7 = vmul.f32 %v9535_v25, %v5460_v33  ;;  %v9539_v8 = vpop.eup %9538  ;;  %v5475_v51 = vmul.f32 0.5, %v9537_v30 }
0x177c   :  { %v12323_v61 = vadd.f32 %v5481_v43, %v5479_v32  ;;  %v5476_v23 = vmul.f32 0.5, %v9539_v8 }
0x177d   :  { %v5480_v34 = vmul.f32 %v5468_v40, %v12271_v22  ;;  %v5477_v57 = vadd.f32 0.5, %v5475_v51 }
0x177e   :  { %9540 = vtanh.f32 %v12323_v61  ;;  %v5478_v29 = vadd.f32 0.5, %v5476_v23 }
0x177f   :  { %v12327_v28 = vadd.f32 %v5482_v7, %v5480_v34 }
0x1781   :  { %9542 = vtanh.f32 %v12327_v28 }
0x1788   :  { %v9541_v42 = vpop.eup %9540 }
0x1789   :  { %v5487_v56 = vmul.f32 %v9541_v42, %v5477_v57 }
0x178b   :  { %v9543_v63 = vpop.eup %9542 }
0x178c   :  { %v5488_v39 = vmul.f32 %v9543_v63, %v5478_v29 }
0x178e   :  { %v12330_v41 = vpack.c.bf16 %v5488_v39, %v5487_v56 }
0x1790   :  { %5533 = vmatmul.mubr.bf16.vlgmr.msra.gmra.mrb[88].mxu0 %v12330_v41  ;;  %5576 = vmatmul.mubr.bf16.vlgmr.msra.gmra.mrb[104].mxu1 %v12330_v41 }
0x1791   :  { %5642 = vmatpush1.bf16.msra.mxu0 %v12162_v31  ;;  %5685 = vmatpush1.bf16.msra.mxu1 %v12165_v19  ;;  %v9002_v31 = vld [vmem:[#allocation9 + $0x4] ss:$16 sps:$4 sm:$0xff]   ;;  %v9005_v19 = vld [vmem:[#allocation9 + $0xc] ss:$16 sps:$4 sm:$0xff]  }
0x1792   :  { %5643 = vmatprep.subr.bf16.mxu0 %v12168_v48  ;;  %5686 = vmatprep.subr.bf16.mxu1 %v12171_v4 }
0x1793   :  { %5673 = vmatprep.mubr.bf16.mxu0 %v13149_v53  ;;  %5716 = vmatprep.mubr.bf16.mxu1 %v13149_v53 }
0x1795   :  { %5644 = vmatpush1.bf16.msra.mxu0 %v12176_v12  ;;  %5687 = vmatpush1.bf16.msra.mxu1 %v12179_v62 }
0x1796   :  { %5645 = vmatprep.subr.bf16.mxu0 %v12182_v44  ;;  %5688 = vmatprep.subr.bf16.mxu1 %v12185_v24 }
0x1799   :  { %5646 = vmatpush1.bf16.msra.mxu0 %v12188_v60  ;;  %5689 = vmatpush1.bf16.msra.mxu1 %v12191_v38 }
0x179a   :  { %5647 = vmatprep.subr.bf16.mxu0 %v12194_v9  ;;  %5690 = vmatprep.subr.bf16.mxu1 %v12197_v52 }
0x179d   :  { %5648 = vmatpush1.bf16.msra.mxu0 %v12200_v10  ;;  %5691 = vmatpush1.bf16.msra.mxu1 %v12203_v14 }
0x179e   :  { %5649 = vmatprep.subr.bf16.mxu0 %v12206_v13  ;;  %5692 = vmatprep.subr.bf16.mxu1 %v12209_v37 }
0x17a1   :  { %5650 = vmatpush1.bf16.msra.mxu0 %v12212_v20  ;;  %5693 = vmatpush1.bf16.msra.mxu1 %v12215_v49 }
0x17a2   :  { %5651 = vmatprep.subr.bf16.mxu0 %v12218_v16  ;;  %5694 = vmatprep.subr.bf16.mxu1 %v12221_v2 }
0x17a5   :  { %5652 = vmatpush1.bf16.msra.mxu0 %v12224_v21  ;;  %5695 = vmatpush1.bf16.msra.mxu1 %v12227_v50 }
0x17a6   :  { %5653 = vmatprep.subr.bf16.mxu0 %v12230_v45  ;;  %5696 = vmatprep.subr.bf16.mxu1 %v12233_v46 }
0x17a9   :  { %5654 = vmatpush1.bf16.msra.mxu0 %v12236_v0  ;;  %5697 = vmatpush1.bf16.msra.mxu1 %v12239_v58 }
0x17aa   :  { %5655 = vmatprep.subr.bf16.mxu0 %v12242_v6  ;;  %5698 = vmatprep.subr.bf16.mxu1 %v12245_v17 }
0x17ad   :  { %5656 = vmatpush1.bf16.msra.mxu0 %v12248_v47  ;;  %5699 = vmatpush1.bf16.msra.mxu1 %v12309_v26 }
0x17ae   :  { %6017 = vmatprep.subr.bf16.mxu0 %v9002_v31  ;;  %6130 = vmatprep.subr.bf16.mxu1 %v9005_v19 }
0x1863   :  { %v5534_v48 = vpop.f32.mrb[88].mxu0  ;;  %v5577_v4 = vpop.f32.mrb[104].mxu1 }
0x1864   :  { %v8375_v12 = vadd.f32 %v5534_v48, %v11971_v15  ;;  %v5536_v62 = vpop.f32.mrb[89].mxu0  ;;  %v5579_v44 = vpop.f32.mrb[105].mxu1  ;;  %v8407_v20 = vadd.f32 %v5577_v4, %v11978_v5 }
0x1865   :  { %v8376_v24 = vadd.f32 %v5536_v62, %v11974_v27  ;;  %v5538_v60 = vpop.f32.mrb[90].mxu0  ;;  %v5581_v38 = vpop.f32.mrb[106].mxu1  ;;  %v8408_v21 = vadd.f32 %v5579_v44, %v11985_v3  ;;  %v9003_v62 = vld [vmem:[#allocation9 + $0x8] ss:$16 sps:$4 sm:$0xff]  }
0x1866   :  { %v5594_v9 = vmul.f32 0.5, %v8375_v12  ;;  %v8377_v52 = vadd.f32 %v5538_v60, %v11971_v15  ;;  %v5540_v10 = vpop.f32.mrb[91].mxu0  ;;  %v5583_v14 = vpop.f32.mrb[107].mxu1  ;;  %v8409_v2 = vadd.f32 %v5581_v38, %v11978_v5  ;;  %v9000_v12 = vld [vmem:[#allocation9] ss:$16 sps:$4 sm:$0xff]  }
0x1867   :  { %v5602_v13 = vmul.f32 0.5, %v8376_v24  ;;  %v8378_v37 = vadd.f32 %v5540_v10, %v11974_v27  ;;  %v8410_v50 = vadd.f32 %v5583_v14, %v11985_v3  ;;  %v5612_v58 = vmul.f32 0.5, %v8408_v21  ;;  %v9011_v24 = vld [vmem:[#allocation9 + $0x2c] ss:$16 sps:$4 sm:$0xff]   ;;  %v9006_v60 = vld [vmem:[#allocation9 + $0x20] ss:$16 sps:$4 sm:$0xff]  }
0x1868   :  { %9544 = vtanh.f32 %v5594_v9  ;;  %v5595_v49 = vmul.f32 0.5, %v8377_v52  ;;  %v9009_v38 = vld [vmem:[#allocation9 + $0x28] ss:$16 sps:$4 sm:$0xff]   ;;  %v9014_v9 = vld [vmem:[#allocation9 + $0x44] ss:$16 sps:$4 sm:$0xff]  }
0x1869   :  { %9546 = vtanh.f32 %v5602_v13  ;;  %v5603_v16 = vmul.f32 0.5, %v8378_v37  ;;  %v5613_v17 = vmul.f32 0.5, %v8410_v50  ;;  %v9017_v52 = vld [vmem:[#allocation9 + $0x4c] ss:$16 sps:$4 sm:$0xff]   ;;  %v9012_v10 = vld [vmem:[#allocation9 + $0x40] ss:$16 sps:$4 sm:$0xff]  }
0x186a   :  { %9548 = vtanh.f32 %v5595_v49  ;;  %v9015_v14 = vld [vmem:[#allocation9 + $0x48] ss:$16 sps:$4 sm:$0xff]   ;;  %v9020_v13 = vld [vmem:[#allocation9 + $0x64] ss:$16 sps:$4 sm:$0xff]   ;;  %v9023_v37 = vld [vmem:[#allocation9 + $0x6c] ss:$16 sps:$4 sm:$0xff]  }
0x186b   :  { %9550 = vtanh.f32 %v8407_v20  ;;  %v9018_v20 = vld [vmem:[#allocation9 + $0x60] ss:$16 sps:$4 sm:$0xff]   ;;  %v9021_v49 = vld [vmem:[#allocation9 + $0x68] ss:$16 sps:$4 sm:$0xff]  }
0x186c   :  { %9552 = vtanh.f32 %v5603_v16  ;;  %v9026_v16 = vld [vmem:[#allocation9 + $0x84] ss:$16 sps:$4 sm:$0xff]   ;;  %v9024_v21 = vld [vmem:[#allocation9 + $0x80] ss:$16 sps:$4 sm:$0xff]   ;;  %v9027_v50 = vld [vmem:[#allocation9 + $0x88] ss:$16 sps:$4 sm:$0xff]  }
0x186d   :  { %9554 = vtanh.f32 %v8409_v2  ;;  %v9029_v2 = vld [vmem:[#allocation9 + $0x8c] ss:$16 sps:$4 sm:$0xff]  }
0x186e   :  { %9556 = vtanh.f32 %v5612_v58  ;;  %v9033_v58 = vld [vmem:[#allocation9 + $0xa8] ss:$16 sps:$4 sm:$0xff]  }
0x186f   :  { %9558 = vtanh.f32 %v5613_v17  ;;  %v9041_v17 = vld [vmem:[#allocation9 + $0xcc] ss:$16 sps:$4 sm:$0xff]  }
0x1872   :  { %v9545_v45 = vpop.eup %9544 }
0x1873   :  { %v9547_v46 = vpop.eup %9546  ;;  %v5598_v0 = vmul.f32 0.5, %v9545_v45  ;;  %v9032_v45 = vld [vmem:[#allocation9 + $0xa4] ss:$16 sps:$4 sm:$0xff]  }
0x1874   :  { %v5606_v6 = vmul.f32 0.5, %v9547_v46  ;;  %v9549_v47 = vpop.eup %9548  ;;  %v9035_v46 = vld [vmem:[#allocation9 + $0xac] ss:$16 sps:$4 sm:$0xff]  }
0x1875   :  { %v5600_v22 = vadd.f32 0.5, %v5598_v0  ;;  %v9551_v26 = vpop.eup %9550  ;;  %v5599_v32 = vmul.f32 0.5, %v9549_v47  ;;  %v9030_v0 = vld [vmem:[#allocation9 + $0xa0] ss:$16 sps:$4 sm:$0xff]  }
0x1876   :  { %v5608_v43 = vadd.f32 0.5, %v5606_v6  ;;  %v9553_v33 = vpop.eup %9552  ;;  %v9038_v6 = vld [vmem:[#allocation9 + $0xc4] ss:$16 sps:$4 sm:$0xff]   ;;  %v9036_v47 = vld [vmem:[#allocation9 + $0xc0] ss:$16 sps:$4 sm:$0xff]  }
0x1877   :  { %v5622_v18 = vmul.f32 %v9551_v26, %v5600_v22  ;;  %v5601_v40 = vadd.f32 0.5, %v5599_v32  ;;  %v5607_v7 = vmul.f32 0.5, %v9553_v33  ;;  %v9555_v34 = vpop.eup %9554  ;;  %v9039_v22 = vld [vmem:[#allocation9 + $0xc8] ss:$16 sps:$4 sm:$0xff]   ;;  %v9044_v26 = vld [vmem:[#allocation9 + $0xe4] ss:$16 sps:$4 sm:$0xff]  }
0x1878   :  { %v5620_v25 = vmul.f32 %v5608_v43, %v12323_v61  ;;  %v9557_v57 = vpop.eup %9556  ;;  %v9047_v43 = vld [vmem:[#allocation9 + $0xec] ss:$16 sps:$4 sm:$0xff]   ;;  %v9042_v32 = vld [vmem:[#allocation9 + $0xe0] ss:$16 sps:$4 sm:$0xff]   ;;  %v9045_v33 = vld [vmem:[#allocation9 + $0xe8] ss:$16 sps:$4 sm:$0xff]  }
0x1879   :  { %v5609_v8 = vadd.f32 0.5, %v5607_v7  ;;  %v5623_v51 = vmul.f32 %v9555_v34, %v5601_v40  ;;  %v9559_v29 = vpop.eup %9558  ;;  %v5616_v63 = vmul.f32 0.5, %v9557_v57  ;;  %v12393_v40 = vld [vmem:[#allocation15] ss:$16 sps:$4 sm:$0xff]   ;;  %v12396_v7 = vld [vmem:[#allocation15 + $0x8] ss:$16 sps:$4 sm:$0xff]  }
0x187a   :  { %v12375_v30 = vadd.f32 %v5622_v18, %v5620_v25  ;;  %v5617_v61 = vmul.f32 0.5, %v9559_v29  ;;  %v12388_v18 = vld [vmem:[#allocation15 + $0x4] ss:$16 sps:$4 sm:$0xff]   ;;  %v12390_v25 = vld [vmem:[#allocation15 + $0xc] ss:$16 sps:$4 sm:$0xff]  }
0x187b   :  { %v5621_v23 = vmul.f32 %v5609_v8, %v12327_v28  ;;  %v5618_v39 = vadd.f32 0.5, %v5616_v63  ;;  %v9008_v28 = vld [vmem:[#allocation9 + $0x24] ss:$16 sps:$4 sm:$0xff]   ;;  %v12406_v8 = vld [vmem:[#allocation15 + $0x20] ss:$16 sps:$4 sm:$0xff]  }
0x187c   :  { %9560 = vtanh.f32 %v12375_v30  ;;  %v5619_v31 = vadd.f32 0.5, %v5617_v61  ;;  %v12398_v34 = vld [vmem:[#allocation15 + $0x24] ss:$16 sps:$4 sm:$0xff]   ;;  %v12455_v57 = vld [vmem:[#allocation15 + $0x6c] ss:$16 sps:$4 sm:$0xff]  }
0x187d   :  { %v12379_v42 = vadd.f32 %v5623_v51, %v5621_v23  ;;  %v12450_v51 = vld [vmem:[#allocation15 + $0x48] ss:$16 sps:$4 sm:$0xff]   ;;  %v12452_v23 = vld [vmem:[#allocation15 + $0x60] ss:$16 sps:$4 sm:$0xff]   ;;  %v12457_v29 = vld [vmem:[#allocation15 + $0x84] ss:$16 sps:$4 sm:$0xff]  }
0x187e   :  { %v12461_v63 = vld [vmem:[#allocation15 + $0x68] ss:$16 sps:$4 sm:$0xff]   ;;  %v12465_v61 = vld [vmem:[#allocation15 + $0x80] ss:$16 sps:$4 sm:$0xff]  }
0x187f   :  { %9562 = vtanh.f32 %v12379_v42 }
0x1886   :  { %v9561_v56 = vpop.eup %9560 }
0x1887   :  { %v5628_v48 = vmul.f32 %v9561_v56, %v5618_v39  ;;  %v12467_v56 = vld [vmem:[#allocation15 + $0x8c] ss:$16 sps:$4 sm:$0xff]   ;;  %v12470_v39 = vld [vmem:[#allocation15 + $0xa4] ss:$16 sps:$4 sm:$0xff]  }
0x1889   :  { %v9563_v19 = vpop.eup %9562 }
0x188a   :  { %v5629_v4 = vmul.f32 %v9563_v19, %v5619_v31  ;;  %v12473_v31 = vld [vmem:[#allocation15 + $0x88] ss:$16 sps:$4 sm:$0xff]   ;;  %v12477_v19 = vld [vmem:[#allocation15 + $0xa0] ss:$16 sps:$4 sm:$0xff]  }
0x188c   :  { %v12382_v44 = vpack.c.bf16 %v5629_v4, %v5628_v48  ;;  %v12479_v48 = vld [vmem:[#allocation15 + $0xac] ss:$16 sps:$4 sm:$0xff]   ;;  %v12482_v4 = vld [vmem:[#allocation15 + $0xc4] ss:$16 sps:$4 sm:$0xff]  }
0x188e   :  { %5674 = vmatmul.mubr.bf16.vlgmr.msra.gmra.mrb[92].mxu0 %v12382_v44  ;;  %5717 = vmatmul.mubr.bf16.vlgmr.msra.gmra.mrb[108].mxu1 %v12382_v44 }
0x188f   :  { %6018 = vmatpush1.bf16.msra.mxu0 %v9000_v12  ;;  %6131 = vmatpush1.bf16.msra.mxu1 %v9003_v62  ;;  %v12485_v12 = vld [vmem:[#allocation15 + $0xa8] ss:$16 sps:$4 sm:$0xff]   ;;  %v12489_v62 = vld [vmem:[#allocation15 + $0xc0] ss:$16 sps:$4 sm:$0xff]  }
0x1890   :  { %6019 = vmatprep.subr.bf16.mxu0 %v9008_v28  ;;  %6132 = vmatprep.subr.bf16.mxu1 %v9011_v24  ;;  %v12494_v28 = vld [vmem:[#allocation15 + $0xe4] ss:$16 sps:$4 sm:$0xff]   ;;  %v12497_v24 = vld [vmem:[#allocation15 + $0xc8] ss:$16 sps:$4 sm:$0xff]  }
0x1891   :  { %6049 = vmatprep.mubr.bf16.mxu0 %v13149_v53  ;;  %6162 = vmatprep.mubr.bf16.mxu1 %v13149_v53 }
0x1893   :  { %6020 = vmatpush1.bf16.msra.mxu0 %v9006_v60  ;;  %6133 = vmatpush1.bf16.msra.mxu1 %v9009_v38  ;;  %v12501_v60 = vld [vmem:[#allocation15 + $0xe0] ss:$16 sps:$4 sm:$0xff]   ;;  %v12503_v38 = vld [vmem:[#allocation15 + $0xec] ss:$16 sps:$4 sm:$0xff]  }
0x1894   :  { %6021 = vmatprep.subr.bf16.mxu0 %v9014_v9  ;;  %6134 = vmatprep.subr.bf16.mxu1 %v9017_v52  ;;  %v12507_v9 = vld [vmem:[#allocation15 + $0xe8] ss:$16 sps:$4 sm:$0xff]  }
0x1897   :  { %6022 = vmatpush1.bf16.msra.mxu0 %v9012_v10  ;;  %6135 = vmatpush1.bf16.msra.mxu1 %v9015_v14 }
0x1898   :  { %6023 = vmatprep.subr.bf16.mxu0 %v9020_v13  ;;  %6136 = vmatprep.subr.bf16.mxu1 %v9023_v37 }
0x189b   :  { %6024 = vmatpush1.bf16.msra.mxu0 %v9018_v20  ;;  %6137 = vmatpush1.bf16.msra.mxu1 %v9021_v49 }
0x189c   :  { %6025 = vmatprep.subr.bf16.mxu0 %v9026_v16  ;;  %6138 = vmatprep.subr.bf16.mxu1 %v9029_v2 }
0x189f   :  { %6026 = vmatpush1.bf16.msra.mxu0 %v9024_v21  ;;  %6139 = vmatpush1.bf16.msra.mxu1 %v9027_v50 }
0x18a0   :  { %6027 = vmatprep.subr.bf16.mxu0 %v9032_v45  ;;  %6140 = vmatprep.subr.bf16.mxu1 %v9035_v46 }
0x18a3   :  { %6028 = vmatpush1.bf16.msra.mxu0 %v9030_v0  ;;  %6141 = vmatpush1.bf16.msra.mxu1 %v9033_v58 }
0x18a4   :  { %6029 = vmatprep.subr.bf16.mxu0 %v9038_v6  ;;  %6142 = vmatprep.subr.bf16.mxu1 %v9041_v17 }
0x18a7   :  { %6030 = vmatpush1.bf16.msra.mxu0 %v9036_v47  ;;  %6143 = vmatpush1.bf16.msra.mxu1 %v9039_v22 }
0x18a8   :  { %6031 = vmatprep.subr.bf16.mxu0 %v9044_v26  ;;  %6144 = vmatprep.subr.bf16.mxu1 %v9047_v43 }
0x18ab   :  { %6032 = vmatpush1.bf16.msra.mxu0 %v9042_v32  ;;  %6145 = vmatpush1.bf16.msra.mxu1 %v9045_v33 }
0x18ac   :  { %6507 = vmatprep.subr.bf16.mxu0 %v12388_v18  ;;  %6550 = vmatprep.subr.bf16.mxu1 %v12390_v25 }
0x18ae   :  { %6050 = vmatmul.mubr.bf16.vlgmr.msra.gmra.mrb[96].mxu0 %v11996_v11  ;;  %6163 = vmatmul.mubr.bf16.vlgmr.msra.gmra.mrb[112].mxu1 %v11996_v11  ;;  %v12434_v11 = vld [vmem:[#allocation15 + $0x2c] ss:$16 sps:$4 sm:$0xff]  }
0x18af   :  { %6059 = vmatprep.mubr.bf16.mxu0 %v13149_v53  ;;  %6172 = vmatprep.mubr.bf16.mxu1 %v13149_v53 }
0x18b0   :  { %6508 = vmatpush1.bf16.msra.mxu0 %v12393_v40  ;;  %6551 = vmatpush1.bf16.msra.mxu1 %v12396_v7 }
0x18b1   :  { %6509 = vmatprep.subr.bf16.mxu0 %v12398_v34  ;;  %6552 = vmatprep.subr.bf16.mxu1 %v12434_v11 }
0x18b4   :  { %6510 = vmatpush1.bf16.msra.mxu0 %v12406_v8 }
0x18b6   :  { %6060 = vmatmul.mubr.bf16.gmra.mrb[100].mxu0 %v12050_v1  ;;  %6173 = vmatmul.mubr.bf16.gmra.mrb[116].mxu1 %v12050_v1  ;;  %v12437_v1 = vld [vmem:[#allocation15 + $0x28] ss:$16 sps:$4 sm:$0xff]  }
0x18b7   :  { %6069 = vmatprep.mubr.bf16.mxu0 %v13149_v53  ;;  %6182 = vmatprep.mubr.bf16.mxu1 %v13149_v53 }
0x18b8   :  { %6553 = vmatpush1.bf16.msra.mxu1 %v12437_v1 }
0x18be   :  { %6070 = vmatmul.mubr.bf16.gmra.mrb[104].mxu0 %v12104_v36  ;;  %6183 = vmatmul.mubr.bf16.gmra.mrb[120].mxu1 %v12104_v36  ;;  %v12439_v36 = vld [vmem:[#allocation15 + $0x44] ss:$16 sps:$4 sm:$0xff]  }
0x18bf   :  { %6079 = vmatprep.mubr.bf16.mxu0 %v13149_v53  ;;  %6192 = vmatprep.mubr.bf16.mxu1 %v13149_v53 }
0x18c0   :  { %6511 = vmatprep.subr.bf16.mxu0 %v12439_v36 }
0x18c6   :  { %6080 = vmatmul.mubr.bf16.gmra.mrb[108].mxu0 %v12158_v35  ;;  %6193 = vmatmul.mubr.bf16.gmra.mrb[124].mxu1 %v12158_v35  ;;  %v12442_v35 = vld [vmem:[#allocation15 + $0x40] ss:$16 sps:$4 sm:$0xff]  }
0x18c7   :  { %6089 = vmatprep.mubr.bf16.mxu0 %v13149_v53  ;;  %6202 = vmatprep.mubr.bf16.mxu1 %v13149_v53 }
0x18c8   :  { %6512 = vmatpush1.bf16.msra.mxu0 %v12442_v35 }
0x18ce   :  { %6090 = vmatmul.mubr.bf16.gmra.mrb[112].mxu0 %v12274_v59  ;;  %6203 = vmatmul.mubr.bf16.gmra.mrb[128].mxu1 %v12274_v59  ;;  %v12446_v59 = vld [vmem:[#allocation15 + $0x4c] ss:$16 sps:$4 sm:$0xff]  }
0x18cf   :  { %6099 = vmatprep.mubr.bf16.mxu0 %v13149_v53  ;;  %6212 = vmatprep.mubr.bf16.mxu1 %v13149_v53 }
0x18d0   :  { %6554 = vmatprep.subr.bf16.mxu1 %v12446_v59 }
0x18d1   :  { %6555 = vmatpush1.bf16.msra.mxu1 %v12450_v51 }
0x18d2   :  { %6556 = vmatprep.subr.bf16.mxu1 %v12455_v57 }
0x18d5   :  { %6557 = vmatpush1.bf16.msra.mxu1 %v12461_v63 }
0x18d6   :  { %6100 = vmatmul.mubr.bf16.gmra.mrb[116].mxu0 %v12330_v41  ;;  %6213 = vmatmul.mubr.bf16.gmra.mrb[132].mxu1 %v12330_v41  ;;  %v12448_v41 = vld [vmem:[#allocation15 + $0x64] ss:$16 sps:$4 sm:$0xff]  }
0x18d7   :  { %6109 = vmatprep.mubr.bf16.mxu0 %v13149_v53  ;;  %6222 = vmatprep.mubr.bf16.mxu1 %v13149_v53 }
0x18d8   :  { %6513 = vmatprep.subr.bf16.mxu0 %v12448_v41  ;;  %6558 = vmatprep.subr.bf16.mxu1 %v12467_v56 }
0x18d9   :  { %6514 = vmatpush1.bf16.msra.mxu0 %v12452_v23  ;;  %6559 = vmatpush1.bf16.msra.mxu1 %v12473_v31 }
0x18da   :  { %6515 = vmatprep.subr.bf16.mxu0 %v12457_v29  ;;  %6560 = vmatprep.subr.bf16.mxu1 %v12479_v48 }
0x18dd   :  { %6516 = vmatpush1.bf16.msra.mxu0 %v12465_v61  ;;  %6561 = vmatpush1.bf16.msra.mxu1 %v12485_v12 }
0x18de   :  { %6110 = vmatmul.mubr.bf16.gmra.mrb[120].mxu0 %v12382_v44  ;;  %6223 = vmatmul.mubr.bf16.gmra.mrb[136].mxu1 %v12382_v44  ;;  %v12491_v44 = vld [vmem:[#allocation15 + $0xcc] ss:$16 sps:$4 sm:$0xff]  }
0x18df   :  { %6119 = vmatprep.mubr.bf16.mxu0 %v13149_v53  ;;  %6232 = vmatprep.mubr.bf16.mxu1 %v13149_v53 }
0x18e0   :  { %6517 = vmatprep.subr.bf16.mxu0 %v12470_v39  ;;  %6562 = vmatprep.subr.bf16.mxu1 %v12491_v44 }
0x18e1   :  { %6518 = vmatpush1.bf16.msra.mxu0 %v12477_v19  ;;  %6563 = vmatpush1.bf16.msra.mxu1 %v12497_v24 }
0x18e2   :  { %6519 = vmatprep.subr.bf16.mxu0 %v12482_v4  ;;  %6564 = vmatprep.subr.bf16.mxu1 %v12503_v38 }
0x18e5   :  { %6520 = vmatpush1.bf16.msra.mxu0 %v12489_v62  ;;  %6565 = vmatpush1.bf16.msra.mxu1 %v12507_v9 }
0x18e6   :  { %6521 = vmatprep.subr.bf16.mxu0 %v12494_v28  ;;  %6691 = vmatprep.subr.bf16.mxu1 %v12390_v25 }
0x18e9   :  { %6522 = vmatpush1.bf16.msra.mxu0 %v12501_v60 }
0x18ea   :  { %6648 = vmatprep.subr.bf16.mxu0 %v12388_v18 }
0x1961   :  { %v5675_v52 = vpop.f32.mrb[92].mxu0  ;;  %v5718_v10 = vpop.f32.mrb[108].mxu1 }
0x1962   :  { %v8379_v14 = vadd.f32 %v5675_v52, %v11971_v15  ;;  %v5677_v13 = vpop.f32.mrb[93].mxu0  ;;  %v5720_v37 = vpop.f32.mrb[109].mxu1  ;;  %v8411_v58 = vadd.f32 %v5718_v10, %v11978_v5 }
0x1963   :  { %v8380_v20 = vadd.f32 %v5677_v13, %v11974_v27  ;;  %v5679_v49 = vpop.f32.mrb[94].mxu0  ;;  %v5722_v16 = vpop.f32.mrb[110].mxu1  ;;  %v8412_v22 = vadd.f32 %v5720_v37, %v11985_v3 }
0x1964   :  { %v5735_v2 = vmul.f32 0.5, %v8379_v14  ;;  %v8381_v21 = vadd.f32 %v5679_v49, %v11971_v15  ;;  %v5681_v50 = vpop.f32.mrb[95].mxu0  ;;  %v5724_v45 = vpop.f32.mrb[111].mxu1  ;;  %v8413_v47 = vadd.f32 %v5722_v16, %v11978_v5 }
0x1965   :  { %v5743_v46 = vmul.f32 0.5, %v8380_v20  ;;  %v8382_v0 = vadd.f32 %v5681_v50, %v11974_v27  ;;  %v5753_v15 = vmul.f32 0.5, %v8412_v22  ;;  %v8414_v26 = vadd.f32 %v5724_v45, %v11985_v3 }
0x1966   :  { %9564 = vtanh.f32 %v5735_v2  ;;  %v5736_v6 = vmul.f32 0.5, %v8381_v21 }
0x1967   :  { %9566 = vtanh.f32 %v5743_v46  ;;  %v5744_v17 = vmul.f32 0.5, %v8382_v0  ;;  %v5754_v52 = vmul.f32 0.5, %v8414_v26 }
0x1968   :  { %9568 = vtanh.f32 %v5736_v6 }
0x1969   :  { %9570 = vtanh.f32 %v8411_v58 }
0x196a   :  { %9572 = vtanh.f32 %v5744_v17 }
0x196b   :  { %9574 = vtanh.f32 %v8413_v47 }
0x196c   :  { %9576 = vtanh.f32 %v5753_v15 }
0x196d   :  { %9578 = vtanh.f32 %v5754_v52 }
0x1970   :  { %v9565_v43 = vpop.eup %9564 }
0x1971   :  { %v9567_v32 = vpop.eup %9566  ;;  %v5739_v27 = vmul.f32 0.5, %v9565_v43 }
0x1972   :  { %v5747_v33 = vmul.f32 0.5, %v9567_v32  ;;  %v9569_v10 = vpop.eup %9568 }
0x1973   :  { %v5741_v14 = vadd.f32 0.5, %v5739_v27  ;;  %v9571_v13 = vpop.eup %9570  ;;  %v5740_v49 = vmul.f32 0.5, %v9569_v10 }
0x1974   :  { %v5749_v20 = vadd.f32 0.5, %v5747_v33  ;;  %v9573_v5 = vpop.eup %9572  ;;  %v5835_v33 = vld [vmem:[#allocation20] sm:$0xf] }
0x1975   :  { %v5763_v16 = vmul.f32 %v9571_v13, %v5741_v14  ;;  %v5742_v2 = vadd.f32 0.5, %v5740_v49  ;;  %v5748_v21 = vmul.f32 0.5, %v9573_v5  ;;  %v9575_v50 = vpop.eup %9574  ;;  %v12575_v52 = vrot.slane %v5835_v33, %v13164_v54  ;;  %v13171_v49 = vld [vmem:[#allocation40_spill] sm:$0xff] }
0x1976   :  { %v5761_v37 = vmul.f32 %v5749_v20, %v12375_v30  ;;  %v9577_v58 = vpop.eup %9576  ;;  %v12578_v10 = vrot.slane %v5835_v33, %v13168_v55  ;;  %v12582_v5 = vrot.slane %v5835_v33, %v13171_v49 }
0x1977   :  { %v5750_v45 = vadd.f32 0.5, %v5748_v21  ;;  %v5764_v46 = vmul.f32 %v9575_v50, %v5742_v2  ;;  %v5757_v30 = vmul.f32 0.5, %v9577_v58  ;;  %v9579_v17 = vpop.eup %9578 }
0x1978   :  { %v5765_v3 = vadd.f32 %v5763_v16, %v5761_v37  ;;  %v5758_v22 = vmul.f32 0.5, %v9579_v17  ;;  %v13172_v17 = vld [vmem:[#allocation41_spill] sm:$0xff] }
0x1979   :  { %v5762_v0 = vmul.f32 %v5750_v45, %v12379_v42  ;;  %v5759_v47 = vadd.f32 0.5, %v5757_v30 }
0x197a   :  { %9580 = vtanh.f32 %v5765_v3  ;;  %8072 = vst [vmem:[%s13110_s17 + $0x20] sm:$0xff] %v5765_v3  ;;  %v5760_v43 = vadd.f32 0.5, %v5758_v22 }
0x197b   :  { %v5766_v6 = vadd.f32 %v5764_v46, %v5762_v0 }
0x197d   :  { %9582 = vtanh.f32 %v5766_v6  ;;  %8073 = vst [vmem:[%s13110_s17 + $0x28] sm:$0xff] %v5766_v6 }
0x1984   :  { %v9581_v15 = vpop.eup %9580 }
0x1985   :  { %v5769_v26 = vmul.f32 %v9581_v15, %v5759_v47  ;;  %v12589_v47 = vrot.slane %v5835_v33, %v13172_v17 }
0x1987   :  { %8070 = vst [vmem:[%s13109_s16 + $0x20] sm:$0xff] %v5769_v26  ;;  %v9583_v32 = vpop.eup %9582 }
0x1988   :  { %v5770_v42 = vmul.f32 %v9583_v32, %v5760_v43 }
0x198a   :  { %8071 = vst [vmem:[%s13109_s16 + $0x28] sm:$0xff] %v5770_v42  ;;  %v5802_v27 = vpack.c.bf16 %v5770_v42, %v5769_v26 }
0x198c   :  { %6120 = vmatmul.mubr.bf16.gmra.mrb[124].mxu0 %v5802_v27  ;;  %6233 = vmatmul.mubr.bf16.gmra.mrb[140].mxu1 %v5802_v27 }
0x198d   :  { %6539 = vmatprep.mubr.bf16.mxu0 %v13149_v53  ;;  %6582 = vmatprep.mubr.bf16.mxu1 %v13149_v53 }
0x1994   :  { %6540 = vmatmul.mubr.bf16.vlgmr.msra.gmra.mrb[96].mxu0 %v13149_v53  ;;  %6583 = vmatmul.mubr.bf16.vlgmr.msra.gmra.mrb[112].mxu1 %v13149_v53 }
0x1995   :  { %6649 = vmatpush1.bf16.msra.mxu0 %v12393_v40  ;;  %6692 = vmatpush1.bf16.msra.mxu1 %v12396_v7 }
0x1996   :  { %6650 = vmatprep.subr.bf16.mxu0 %v12398_v34  ;;  %6693 = vmatprep.subr.bf16.mxu1 %v12434_v11 }
0x1997   :  { %6680 = vmatprep.mubr.bf16.mxu0 %v13149_v53  ;;  %6723 = vmatprep.mubr.bf16.mxu1 %v13149_v53 }
0x1999   :  { %6651 = vmatpush1.bf16.msra.mxu0 %v12406_v8  ;;  %6694 = vmatpush1.bf16.msra.mxu1 %v12437_v1 }
0x199a   :  { %6652 = vmatprep.subr.bf16.mxu0 %v12439_v36  ;;  %6695 = vmatprep.subr.bf16.mxu1 %v12446_v59 }
0x199d   :  { %6653 = vmatpush1.bf16.msra.mxu0 %v12442_v35  ;;  %6696 = vmatpush1.bf16.msra.mxu1 %v12450_v51 }
0x199e   :  { %6654 = vmatprep.subr.bf16.mxu0 %v12448_v41  ;;  %6697 = vmatprep.subr.bf16.mxu1 %v12455_v57 }
0x19a1   :  { %6655 = vmatpush1.bf16.msra.mxu0 %v12452_v23  ;;  %6698 = vmatpush1.bf16.msra.mxu1 %v12461_v63 }
0x19a2   :  { %6656 = vmatprep.subr.bf16.mxu0 %v12457_v29  ;;  %6699 = vmatprep.subr.bf16.mxu1 %v12467_v56 }
0x19a5   :  { %6657 = vmatpush1.bf16.msra.mxu0 %v12465_v61  ;;  %6700 = vmatpush1.bf16.msra.mxu1 %v12473_v31 }
0x19a6   :  { %6658 = vmatprep.subr.bf16.mxu0 %v12470_v39  ;;  %6701 = vmatprep.subr.bf16.mxu1 %v12479_v48 }
0x19a9   :  { %6659 = vmatpush1.bf16.msra.mxu0 %v12477_v19  ;;  %6702 = vmatpush1.bf16.msra.mxu1 %v12485_v12 }
0x19aa   :  { %6660 = vmatprep.subr.bf16.mxu0 %v12482_v4  ;;  %6703 = vmatprep.subr.bf16.mxu1 %v12491_v44 }
0x19ad   :  { %6661 = vmatpush1.bf16.msra.mxu0 %v12489_v62  ;;  %6704 = vmatpush1.bf16.msra.mxu1 %v12497_v24 }
0x19ae   :  { %6662 = vmatprep.subr.bf16.mxu0 %v12494_v28  ;;  %6705 = vmatprep.subr.bf16.mxu1 %v12503_v38 }
0x19b1   :  { %6663 = vmatpush1.bf16.msra.mxu0 %v12501_v60  ;;  %6706 = vmatpush1.bf16.msra.mxu1 %v12507_v9 }
0x19b2   :  { %6789 = vmatprep.subr.bf16.mxu0 %v12388_v18  ;;  %6832 = vmatprep.subr.bf16.mxu1 %v12390_v25 }
0x1a67   :  { %v6541_v14 = vpop.f32.mrb[96].mxu0  ;;  %v6584_v13 = vpop.f32.mrb[112].mxu1 }
0x1a68   :  { %v8415_v20 = vadd.f32 %v6541_v14, %v12575_v52  ;;  %v6543_v16 = vpop.f32.mrb[97].mxu0  ;;  %v6586_v37 = vpop.f32.mrb[113].mxu1  ;;  %v8447_v58 = vadd.f32 %v6584_v13, %v12582_v5 }
0x1a69   :  { %v8416_v2 = vadd.f32 %v6543_v16, %v12578_v10  ;;  %v6545_v21 = vpop.f32.mrb[98].mxu0  ;;  %v6588_v50 = vpop.f32.mrb[114].mxu1  ;;  %v8448_v15 = vadd.f32 %v6586_v37, %v12589_v47 }
0x1a6a   :  { %v6601_v3 = vmul.f32 0.5, %v8415_v20  ;;  %v8417_v54 = vadd.f32 %v6545_v21, %v12575_v52  ;;  %v6547_v45 = vpop.f32.mrb[99].mxu0  ;;  %v6590_v46 = vpop.f32.mrb[115].mxu1  ;;  %v8449_v22 = vadd.f32 %v6588_v50, %v12582_v5 }
0x1a6b   :  { %v6609_v55 = vmul.f32 0.5, %v8416_v2  ;;  %v8418_v0 = vadd.f32 %v6547_v45, %v12578_v10  ;;  %v8450_v26 = vadd.f32 %v6590_v46, %v12589_v47  ;;  %v6619_v27 = vmul.f32 0.5, %v8448_v15 }
0x1a6c   :  { %9584 = vtanh.f32 %v6601_v3  ;;  %v6602_v6 = vmul.f32 0.5, %v8417_v54 }
0x1a6d   :  { %9586 = vtanh.f32 %v6609_v55  ;;  %v6610_v30 = vmul.f32 0.5, %v8418_v0  ;;  %v6620_v13 = vmul.f32 0.5, %v8450_v26 }
0x1a6e   :  { %9588 = vtanh.f32 %v6602_v6 }
0x1a6f   :  { %9590 = vtanh.f32 %v8447_v58 }
0x1a70   :  { %9592 = vtanh.f32 %v6610_v30 }
0x1a71   :  { %9594 = vtanh.f32 %v8449_v22 }
0x1a72   :  { %9596 = vtanh.f32 %v6619_v27 }
0x1a73   :  { %9598 = vtanh.f32 %v6620_v13 }
0x1a76   :  { %v9585_v43 = vpop.eup %9584 }
0x1a77   :  { %v9587_v32 = vpop.eup %9586  ;;  %v6605_v42 = vmul.f32 0.5, %v9585_v43 }
0x1a78   :  { %v6613_v14 = vmul.f32 0.5, %v9587_v32  ;;  %v9589_v20 = vpop.eup %9588 }
0x1a79   :  { %v6607_v49 = vadd.f32 0.5, %v6605_v42  ;;  %v9591_v33 = vpop.eup %9590  ;;  %v6606_v2 = vmul.f32 0.5, %v9589_v20 }
0x1a7a   :  { %v6615_v16 = vadd.f32 0.5, %v6613_v14  ;;  %v9593_v21 = vpop.eup %9592 }
0x1a7b   :  { %v6629_v50 = vmul.f32 %v9591_v33, %v6607_v49  ;;  %v6608_v54 = vadd.f32 0.5, %v6606_v2  ;;  %v6614_v37 = vmul.f32 0.5, %v9593_v21  ;;  %v9595_v45 = vpop.eup %9594 }
0x1a7c   :  { %v6627_v3 = vmul.f32 0.0, %v6615_v16  ;;  %v9597_v30 = vpop.eup %9596 }
0x1a7d   :  { %v6616_v55 = vadd.f32 0.5, %v6614_v37  ;;  %v6630_v0 = vmul.f32 %v9595_v45, %v6608_v54  ;;  %v9599_v17 = vpop.eup %9598  ;;  %v6623_v22 = vmul.f32 0.5, %v9597_v30 }
0x1a7e   :  { %v12594_v46 = vadd.f32 %v6629_v50, %v6627_v3  ;;  %v6624_v15 = vmul.f32 0.5, %v9599_v17 }
0x1a7f   :  { %v6628_v58 = vmul.f32 0.0, %v6616_v55  ;;  %v6625_v43 = vadd.f32 0.5, %v6623_v22 }
0x1a80   :  { %9600 = vtanh.f32 %v12594_v46  ;;  %v6626_v32 = vadd.f32 0.5, %v6624_v15 }
0x1a81   :  { %v12597_v6 = vadd.f32 %v6630_v0, %v6628_v58 }
0x1a83   :  { %9602 = vtanh.f32 %v12597_v6 }
0x1a8a   :  { %v9601_v26 = vpop.eup %9600 }
0x1a8b   :  { %v6635_v27 = vmul.f32 %v9601_v26, %v6625_v43 }
0x1a8d   :  { %v9603_v42 = vpop.eup %9602 }
0x1a8e   :  { %v6636_v14 = vmul.f32 %v9603_v42, %v6626_v32 }
0x1a90   :  { %v12600_v13 = vpack.c.bf16 %v6636_v14, %v6635_v27 }
0x1a92   :  { %6681 = vmatmul.mubr.bf16.vlgmr.msra.gmra.mrb[100].mxu0 %v12600_v13  ;;  %6724 = vmatmul.mubr.bf16.vlgmr.msra.gmra.mrb[116].mxu1 %v12600_v13 }
0x1a93   :  { %6790 = vmatpush1.bf16.msra.mxu0 %v12393_v40  ;;  %6833 = vmatpush1.bf16.msra.mxu1 %v12396_v7 }
0x1a94   :  { %6791 = vmatprep.subr.bf16.mxu0 %v12398_v34  ;;  %6834 = vmatprep.subr.bf16.mxu1 %v12434_v11 }
0x1a95   :  { %6821 = vmatprep.mubr.bf16.mxu0 %v13149_v53  ;;  %6864 = vmatprep.mubr.bf16.mxu1 %v13149_v53 }
0x1a97   :  { %6792 = vmatpush1.bf16.msra.mxu0 %v12406_v8  ;;  %6835 = vmatpush1.bf16.msra.mxu1 %v12437_v1 }
0x1a98   :  { %6793 = vmatprep.subr.bf16.mxu0 %v12439_v36  ;;  %6836 = vmatprep.subr.bf16.mxu1 %v12446_v59 }
0x1a9b   :  { %6794 = vmatpush1.bf16.msra.mxu0 %v12442_v35  ;;  %6837 = vmatpush1.bf16.msra.mxu1 %v12450_v51 }
0x1a9c   :  { %6795 = vmatprep.subr.bf16.mxu0 %v12448_v41  ;;  %6838 = vmatprep.subr.bf16.mxu1 %v12455_v57 }
0x1a9f   :  { %6796 = vmatpush1.bf16.msra.mxu0 %v12452_v23  ;;  %6839 = vmatpush1.bf16.msra.mxu1 %v12461_v63 }
0x1aa0   :  { %6797 = vmatprep.subr.bf16.mxu0 %v12457_v29  ;;  %6840 = vmatprep.subr.bf16.mxu1 %v12467_v56 }
0x1aa3   :  { %6798 = vmatpush1.bf16.msra.mxu0 %v12465_v61  ;;  %6841 = vmatpush1.bf16.msra.mxu1 %v12473_v31 }
0x1aa4   :  { %6799 = vmatprep.subr.bf16.mxu0 %v12470_v39  ;;  %6842 = vmatprep.subr.bf16.mxu1 %v12479_v48 }
0x1aa7   :  { %6800 = vmatpush1.bf16.msra.mxu0 %v12477_v19  ;;  %6843 = vmatpush1.bf16.msra.mxu1 %v12485_v12 }
0x1aa8   :  { %6801 = vmatprep.subr.bf16.mxu0 %v12482_v4  ;;  %6844 = vmatprep.subr.bf16.mxu1 %v12491_v44 }
0x1aab   :  { %6802 = vmatpush1.bf16.msra.mxu0 %v12489_v62  ;;  %6845 = vmatpush1.bf16.msra.mxu1 %v12497_v24 }
0x1aac   :  { %6803 = vmatprep.subr.bf16.mxu0 %v12494_v28  ;;  %6846 = vmatprep.subr.bf16.mxu1 %v12503_v38 }
0x1aaf   :  { %6804 = vmatpush1.bf16.msra.mxu0 %v12501_v60  ;;  %6847 = vmatpush1.bf16.msra.mxu1 %v12507_v9 }
0x1ab0   :  { %6930 = vmatprep.subr.bf16.mxu0 %v12388_v18  ;;  %6973 = vmatprep.subr.bf16.mxu1 %v12390_v25 }
0x1b65   :  { %v6682_v20 = vpop.f32.mrb[100].mxu0  ;;  %v6725_v49 = vpop.f32.mrb[116].mxu1 }
0x1b66   :  { %v8419_v33 = vadd.f32 %v6682_v20, %v12575_v52  ;;  %v6684_v16 = vpop.f32.mrb[101].mxu0  ;;  %v6727_v2 = vpop.f32.mrb[117].mxu1  ;;  %v8451_v30 = vadd.f32 %v6725_v49, %v12582_v5 }
0x1b67   :  { %v8420_v21 = vadd.f32 %v6684_v16, %v12578_v10  ;;  %v6686_v50 = vpop.f32.mrb[102].mxu0  ;;  %v6729_v3 = vpop.f32.mrb[118].mxu1  ;;  %v8452_v26 = vadd.f32 %v6727_v2, %v12589_v47 }
0x1b68   :  { %v6742_v54 = vmul.f32 0.5, %v8419_v33  ;;  %v8421_v37 = vadd.f32 %v6686_v50, %v12575_v52  ;;  %v6688_v45 = vpop.f32.mrb[103].mxu0  ;;  %v6731_v55 = vpop.f32.mrb[119].mxu1  ;;  %v8453_v15 = vadd.f32 %v6729_v3, %v12582_v5 }
0x1b69   :  { %v6750_v0 = vmul.f32 0.5, %v8420_v21  ;;  %v8422_v58 = vadd.f32 %v6688_v45, %v12578_v10  ;;  %v8454_v43 = vadd.f32 %v6731_v55, %v12589_v47  ;;  %v6760_v14 = vmul.f32 0.5, %v8452_v26 }
0x1b6a   :  { %9604 = vtanh.f32 %v6742_v54  ;;  %v6743_v17 = vmul.f32 0.5, %v8421_v37 }
0x1b6b   :  { %9606 = vtanh.f32 %v6750_v0  ;;  %v6751_v22 = vmul.f32 0.5, %v8422_v58  ;;  %v6761_v33 = vmul.f32 0.5, %v8454_v43 }
0x1b6c   :  { %9608 = vtanh.f32 %v6743_v17 }
0x1b6d   :  { %9610 = vtanh.f32 %v8451_v30 }
0x1b6e   :  { %9612 = vtanh.f32 %v6751_v22 }
0x1b6f   :  { %9614 = vtanh.f32 %v8453_v15 }
0x1b70   :  { %9616 = vtanh.f32 %v6760_v14 }
0x1b71   :  { %9618 = vtanh.f32 %v6761_v33 }
0x1b74   :  { %v9605_v32 = vpop.eup %9604 }
0x1b75   :  { %v9607_v42 = vpop.eup %9606  ;;  %v6746_v27 = vmul.f32 0.5, %v9605_v32 }
0x1b76   :  { %v6754_v20 = vmul.f32 0.5, %v9607_v42  ;;  %v9609_v49 = vpop.eup %9608 }
0x1b77   :  { %v6748_v16 = vadd.f32 0.5, %v6746_v27  ;;  %v9611_v21 = vpop.eup %9610  ;;  %v6747_v54 = vmul.f32 0.5, %v9609_v49 }
0x1b78   :  { %v6756_v50 = vadd.f32 0.5, %v6754_v20  ;;  %v9613_v37 = vpop.eup %9612 }
0x1b79   :  { %v6770_v3 = vmul.f32 %v9611_v21, %v6748_v16  ;;  %v6749_v2 = vadd.f32 0.5, %v6747_v54  ;;  %v6755_v0 = vmul.f32 0.5, %v9613_v37  ;;  %v9615_v55 = vpop.eup %9614 }
0x1b7a   :  { %v6768_v45 = vmul.f32 %v6756_v50, %v12594_v46  ;;  %v9617_v26 = vpop.eup %9616 }
0x1b7b   :  { %v6757_v30 = vadd.f32 0.5, %v6755_v0  ;;  %v6771_v17 = vmul.f32 %v9615_v55, %v6749_v2  ;;  %v9619_v43 = vpop.eup %9618  ;;  %v6764_v32 = vmul.f32 0.5, %v9617_v26 }
0x1b7c   :  { %v12647_v58 = vadd.f32 %v6770_v3, %v6768_v45  ;;  %v6765_v46 = vmul.f32 0.5, %v9619_v43 }
0x1b7d   :  { %v6769_v22 = vmul.f32 %v6757_v30, %v12597_v6  ;;  %v6766_v27 = vadd.f32 0.5, %v6764_v32 }
0x1b7e   :  { %9620 = vtanh.f32 %v12647_v58  ;;  %v6767_v14 = vadd.f32 0.5, %v6765_v46 }
0x1b7f   :  { %v12651_v15 = vadd.f32 %v6771_v17, %v6769_v22 }
0x1b81   :  { %9622 = vtanh.f32 %v12651_v15 }
0x1b88   :  { %v9621_v42 = vpop.eup %9620 }
0x1b89   :  { %v6776_v33 = vmul.f32 %v9621_v42, %v6766_v27 }
0x1b8b   :  { %v9623_v20 = vpop.eup %9622 }
0x1b8c   :  { %v6777_v49 = vmul.f32 %v9623_v20, %v6767_v14 }
0x1b8e   :  { %v12654_v16 = vpack.c.bf16 %v6777_v49, %v6776_v33 }
0x1b90   :  { %6822 = vmatmul.mubr.bf16.vlgmr.msra.gmra.mrb[104].mxu0 %v12654_v16  ;;  %6865 = vmatmul.mubr.bf16.vlgmr.msra.gmra.mrb[120].mxu1 %v12654_v16 }
0x1b91   :  { %6931 = vmatpush1.bf16.msra.mxu0 %v12393_v40  ;;  %6974 = vmatpush1.bf16.msra.mxu1 %v12396_v7 }
0x1b92   :  { %6932 = vmatprep.subr.bf16.mxu0 %v12398_v34  ;;  %6975 = vmatprep.subr.bf16.mxu1 %v12434_v11 }
0x1b93   :  { %6962 = vmatprep.mubr.bf16.mxu0 %v13149_v53  ;;  %7005 = vmatprep.mubr.bf16.mxu1 %v13149_v53 }
0x1b95   :  { %6933 = vmatpush1.bf16.msra.mxu0 %v12406_v8  ;;  %6976 = vmatpush1.bf16.msra.mxu1 %v12437_v1 }
0x1b96   :  { %6934 = vmatprep.subr.bf16.mxu0 %v12439_v36  ;;  %6977 = vmatprep.subr.bf16.mxu1 %v12446_v59 }
0x1b99   :  { %6935 = vmatpush1.bf16.msra.mxu0 %v12442_v35  ;;  %6978 = vmatpush1.bf16.msra.mxu1 %v12450_v51 }
0x1b9a   :  { %6936 = vmatprep.subr.bf16.mxu0 %v12448_v41  ;;  %6979 = vmatprep.subr.bf16.mxu1 %v12455_v57 }
0x1b9d   :  { %6937 = vmatpush1.bf16.msra.mxu0 %v12452_v23  ;;  %6980 = vmatpush1.bf16.msra.mxu1 %v12461_v63 }
0x1b9e   :  { %6938 = vmatprep.subr.bf16.mxu0 %v12457_v29  ;;  %6981 = vmatprep.subr.bf16.mxu1 %v12467_v56 }
0x1ba1   :  { %6939 = vmatpush1.bf16.msra.mxu0 %v12465_v61  ;;  %6982 = vmatpush1.bf16.msra.mxu1 %v12473_v31 }
0x1ba2   :  { %6940 = vmatprep.subr.bf16.mxu0 %v12470_v39  ;;  %6983 = vmatprep.subr.bf16.mxu1 %v12479_v48 }
0x1ba5   :  { %6941 = vmatpush1.bf16.msra.mxu0 %v12477_v19  ;;  %6984 = vmatpush1.bf16.msra.mxu1 %v12485_v12 }
0x1ba6   :  { %6942 = vmatprep.subr.bf16.mxu0 %v12482_v4  ;;  %6985 = vmatprep.subr.bf16.mxu1 %v12491_v44 }
0x1ba9   :  { %6943 = vmatpush1.bf16.msra.mxu0 %v12489_v62  ;;  %6986 = vmatpush1.bf16.msra.mxu1 %v12497_v24 }
0x1baa   :  { %6944 = vmatprep.subr.bf16.mxu0 %v12494_v28  ;;  %6987 = vmatprep.subr.bf16.mxu1 %v12503_v38 }
0x1bad   :  { %6945 = vmatpush1.bf16.msra.mxu0 %v12501_v60  ;;  %6988 = vmatpush1.bf16.msra.mxu1 %v12507_v9 }
0x1bae   :  { %7071 = vmatprep.subr.bf16.mxu0 %v12388_v18  ;;  %7114 = vmatprep.subr.bf16.mxu1 %v12390_v25 }
0x1c63   :  { %v6823_v6 = vpop.f32.mrb[104].mxu0  ;;  %v6866_v21 = vpop.f32.mrb[120].mxu1 }
0x1c64   :  { %v8423_v50 = vadd.f32 %v6823_v6, %v12575_v52  ;;  %v6825_v54 = vpop.f32.mrb[105].mxu0  ;;  %v6868_v37 = vpop.f32.mrb[121].mxu1  ;;  %v8455_v43 = vadd.f32 %v6866_v21, %v12582_v5 }
0x1c65   :  { %v8424_v3 = vadd.f32 %v6825_v54, %v12578_v10  ;;  %v6827_v45 = vpop.f32.mrb[106].mxu0  ;;  %v6870_v2 = vpop.f32.mrb[122].mxu1  ;;  %v8456_v27 = vadd.f32 %v6868_v37, %v12589_v47 }
0x1c66   :  { %v6883_v0 = vmul.f32 0.5, %v8423_v50  ;;  %v8425_v55 = vadd.f32 %v6827_v45, %v12575_v52  ;;  %v6829_v30 = vpop.f32.mrb[107].mxu0  ;;  %v6872_v17 = vpop.f32.mrb[123].mxu1  ;;  %v8457_v42 = vadd.f32 %v6870_v2, %v12582_v5 }
0x1c67   :  { %v6891_v22 = vmul.f32 0.5, %v8424_v3  ;;  %v8426_v26 = vadd.f32 %v6829_v30, %v12578_v10  ;;  %v8458_v14 = vadd.f32 %v6872_v17, %v12589_v47  ;;  %v6901_v6 = vmul.f32 0.5, %v8456_v27 }
0x1c68   :  { %9624 = vtanh.f32 %v6883_v0  ;;  %v6884_v32 = vmul.f32 0.5, %v8425_v55 }
0x1c69   :  { %9626 = vtanh.f32 %v6891_v22  ;;  %v6892_v46 = vmul.f32 0.5, %v8426_v26  ;;  %v6902_v54 = vmul.f32 0.5, %v8458_v14 }
0x1c6a   :  { %9628 = vtanh.f32 %v6884_v32 }
0x1c6b   :  { %9630 = vtanh.f32 %v8455_v43 }
0x1c6c   :  { %9632 = vtanh.f32 %v6892_v46 }
0x1c6d   :  { %9634 = vtanh.f32 %v8457_v42 }
0x1c6e   :  { %9636 = vtanh.f32 %v6901_v6 }
0x1c6f   :  { %9638 = vtanh.f32 %v6902_v54 }
0x1c72   :  { %v9625_v20 = vpop.eup %9624 }
0x1c73   :  { %v9627_v33 = vpop.eup %9626  ;;  %v6887_v49 = vmul.f32 0.5, %v9625_v20 }
0x1c74   :  { %v6895_v50 = vmul.f32 0.5, %v9627_v33  ;;  %v9629_v21 = vpop.eup %9628 }
0x1c75   :  { %v6889_v3 = vadd.f32 0.5, %v6887_v49  ;;  %v9631_v45 = vpop.eup %9630  ;;  %v6888_v55 = vmul.f32 0.5, %v9629_v21 }
0x1c76   :  { %v6897_v0 = vadd.f32 0.5, %v6895_v50  ;;  %v9633_v30 = vpop.eup %9632 }
0x1c77   :  { %v6911_v2 = vmul.f32 %v9631_v45, %v6889_v3  ;;  %v6890_v37 = vadd.f32 0.5, %v6888_v55  ;;  %v6896_v26 = vmul.f32 0.5, %v9633_v30  ;;  %v9635_v17 = vpop.eup %9634 }
0x1c78   :  { %v6909_v22 = vmul.f32 %v6897_v0, %v12647_v58  ;;  %v9637_v14 = vpop.eup %9636 }
0x1c79   :  { %v6898_v32 = vadd.f32 0.5, %v6896_v26  ;;  %v6912_v46 = vmul.f32 %v9635_v17, %v6890_v37  ;;  %v9639_v20 = vpop.eup %9638  ;;  %v6905_v33 = vmul.f32 0.5, %v9637_v14 }
0x1c7a   :  { %v12701_v43 = vadd.f32 %v6911_v2, %v6909_v22  ;;  %v6906_v58 = vmul.f32 0.5, %v9639_v20 }
0x1c7b   :  { %v6910_v42 = vmul.f32 %v6898_v32, %v12651_v15  ;;  %v6907_v6 = vadd.f32 0.5, %v6905_v33 }
0x1c7c   :  { %9640 = vtanh.f32 %v12701_v43  ;;  %v6908_v50 = vadd.f32 0.5, %v6906_v58 }
0x1c7d   :  { %v12705_v27 = vadd.f32 %v6912_v46, %v6910_v42 }
0x1c7f   :  { %9642 = vtanh.f32 %v12705_v27 }
0x1c86   :  { %v9641_v49 = vpop.eup %9640 }
0x1c87   :  { %v6917_v21 = vmul.f32 %v9641_v49, %v6907_v6 }
0x1c89   :  { %v9643_v54 = vpop.eup %9642 }
0x1c8a   :  { %v6918_v3 = vmul.f32 %v9643_v54, %v6908_v50 }
0x1c8c   :  { %v12708_v45 = vpack.c.bf16 %v6918_v3, %v6917_v21  ;;  %v12769_v3 = vld [vmem:[#allocation15 + $0x8] ss:$16 sps:$4 sm:$0xff]  }
0x1c8e   :  { %6963 = vmatmul.mubr.bf16.vlgmr.msra.gmra.mrb[108].mxu0 %v12708_v45  ;;  %7006 = vmatmul.mubr.bf16.vlgmr.msra.gmra.mrb[124].mxu1 %v12708_v45 }
0x1c8f   :  { %7072 = vmatpush1.bf16.msra.mxu0 %v12393_v40  ;;  %7115 = vmatpush1.bf16.msra.mxu1 %v12396_v7 }
0x1c90   :  { %7073 = vmatprep.subr.bf16.mxu0 %v12398_v34  ;;  %7116 = vmatprep.subr.bf16.mxu1 %v12434_v11 }
0x1c91   :  { %7103 = vmatprep.mubr.bf16.mxu0 %v13149_v53  ;;  %7146 = vmatprep.mubr.bf16.mxu1 %v13149_v53 }
0x1c93   :  { %7074 = vmatpush1.bf16.msra.mxu0 %v12406_v8  ;;  %7117 = vmatpush1.bf16.msra.mxu1 %v12437_v1 }
0x1c94   :  { %7075 = vmatprep.subr.bf16.mxu0 %v12439_v36  ;;  %7118 = vmatprep.subr.bf16.mxu1 %v12446_v59 }
0x1c97   :  { %7076 = vmatpush1.bf16.msra.mxu0 %v12442_v35  ;;  %7119 = vmatpush1.bf16.msra.mxu1 %v12450_v51 }
0x1c98   :  { %7077 = vmatprep.subr.bf16.mxu0 %v12448_v41  ;;  %7120 = vmatprep.subr.bf16.mxu1 %v12455_v57 }
0x1c9b   :  { %7078 = vmatpush1.bf16.msra.mxu0 %v12452_v23  ;;  %7121 = vmatpush1.bf16.msra.mxu1 %v12461_v63 }
0x1c9c   :  { %7079 = vmatprep.subr.bf16.mxu0 %v12457_v29  ;;  %7122 = vmatprep.subr.bf16.mxu1 %v12467_v56 }
0x1c9f   :  { %7080 = vmatpush1.bf16.msra.mxu0 %v12465_v61  ;;  %7123 = vmatpush1.bf16.msra.mxu1 %v12473_v31 }
0x1ca0   :  { %7081 = vmatprep.subr.bf16.mxu0 %v12470_v39  ;;  %7124 = vmatprep.subr.bf16.mxu1 %v12479_v48 }
0x1ca3   :  { %7082 = vmatpush1.bf16.msra.mxu0 %v12477_v19  ;;  %7125 = vmatpush1.bf16.msra.mxu1 %v12485_v12 }
0x1ca4   :  { %7083 = vmatprep.subr.bf16.mxu0 %v12482_v4  ;;  %7126 = vmatprep.subr.bf16.mxu1 %v12491_v44 }
0x1ca7   :  { %7084 = vmatpush1.bf16.msra.mxu0 %v12489_v62  ;;  %7127 = vmatpush1.bf16.msra.mxu1 %v12497_v24 }
0x1ca8   :  { %7085 = vmatprep.subr.bf16.mxu0 %v12494_v28  ;;  %7128 = vmatprep.subr.bf16.mxu1 %v12503_v38 }
0x1cab   :  { %7086 = vmatpush1.bf16.msra.mxu0 %v12501_v60  ;;  %7129 = vmatpush1.bf16.msra.mxu1 %v12507_v9 }
0x1cac   :  { %7212 = vmatprep.subr.bf16.mxu0 %v12388_v18  ;;  %7255 = vmatprep.subr.bf16.mxu1 %v12390_v25 }
0x1d61   :  { %v6964_v40 = vpop.f32.mrb[108].mxu0  ;;  %v7007_v7 = vpop.f32.mrb[124].mxu1 }
0x1d62   :  { %v8427_v34 = vadd.f32 %v6964_v40, %v12575_v52  ;;  %v6966_v8 = vpop.f32.mrb[109].mxu0  ;;  %v7009_v11 = vpop.f32.mrb[125].mxu1  ;;  %v8459_v25 = vadd.f32 %v7007_v7, %v12582_v5  ;;  %v12772_v40 = vld [vmem:[#allocation15 + $0x24] ss:$16 sps:$4 sm:$0xff]   ;;  %v12775_v7 = vld [vmem:[#allocation15 + $0x2c] ss:$16 sps:$4 sm:$0xff]  }
0x1d63   :  { %v8428_v1 = vadd.f32 %v6966_v8, %v12578_v10  ;;  %v6968_v36 = vpop.f32.mrb[110].mxu0  ;;  %v7011_v35 = vpop.f32.mrb[126].mxu1  ;;  %v8460_v56 = vadd.f32 %v7009_v11, %v12589_v47  ;;  %v12783_v8 = vld [vmem:[#allocation15 + $0x28] ss:$16 sps:$4 sm:$0xff]   ;;  %v12786_v11 = vld [vmem:[#allocation15 + $0x44] ss:$16 sps:$4 sm:$0xff]  }
0x1d64   :  { %v7024_v59 = vmul.f32 0.5, %v8427_v34  ;;  %v8429_v41 = vadd.f32 %v6968_v36, %v12575_v52  ;;  %v6970_v51 = vpop.f32.mrb[111].mxu0  ;;  %v7013_v23 = vpop.f32.mrb[127].mxu1  ;;  %v8461_v61 = vadd.f32 %v7011_v35, %v12582_v5  ;;  %v12780_v34 = vld [vmem:[#allocation15 + $0x20] ss:$16 sps:$4 sm:$0xff]  }
0x1d65   :  { %v7032_v57 = vmul.f32 0.5, %v8428_v1  ;;  %v8430_v18 = vadd.f32 %v6970_v51, %v12578_v10  ;;  %v8462_v39 = vadd.f32 %v7013_v23, %v12589_v47  ;;  %v7042_v4 = vmul.f32 0.5, %v8460_v56  ;;  %v12789_v1 = vld [vmem:[#allocation15 + $0x4c] ss:$16 sps:$4 sm:$0xff]   ;;  %v12792_v36 = vld [vmem:[#allocation15 + $0x40] ss:$16 sps:$4 sm:$0xff]  }
0x1d66   :  { %9644 = vtanh.f32 %v7024_v59  ;;  %v7025_v29 = vmul.f32 0.5, %v8429_v41  ;;  %v12795_v35 = vld [vmem:[#allocation15 + $0x48] ss:$16 sps:$4 sm:$0xff]   ;;  %v12798_v59 = vld [vmem:[#allocation15 + $0x64] ss:$16 sps:$4 sm:$0xff]  }
0x1d67   :  { %9646 = vtanh.f32 %v7032_v57  ;;  %v7033_v63 = vmul.f32 0.5, %v8430_v18  ;;  %v7043_v62 = vmul.f32 0.5, %v8462_v39  ;;  %v12801_v41 = vld [vmem:[#allocation15 + $0x6c] ss:$16 sps:$4 sm:$0xff]   ;;  %v12804_v51 = vld [vmem:[#allocation15 + $0x60] ss:$16 sps:$4 sm:$0xff]  }
0x1d68   :  { %9648 = vtanh.f32 %v7025_v29  ;;  %v12807_v23 = vld [vmem:[#allocation15 + $0x68] ss:$16 sps:$4 sm:$0xff]   ;;  %v12810_v57 = vld [vmem:[#allocation15 + $0x84] ss:$16 sps:$4 sm:$0xff]   ;;  %v12813_v18 = vld [vmem:[#allocation15 + $0x8c] ss:$16 sps:$4 sm:$0xff]  }
0x1d69   :  { %9650 = vtanh.f32 %v8459_v25  ;;  %v12816_v25 = vld [vmem:[#allocation15 + $0x80] ss:$16 sps:$4 sm:$0xff]   ;;  %v12819_v29 = vld [vmem:[#allocation15 + $0x88] ss:$16 sps:$4 sm:$0xff]  }
0x1d6a   :  { %9652 = vtanh.f32 %v7033_v63  ;;  %v12822_v63 = vld [vmem:[#allocation15 + $0xa4] ss:$16 sps:$4 sm:$0xff]   ;;  %v12828_v56 = vld [vmem:[#allocation15 + $0xa0] ss:$16 sps:$4 sm:$0xff]   ;;  %v12831_v39 = vld [vmem:[#allocation15 + $0xa8] ss:$16 sps:$4 sm:$0xff]  }
0x1d6b   :  { %9654 = vtanh.f32 %v8461_v61  ;;  %v12825_v61 = vld [vmem:[#allocation15 + $0xac] ss:$16 sps:$4 sm:$0xff]  }
0x1d6c   :  { %9656 = vtanh.f32 %v7042_v4  ;;  %v12843_v4 = vld [vmem:[#allocation15 + $0xc8] ss:$16 sps:$4 sm:$0xff]  }
0x1d6d   :  { %9658 = vtanh.f32 %v7043_v62  ;;  %v12849_v62 = vld [vmem:[#allocation15 + $0xec] ss:$16 sps:$4 sm:$0xff]  }
0x1d70   :  { %v9645_v31 = vpop.eup %9644 }
0x1d71   :  { %v9647_v19 = vpop.eup %9646  ;;  %v7028_v48 = vmul.f32 0.5, %v9645_v31  ;;  %v12834_v31 = vld [vmem:[#allocation15 + $0xc4] ss:$16 sps:$4 sm:$0xff]  }
0x1d72   :  { %v7036_v12 = vmul.f32 0.5, %v9647_v19  ;;  %v9649_v44 = vpop.eup %9648  ;;  %v12837_v19 = vld [vmem:[#allocation15 + $0xcc] ss:$16 sps:$4 sm:$0xff]  }
0x1d73   :  { %v7030_v28 = vadd.f32 0.5, %v7028_v48  ;;  %v9651_v24 = vpop.eup %9650  ;;  %v7029_v38 = vmul.f32 0.5, %v9649_v44  ;;  %v12840_v48 = vld [vmem:[#allocation15 + $0xc0] ss:$16 sps:$4 sm:$0xff]  }
0x1d74   :  { %v7038_v60 = vadd.f32 0.5, %v7036_v12  ;;  %v9653_v15 = vpop.eup %9652  ;;  %v12846_v12 = vld [vmem:[#allocation15 + $0xe4] ss:$16 sps:$4 sm:$0xff]   ;;  %v12852_v44 = vld [vmem:[#allocation15 + $0xe0] ss:$16 sps:$4 sm:$0xff]  }
0x1d75   :  { %v7052_v0 = vmul.f32 %v9651_v24, %v7030_v28  ;;  %v7031_v30 = vadd.f32 0.5, %v7029_v38  ;;  %v7037_v2 = vmul.f32 0.5, %v9653_v15  ;;  %v9655_v22 = vpop.eup %9654  ;;  %v12856_v28 = vld [vmem:[#allocation15 + $0x4] ss:$16 sps:$4 sm:$0xff]   ;;  %v12859_v24 = vld [vmem:[#allocation15 + $0xc] ss:$16 sps:$4 sm:$0xff]  }
0x1d76   :  { %v7050_v55 = vmul.f32 %v7038_v60, %v12701_v43  ;;  %v9657_v42 = vpop.eup %9656 }
0x1d77   :  { %v7039_v26 = vadd.f32 0.5, %v7037_v2  ;;  %v7053_v17 = vmul.f32 %v9655_v22, %v7031_v30  ;;  %v9659_v14 = vpop.eup %9658  ;;  %v7046_v20 = vmul.f32 0.5, %v9657_v42 }
0x1d78   :  { %v12755_v37 = vadd.f32 %v7052_v0, %v7050_v55  ;;  %v7047_v43 = vmul.f32 0.5, %v9659_v14 }
0x1d79   :  { %v7051_v32 = vmul.f32 %v7039_v26, %v12705_v27  ;;  %v7048_v58 = vadd.f32 0.5, %v7046_v20  ;;  %v12766_v27 = vld [vmem:[#allocation15] ss:$16 sps:$4 sm:$0xff]  }
0x1d7a   :  { %9660 = vtanh.f32 %v12755_v37  ;;  %v7049_v49 = vadd.f32 0.5, %v7047_v43 }
0x1d7b   :  { %v12759_v46 = vadd.f32 %v7053_v17, %v7051_v32 }
0x1d7d   :  { %9662 = vtanh.f32 %v12759_v46 }
0x1d84   :  { %v9661_v33 = vpop.eup %9660 }
0x1d85   :  { %v7058_v50 = vmul.f32 %v9661_v33, %v7048_v58 }
0x1d87   :  { %v9663_v6 = vpop.eup %9662 }
0x1d88   :  { %v7059_v54 = vmul.f32 %v9663_v6, %v7049_v49 }
0x1d8a   :  { %v12762_v21 = vpack.c.bf16 %v7059_v54, %v7058_v50 }
0x1d8c   :  { %7104 = vmatmul.mubr.bf16.vlgmr.msra.gmra.mrb[112].mxu0 %v12762_v21  ;;  %7147 = vmatmul.mubr.bf16.vlgmr.msra.gmra.mrb[128].mxu1 %v12762_v21 }
0x1d8d   :  { %7213 = vmatpush1.bf16.msra.mxu0 %v12766_v27  ;;  %7256 = vmatpush1.bf16.msra.mxu1 %v12769_v3 }
0x1d8e   :  { %7214 = vmatprep.subr.bf16.mxu0 %v12772_v40  ;;  %7257 = vmatprep.subr.bf16.mxu1 %v12775_v7 }
0x1d8f   :  { %7244 = vmatprep.mubr.bf16.mxu0 %v13149_v53  ;;  %7287 = vmatprep.mubr.bf16.mxu1 %v13149_v53 }
0x1d91   :  { %7215 = vmatpush1.bf16.msra.mxu0 %v12780_v34  ;;  %7258 = vmatpush1.bf16.msra.mxu1 %v12783_v8 }
0x1d92   :  { %7216 = vmatprep.subr.bf16.mxu0 %v12786_v11  ;;  %7259 = vmatprep.subr.bf16.mxu1 %v12789_v1 }
0x1d95   :  { %7217 = vmatpush1.bf16.msra.mxu0 %v12792_v36  ;;  %7260 = vmatpush1.bf16.msra.mxu1 %v12795_v35 }
0x1d96   :  { %7218 = vmatprep.subr.bf16.mxu0 %v12798_v59  ;;  %7261 = vmatprep.subr.bf16.mxu1 %v12801_v41 }
0x1d99   :  { %7219 = vmatpush1.bf16.msra.mxu0 %v12804_v51  ;;  %7262 = vmatpush1.bf16.msra.mxu1 %v12807_v23 }
0x1d9a   :  { %7220 = vmatprep.subr.bf16.mxu0 %v12810_v57  ;;  %7263 = vmatprep.subr.bf16.mxu1 %v12813_v18 }
0x1d9d   :  { %7221 = vmatpush1.bf16.msra.mxu0 %v12816_v25  ;;  %7264 = vmatpush1.bf16.msra.mxu1 %v12819_v29 }
0x1d9e   :  { %7222 = vmatprep.subr.bf16.mxu0 %v12822_v63  ;;  %7265 = vmatprep.subr.bf16.mxu1 %v12825_v61 }
0x1da1   :  { %7223 = vmatpush1.bf16.msra.mxu0 %v12828_v56  ;;  %7266 = vmatpush1.bf16.msra.mxu1 %v12831_v39 }
0x1da2   :  { %7224 = vmatprep.subr.bf16.mxu0 %v12834_v31  ;;  %7267 = vmatprep.subr.bf16.mxu1 %v12837_v19 }
0x1da5   :  { %7225 = vmatpush1.bf16.msra.mxu0 %v12840_v48  ;;  %7268 = vmatpush1.bf16.msra.mxu1 %v12843_v4 }
0x1da6   :  { %7226 = vmatprep.subr.bf16.mxu0 %v12846_v12  ;;  %7269 = vmatprep.subr.bf16.mxu1 %v12849_v62 }
0x1da9   :  { %7227 = vmatpush1.bf16.msra.mxu0 %v12852_v44  ;;  %7270 = vmatpush1.bf16.msra.mxu1 %v12507_v9 }
0x1daa   :  { %7353 = vmatprep.subr.bf16.mxu0 %v12856_v28  ;;  %7396 = vmatprep.subr.bf16.mxu1 %v12859_v24 }
0x1e5f   :  { %v7105_v60 = vpop.f32.mrb[112].mxu0  ;;  %v7148_v38 = vpop.f32.mrb[128].mxu1 }
0x1e60   :  { %v8431_v15 = vadd.f32 %v7105_v60, %v12575_v52  ;;  %v7107_v0 = vpop.f32.mrb[113].mxu0  ;;  %v7150_v55 = vpop.f32.mrb[129].mxu1  ;;  %v8463_v20 = vadd.f32 %v7148_v38, %v12582_v5 }
0x1e61   :  { %v8432_v30 = vadd.f32 %v7107_v0, %v12578_v10  ;;  %v7109_v2 = vpop.f32.mrb[114].mxu0  ;;  %v7152_v22 = vpop.f32.mrb[130].mxu1  ;;  %v8464_v49 = vadd.f32 %v7150_v55, %v12589_v47 }
0x1e62   :  { %v7165_v26 = vmul.f32 0.5, %v8431_v15  ;;  %v8433_v9 = vadd.f32 %v7109_v2, %v12575_v52  ;;  %v7111_v17 = vpop.f32.mrb[115].mxu0  ;;  %v7154_v32 = vpop.f32.mrb[131].mxu1  ;;  %v8465_v58 = vadd.f32 %v7152_v22, %v12582_v5 }
0x1e63   :  { %v7173_v42 = vmul.f32 0.5, %v8432_v30  ;;  %v8434_v14 = vadd.f32 %v7111_v17, %v12578_v10  ;;  %v8466_v6 = vadd.f32 %v7154_v32, %v12589_v47  ;;  %v7183_v15 = vmul.f32 0.5, %v8464_v49 }
0x1e64   :  { %9664 = vtanh.f32 %v7165_v26  ;;  %v7166_v43 = vmul.f32 0.5, %v8433_v9 }
0x1e65   :  { %9666 = vtanh.f32 %v7173_v42  ;;  %v7174_v33 = vmul.f32 0.5, %v8434_v14  ;;  %v7184_v30 = vmul.f32 0.5, %v8466_v6 }
0x1e66   :  { %9668 = vtanh.f32 %v7166_v43 }
0x1e67   :  { %9670 = vtanh.f32 %v8463_v20 }
0x1e68   :  { %9672 = vtanh.f32 %v7174_v33 }
0x1e69   :  { %9674 = vtanh.f32 %v8465_v58 }
0x1e6a   :  { %9676 = vtanh.f32 %v7183_v15 }
0x1e6b   :  { %9678 = vtanh.f32 %v7184_v30 }
0x1e6e   :  { %v9665_v50 = vpop.eup %9664 }
0x1e6f   :  { %v9667_v54 = vpop.eup %9666  ;;  %v7169_v60 = vmul.f32 0.5, %v9665_v50 }
0x1e70   :  { %v7177_v0 = vmul.f32 0.5, %v9667_v54  ;;  %v9669_v38 = vpop.eup %9668 }
0x1e71   :  { %v7171_v2 = vadd.f32 0.5, %v7169_v60  ;;  %v9671_v26 = vpop.eup %9670  ;;  %v7170_v17 = vmul.f32 0.5, %v9669_v38 }
0x1e72   :  { %v7179_v9 = vadd.f32 0.5, %v7177_v0  ;;  %v9673_v42 = vpop.eup %9672 }
0x1e73   :  { %v7193_v22 = vmul.f32 %v9671_v26, %v7171_v2  ;;  %v7172_v55 = vadd.f32 0.5, %v7170_v17  ;;  %v7178_v20 = vmul.f32 0.5, %v9673_v42  ;;  %v9675_v32 = vpop.eup %9674 }
0x1e74   :  { %v7191_v14 = vmul.f32 %v7179_v9, %v12755_v37  ;;  %v9677_v50 = vpop.eup %9676 }
0x1e75   :  { %v7180_v33 = vadd.f32 0.5, %v7178_v20  ;;  %v7194_v58 = vmul.f32 %v9675_v32, %v7172_v55  ;;  %v9679_v54 = vpop.eup %9678  ;;  %v7187_v60 = vmul.f32 0.5, %v9677_v50 }
0x1e76   :  { %v12871_v43 = vadd.f32 %v7193_v22, %v7191_v14  ;;  %v7188_v37 = vmul.f32 0.5, %v9679_v54 }
0x1e77   :  { %v7192_v49 = vmul.f32 %v7180_v33, %v12759_v46  ;;  %v7189_v0 = vadd.f32 0.5, %v7187_v60  ;;  %v12913_v46 = vld [vmem:[#allocation15 + $0xe8] ss:$16 sps:$4 sm:$0xff]  }
0x1e78   :  { %9680 = vtanh.f32 %v12871_v43  ;;  %v7190_v30 = vadd.f32 0.5, %v7188_v37 }
0x1e79   :  { %v12875_v6 = vadd.f32 %v7194_v58, %v7192_v49 }
0x1e7b   :  { %9682 = vtanh.f32 %v12875_v6 }
0x1e82   :  { %v9681_v15 = vpop.eup %9680 }
0x1e83   :  { %v7199_v2 = vmul.f32 %v9681_v15, %v7189_v0 }
0x1e85   :  { %v9683_v38 = vpop.eup %9682 }
0x1e86   :  { %v7200_v26 = vmul.f32 %v9683_v38, %v7190_v30 }
0x1e88   :  { %v12878_v9 = vpack.c.bf16 %v7200_v26, %v7199_v2 }
0x1e8a   :  { %7245 = vmatmul.mubr.bf16.vlgmr.msra.gmra.mrb[116].mxu0 %v12878_v9  ;;  %7288 = vmatmul.mubr.bf16.vlgmr.msra.gmra.mrb[132].mxu1 %v12878_v9 }
0x1e8b   :  { %7354 = vmatpush1.bf16.msra.mxu0 %v12766_v27  ;;  %7397 = vmatpush1.bf16.msra.mxu1 %v12769_v3 }
0x1e8c   :  { %7355 = vmatprep.subr.bf16.mxu0 %v12772_v40  ;;  %7398 = vmatprep.subr.bf16.mxu1 %v12775_v7 }
0x1e8d   :  { %7385 = vmatprep.mubr.bf16.mxu0 %v13149_v53  ;;  %7428 = vmatprep.mubr.bf16.mxu1 %v13149_v53 }
0x1e8f   :  { %7356 = vmatpush1.bf16.msra.mxu0 %v12780_v34  ;;  %7399 = vmatpush1.bf16.msra.mxu1 %v12783_v8 }
0x1e90   :  { %7357 = vmatprep.subr.bf16.mxu0 %v12786_v11  ;;  %7400 = vmatprep.subr.bf16.mxu1 %v12789_v1 }
0x1e93   :  { %7358 = vmatpush1.bf16.msra.mxu0 %v12792_v36  ;;  %7401 = vmatpush1.bf16.msra.mxu1 %v12795_v35 }
0x1e94   :  { %7359 = vmatprep.subr.bf16.mxu0 %v12798_v59  ;;  %7402 = vmatprep.subr.bf16.mxu1 %v12801_v41 }
0x1e97   :  { %7360 = vmatpush1.bf16.msra.mxu0 %v12804_v51  ;;  %7403 = vmatpush1.bf16.msra.mxu1 %v12807_v23 }
0x1e98   :  { %7361 = vmatprep.subr.bf16.mxu0 %v12810_v57  ;;  %7404 = vmatprep.subr.bf16.mxu1 %v12813_v18 }
0x1e9b   :  { %7362 = vmatpush1.bf16.msra.mxu0 %v12816_v25  ;;  %7405 = vmatpush1.bf16.msra.mxu1 %v12819_v29 }
0x1e9c   :  { %7363 = vmatprep.subr.bf16.mxu0 %v12822_v63  ;;  %7406 = vmatprep.subr.bf16.mxu1 %v12825_v61 }
0x1e9f   :  { %7364 = vmatpush1.bf16.msra.mxu0 %v12828_v56  ;;  %7407 = vmatpush1.bf16.msra.mxu1 %v12831_v39 }
0x1ea0   :  { %7365 = vmatprep.subr.bf16.mxu0 %v12834_v31  ;;  %7408 = vmatprep.subr.bf16.mxu1 %v12837_v19 }
0x1ea3   :  { %7366 = vmatpush1.bf16.msra.mxu0 %v12840_v48  ;;  %7409 = vmatpush1.bf16.msra.mxu1 %v12843_v4 }
0x1ea4   :  { %7367 = vmatprep.subr.bf16.mxu0 %v12846_v12  ;;  %7410 = vmatprep.subr.bf16.mxu1 %v12849_v62 }
0x1ea7   :  { %7368 = vmatpush1.bf16.msra.mxu0 %v12852_v44  ;;  %7411 = vmatpush1.bf16.msra.mxu1 %v12913_v46 }
0x1ea8   :  { %7494 = vmatprep.subr.bf16.mxu0 %v12856_v28  ;;  %7537 = vmatprep.subr.bf16.mxu1 %v12859_v24 }
0x1f5d   :  { %v7246_v17 = vpop.f32.mrb[116].mxu0  ;;  %v7289_v42 = vpop.f32.mrb[132].mxu1 }
0x1f5e   :  { %v8435_v22 = vadd.f32 %v7246_v17, %v12575_v52  ;;  %v7248_v14 = vpop.f32.mrb[117].mxu0  ;;  %v7291_v55 = vpop.f32.mrb[133].mxu1  ;;  %v8467_v24 = vadd.f32 %v7289_v42, %v12582_v5 }
0x1f5f   :  { %v8436_v20 = vadd.f32 %v7248_v14, %v12578_v10  ;;  %v7250_v32 = vpop.f32.mrb[118].mxu0  ;;  %v7293_v33 = vpop.f32.mrb[134].mxu1  ;;  %v8468_v30 = vadd.f32 %v7291_v55, %v12589_v47 }
0x1f60   :  { %v7306_v58 = vmul.f32 0.5, %v8435_v22  ;;  %v8437_v49 = vadd.f32 %v7250_v32, %v12575_v52  ;;  %v7252_v50 = vpop.f32.mrb[119].mxu0  ;;  %v7295_v54 = vpop.f32.mrb[135].mxu1  ;;  %v8469_v0 = vadd.f32 %v7293_v33, %v12582_v5 }
0x1f61   :  { %v7314_v60 = vmul.f32 0.5, %v8436_v20  ;;  %v8438_v28 = vadd.f32 %v7252_v50, %v12578_v10  ;;  %v8470_v38 = vadd.f32 %v7295_v54, %v12589_v47  ;;  %v7324_v22 = vmul.f32 0.5, %v8468_v30 }
0x1f62   :  { %9684 = vtanh.f32 %v7306_v58  ;;  %v7307_v37 = vmul.f32 0.5, %v8437_v49 }
0x1f63   :  { %9686 = vtanh.f32 %v7314_v60  ;;  %v7315_v15 = vmul.f32 0.5, %v8438_v28  ;;  %v7325_v20 = vmul.f32 0.5, %v8470_v38 }
0x1f64   :  { %9688 = vtanh.f32 %v7307_v37 }
0x1f65   :  { %9690 = vtanh.f32 %v8467_v24 }
0x1f66   :  { %9692 = vtanh.f32 %v7315_v15 }
0x1f67   :  { %9694 = vtanh.f32 %v8469_v0 }
0x1f68   :  { %9696 = vtanh.f32 %v7324_v22 }
0x1f69   :  { %9698 = vtanh.f32 %v7325_v20 }
0x1f6c   :  { %v9685_v2 = vpop.eup %9684 }
0x1f6d   :  { %v9687_v26 = vpop.eup %9686  ;;  %v7310_v17 = vmul.f32 0.5, %v9685_v2 }
0x1f6e   :  { %v7318_v14 = vmul.f32 0.5, %v9687_v26  ;;  %v9689_v42 = vpop.eup %9688 }
0x1f6f   :  { %v7312_v32 = vadd.f32 0.5, %v7310_v17  ;;  %v9691_v58 = vpop.eup %9690  ;;  %v7311_v50 = vmul.f32 0.5, %v9689_v42 }
0x1f70   :  { %v7320_v49 = vadd.f32 0.5, %v7318_v14  ;;  %v9693_v60 = vpop.eup %9692 }
0x1f71   :  { %v7334_v33 = vmul.f32 %v9691_v58, %v7312_v32  ;;  %v7313_v55 = vadd.f32 0.5, %v7311_v50  ;;  %v7319_v24 = vmul.f32 0.5, %v9693_v60  ;;  %v9695_v54 = vpop.eup %9694 }
0x1f72   :  { %v7332_v28 = vmul.f32 %v7320_v49, %v12871_v43  ;;  %v9697_v2 = vpop.eup %9696 }
0x1f73   :  { %v7321_v15 = vadd.f32 0.5, %v7319_v24  ;;  %v7335_v0 = vmul.f32 %v9695_v54, %v7313_v55  ;;  %v9699_v26 = vpop.eup %9698  ;;  %v7328_v17 = vmul.f32 0.5, %v9697_v2 }
0x1f74   :  { %v12927_v37 = vadd.f32 %v7334_v33, %v7332_v28  ;;  %v7329_v43 = vmul.f32 0.5, %v9699_v26 }
0x1f75   :  { %v7333_v30 = vmul.f32 %v7321_v15, %v12875_v6  ;;  %v7330_v14 = vadd.f32 0.5, %v7328_v17 }
0x1f76   :  { %9700 = vtanh.f32 %v12927_v37  ;;  %v7331_v20 = vadd.f32 0.5, %v7329_v43 }
0x1f77   :  { %v12931_v38 = vadd.f32 %v7335_v0, %v7333_v30 }
0x1f79   :  { %9702 = vtanh.f32 %v12931_v38 }
0x1f80   :  { %v9701_v22 = vpop.eup %9700 }
0x1f81   :  { %v7340_v32 = vmul.f32 %v9701_v22, %v7330_v14 }
0x1f83   :  { %v9703_v42 = vpop.eup %9702 }
0x1f84   :  { %v7341_v58 = vmul.f32 %v9703_v42, %v7331_v20 }
0x1f86   :  { %v12934_v49 = vpack.c.bf16 %v7341_v58, %v7340_v32 }
0x1f88   :  { %7386 = vmatmul.mubr.bf16.vlgmr.msra.gmra.mrb[120].mxu0 %v12934_v49  ;;  %7429 = vmatmul.mubr.bf16.vlgmr.msra.gmra.mrb[136].mxu1 %v12934_v49 }
0x1f89   :  { %7495 = vmatpush1.bf16.msra.mxu0 %v12766_v27  ;;  %7538 = vmatpush1.bf16.msra.mxu1 %v12769_v3 }
0x1f8a   :  { %7496 = vmatprep.subr.bf16.mxu0 %v12772_v40  ;;  %7539 = vmatprep.subr.bf16.mxu1 %v12775_v7 }
0x1f8b   :  { %7526 = vmatprep.mubr.bf16.mxu0 %v13149_v53  ;;  %7569 = vmatprep.mubr.bf16.mxu1 %v13149_v53  ;;  %v12973_v53 = vld [vmem:[%s13106_s13] sm:$0xff]  }
0x1f8d   :  { %7497 = vmatpush1.bf16.msra.mxu0 %v12780_v34  ;;  %7540 = vmatpush1.bf16.msra.mxu1 %v12783_v8 }
0x1f8e   :  { %7498 = vmatprep.subr.bf16.mxu0 %v12786_v11  ;;  %7541 = vmatprep.subr.bf16.mxu1 %v12789_v1 }
0x1f91   :  { %7499 = vmatpush1.bf16.msra.mxu0 %v12792_v36  ;;  %7542 = vmatpush1.bf16.msra.mxu1 %v12795_v35 }
0x1f92   :  { %7500 = vmatprep.subr.bf16.mxu0 %v12798_v59  ;;  %7543 = vmatprep.subr.bf16.mxu1 %v12801_v41 }
0x1f95   :  { %7501 = vmatpush1.bf16.msra.mxu0 %v12804_v51  ;;  %7544 = vmatpush1.bf16.msra.mxu1 %v12807_v23 }
0x1f96   :  { %7502 = vmatprep.subr.bf16.mxu0 %v12810_v57  ;;  %7545 = vmatprep.subr.bf16.mxu1 %v12813_v18 }
0x1f99   :  { %7503 = vmatpush1.bf16.msra.mxu0 %v12816_v25  ;;  %7546 = vmatpush1.bf16.msra.mxu1 %v12819_v29 }
0x1f9a   :  { %7504 = vmatprep.subr.bf16.mxu0 %v12822_v63  ;;  %7547 = vmatprep.subr.bf16.mxu1 %v12825_v61 }
0x1f9d   :  { %7505 = vmatpush1.bf16.msra.mxu0 %v12828_v56  ;;  %7548 = vmatpush1.bf16.msra.mxu1 %v12831_v39 }
0x1f9e   :  { %7506 = vmatprep.subr.bf16.mxu0 %v12834_v31  ;;  %7549 = vmatprep.subr.bf16.mxu1 %v12837_v19 }
0x1fa1   :  { %7507 = vmatpush1.bf16.msra.mxu0 %v12840_v48  ;;  %7550 = vmatpush1.bf16.msra.mxu1 %v12843_v4 }
0x1fa2   :  { %7508 = vmatprep.subr.bf16.mxu0 %v12846_v12  ;;  %7551 = vmatprep.subr.bf16.mxu1 %v12849_v62 }
0x1fa5   :  { %7509 = vmatpush1.bf16.msra.mxu0 %v12852_v44  ;;  %7552 = vmatpush1.bf16.msra.mxu1 %v12913_v46 }
0x1fa6   :  { %8167 = vmatprep.subr.bf16.mxu0 %v12973_v53 }
0x205b   :  { %v7387_v27 = vpop.f32.mrb[120].mxu0  ;;  %v7430_v3 = vpop.f32.mrb[136].mxu1 }
0x205c   :  { %v8439_v40 = vadd.f32 %v7387_v27, %v12575_v52  ;;  %v7389_v7 = vpop.f32.mrb[121].mxu0  ;;  %v7432_v34 = vpop.f32.mrb[137].mxu1  ;;  %v8471_v57 = vadd.f32 %v7430_v3, %v12582_v5  ;;  %v9098_v3 = vld [vmem:[%s13106_s13 + $0x10] sm:$0xff]  }
0x205d   :  { %v8440_v8 = vadd.f32 %v7389_v7, %v12578_v10  ;;  %v7391_v11 = vpop.f32.mrb[122].mxu0  ;;  %v7434_v1 = vpop.f32.mrb[138].mxu1  ;;  %v8472_v63 = vadd.f32 %v7432_v34, %v12589_v47  ;;  %v9100_v7 = vld [vmem:[%s13106_s13 + $0x20] sm:$0xff]   ;;  %v9103_v34 = vld [vmem:[%s13106_s13 + $0x38] sm:$0xff]  }
0x205e   :  { %v7447_v36 = vmul.f32 0.5, %v8439_v40  ;;  %v8441_v35 = vadd.f32 %v7391_v11, %v12575_v52  ;;  %v7393_v59 = vpop.f32.mrb[123].mxu0  ;;  %v7436_v41 = vpop.f32.mrb[139].mxu1  ;;  %v8473_v29 = vadd.f32 %v7434_v1, %v12582_v5  ;;  %v9099_v40 = vld [vmem:[%s13106_s13 + $0x18] sm:$0xff]  }
0x205f   :  { %v7455_v51 = vmul.f32 0.5, %v8440_v8  ;;  %v8442_v23 = vadd.f32 %v7393_v59, %v12578_v10  ;;  %v8474_v61 = vadd.f32 %v7436_v41, %v12589_v47  ;;  %v7465_v19 = vmul.f32 0.5, %v8472_v63 }
0x2060   :  { %9704 = vtanh.f32 %v7447_v36  ;;  %v7448_v18 = vmul.f32 0.5, %v8441_v35 }
0x2061   :  { %9706 = vtanh.f32 %v7455_v51  ;;  %v7456_v25 = vmul.f32 0.5, %v8442_v23  ;;  %v7466_v4 = vmul.f32 0.5, %v8474_v61 }
0x2062   :  { %9708 = vtanh.f32 %v7448_v18 }
0x2063   :  { %9710 = vtanh.f32 %v8471_v57 }
0x2064   :  { %9712 = vtanh.f32 %v7456_v25 }
0x2065   :  { %9714 = vtanh.f32 %v8473_v29 }
0x2066   :  { %9716 = vtanh.f32 %v7465_v19 }
0x2067   :  { %9718 = vtanh.f32 %v7466_v4 }
0x206a   :  { %v9705_v56 = vpop.eup %9704 }
0x206b   :  { %v9707_v39 = vpop.eup %9706  ;;  %v7451_v31 = vmul.f32 0.5, %v9705_v56 }
0x206c   :  { %v7459_v48 = vmul.f32 0.5, %v9707_v39  ;;  %v9709_v12 = vpop.eup %9708 }
0x206d   :  { %v7453_v62 = vadd.f32 0.5, %v7451_v31  ;;  %v9711_v44 = vpop.eup %9710  ;;  %v7452_v46 = vmul.f32 0.5, %v9709_v12 }
0x206e   :  { %v7461_v6 = vadd.f32 0.5, %v7459_v48  ;;  %v9713_v50 = vpop.eup %9712 }
0x206f   :  { %v7475_v60 = vmul.f32 %v9711_v44, %v7453_v62  ;;  %v7454_v28 = vadd.f32 0.5, %v7452_v46  ;;  %v7460_v55 = vmul.f32 0.5, %v9713_v50  ;;  %v9715_v24 = vpop.eup %9714 }
0x2070   :  { %v7473_v33 = vmul.f32 %v7461_v6, %v12927_v37  ;;  %v9717_v26 = vpop.eup %9716 }
0x2071   :  { %v7462_v15 = vadd.f32 0.5, %v7460_v55  ;;  %v7476_v0 = vmul.f32 %v9715_v24, %v7454_v28  ;;  %v9719_v17 = vpop.eup %9718  ;;  %v7469_v43 = vmul.f32 0.5, %v9717_v26 }
0x2072   :  { %v12985_v54 = vadd.f32 %v7475_v60, %v7473_v33  ;;  %v7470_v37 = vmul.f32 0.5, %v9719_v17 }
0x2073   :  { %v7474_v30 = vmul.f32 %v7462_v15, %v12931_v38  ;;  %v7471_v14 = vadd.f32 0.5, %v7469_v43  ;;  %v9097_v38 = vld [vmem:[%s13106_s13 + $0x8] sm:$0xff]  }
0x2074   :  { %9720 = vtanh.f32 %v12985_v54  ;;  %v7472_v20 = vadd.f32 0.5, %v7470_v37 }
0x2075   :  { %v12989_v2 = vadd.f32 %v7476_v0, %v7474_v30  ;;  %v8142_v30 = vld [vmem:[%s13107_s14] ss:$0 sm:$0xff] }
0x2077   :  { %9722 = vtanh.f32 %v12989_v2 }
0x207e   :  { %v9721_v22 = vpop.eup %9720 }
0x207f   :  { %v7481_v32 = vmul.f32 %v9721_v22, %v7471_v14 }
0x2081   :  { %v9723_v42 = vpop.eup %9722 }
0x2082   :  { %v7482_v58 = vmul.f32 %v9723_v42, %v7472_v20 }
0x2084   :  { %v7493_v27 = vpack.c.bf16 %v7482_v58, %v7481_v32 }
0x2086   :  { %7527 = vmatmul.mubr.bf16.vlgmr.msra.gmra.mrb[124].mxu0 %v7493_v27  ;;  %7570 = vmatmul.mubr.bf16.vlgmr.msra.gmra.mrb[140].mxu1 %v7493_v27 }
0x2087   :  { %8168 = vmatpush3.bf16.msra.mxu0 %v12973_v53  ;;  %8183 = vmatprep.mubr.bf16.mxu0 %v12600_v13  ;;  %v9101_v13 = vld [vmem:[%s13106_s13 + $0x28] sm:$0xff]   ;;  %v9102_v53 = vld [vmem:[%s13106_s13 + $0x30] sm:$0xff]  }
0x2088   :  { %8169 = vmatprep.subr.bf16.mxu0 %v9097_v38 }
0x208b   :  { %8170 = vmatpush3.bf16.msra.mxu0 %v9097_v38 }
0x208c   :  { %8171 = vmatprep.subr.bf16.mxu0 %v9098_v3 }
0x208f   :  { %8172 = vmatpush3.bf16.msra.mxu0 %v9098_v3 }
0x2090   :  { %8173 = vmatprep.subr.bf16.mxu0 %v9099_v40 }
0x2093   :  { %8174 = vmatpush3.bf16.msra.mxu0 %v9099_v40 }
0x2094   :  { %8175 = vmatprep.subr.bf16.mxu0 %v9100_v7 }
0x2097   :  { %8176 = vmatpush3.bf16.msra.mxu0 %v9100_v7 }
0x2098   :  { %8177 = vmatprep.subr.bf16.mxu0 %v9101_v13 }
0x209b   :  { %8178 = vmatpush3.bf16.msra.mxu0 %v9101_v13 }
0x209c   :  { %8179 = vmatprep.subr.bf16.mxu0 %v9102_v53 }
0x209f   :  { %8180 = vmatpush3.bf16.msra.mxu0 %v9102_v53 }
0x20a0   :  { %8181 = vmatprep.subr.bf16.mxu0 %v9103_v34 }
0x20a3   :  { %8182 = vmatpush3.bf16.msra.mxu0 %v9103_v34 }
0x20a6   :  { %8184 = vmatmul.mubr.bf16.vlgmr.msra.gmra.mrb[128].mxu0 %v12654_v16 }
0x20a7   :  { %8187 = vmatprep.mubr.bf16.mxu0 %v12708_v45 }
0x20ae   :  { %8188 = vmatmul.mubr.bf16.gmra.mrb[132].mxu0 %v12762_v21 }
0x20af   :  { %8191 = vmatprep.mubr.bf16.mxu0 %v12878_v9 }
0x20b6   :  { %8192 = vmatmul.mubr.bf16.gmra.mrb[136].mxu0 %v12934_v49 }
0x20b7   :  { %8195 = vmatprep.mubr.bf16.mxu0 %v7493_v27 }
0x2159   :  { %v7528_v8 = vpop.f32.mrb[124].mxu0  ;;  %v7571_v11 = vpop.f32.mrb[140].mxu1 }
0x215a   :  { %v8443_v1 = vadd.f32 %v7528_v8, %v12575_v52  ;;  %v7530_v36 = vpop.f32.mrb[125].mxu0  ;;  %v7573_v35 = vpop.f32.mrb[141].mxu1  ;;  %v8475_v49 = vadd.f32 %v7571_v11, %v12582_v5 }
0x215b   :  { %v8444_v59 = vadd.f32 %v7530_v36, %v12578_v10  ;;  %v7532_v41 = vpop.f32.mrb[126].mxu0  ;;  %v7575_v51 = vpop.f32.mrb[142].mxu1  ;;  %v8476_v63 = vadd.f32 %v7573_v35, %v12589_v47 }
0x215c   :  { %v7588_v16 = vmul.f32 0.5, %v8443_v1  ;;  %v8445_v45 = vadd.f32 %v7532_v41, %v12575_v52  ;;  %v7534_v23 = vpop.f32.mrb[127].mxu0  ;;  %v7577_v21 = vpop.f32.mrb[143].mxu1  ;;  %v8477_v29 = vadd.f32 %v7575_v51, %v12582_v5 }
0x215d   :  { %v7596_v57 = vmul.f32 0.5, %v8444_v59  ;;  %v8446_v9 = vadd.f32 %v7534_v23, %v12578_v10  ;;  %v7606_v52 = vmul.f32 0.5, %v8476_v63  ;;  %v8478_v61 = vadd.f32 %v7577_v21, %v12589_v47 }
0x215e   :  { %9724 = vtanh.f32 %v7588_v16  ;;  %v7589_v18 = vmul.f32 0.5, %v8445_v45 }
0x215f   :  { %9726 = vtanh.f32 %v7596_v57  ;;  %v7597_v25 = vmul.f32 0.5, %v8446_v9  ;;  %v7607_v19 = vmul.f32 0.5, %v8478_v61 }
0x2160   :  { %9728 = vtanh.f32 %v7589_v18 }
0x2161   :  { %9730 = vtanh.f32 %v8475_v49 }
0x2162   :  { %9732 = vtanh.f32 %v7597_v25 }
0x2163   :  { %9734 = vtanh.f32 %v8477_v29 }
0x2164   :  { %9736 = vtanh.f32 %v7606_v52 }
0x2165   :  { %9738 = vtanh.f32 %v7607_v19 }
0x2168   :  { %v9725_v56 = vpop.eup %9724 }
0x2169   :  { %v9727_v39 = vpop.eup %9726  ;;  %v7592_v10 = vmul.f32 0.5, %v9725_v56 }
0x216a   :  { %v7600_v31 = vmul.f32 0.5, %v9727_v39  ;;  %v9729_v48 = vpop.eup %9728 }
0x216b   :  { %v7594_v4 = vadd.f32 0.5, %v7592_v10  ;;  %v9731_v12 = vpop.eup %9730  ;;  %v7593_v44 = vmul.f32 0.5, %v9729_v48 }
0x216c   :  { %v7602_v62 = vadd.f32 0.5, %v7600_v31  ;;  %v9733_v5 = vpop.eup %9732 }
0x216d   :  { %v7616_v6 = vmul.f32 %v9731_v12, %v7594_v4  ;;  %v7595_v50 = vadd.f32 0.5, %v7593_v44  ;;  %v7601_v60 = vmul.f32 0.5, %v9733_v5  ;;  %v9735_v33 = vpop.eup %9734 }
0x216e   :  { %v7614_v46 = vmul.f32 %v7602_v62, %v12985_v54  ;;  %v9737_v15 = vpop.eup %9736 }
0x216f   :  { %v7603_v28 = vadd.f32 0.5, %v7601_v60  ;;  %v7617_v55 = vmul.f32 %v9735_v33, %v7595_v50  ;;  %v7610_v54 = vmul.f32 0.5, %v9737_v15  ;;  %v9739_v26 = vpop.eup %9738 }
0x2170   :  { %v7618_v47 = vadd.f32 %v7616_v6, %v7614_v46  ;;  %v7611_v14 = vmul.f32 0.5, %v9739_v26 }
0x2171   :  { %v7615_v24 = vmul.f32 %v7603_v28, %v12989_v2  ;;  %v7612_v22 = vadd.f32 0.5, %v7610_v54 }
0x2172   :  { %9740 = vtanh.f32 %v7618_v47  ;;  %8140 = vst [vmem:[%s13110_s17 + $0x30] sm:$0xff] %v7618_v47  ;;  %v7613_v3 = vadd.f32 0.5, %v7611_v14 }
0x2173   :  { %v7619_v0 = vadd.f32 %v7617_v55, %v7615_v24 }
0x2175   :  { %9742 = vtanh.f32 %v7619_v0  ;;  %8141 = vst [vmem:[%s13110_s17 + $0x38] sm:$0xff] %v7619_v0 }
0x2179   :  { %v8185_v17 = vpop.f32.mrb[128].mxu0 }
0x217a   :  { %v7770_v43 = vadd.f32 %v8185_v17, %v8142_v30  ;;  %v7761_v37 = vpop.f32.mrb[129].mxu0 }
0x217b   :  { %v7762_v20 = vadd.f32 %v8142_v30, %v7761_v37  ;;  %v8186_v2 = vpop.f32.mrb[130].mxu0 }
0x217c   :  { %v9741_v42 = vpop.eup %9740  ;;  %7826 = vst [vmem:[%s13173_s25 + $0x10] sm:$0xff] %v7770_v43  ;;  %v7773_v32 = vadd.f32 %v8186_v2, %v8142_v30  ;;  %v7764_v58 = vpop.f32.mrb[131].mxu0 }
0x217d   :  { %7824 = vst [vmem:[%s13173_s25] sm:$0xff] %v7762_v20  ;;  %v7765_v27 = vadd.f32 %v8142_v30, %v7764_v58  ;;  %v7622_v38 = vmul.f32 %v9741_v42, %v7612_v22 }
0x217e   :  { %7827 = vst [vmem:[%s13173_s25 + $0x18] sm:$0xff] %v7773_v32 }
0x217f   :  { %7825 = vst [vmem:[%s13173_s25 + $0x8] sm:$0xff] %v7765_v27  ;;  %8138 = vst [vmem:[%s13109_s16 + $0x30] sm:$0xff] %v7622_v38  ;;  %v9743_v40 = vpop.eup %9742 }
0x2180   :  { %v7623_v13 = vmul.f32 %v9743_v40, %v7613_v3 }
0x2181   :  { %v8189_v7 = vpop.f32.mrb[132].mxu0 }
0x2182   :  { %v7786_v53 = vadd.f32 %v8189_v7, %v8142_v30  ;;  %v7777_v34 = vpop.f32.mrb[133].mxu0  ;;  %8139 = vst [vmem:[%s13109_s16 + $0x38] sm:$0xff] %v7623_v13  ;;  %v7655_v1 = vpack.c.bf16 %v7623_v13, %v7622_v38 }
0x2183   :  { %v7778_v8 = vadd.f32 %v8142_v30, %v7777_v34  ;;  %v8190_v11 = vpop.f32.mrb[134].mxu0 }
0x2184   :  { %7830 = vst [vmem:[%s13173_s25 + $0x30] sm:$0xff] %v7786_v53  ;;  %v7789_v36 = vadd.f32 %v8190_v11, %v8142_v30  ;;  %v7780_v35 = vpop.f32.mrb[135].mxu0  ;;  %8196 = vmatmul.mubr.bf16.gmra.mrb[140].mxu0 %v7655_v1 }
0x2185   :  { %7828 = vst [vmem:[%s13173_s25 + $0x20] sm:$0xff] %v7778_v8  ;;  %v7781_v59 = vadd.f32 %v8142_v30, %v7780_v35 }
0x2186   :  { %7831 = vst [vmem:[%s13173_s25 + $0x38] sm:$0xff] %v7789_v36 }
0x2187   :  { %7829 = vst [vmem:[%s13173_s25 + $0x28] sm:$0xff] %v7781_v59 }
0x2189   :  { %v8193_v41 = vpop.f32.mrb[136].mxu0 }
0x218a   :  { %v7802_v51 = vadd.f32 %v8193_v41, %v8142_v30  ;;  %v7793_v16 = vpop.f32.mrb[137].mxu0 }
0x218b   :  { %v7794_v45 = vadd.f32 %v8142_v30, %v7793_v16  ;;  %v8194_v23 = vpop.f32.mrb[138].mxu0 }
0x218c   :  { %7834 = vst [vmem:[%s13173_s25 + $0x50] sm:$0xff] %v7802_v51  ;;  %v7805_v21 = vadd.f32 %v8194_v23, %v8142_v30  ;;  %v7796_v57 = vpop.f32.mrb[139].mxu0 }
0x218d   :  { %7832 = vst [vmem:[%s13173_s25 + $0x40] sm:$0xff] %v7794_v45  ;;  %v7797_v9 = vadd.f32 %v8142_v30, %v7796_v57 }
0x218e   :  { %7835 = vst [vmem:[%s13173_s25 + $0x58] sm:$0xff] %v7805_v21 }
0x218f   :  { %7833 = vst [vmem:[%s13173_s25 + $0x48] sm:$0xff] %v7797_v9 }
0x2257   :  { %v8197_v49 = vpop.f32.mrb[140].mxu0 }
0x2258   :  { %v7818_v18 = vadd.f32 %v8197_v49, %v8142_v30  ;;  %v7809_v25 = vpop.f32.mrb[141].mxu0 }
0x2259   :  { %v7810_v29 = vadd.f32 %v8142_v30, %v7809_v25  ;;  %v8198_v63 = vpop.f32.mrb[142].mxu0 }
0x225a   :  { %7838 = vst [vmem:[%s13173_s25 + $0x70] sm:$0xff] %v7818_v18  ;;  %v7821_v52 = vadd.f32 %v8198_v63, %v8142_v30  ;;  %v7812_v61 = vpop.f32.mrb[143].mxu0 }
0x225b   :  { %7836 = vst [vmem:[%s13173_s25 + $0x60] sm:$0xff] %v7810_v29  ;;  %v7813_v56 = vadd.f32 %v8142_v30, %v7812_v61 }
0x225c   :  { %7839 = vst [vmem:[%s13173_s25 + $0x78] sm:$0xff] %v7821_v52 }
0x225d   :  { %7837 = vst [vmem:[%s13173_s25 + $0x68] sm:$0xff] %v7813_v56 }
0x225e   :  { %7852 = vsyncpa [#allocation5], 1 }
0x225f   :  { %7853 = vsyncpa [#allocation7], 1 }
0x2260   :  { %7854 = vsyncpa [#allocation10], 1 }
0x2261   :  { %7855 = vsyncpa [#allocation13], 1 }
0x2262   :  { %7856 = vsyncpa [#allocation16], 1 }
0x2263   :  { %7857 = vsyncpa [#allocation19], 1 }

</bundles_post_ra>
